<compile_context>
chip_gen: v6e
topology: v6e:2x2x1
jax: 0.10.0
libtpu: 0.0.40
codegen_flags: <defaults>
</compile_context>

<pallas_src>
import numpy as np
import jax
import jax.numpy as jnp
from jax import lax
from jax.experimental import pallas as pl
from jax.experimental.pallas import tpu as pltpu

# --- module constants (fixed by the PyTorch __init__) -----------------------
IN_CH = 3
CONV_OUT_CH = 8
CONV_K = 5
HID = 256                 # LSTM hidden size
GATES = 4 * HID           # 1024, gate order i, f, g, o
NUM_ACTIONS = 8           # fc output
# calc_conv_output_dim uses H=25, W=19  ->  8 * 21 * 15 = 2520
REF_H, REF_W = 25, 19
REF_OH, REF_OW = REF_H - CONV_K + 1, REF_W - CONV_K + 1
N_POS = REF_OH * REF_OW                                   # 315
CONV_FLAT = CONV_OUT_CH * N_POS                           # 2520 (LSTM input_size)

# padded sizes for lane/sublane-friendly layouts
KCOL = IN_CH * CONV_K * CONV_K                            # 75 im2col columns
CONV_KCOL_PAD = 128                                       # 75 -> 128
POS_PAD = ((N_POS + 15) // 16) * 16                       # 315 -> 320
K0_PAD = POS_PAD * CONV_OUT_CH                            # 2560 (= 20 * 128)
FC_LANE_PAD = 128                                         # fc out 8 -> 128

MIB = 1024 * 1024


# ----------------------------- Pallas kernels -------------------------------
def _conv_relu_kernel(p_ref, w_ref, b_ref, o_ref):
    # (tm, 128) @ (128, 8) -> (tm, 8); bf16 operands, f32 accumulation.
    acc = jnp.dot(p_ref[...], w_ref[...], preferred_element_type=jnp.float32)
    o_ref[...] = jnp.maximum(acc + b_ref[...], 0.0).astype(o_ref.dtype)


def conv_relu(patches, w_t, b):
    M = patches.shape[0]
    nblk = 2 if (M % 16 == 0) else 1      # even parallel grid for v7x megacore
    tm = M // nblk
    return pl.pallas_call(
        _conv_relu_kernel,
        out_shape=jax.ShapeDtypeStruct((M, CONV_OUT_CH), jnp.bfloat16),
        grid=(nblk,),
        in_specs=[
            pl.BlockSpec((tm, CONV_KCOL_PAD), lambda i: (i, 0)),
            pl.BlockSpec((CONV_KCOL_PAD, CONV_OUT_CH), lambda i: (0, 0)),
            pl.BlockSpec((1, CONV_OUT_CH), lambda i: (0, 0)),
        ],
        out_specs=pl.BlockSpec((tm, CONV_OUT_CH), lambda i: (i, 0)),
        compiler_params=pltpu.CompilerParams(
            dimension_semantics=("parallel",),
            vmem_limit_bytes=16 * MIB),
    )(patches, w_t, b)


def _input_proj_kernel(x_ref, w_ref, b_ref, o_ref):
    # gates0 = feats @ W_ih0^T + (b_ih0 + b_hh0); layer-0 bias folded here.
    o_ref[...] = (jnp.dot(x_ref[...], w_ref[...],
                          preferred_element_type=jnp.float32) + b_ref[...])


def input_projection(feats, w0_t, b0, *, n_pad):
    R = feats.shape[0]                     # seq * n_pad rows
    return pl.pallas_call(
        _input_proj_kernel,
        out_shape=jax.ShapeDtypeStruct((R, GATES), jnp.float32),
        grid=(R // n_pad,),                # parallel over sequence steps
        in_specs=[
            pl.BlockSpec((n_pad, K0_PAD), lambda i: (i, 0)),
            pl.BlockSpec((K0_PAD, GATES), lambda i: (0, 0)),
            pl.BlockSpec((1, GATES), lambda i: (0, 0)),
        ],
        out_specs=pl.BlockSpec((n_pad, GATES), lambda i: (i, 0)),
        compiler_params=pltpu.CompilerParams(
            dimension_semantics=("parallel",),
            vmem_limit_bytes=32 * MIB),
    )(feats, w0_t, b0)


def lstm_recurrent_fc(gates0, whh0_t, w1cat_t, b1, fcw_t, fcb,
                      *, seq, n_pad, t_last):
    """Sequential 2-layer LSTM + relu->fc->sigmoid epilogue (row t_last only)."""

    def kernel(g0_ref, whh0_ref, w1_ref, b1_ref, fcw_ref, fcb_ref,
               out_ref, h12_ref, c1_ref, c2_ref):
        @pl.when(pl.program_id(0) == 0)
        def _():
            h12_ref[...] = jnp.zeros_like(h12_ref)
            c1_ref[...] = jnp.zeros_like(c1_ref)
            c2_ref[...] = jnp.zeros_like(c2_ref)

        def lstm_gates(gates, c_prev):
            i_g = jax.nn.sigmoid(gates[:, 0 * HID:1 * HID])
            f_g = jax.nn.sigmoid(gates[:, 1 * HID:2 * HID])
            g_g = jnp.tanh(gates[:, 2 * HID:3 * HID])
            o_g = jax.nn.sigmoid(gates[:, 3 * HID:4 * HID])
            c_new = f_g * c_prev + i_g * g_g
            return o_g * jnp.tanh(c_new), c_new

        # ---- layer 0: input gates precomputed; add h1_{t-1} @ W_hh0^T ------
        h1_prev = h12_ref[:, :HID].astype(jnp.bfloat16)
        gates0 = g0_ref[...] + jnp.dot(h1_prev, whh0_ref[...],
                                       preferred_element_type=jnp.float32)
        h1, c1 = lstm_gates(gates0, c1_ref[...])
        c1_ref[...] = c1
        h12_ref[:, :HID] = h1              # h2 half still holds h2_{t-1}

        # ---- layer 1: ONE fused matmul  [h1 | h2_prev] @ [W_ih1^T;W_hh1^T] -
        gates1 = (jnp.dot(h12_ref[...].astype(jnp.bfloat16), w1_ref[...],
                          preferred_element_type=jnp.float32) + b1_ref[...])
        h2, c2 = lstm_gates(gates1, c2_ref[...])
        c2_ref[...] = c2
        h12_ref[:, HID:] = h2

        # ---- epilogue: relu -> fc -> sigmoid for LSTM-batch row T-1 only ---
        h_last = jnp.maximum(h2[t_last:t_last + 1, :], 0.0).astype(jnp.bfloat16)
        y = (jnp.dot(h_last, fcw_ref[...], preferred_element_type=jnp.float32)
             + fcb_ref[...])
        out_ref[...] = jax.nn.sigmoid(y)

    const = lambda s: (0, 0)               # resident weights: same block each step
    return pl.pallas_call(
        kernel,
        out_shape=jax.ShapeDtypeStruct((seq, 1, FC_LANE_PAD), jnp.float32),
        grid=(seq,),
        in_specs=[
            pl.BlockSpec((n_pad, GATES), lambda s: (s, 0)),
            pl.BlockSpec((HID, GATES), const),
            pl.BlockSpec((2 * HID, GATES), const),
            pl.BlockSpec((1, GATES), const),
            pl.BlockSpec((HID, FC_LANE_PAD), const),
            pl.BlockSpec((1, FC_LANE_PAD), const),
        ],
        out_specs=pl.BlockSpec((None, 1, FC_LANE_PAD), lambda s: (s, 0, 0)),
        scratch_shapes=[pltpu.VMEM((n_pad, 2 * HID), jnp.float32),   # [h1|h2]
                        pltpu.VMEM((n_pad, HID), jnp.float32),       # c1
                        pltpu.VMEM((n_pad, HID), jnp.float32)],      # c2
        compiler_params=pltpu.CompilerParams(
            dimension_semantics=("arbitrary",),          # true recurrence
            vmem_limit_bytes=16 * MIB),
    )(gates0, whh0_t, w1cat_t, b1, fcw_t, fcb)


# ----------------------------- parameter init -------------------------------
def init_params(key):
    def u(k, shape, bound):
        return jax.random.uniform(k, shape, jnp.float32, -bound, bound)

    keys = jax.random.split(key, 12)
    ki = iter(keys)

    # conv1: contraction padded 75 -> 128, output kept at the 8 real channels.
    cb = 1.0 / (IN_CH * CONV_K * CONV_K) ** 0.5
    conv_w = u(next(ki), (CONV_OUT_CH, IN_CH, CONV_K, CONV_K), cb)
    conv_b = u(next(ki), (CONV_OUT_CH,), cb)
    w_pad = jnp.zeros((CONV_KCOL_PAD, CONV_OUT_CH), jnp.float32)
    w_pad = w_pad.at[:KCOL, :].set(conv_w.reshape(CONV_OUT_CH, KCOL).T)
    params = {"conv_w_t": w_pad.astype(jnp.bfloat16),
              "conv_b": conv_b.reshape(1, CONV_OUT_CH)}

    hb = 1.0 / HID ** 0.5
    # LSTM layer 0 (PyTorch gate order i,f,g,o).  W_ih0 columns are permuted
    # from PyTorch's (c, oh, ow) feature order to the conv kernel's
    # (position, channel) order; padded positions (315..319) get zero rows so
    # the relu(bias) garbage in padded im2col rows contributes nothing.
    w_ih0 = u(next(ki), (GATES, CONV_FLAT), hb)
    w_hh0 = u(next(ki), (GATES, HID), hb)
    b_ih0 = u(next(ki), (GATES,), hb)
    b_hh0 = u(next(ki), (GATES,), hb)
    pos = np.arange(N_POS)
    ch = np.arange(CONV_OUT_CH)
    f_pt = (ch[None, :] * N_POS + pos[:, None]).reshape(-1)   # new idx p*8+c -> old c*315+p
    w0_t = jnp.zeros((K0_PAD, GATES), jnp.float32)
    w0_t = w0_t.at[:CONV_FLAT, :].set(w_ih0[:, f_pt].T)
    params["w0_t"] = w0_t.astype(jnp.bfloat16)
    params["b0"] = (b_ih0 + b_hh0).reshape(1, GATES)
    params["whh0_t"] = w_hh0.T.astype(jnp.bfloat16)

    # LSTM layer 1: row-concatenate W_ih1^T and W_hh1^T -> one fused matmul.
    w_ih1 = u(next(ki), (GATES, HID), hb)
    w_hh1 = u(next(ki), (GATES, HID), hb)
    b_ih1 = u(next(ki), (GATES,), hb)
    b_hh1 = u(next(ki), (GATES,), hb)
    params["w1cat_t"] = jnp.concatenate([w_ih1.T, w_hh1.T],
                                        axis=0).astype(jnp.bfloat16)
    params["b1"] = (b_ih1 + b_hh1).reshape(1, GATES)

    # fc: pad output lanes 8 -> 128 (lane-dense store), bf16 weight / f32 bias.
    fb = 1.0 / HID ** 0.5
    fc_w = u(next(ki), (NUM_ACTIONS, HID), fb)
    fc_b = u(next(ki), (NUM_ACTIONS,), fb)
    fcw = jnp.zeros((HID, FC_LANE_PAD), jnp.float32)
    fcw = fcw.at[:, :NUM_ACTIONS].set(fc_w.T)
    fcb = jnp.zeros((1, FC_LANE_PAD), jnp.float32)
    fcb = fcb.at[0, :NUM_ACTIONS].set(fc_b)
    params["fc_w_t"] = fcw.astype(jnp.bfloat16)
    params["fc_b"] = fcb
    return params


# ----------------------------- forward ---------------------------------------
def forward(params, x):
    B, T, C, H, W = x.shape
    OH, OW = H - CONV_K + 1, W - CONV_K + 1
    npos = OH * OW
    assert npos * CONV_OUT_CH == CONV_FLAT, \
        "spatial dims must match calc_conv_output_dim (H=25, W=19)"

    c_in = x.reshape(B * T, C, H, W).astype(jnp.bfloat16)

    # im2col via one XLA op (channel-major columns, matching conv_w.reshape).
    patches = lax.conv_general_dilated_patches(
        c_in, filter_shape=(CONV_K, CONV_K), window_strides=(1, 1),
        padding="VALID", dimension_numbers=("NCHW", "OIHW", "NHWC"))
    patches = patches.reshape(B * T, npos, KCOL)
    patches = jnp.pad(patches, ((0, 0), (0, POS_PAD - npos),
                                (0, CONV_KCOL_PAD - KCOL)))
    patches = patches.reshape(B * T * POS_PAD, CONV_KCOL_PAD)

    # conv1 + relu (channel-dense 8-lane output; padded position rows carry
    # relu(bias) but their W_ih0 rows are zero).
    conv = conv_relu(patches, params["conv_w_t"], params["conv_b"])

    # contiguous handoff: (B*T*320, 8) -> (B, T, 2560), feature idx = p*8 + c.
    feats = conv.reshape(B, T, K0_PAD)

    # batch_first=False semantics: seq axis = B, LSTM batch axis = T (pad to 8).
    n_pad = max(8, ((T + 7) // 8) * 8)
    feats = jnp.pad(feats, ((0, 0), (0, n_pad - T), (0, 0)))
    feats = feats.reshape(B * n_pad, K0_PAD)

    # hoisted layer-0 input projection (parallel over sequence steps).
    gates0 = input_projection(feats, params["w0_t"], params["b0"], n_pad=n_pad)

    # sequential LSTM + fused relu->fc->sigmoid epilogue (row T-1 only).
    out = lstm_recurrent_fc(gates0, params["whh0_t"], params["w1cat_t"],
                            params["b1"], params["fc_w_t"], params["fc_b"],
                            seq=B, n_pad=n_pad, t_last=T - 1)
    return out[:, 0, :NUM_ACTIONS]


if __name__ == "__main__":
    key = jax.random.PRNGKey(0)
    k_params, k_x = jax.random.split(key)

    params = init_params(k_params)

    # H=25, W=19 are forced by calc_conv_output_dim (LSTM input_size = 2520).
    B, T = 2, 4
    x = jax.random.normal(k_x, (B, T, IN_CH, REF_H, REF_W), jnp.float32)

    out = jax.jit(forward)(params, x)
    out = jax.block_until_ready(out)

    assert out.shape == (B, NUM_ACTIONS)
    assert bool(jnp.all(jnp.isfinite(out)))
    assert bool(jnp.all((out >= 0.0) & (out <= 1.0)))   # sigmoid range
    print("KERNEL_OK")
</pallas_src>

<mosaic_0001>
module attributes {stable_mosaic.version = 11 : i64} {
  func.func @_conv_relu_kernel(%arg0: i32, %arg1: memref<1280x128xbf16, #tpu.memory_space<vmem>>, %arg2: memref<128x8xbf16, #tpu.memory_space<vmem>>, %arg3: memref<1x8xf32, #tpu.memory_space<vmem>>, %arg4: memref<1280x8xbf16, #tpu.memory_space<vmem>>) attributes {dimension_semantics = [#tpu.dimension_semantics<parallel>], iteration_bounds = array<i64: 2>, scalar_prefetch = 0 : i64, scratch_operands = 0 : i64, tpu.core_type = #tpu.core_type<tc>, window_params = [{transform_indices = @transform_0, window_bounds = array<i64: 1280, 128>}, {pipeline_mode = #tpu.pipeline_mode<synchronous>, transform_indices = @transform_1, window_bounds = array<i64: 128, 8>}, {pipeline_mode = #tpu.pipeline_mode<synchronous>, transform_indices = @transform_2, window_bounds = array<i64: 1, 8>}, {transform_indices = @transform_3, window_bounds = array<i64: 1280, 8>}]} {
    %c0 = arith.constant 0 : index
    %c0_0 = arith.constant 0 : index
    %0 = vector.load %arg1[%c0, %c0_0] : memref<1280x128xbf16, #tpu.memory_space<vmem>>, vector<1280x128xbf16>
    %c0_1 = arith.constant 0 : index
    %c0_2 = arith.constant 0 : index
    %1 = vector.load %arg2[%c0_1, %c0_2] : memref<128x8xbf16, #tpu.memory_space<vmem>>, vector<128x8xbf16>
    %cst = arith.constant dense<0.000000e+00> : vector<1280x8xf32>
    %2 = tpu.matmul %0, %1, %cst {dimension_numbers = #tpu.dot_dimension_numbers<[1], [0], [0], [1], [0, 0, 1, 1], [], []>} : vector<1280x128xbf16>, vector<128x8xbf16>, vector<1280x8xf32> -> vector<1280x8xf32>
    %c0_3 = arith.constant 0 : index
    %c0_4 = arith.constant 0 : index
    %3 = vector.load %arg3[%c0_3, %c0_4] : memref<1x8xf32, #tpu.memory_space<vmem>>, vector<1x8xf32>
    %4 = vector.broadcast %3 : vector<1x8xf32> to vector<1280x8xf32>
    %5 = arith.addf %2, %4 : vector<1280x8xf32>
    %cst_5 = arith.constant 0.000000e+00 : f32
    %6 = vector.broadcast %cst_5 : f32 to vector<1280x8xf32>
    %7 = arith.maximumf %5, %6 : vector<1280x8xf32>
    %8 = arith.truncf %7 : vector<1280x8xf32> to vector<1280x8xbf16>
    %c0_6 = arith.constant 0 : index
    %c0_7 = arith.constant 0 : index
    %9 = vector.load %arg4[%c0_6, %c0_7] : memref<1280x8xbf16, #tpu.memory_space<vmem>>, vector<1280x8xbf16>
    tpu.vector_store %arg4[%c0_6, %c0_7], %8 {strides = array<i32>} : memref<1280x8xbf16, #tpu.memory_space<vmem>>, vector<1280x8xbf16>,
    return
  }
  func.func @transform_0(%arg0: i32) -> (i32, i32) {
    %c0_i32 = arith.constant 0 : i32
    %c0_i32_0 = arith.constant 0 : i32
    return %arg0, %c0_i32 : i32, i32
  }
  func.func @transform_1(%arg0: i32) -> (i32, i32) {
    %c0_i32 = arith.constant 0 : i32
    %c0_i32_0 = arith.constant 0 : i32
    %c0_i32_1 = arith.constant 0 : i32
    return %c0_i32, %c0_i32_0 : i32, i32
  }
  func.func @transform_2(%arg0: i32) -> (i32, i32) {
    %c0_i32 = arith.constant 0 : i32
    %c0_i32_0 = arith.constant 0 : i32
    %c0_i32_1 = arith.constant 0 : i32
    return %c0_i32, %c0_i32_0 : i32, i32
  }
  func.func @transform_3(%arg0: i32) -> (i32, i32) {
    %c0_i32 = arith.constant 0 : i32
    %c0_i32_0 = arith.constant 0 : i32
    return %arg0, %c0_i32 : i32, i32
  }
}

module attributes {stable_mosaic.version = 11 : i64} {
  func.func @_input_proj_kernel(%arg0: i32, %arg1: memref<8x2560xbf16, #tpu.memory_space<vmem>>, %arg2: memref<2560x1024xbf16, #tpu.memory_space<vmem>>, %arg3: memref<1x1024xf32, #tpu.memory_space<vmem>>, %arg4: memref<8x1024xf32, #tpu.memory_space<vmem>>) attributes {dimension_semantics = [#tpu.dimension_semantics<parallel>], iteration_bounds = array<i64: 2>, scalar_prefetch = 0 : i64, scratch_operands = 0 : i64, tpu.core_type = #tpu.core_type<tc>, window_params = [{transform_indices = @transform_0, window_bounds = array<i64: 8, 2560>}, {pipeline_mode = #tpu.pipeline_mode<synchronous>, transform_indices = @transform_1, window_bounds = array<i64: 2560, 1024>}, {pipeline_mode = #tpu.pipeline_mode<synchronous>, transform_indices = @transform_2, window_bounds = array<i64: 1, 1024>}, {transform_indices = @transform_3, window_bounds = array<i64: 8, 1024>}]} {
    %c0 = arith.constant 0 : index
    %c0_0 = arith.constant 0 : index
    %0 = vector.load %arg1[%c0, %c0_0] : memref<8x2560xbf16, #tpu.memory_space<vmem>>, vector<8x2560xbf16>
    %c0_1 = arith.constant 0 : index
    %c0_2 = arith.constant 0 : index
    %1 = vector.load %arg2[%c0_1, %c0_2] : memref<2560x1024xbf16, #tpu.memory_space<vmem>>, vector<2560x1024xbf16>
    %cst = arith.constant dense<0.000000e+00> : vector<8x1024xf32>
    %2 = tpu.matmul %0, %1, %cst {dimension_numbers = #tpu.dot_dimension_numbers<[1], [0], [0], [1], [0, 0, 1, 1], [], []>} : vector<8x2560xbf16>, vector<2560x1024xbf16>, vector<8x1024xf32> -> vector<8x1024xf32>
    %c0_3 = arith.constant 0 : index
    %c0_4 = arith.constant 0 : index
    %3 = vector.load %arg3[%c0_3, %c0_4] : memref<1x1024xf32, #tpu.memory_space<vmem>>, vector<1x1024xf32>
    %4 = vector.broadcast %3 : vector<1x1024xf32> to vector<8x1024xf32>
    %5 = arith.addf %2, %4 : vector<8x1024xf32>
    %c0_5 = arith.constant 0 : index
    %c0_6 = arith.constant 0 : index
    %6 = vector.load %arg4[%c0_5, %c0_6] : memref<8x1024xf32, #tpu.memory_space<vmem>>, vector<8x1024xf32>
    tpu.vector_store %arg4[%c0_5, %c0_6], %5 {strides = array<i32>} : memref<8x1024xf32, #tpu.memory_space<vmem>>, vector<8x1024xf32>,
    return
  }
  func.func @transform_0(%arg0: i32) -> (i32, i32) {
    %c0_i32 = arith.constant 0 : i32
    %c0_i32_0 = arith.constant 0 : i32
    return %arg0, %c0_i32 : i32, i32
  }
  func.func @transform_1(%arg0: i32) -> (i32, i32) {
    %c0_i32 = arith.constant 0 : i32
    %c0_i32_0 = arith.constant 0 : i32
    %c0_i32_1 = arith.constant 0 : i32
    return %c0_i32, %c0_i32_0 : i32, i32
  }
  func.func @transform_2(%arg0: i32) -> (i32, i32) {
    %c0_i32 = arith.constant 0 : i32
    %c0_i32_0 = arith.constant 0 : i32
    %c0_i32_1 = arith.constant 0 : i32
    return %c0_i32, %c0_i32_0 : i32, i32
  }
  func.func @transform_3(%arg0: i32) -> (i32, i32) {
    %c0_i32 = arith.constant 0 : i32
    %c0_i32_0 = arith.constant 0 : i32
    return %arg0, %c0_i32 : i32, i32
  }
}

module attributes {stable_mosaic.version = 11 : i64} {
  func.func @kernel(%arg0: i32, %arg1: memref<8x1024xf32, #tpu.memory_space<vmem>>, %arg2: memref<256x1024xbf16, #tpu.memory_space<vmem>>, %arg3: memref<512x1024xbf16, #tpu.memory_space<vmem>>, %arg4: memref<1x1024xf32, #tpu.memory_space<vmem>>, %arg5: memref<256x128xbf16, #tpu.memory_space<vmem>>, %arg6: memref<1x128xf32, #tpu.memory_space<vmem>>, %arg7: memref<1x1x128xf32, #tpu.memory_space<vmem>>, %arg8: memref<8x512xf32, #tpu.memory_space<vmem>>, %arg9: memref<8x256xf32, #tpu.memory_space<vmem>>, %arg10: memref<8x256xf32, #tpu.memory_space<vmem>>) attributes {dimension_semantics = [#tpu.dimension_semantics<arbitrary>], iteration_bounds = array<i64: 2>, scalar_prefetch = 0 : i64, scratch_operands = 3 : i64, tpu.core_type = #tpu.core_type<tc>, window_params = [{transform_indices = @transform_0, window_bounds = array<i64: 8, 1024>}, {pipeline_mode = #tpu.pipeline_mode<synchronous>, transform_indices = @transform_1, window_bounds = array<i64: 256, 1024>}, {pipeline_mode = #tpu.pipeline_mode<synchronous>, transform_indices = @transform_2, window_bounds = array<i64: 512, 1024>}, {pipeline_mode = #tpu.pipeline_mode<synchronous>, transform_indices = @transform_3, window_bounds = array<i64: 1, 1024>}, {pipeline_mode = #tpu.pipeline_mode<synchronous>, transform_indices = @transform_4, window_bounds = array<i64: 256, 128>}, {pipeline_mode = #tpu.pipeline_mode<synchronous>, transform_indices = @transform_5, window_bounds = array<i64: 1, 128>}, {transform_indices = @transform_6, window_bounds = array<i64: 1, 1, 128>}]} {
    %c0_i32 = arith.constant 0 : i32
    %0 = arith.cmpi eq, %arg0, %c0_i32 : i32
    %1 = arith.extui %0 : i1 to i32
    %c0_i32_0 = arith.constant 0 : i32
    %2 = arith.cmpi ne, %1, %c0_i32_0 : i32
    scf.if %2 {
      %cst_40 = arith.constant 0.000000e+00 : f32
      %88 = vector.broadcast %cst_40 : f32 to vector<8x512xf32>
      %c0_41 = arith.constant 0 : index
      %c0_42 = arith.constant 0 : index
      %89 = vector.load %arg8[%c0_41, %c0_42] : memref<8x512xf32, #tpu.memory_space<vmem>>, vector<8x512xf32>
      tpu.vector_store %arg8[%c0_41, %c0_42], %88 {strides = array<i32>} : memref<8x512xf32, #tpu.memory_space<vmem>>, vector<8x512xf32>,
      %cst_43 = arith.constant 0.000000e+00 : f32
      %90 = vector.broadcast %cst_43 : f32 to vector<8x256xf32>
      %c0_44 = arith.constant 0 : index
      %c0_45 = arith.constant 0 : index
      %91 = vector.load %arg9[%c0_44, %c0_45] : memref<8x256xf32, #tpu.memory_space<vmem>>, vector<8x256xf32>
      tpu.vector_store %arg9[%c0_44, %c0_45], %90 {strides = array<i32>} : memref<8x256xf32, #tpu.memory_space<vmem>>, vector<8x256xf32>,
      %cst_46 = arith.constant 0.000000e+00 : f32
      %92 = vector.broadcast %cst_46 : f32 to vector<8x256xf32>
      %c0_47 = arith.constant 0 : index
      %c0_48 = arith.constant 0 : index
      %93 = vector.load %arg10[%c0_47, %c0_48] : memref<8x256xf32, #tpu.memory_space<vmem>>, vector<8x256xf32>
      tpu.vector_store %arg10[%c0_47, %c0_48], %92 {strides = array<i32>} : memref<8x256xf32, #tpu.memory_space<vmem>>, vector<8x256xf32>,
    } else {
    }
    %c0 = arith.constant 0 : index
    %c0_1 = arith.constant 0 : index
    %3 = vector.load %arg8[%c0, %c0_1] : memref<8x512xf32, #tpu.memory_space<vmem>>, vector<8x256xf32>
    %4 = arith.truncf %3 : vector<8x256xf32> to vector<8x256xbf16>
    %c0_2 = arith.constant 0 : index
    %c0_3 = arith.constant 0 : index
    %5 = vector.load %arg1[%c0_2, %c0_3] : memref<8x1024xf32, #tpu.memory_space<vmem>>, vector<8x1024xf32>
    %c0_4 = arith.constant 0 : index
    %c0_5 = arith.constant 0 : index
    %6 = vector.load %arg2[%c0_4, %c0_5] : memref<256x1024xbf16, #tpu.memory_space<vmem>>, vector<256x1024xbf16>
    %cst = arith.constant dense<0.000000e+00> : vector<8x1024xf32>
    %7 = tpu.matmul %4, %6, %cst {dimension_numbers = #tpu.dot_dimension_numbers<[1], [0], [0], [1], [0, 0, 1, 1], [], []>} : vector<8x256xbf16>, vector<256x1024xbf16>, vector<8x1024xf32> -> vector<8x1024xf32>
    %8 = arith.addf %5, %7 : vector<8x1024xf32>
    %c0_6 = arith.constant 0 : index
    %c0_7 = arith.constant 0 : index
    %9 = vector.load %arg9[%c0_6, %c0_7] : memref<8x256xf32, #tpu.memory_space<vmem>>, vector<8x256xf32>
    %10 = vector.extract_strided_slice %8 {offsets = [0, 0], sizes = [8, 256], strides = [1, 1]} : vector<8x1024xf32> to vector<8x256xf32>
    %11 = arith.negf %10 : vector<8x256xf32>
    %12 = math.exp %11 : vector<8x256xf32>
    %cst_8 = arith.constant 1.000000e+00 : f32
    %13 = vector.broadcast %cst_8 : f32 to vector<8x256xf32>
    %14 = arith.addf %13, %12 : vector<8x256xf32>
    %15 = arith.divf %13, %14 : vector<8x256xf32>
    %16 = vector.extract_strided_slice %8 {offsets = [0, 256], sizes = [8, 256], strides = [1, 1]} : vector<8x1024xf32> to vector<8x256xf32>
    %17 = arith.negf %16 : vector<8x256xf32>
    %18 = math.exp %17 : vector<8x256xf32>
    %cst_9 = arith.constant 1.000000e+00 : f32
    %19 = vector.broadcast %cst_9 : f32 to vector<8x256xf32>
    %20 = arith.addf %19, %18 : vector<8x256xf32>
    %21 = arith.divf %19, %20 : vector<8x256xf32>
    %22 = vector.extract_strided_slice %8 {offsets = [0, 512], sizes = [8, 256], strides = [1, 1]} : vector<8x1024xf32> to vector<8x256xf32>
    %23 = math.tanh %22 : vector<8x256xf32>
    %24 = vector.extract_strided_slice %8 {offsets = [0, 768], sizes = [8, 256], strides = [1, 1]} : vector<8x1024xf32> to vector<8x256xf32>
    %25 = arith.negf %24 : vector<8x256xf32>
    %26 = math.exp %25 : vector<8x256xf32>
    %cst_10 = arith.constant 1.000000e+00 : f32
    %27 = vector.broadcast %cst_10 : f32 to vector<8x256xf32>
    %28 = arith.addf %27, %26 : vector<8x256xf32>
    %29 = arith.divf %27, %28 : vector<8x256xf32>
    %30 = arith.mulf %21, %9 : vector<8x256xf32>
    %31 = arith.mulf %15, %23 : vector<8x256xf32>
    %32 = arith.addf %30, %31 : vector<8x256xf32>
    %33 = math.tanh %32 : vector<8x256xf32>
    %34 = arith.mulf %29, %33 : vector<8x256xf32>
    %c0_11 = arith.constant 0 : index
    %c0_12 = arith.constant 0 : index
    %35 = vector.load %arg9[%c0_11, %c0_12] : memref<8x256xf32, #tpu.memory_space<vmem>>, vector<8x256xf32>
    tpu.vector_store %arg9[%c0_11, %c0_12], %32 {strides = array<i32>} : memref<8x256xf32, #tpu.memory_space<vmem>>, vector<8x256xf32>,
    %c0_13 = arith.constant 0 : index
    %c0_14 = arith.constant 0 : index
    %36 = vector.load %arg8[%c0_13, %c0_14] : memref<8x512xf32, #tpu.memory_space<vmem>>, vector<8x256xf32>
    tpu.vector_store %arg8[%c0_13, %c0_14], %34 {strides = array<i32>} : memref<8x512xf32, #tpu.memory_space<vmem>>, vector<8x256xf32>,
    %c0_15 = arith.constant 0 : index
    %c0_16 = arith.constant 0 : index
    %37 = vector.load %arg8[%c0_15, %c0_16] : memref<8x512xf32, #tpu.memory_space<vmem>>, vector<8x512xf32>
    %38 = arith.truncf %37 : vector<8x512xf32> to vector<8x512xbf16>
    %c0_17 = arith.constant 0 : index
    %c0_18 = arith.constant 0 : index
    %39 = vector.load %arg3[%c0_17, %c0_18] : memref<512x1024xbf16, #tpu.memory_space<vmem>>, vector<512x1024xbf16>
    %cst_19 = arith.constant dense<0.000000e+00> : vector<8x1024xf32>
    %40 = tpu.matmul %38, %39, %cst_19 {dimension_numbers = #tpu.dot_dimension_numbers<[1], [0], [0], [1], [0, 0, 1, 1], [], []>} : vector<8x512xbf16>, vector<512x1024xbf16>, vector<8x1024xf32> -> vector<8x1024xf32>
    %c0_20 = arith.constant 0 : index
    %c0_21 = arith.constant 0 : index
    %41 = vector.load %arg4[%c0_20, %c0_21] : memref<1x1024xf32, #tpu.memory_space<vmem>>, vector<1x1024xf32>
    %42 = vector.broadcast %41 : vector<1x1024xf32> to vector<8x1024xf32>
    %43 = arith.addf %40, %42 : vector<8x1024xf32>
    %c0_22 = arith.constant 0 : index
    %c0_23 = arith.constant 0 : index
    %44 = vector.load %arg10[%c0_22, %c0_23] : memref<8x256xf32, #tpu.memory_space<vmem>>, vector<8x256xf32>
    %45 = vector.extract_strided_slice %43 {offsets = [0, 0], sizes = [8, 256], strides = [1, 1]} : vector<8x1024xf32> to vector<8x256xf32>
    %46 = arith.negf %45 : vector<8x256xf32>
    %47 = math.exp %46 : vector<8x256xf32>
    %cst_24 = arith.constant 1.000000e+00 : f32
    %48 = vector.broadcast %cst_24 : f32 to vector<8x256xf32>
    %49 = arith.addf %48, %47 : vector<8x256xf32>
    %50 = arith.divf %48, %49 : vector<8x256xf32>
    %51 = vector.extract_strided_slice %43 {offsets = [0, 256], sizes = [8, 256], strides = [1, 1]} : vector<8x1024xf32> to vector<8x256xf32>
    %52 = arith.negf %51 : vector<8x256xf32>
    %53 = math.exp %52 : vector<8x256xf32>
    %cst_25 = arith.constant 1.000000e+00 : f32
    %54 = vector.broadcast %cst_25 : f32 to vector<8x256xf32>
    %55 = arith.addf %54, %53 : vector<8x256xf32>
    %56 = arith.divf %54, %55 : vector<8x256xf32>
    %57 = vector.extract_strided_slice %43 {offsets = [0, 512], sizes = [8, 256], strides = [1, 1]} : vector<8x1024xf32> to vector<8x256xf32>
    %58 = math.tanh %57 : vector<8x256xf32>
    %59 = vector.extract_strided_slice %43 {offsets = [0, 768], sizes = [8, 256], strides = [1, 1]} : vector<8x1024xf32> to vector<8x256xf32>
    %60 = arith.negf %59 : vector<8x256xf32>
    %61 = math.exp %60 : vector<8x256xf32>
    %cst_26 = arith.constant 1.000000e+00 : f32
    %62 = vector.broadcast %cst_26 : f32 to vector<8x256xf32>
    %63 = arith.addf %62, %61 : vector<8x256xf32>
    %64 = arith.divf %62, %63 : vector<8x256xf32>
    %65 = arith.mulf %56, %44 : vector<8x256xf32>
    %66 = arith.mulf %50, %58 : vector<8x256xf32>
    %67 = arith.addf %65, %66 : vector<8x256xf32>
    %68 = math.tanh %67 : vector<8x256xf32>
    %69 = arith.mulf %64, %68 : vector<8x256xf32>
    %c0_27 = arith.constant 0 : index
    %c0_28 = arith.constant 0 : index
    %70 = vector.load %arg10[%c0_27, %c0_28] : memref<8x256xf32, #tpu.memory_space<vmem>>, vector<8x256xf32>
    tpu.vector_store %arg10[%c0_27, %c0_28], %67 {strides = array<i32>} : memref<8x256xf32, #tpu.memory_space<vmem>>, vector<8x256xf32>,
    %c0_29 = arith.constant 0 : index
    %c256 = arith.constant 256 : index
    %71 = vector.load %arg8[%c0_29, %c256] : memref<8x512xf32, #tpu.memory_space<vmem>>, vector<8x256xf32>
    tpu.vector_store %arg8[%c0_29, %c256], %69 {strides = array<i32>} : memref<8x512xf32, #tpu.memory_space<vmem>>, vector<8x256xf32>,
    %72 = vector.extract_strided_slice %69 {offsets = [3, 0], sizes = [1, 256], strides = [1, 1]} : vector<8x256xf32> to vector<1x256xf32>
    %cst_30 = arith.constant 0.000000e+00 : f32
    %73 = vector.broadcast %cst_30 : f32 to vector<1x256xf32>
    %74 = arith.maximumf %72, %73 : vector<1x256xf32>
    %75 = arith.truncf %74 : vector<1x256xf32> to vector<1x256xbf16>
    %c0_31 = arith.constant 0 : index
    %c0_32 = arith.constant 0 : index
    %76 = vector.load %arg5[%c0_31, %c0_32] : memref<256x128xbf16, #tpu.memory_space<vmem>>, vector<256x128xbf16>
    %cst_33 = arith.constant dense<0.000000e+00> : vector<1x128xf32>
    %77 = tpu.matmul %75, %76, %cst_33 {dimension_numbers = #tpu.dot_dimension_numbers<[1], [0], [0], [1], [0, 0, 1, 1], [], []>} : vector<1x256xbf16>, vector<256x128xbf16>, vector<1x128xf32> -> vector<1x128xf32>
    %c0_34 = arith.constant 0 : index
    %c0_35 = arith.constant 0 : index
    %78 = vector.load %arg6[%c0_34, %c0_35] : memref<1x128xf32, #tpu.memory_space<vmem>>, vector<1x128xf32>
    %79 = arith.addf %77, %78 : vector<1x128xf32>
    %80 = arith.negf %79 : vector<1x128xf32>
    %81 = math.exp %80 : vector<1x128xf32>
    %cst_36 = arith.constant 1.000000e+00 : f32
    %82 = vector.broadcast %cst_36 : f32 to vector<1x128xf32>
    %83 = arith.addf %82, %81 : vector<1x128xf32>
    %84 = arith.divf %82, %83 : vector<1x128xf32>
    %c0_37 = arith.constant 0 : index
    %c0_38 = arith.constant 0 : index
    %c0_39 = arith.constant 0 : index
    %85 = vector.load %arg7[%c0_37, %c0_38, %c0_39] : memref<1x1x128xf32, #tpu.memory_space<vmem>>, vector<1x1x128xf32>
    %86 = vector.shape_cast %85 : vector<1x1x128xf32> to vector<1x128xf32>
    %87 = vector.shape_cast %84 : vector<1x128xf32> to vector<1x1x128xf32>
    tpu.vector_store %arg7[%c0_37, %c0_38, %c0_39], %87 {strides = array<i32>} : memref<1x1x128xf32, #tpu.memory_space<vmem>>, vector<1x1x128xf32>,
    return
  }
  func.func @transform_0(%arg0: i32) -> (i32, i32) {
    %c0_i32 = arith.constant 0 : i32
    %c0_i32_0 = arith.constant 0 : i32
    return %arg0, %c0_i32 : i32, i32
  }
  func.func @transform_1(%arg0: i32) -> (i32, i32) {
    %c0_i32 = arith.constant 0 : i32
    %c0_i32_0 = arith.constant 0 : i32
    %c0_i32_1 = arith.constant 0 : i32
    return %c0_i32, %c0_i32_0 : i32, i32
  }
  func.func @transform_2(%arg0: i32) -> (i32, i32) {
    %c0_i32 = arith.constant 0 : i32
    %c0_i32_0 = arith.constant 0 : i32
    %c0_i32_1 = arith.constant 0 : i32
    return %c0_i32, %c0_i32_0 : i32, i32
  }
  func.func @transform_3(%arg0: i32) -> (i32, i32) {
    %c0_i32 = arith.constant 0 : i32
    %c0_i32_0 = arith.constant 0 : i32
    %c0_i32_1 = arith.constant 0 : i32
    return %c0_i32, %c0_i32_0 : i32, i32
  }
  func.func @transform_4(%arg0: i32) -> (i32, i32) {
    %c0_i32 = arith.constant 0 : i32
    %c0_i32_0 = arith.constant 0 : i32
    %c0_i32_1 = arith.constant 0 : i32
    return %c0_i32, %c0_i32_0 : i32, i32
  }
  func.func @transform_5(%arg0: i32) -> (i32, i32) {
    %c0_i32 = arith.constant 0 : i32
    %c0_i32_0 = arith.constant 0 : i32
    %c0_i32_1 = arith.constant 0 : i32
    return %c0_i32, %c0_i32_0 : i32, i32
  }
  func.func @transform_6(%arg0: i32) -> (i32, i32, i32) {
    %c0_i32 = arith.constant 0 : i32
    %c0_i32_0 = arith.constant 0 : i32
    %c0_i32_1 = arith.constant 0 : i32
    return %arg0, %c0_i32, %c0_i32_0 : i32, i32, i32
  }
}

</mosaic_0001>

<bundles_post_ra>
// kernel: forward.3
= control target key start
LH: loop header
LB: loop body
LE: loop exit
PB: predicated region body
PF: predicated region fallthrough
CT: control target
= control target key end

     0   :  { %s3399_s12 = smov 0   ;;  %s4021_s0 = inlined_call_operand.vmem [shape: bf16[2560,128], index: 0, kind: input, shape index: {}]   ;;  %s4022_s1 = inlined_call_operand.vmem [shape: bf16[128,8], index: 1, kind: input, shape index: {}]   ;;  %s4023_s2 = inlined_call_operand.vmem [shape: f32[1,8], index: 2, kind: input, shape index: {}]   ;;  %s4024_s3 = inlined_call_operand.vmem [shape: bf16[2560,8], index: 3, kind: output, shape index: {}]  }
   0x1 LB: > { %s2576_s13 = sadd.s32 4294967295, %s3377_s12   ;;  %p2580_p0 = scmp.ge.s32.totalorder %s3377_s12, 1  ;;  %s3377_s12 = sphi %s3399_s12, %s13_s12  }
   0x2   : > { %p138_p1 = scmp.lt.s32.totalorder %s3377_s12, 3 }
   0x4   : > { %p139_p2 = pnand %p2580_p0, %p138_p1 }
   0x5   : > { %s162_s16 = smul.u32 (!%p139_p2), 160, %s2576_s13 }
   0x6   : > { %142 = sbr.rel (%p139_p2) target bundleno = 402 (0x192), region = 32 }
   0x7   : > { %p163_p3 = scmp.lt.s32.totalorder (!%p139_p2), %s162_s16, 319 }
   0xb   : > { %v3282_v0 = vld [vmem:[%s4022_s1 + $0x38] sm:$0xff]   ;;  %v3283_v1 = vld [vmem:[%s4022_s1 + $0x30] sm:$0xff]   ;;  %v3284_v2 = vld [vmem:[%s4022_s1 + $0x28] sm:$0xff]   ;;  %s4026_s16 = smov (!%p163_p3, %s162_s16), 319  ;;  %vm2359_vm0 = vcmask 60416  }
   0xc   : > { %3082 = vmatprep.subr.bf16.mxu0 %v3282_v0  ;;  %3258 = vmatprep.subr.bf16.mxu1 %v3282_v0  ;;  %s2581_s21 = sshll.u32 %s4026_s16, 2  ;;  %v3285_v3 = vld [vmem:[%s4022_s1 + $0x20] sm:$0xff]   ;;  %v3286_v6 = vld [vmem:[%s4022_s1 + $0x18] sm:$0xff]   ;;  %v3287_v7 = vld [vmem:[%s4022_s1 + $0x10] sm:$0xff]  }
   0xd   : > { %3083 = vmatpush3.bf16.msra.mxu0 %v3282_v0  ;;  %3266 = vmatpush3.bf16.msra.mxu1 %v3282_v0  ;;  %s3427_s26 = scalar_lea.vmem %s4021_s0, %s2581_s21  ;;  %v3288_v8 = vld [vmem:[%s4022_s1 + $0x8] sm:$0xff]   ;;  %v3289_v9 = vld [vmem:[%s4022_s1] sm:$0xff]   ;;  %s3535_s13 = scalar_lea.vmem %s4024_s3, %s2581_s21 }
   0xe   : > { %3084 = vmatprep.subr.bf16.mxu0 %v3283_v1  ;;  %3259 = vmatprep.subr.bf16.mxu1 %v3283_v1  ;;  %v3290_v4 = vld [vmem:[%s3427_s26] sm:$0xff]   ;;  %v3292_v10 = vld [vmem:[%s3427_s26 + $0x8] sm:$0xff]   ;;  %v3294_v12 = vld [vmem:[%s3427_s26 + $0x10] sm:$0xff]  }
   0xf   : > { %v3291_v5 = vld [vmem:[%s3427_s26 + $0x140] sm:$0xff]   ;;  %3098 = vmatprep.mubr.bf16.mxu0 %v3290_v4  ;;  %v3293_v11 = vld [vmem:[%s3427_s26 + $0x148] sm:$0xff]   ;;  %v3295_v13 = vld [vmem:[%s3427_s26 + $0x150] sm:$0xff]  }
  0x10   : > { %3178 = vmatprep.mubr.bf16.mxu1 %v3291_v5  ;;  %v3296_v14 = vld [vmem:[%s3427_s26 + $0x18] sm:$0xff]   ;;  %v3298_v16 = vld [vmem:[%s3427_s26 + $0x20] sm:$0xff]   ;;  %v3300_v18 = vld [vmem:[%s3427_s26 + $0x28] sm:$0xff]  }
  0x11   : > { %3085 = vmatpush3.bf16.msra.mxu0 %v3283_v1  ;;  %3267 = vmatpush3.bf16.msra.mxu1 %v3283_v1  ;;  %v3297_v15 = vld [vmem:[%s3427_s26 + $0x158] sm:$0xff]   ;;  %v3299_v17 = vld [vmem:[%s3427_s26 + $0x160] sm:$0xff]   ;;  %v3301_v19 = vld [vmem:[%s3427_s26 + $0x168] sm:$0xff]  }
  0x12   : > { %3086 = vmatprep.subr.bf16.mxu0 %v3284_v2  ;;  %3260 = vmatprep.subr.bf16.mxu1 %v3284_v2  ;;  %v3302_v20 = vld [vmem:[%s3427_s26 + $0x30] sm:$0xff]   ;;  %v3304_v22 = vld [vmem:[%s3427_s26 + $0x38] sm:$0xff]   ;;  %v3306_v24 = vld [vmem:[%s3427_s26 + $0x40] sm:$0xff]  }
  0x13   : > { %v3303_v21 = vld [vmem:[%s3427_s26 + $0x170] sm:$0xff]   ;;  %v3305_v23 = vld [vmem:[%s3427_s26 + $0x178] sm:$0xff]   ;;  %v3307_v25 = vld [vmem:[%s3427_s26 + $0x180] sm:$0xff]  }
  0x14   : > { %v3308_v26 = vld [vmem:[%s3427_s26 + $0x48] sm:$0xff]   ;;  %v3310_v28 = vld [vmem:[%s3427_s26 + $0x50] sm:$0xff]   ;;  %v3312_v30 = vld [vmem:[%s3427_s26 + $0x58] sm:$0xff]  }
  0x15   : > { %3087 = vmatpush3.bf16.msra.mxu0 %v3284_v2  ;;  %3268 = vmatpush3.bf16.msra.mxu1 %v3284_v2  ;;  %v3309_v27 = vld [vmem:[%s3427_s26 + $0x188] sm:$0xff]   ;;  %v3311_v29 = vld [vmem:[%s3427_s26 + $0x190] sm:$0xff]   ;;  %v3313_v31 = vld [vmem:[%s3427_s26 + $0x198] sm:$0xff]  }
  0x16   : > { %3088 = vmatprep.subr.bf16.mxu0 %v3285_v3  ;;  %3261 = vmatprep.subr.bf16.mxu1 %v3285_v3  ;;  %v3314_v32 = vld [vmem:[%s3427_s26 + $0x60] sm:$0xff]   ;;  %v3316_v34 = vld [vmem:[%s3427_s26 + $0x68] sm:$0xff]   ;;  %v3318_v36 = vld [vmem:[%s3427_s26 + $0x70] sm:$0xff]  }
  0x17   : > { %v3315_v33 = vld [vmem:[%s3427_s26 + $0x1a0] sm:$0xff]   ;;  %v3317_v35 = vld [vmem:[%s3427_s26 + $0x1a8] sm:$0xff]   ;;  %v3319_v37 = vld [vmem:[%s3427_s26 + $0x1b0] sm:$0xff]  }
  0x18   : > { %v3320_v38 = vld [vmem:[%s3427_s26 + $0x78] sm:$0xff]   ;;  %v3322_v40 = vld [vmem:[%s3427_s26 + $0x80] sm:$0xff]   ;;  %v3324_v42 = vld [vmem:[%s3427_s26 + $0x88] sm:$0xff]  }
  0x19   : > { %3089 = vmatpush3.bf16.msra.mxu0 %v3285_v3  ;;  %3269 = vmatpush3.bf16.msra.mxu1 %v3285_v3  ;;  %v3321_v39 = vld [vmem:[%s3427_s26 + $0x1b8] sm:$0xff]   ;;  %v3323_v41 = vld [vmem:[%s3427_s26 + $0x1c0] sm:$0xff]   ;;  %v3325_v43 = vld [vmem:[%s3427_s26 + $0x1c8] sm:$0xff]  }
  0x1a   : > { %3090 = vmatprep.subr.bf16.mxu0 %v3286_v6  ;;  %3262 = vmatprep.subr.bf16.mxu1 %v3286_v6  ;;  %v3326_v44 = vld [vmem:[%s3427_s26 + $0x90] sm:$0xff]   ;;  %v3328_v46 = vld [vmem:[%s3427_s26 + $0x98] sm:$0xff]   ;;  %v3330_v48 = vld [vmem:[%s3427_s26 + $0xa0] sm:$0xff]  }
  0x1b   : > { %v3327_v45 = vld [vmem:[%s3427_s26 + $0x1d0] sm:$0xff]   ;;  %v3329_v47 = vld [vmem:[%s3427_s26 + $0x1d8] sm:$0xff]   ;;  %v3331_v49 = vld [vmem:[%s3427_s26 + $0x1e0] sm:$0xff]  }
  0x1c   : > { %v3332_v50 = vld [vmem:[%s3427_s26 + $0xa8] sm:$0xff]   ;;  %v3334_v52 = vld [vmem:[%s3427_s26 + $0xb0] sm:$0xff]   ;;  %v3336_v54 = vld [vmem:[%s3427_s26 + $0xb8] sm:$0xff]  }
  0x1d   : > { %3091 = vmatpush3.bf16.msra.mxu0 %v3286_v6  ;;  %3270 = vmatpush3.bf16.msra.mxu1 %v3286_v6  ;;  %v3333_v51 = vld [vmem:[%s3427_s26 + $0x1e8] sm:$0xff]   ;;  %v3335_v53 = vld [vmem:[%s3427_s26 + $0x1f0] sm:$0xff]   ;;  %v3337_v55 = vld [vmem:[%s3427_s26 + $0x1f8] sm:$0xff]  }
  0x1e   : > { %3092 = vmatprep.subr.bf16.mxu0 %v3287_v7  ;;  %3263 = vmatprep.subr.bf16.mxu1 %v3287_v7  ;;  %v3338_v56 = vld [vmem:[%s3427_s26 + $0xc0] sm:$0xff]   ;;  %v3340_v58 = vld [vmem:[%s3427_s26 + $0xc8] sm:$0xff]   ;;  %v3342_v60 = vld [vmem:[%s3427_s26 + $0xd0] sm:$0xff]  }
  0x1f   : > { %v3339_v57 = vld [vmem:[%s3427_s26 + $0x200] sm:$0xff]   ;;  %v3341_v59 = vld [vmem:[%s3427_s26 + $0x208] sm:$0xff]   ;;  %v3343_v61 = vld [vmem:[%s3427_s26 + $0x210] sm:$0xff]  }
  0x20   : > { %v3344_v62 = vld [vmem:[%s3427_s26 + $0xd8] sm:$0xff]   ;;  %v3346_v0 = vld [vmem:[%s3427_s26 + $0xe0] sm:$0xff]   ;;  %v3348_v2 = vld [vmem:[%s3427_s26 + $0xe8] sm:$0xff]  }
  0x21   : > { %3093 = vmatpush3.bf16.msra.mxu0 %v3287_v7  ;;  %3271 = vmatpush3.bf16.msra.mxu1 %v3287_v7  ;;  %v3345_v63 = vld [vmem:[%s3427_s26 + $0x218] sm:$0xff]   ;;  %v3347_v1 = vld [vmem:[%s3427_s26 + $0x220] sm:$0xff]   ;;  %v3349_v3 = vld [vmem:[%s3427_s26 + $0x228] sm:$0xff]  }
  0x22   : > { %3094 = vmatprep.subr.bf16.mxu0 %v3288_v8  ;;  %3264 = vmatprep.subr.bf16.mxu1 %v3288_v8  ;;  %v3350_v4 = vld [vmem:[%s3427_s26 + $0xf0] sm:$0xff]   ;;  %v3352_v6 = vld [vmem:[%s3427_s26 + $0xf8] sm:$0xff]  }
  0x23   : > { %v3351_v5 = vld [vmem:[%s3427_s26 + $0x230] sm:$0xff]   ;;  %v3353_v7 = vld [vmem:[%s3427_s26 + $0x238] sm:$0xff]  }
  0x25   : > { %3095 = vmatpush3.bf16.msra.mxu0 %v3288_v8  ;;  %3272 = vmatpush3.bf16.msra.mxu1 %v3288_v8  ;;  %v3354_v8 = vld [vmem:[%s3427_s26 + $0x100] sm:$0xff]  }
  0x26   : > { %3096 = vmatprep.subr.bf16.mxu0 %v3289_v9  ;;  %3265 = vmatprep.subr.bf16.mxu1 %v3289_v9 }
  0x29   : > { %3097 = vmatpush3.bf16.msra.mxu0 %v3289_v9  ;;  %3273 = vmatpush3.bf16.msra.mxu1 %v3289_v9  ;;  %v3355_v9 = vld [vmem:[%s3427_s26 + $0x240] sm:$0xff]  }
  0x2c   : > { %3099 = vmatmul.mubr.bf16.vlgmr.msra.gmra.mxu0 %v3292_v10  ;;  %3179 = vmatmul.mubr.bf16.vlgmr.msra.gmra.mxu1 %v3293_v11  ;;  %v3356_v10 = vld [vmem:[%s3427_s26 + $0x108] sm:$0xff]  }
  0x2d   : > { %3102 = vmatprep.mubr.bf16.mxu0 %v3294_v12  ;;  %3182 = vmatprep.mubr.bf16.mxu1 %v3295_v13  ;;  %v3357_v11 = vld [vmem:[%s3427_s26 + $0x248] sm:$0xff]   ;;  %v3358_v12 = vld [vmem:[%s3427_s26 + $0x110] sm:$0xff]  }
  0x2e   : > { %v3359_v13 = vld [vmem:[%s3427_s26 + $0x250] sm:$0xff]  }
  0x34   : > { %3103 = vmatmul.mubr.bf16.gmra.mxu0 %v3296_v14  ;;  %3183 = vmatmul.mubr.bf16.gmra.mxu1 %v3297_v15  ;;  %v3360_v14 = vld [vmem:[%s3427_s26 + $0x118] sm:$0xff]  }
  0x35   : > { %3106 = vmatprep.mubr.bf16.mxu0 %v3298_v16  ;;  %3186 = vmatprep.mubr.bf16.mxu1 %v3299_v17  ;;  %v3361_v15 = vld [vmem:[%s3427_s26 + $0x258] sm:$0xff]   ;;  %v3362_v16 = vld [vmem:[%s3427_s26 + $0x120] sm:$0xff]  }
  0x36   : > { %v3363_v17 = vld [vmem:[%s3427_s26 + $0x260] sm:$0xff]  }
  0x3c   : > { %3107 = vmatmul.mubr.bf16.gmra.mxu0 %v3300_v18  ;;  %3187 = vmatmul.mubr.bf16.gmra.mxu1 %v3301_v19  ;;  %v3364_v18 = vld [vmem:[%s3427_s26 + $0x128] sm:$0xff]  }
  0x3d   : > { %3110 = vmatprep.mubr.bf16.mxu0 %v3302_v20  ;;  %3190 = vmatprep.mubr.bf16.mxu1 %v3303_v21  ;;  %v3365_v19 = vld [vmem:[%s3427_s26 + $0x268] sm:$0xff]   ;;  %v3366_v20 = vld [vmem:[%s3427_s26 + $0x130] sm:$0xff]  }
  0x3e   : > { %v3367_v21 = vld [vmem:[%s3427_s26 + $0x270] sm:$0xff]  }
  0x44   : > { %3111 = vmatmul.mubr.bf16.gmra.mxu0 %v3304_v22  ;;  %3191 = vmatmul.mubr.bf16.gmra.mxu1 %v3305_v23  ;;  %v3368_v22 = vld [vmem:[%s3427_s26 + $0x138] sm:$0xff]  }
  0x45   : > { %3114 = vmatprep.mubr.bf16.mxu0 %v3306_v24  ;;  %3194 = vmatprep.mubr.bf16.mxu1 %v3307_v25  ;;  %v3369_v23 = vld [vmem:[%s3427_s26 + $0x278] sm:$0xff]   ;;  %v3524_v24 = vld [vmem:[%s4023_s2] ss:$0 sm:$0xff] }
  0x4c   : > { %3115 = vmatmul.mubr.bf16.gmra.mxu0 %v3308_v26  ;;  %3195 = vmatmul.mubr.bf16.gmra.mxu1 %v3309_v27 }
  0x4d   : > { %3118 = vmatprep.mubr.bf16.mxu0 %v3310_v28  ;;  %3198 = vmatprep.mubr.bf16.mxu1 %v3311_v29 }
  0x54   : > { %3119 = vmatmul.mubr.bf16.gmra.mxu0 %v3312_v30  ;;  %3199 = vmatmul.mubr.bf16.gmra.mxu1 %v3313_v31 }
  0x55   : > { %3122 = vmatprep.mubr.bf16.mxu0 %v3314_v32  ;;  %3202 = vmatprep.mubr.bf16.mxu1 %v3315_v33 }
  0x5c   : > { %3123 = vmatmul.mubr.bf16.gmra.mxu0 %v3316_v34  ;;  %3203 = vmatmul.mubr.bf16.gmra.mxu1 %v3317_v35 }
  0x5d   : > { %3126 = vmatprep.mubr.bf16.mxu0 %v3318_v36  ;;  %3206 = vmatprep.mubr.bf16.mxu1 %v3319_v37 }
  0x64   : > { %3127 = vmatmul.mubr.bf16.gmra.mxu0 %v3320_v38  ;;  %3207 = vmatmul.mubr.bf16.gmra.mxu1 %v3321_v39 }
  0x65   : > { %3130 = vmatprep.mubr.bf16.mxu0 %v3322_v40  ;;  %3210 = vmatprep.mubr.bf16.mxu1 %v3323_v41 }
  0x6c   : > { %3131 = vmatmul.mubr.bf16.gmra.mxu0 %v3324_v42  ;;  %3211 = vmatmul.mubr.bf16.gmra.mxu1 %v3325_v43 }
  0x6d   : > { %3134 = vmatprep.mubr.bf16.mxu0 %v3326_v44  ;;  %3214 = vmatprep.mubr.bf16.mxu1 %v3327_v45 }
  0x74   : > { %3135 = vmatmul.mubr.bf16.gmra.mxu0 %v3328_v46  ;;  %3215 = vmatmul.mubr.bf16.gmra.mxu1 %v3329_v47 }
  0x75   : > { %3138 = vmatprep.mubr.bf16.mxu0 %v3330_v48  ;;  %3218 = vmatprep.mubr.bf16.mxu1 %v3331_v49 }
  0x7c   : > { %3139 = vmatmul.mubr.bf16.gmra.mxu0 %v3332_v50  ;;  %3219 = vmatmul.mubr.bf16.gmra.mxu1 %v3333_v51 }
  0x7d   : > { %3142 = vmatprep.mubr.bf16.mxu0 %v3334_v52  ;;  %3222 = vmatprep.mubr.bf16.mxu1 %v3335_v53 }
  0x84   : > { %3143 = vmatmul.mubr.bf16.gmra.mxu0 %v3336_v54  ;;  %3223 = vmatmul.mubr.bf16.gmra.mxu1 %v3337_v55 }
  0x85   : > { %3146 = vmatprep.mubr.bf16.mxu0 %v3338_v56  ;;  %3226 = vmatprep.mubr.bf16.mxu1 %v3339_v57 }
  0x8c   : > { %3147 = vmatmul.mubr.bf16.gmra.mxu0 %v3340_v58  ;;  %3227 = vmatmul.mubr.bf16.gmra.mxu1 %v3341_v59 }
  0x8d   : > { %3150 = vmatprep.mubr.bf16.mxu0 %v3342_v60  ;;  %3230 = vmatprep.mubr.bf16.mxu1 %v3343_v61 }
  0x94   : > { %3151 = vmatmul.mubr.bf16.gmra.mxu0 %v3344_v62  ;;  %3231 = vmatmul.mubr.bf16.gmra.mxu1 %v3345_v63 }
  0x95   : > { %3154 = vmatprep.mubr.bf16.mxu0 %v3346_v0  ;;  %3234 = vmatprep.mubr.bf16.mxu1 %v3347_v1 }
  0x9c   : > { %3155 = vmatmul.mubr.bf16.gmra.mxu0 %v3348_v2  ;;  %3235 = vmatmul.mubr.bf16.gmra.mxu1 %v3349_v3 }
  0x9d   : > { %3158 = vmatprep.mubr.bf16.mxu0 %v3350_v4  ;;  %3238 = vmatprep.mubr.bf16.mxu1 %v3351_v5 }
  0xa4   : > { %3159 = vmatmul.mubr.bf16.gmra.mxu0 %v3352_v6  ;;  %3239 = vmatmul.mubr.bf16.gmra.mxu1 %v3353_v7 }
  0xa5   : > { %3162 = vmatprep.mubr.bf16.mxu0 %v3354_v8  ;;  %3242 = vmatprep.mubr.bf16.mxu1 %v3355_v9 }
  0xac   : > { %3163 = vmatmul.mubr.bf16.gmra.mxu0 %v3356_v10  ;;  %3243 = vmatmul.mubr.bf16.gmra.mxu1 %v3357_v11 }
  0xad   : > { %3166 = vmatprep.mubr.bf16.mxu0 %v3358_v12  ;;  %3246 = vmatprep.mubr.bf16.mxu1 %v3359_v13 }
  0xb4   : > { %3167 = vmatmul.mubr.bf16.gmra.mxu0 %v3360_v14  ;;  %3247 = vmatmul.mubr.bf16.gmra.mxu1 %v3361_v15 }
  0xb5   : > { %3170 = vmatprep.mubr.bf16.mxu0 %v3362_v16  ;;  %3250 = vmatprep.mubr.bf16.mxu1 %v3363_v17 }
  0xbc   : > { %3171 = vmatmul.mubr.bf16.gmra.mxu0 %v3364_v18  ;;  %3251 = vmatmul.mubr.bf16.gmra.mxu1 %v3365_v19 }
  0xbd   : > { %3174 = vmatprep.mubr.bf16.mxu0 %v3366_v20  ;;  %3254 = vmatprep.mubr.bf16.mxu1 %v3367_v21 }
  0xc4   : > { %3175 = vmatmul.mubr.bf16.gmra.mxu0 %v3368_v22  ;;  %3255 = vmatmul.mubr.bf16.gmra.mxu1 %v3369_v23 }
  0xec   : > { %v3100_v25 = vpop.f32.mrf.mxu0  ;;  %v3180_v26 = vpop.f32.mrf.mxu1 }
  0xed   : > { %v929_v27 = vadd.f32 %v3100_v25, %v3524_v24  ;;  %v1249_v28 = vadd.f32 %v3180_v26, %v3524_v24 }
  0xee   : > { %v920_v29 = vpop.f32.mrf.mxu0  ;;  %v1240_v30 = vpop.f32.mrf.mxu1 }
  0xef   : > { %v1561_v31 = vmax.f32 %v929_v27, 0.0  ;;  %v1641_v32 = vmax.f32 %v1249_v28, 0.0  ;;  %v921_v33 = vadd.f32 %v3524_v24, %v920_v29  ;;  %v1241_v34 = vadd.f32 %v3524_v24, %v1240_v30 }
  0xf0   : > { %v3101_v35 = vpop.f32.mrf.mxu0  ;;  %v3181_v36 = vpop.f32.mrf.mxu1 }
  0xf1   : > { %v2836_v37 = vpack.c.bf16 %v1561_v31, %v1561_v31  ;;  %v2916_v38 = vpack.c.bf16 %v1641_v32, %v1641_v32  ;;  %v1559_v39 = vmax.f32 %v921_v33, 0.0  ;;  %v1639_v40 = vmax.f32 %v1241_v34, 0.0 }
  0xf2   : > { %v932_v41 = vadd.f32 %v3101_v35, %v3524_v24  ;;  %v1252_v42 = vadd.f32 %v3181_v36, %v3524_v24  ;;  %v923_v43 = vpop.f32.mrf.mxu0  ;;  %v1243_v44 = vpop.f32.mrf.mxu1 }
  0xf3   : > { %2362 = vst.msk [vmem:[%s3535_s13 + $0x8] sm:$0xf] %vm2359_vm0, %v2836_v37  ;;  %2442 = vst.msk [vmem:[%s3535_s13 + $0x148] sm:$0xf] %vm2359_vm0, %v2916_v38  ;;  %v2834_v45 = vpack.c.bf16 %v1559_v39, %v1559_v39  ;;  %v2914_v46 = vpack.c.bf16 %v1639_v40, %v1639_v40  ;;  %v924_v47 = vadd.f32 %v3524_v24, %v923_v43 }
  0xf4   : > { %v1244_v48 = vadd.f32 %v3524_v24, %v1243_v44  ;;  %v1562_v49 = vmax.f32 %v932_v41, 0.0  ;;  %v1642_v50 = vmax.f32 %v1252_v42, 0.0  ;;  %v3104_v51 = vpop.f32.mrf.mxu0  ;;  %v3184_v52 = vpop.f32.mrf.mxu1 }
  0xf5   : > { %2360 = vst.msk [vmem:[%s3535_s13] sm:$0xf] %vm2359_vm0, %v2834_v45  ;;  %2440 = vst.msk [vmem:[%s3535_s13 + $0x140] sm:$0xf] %vm2359_vm0, %v2914_v46  ;;  %v1560_v53 = vmax.f32 %v924_v47, 0.0  ;;  %v945_v55 = vadd.f32 %v3104_v51, %v3524_v24  ;;  %v1265_v56 = vadd.f32 %v3184_v52, %v3524_v24 }
  0xf6   : > { %v1640_v54 = vmax.f32 %v1244_v48, 0.0  ;;  %v2837_v57 = vpack.c.bf16 %v1562_v49, %v1562_v49  ;;  %v2917_v58 = vpack.c.bf16 %v1642_v50, %v1642_v50  ;;  %v936_v59 = vpop.f32.mrf.mxu0  ;;  %v1256_v60 = vpop.f32.mrf.mxu1 }
  0xf7   : > { %v2835_v61 = vpack.c.bf16 %v1560_v53, %v1560_v53  ;;  %v1565_v63 = vmax.f32 %v945_v55, 0.0  ;;  %v1645_v0 = vmax.f32 %v1265_v56, 0.0  ;;  %v937_v1 = vadd.f32 %v3524_v24, %v936_v59 }
  0xf8   : > { %v2915_v62 = vpack.c.bf16 %v1640_v54, %v1640_v54  ;;  %2363 = vst.msk [vmem:[%s3535_s13 + $0xc] sm:$0xf] %vm2359_vm0, %v2837_v57  ;;  %2443 = vst.msk [vmem:[%s3535_s13 + $0x14c] sm:$0xf] %vm2359_vm0, %v2917_v58  ;;  %v1257_v2 = vadd.f32 %v3524_v24, %v1256_v60  ;;  %v3105_v3 = vpop.f32.mrf.mxu0  ;;  %v3185_v4 = vpop.f32.mrf.mxu1 }
  0xf9   : > { %2361 = vst.msk [vmem:[%s3535_s13 + $0x4] sm:$0xf] %vm2359_vm0, %v2835_v61  ;;  %v2840_v5 = vpack.c.bf16 %v1565_v63, %v1565_v63  ;;  %v2920_v6 = vpack.c.bf16 %v1645_v0, %v1645_v0  ;;  %v948_v7 = vadd.f32 %v3105_v3, %v3524_v24  ;;  %v1268_v8 = vadd.f32 %v3185_v4, %v3524_v24 }
  0xfa   : > { %2441 = vst.msk [vmem:[%s3535_s13 + $0x144] sm:$0xf] %vm2359_vm0, %v2915_v62  ;;  %v1563_v9 = vmax.f32 %v937_v1, 0.0  ;;  %v1643_v10 = vmax.f32 %v1257_v2, 0.0  ;;  %v939_v11 = vpop.f32.mrf.mxu0  ;;  %v1259_v12 = vpop.f32.mrf.mxu1 }
  0xfb   : > { %2366 = vst.msk [vmem:[%s3535_s13 + $0x18] sm:$0xf] %vm2359_vm0, %v2840_v5  ;;  %2446 = vst.msk [vmem:[%s3535_s13 + $0x158] sm:$0xf] %vm2359_vm0, %v2920_v6  ;;  %v1566_v13 = vmax.f32 %v948_v7, 0.0  ;;  %v1646_v14 = vmax.f32 %v1268_v8, 0.0  ;;  %v940_v15 = vadd.f32 %v3524_v24, %v939_v11  ;;  %v1260_v16 = vadd.f32 %v3524_v24, %v1259_v12 }
  0xfc   : > { %v2838_v17 = vpack.c.bf16 %v1563_v9, %v1563_v9  ;;  %v2918_v18 = vpack.c.bf16 %v1643_v10, %v1643_v10  ;;  %v3108_v19 = vpop.f32.mrf.mxu0  ;;  %v3188_v20 = vpop.f32.mrf.mxu1 }
  0xfd   : > { %v2841_v21 = vpack.c.bf16 %v1566_v13, %v1566_v13  ;;  %v2921_v22 = vpack.c.bf16 %v1646_v14, %v1646_v14  ;;  %v1564_v23 = vmax.f32 %v940_v15, 0.0  ;;  %v1644_v25 = vmax.f32 %v1260_v16, 0.0 }
  0xfe   : > { %2364 = vst.msk [vmem:[%s3535_s13 + $0x10] sm:$0xf] %vm2359_vm0, %v2838_v17  ;;  %2444 = vst.msk [vmem:[%s3535_s13 + $0x150] sm:$0xf] %vm2359_vm0, %v2918_v18  ;;  %v961_v26 = vadd.f32 %v3108_v19, %v3524_v24  ;;  %v1281_v27 = vadd.f32 %v3188_v20, %v3524_v24  ;;  %v952_v28 = vpop.f32.mrf.mxu0  ;;  %v1272_v29 = vpop.f32.mrf.mxu1 }
  0xff   : > { %2367 = vst.msk [vmem:[%s3535_s13 + $0x1c] sm:$0xf] %vm2359_vm0, %v2841_v21  ;;  %2447 = vst.msk [vmem:[%s3535_s13 + $0x15c] sm:$0xf] %vm2359_vm0, %v2921_v22  ;;  %v2839_v30 = vpack.c.bf16 %v1564_v23, %v1564_v23  ;;  %v2919_v31 = vpack.c.bf16 %v1644_v25, %v1644_v25  ;;  %v953_v32 = vadd.f32 %v3524_v24, %v952_v28 }
 0x100   : > { %v1273_v33 = vadd.f32 %v3524_v24, %v1272_v29  ;;  %v1569_v34 = vmax.f32 %v961_v26, 0.0  ;;  %v1649_v35 = vmax.f32 %v1281_v27, 0.0  ;;  %v3109_v36 = vpop.f32.mrf.mxu0  ;;  %v3189_v37 = vpop.f32.mrf.mxu1 }
 0x101   : > { %2365 = vst.msk [vmem:[%s3535_s13 + $0x14] sm:$0xf] %vm2359_vm0, %v2839_v30  ;;  %2445 = vst.msk [vmem:[%s3535_s13 + $0x154] sm:$0xf] %vm2359_vm0, %v2919_v31  ;;  %v1567_v38 = vmax.f32 %v953_v32, 0.0  ;;  %v964_v40 = vadd.f32 %v3109_v36, %v3524_v24  ;;  %v1284_v41 = vadd.f32 %v3189_v37, %v3524_v24 }
 0x102   : > { %v1647_v39 = vmax.f32 %v1273_v33, 0.0  ;;  %v2844_v42 = vpack.c.bf16 %v1569_v34, %v1569_v34  ;;  %v2924_v43 = vpack.c.bf16 %v1649_v35, %v1649_v35  ;;  %v955_v44 = vpop.f32.mrf.mxu0  ;;  %v1275_v45 = vpop.f32.mrf.mxu1 }
 0x103   : > { %v2842_v46 = vpack.c.bf16 %v1567_v38, %v1567_v38  ;;  %v1570_v48 = vmax.f32 %v964_v40, 0.0  ;;  %v1650_v49 = vmax.f32 %v1284_v41, 0.0  ;;  %v956_v50 = vadd.f32 %v3524_v24, %v955_v44 }
 0x104   : > { %v2922_v47 = vpack.c.bf16 %v1647_v39, %v1647_v39  ;;  %2370 = vst.msk [vmem:[%s3535_s13 + $0x28] sm:$0xf] %vm2359_vm0, %v2844_v42  ;;  %2450 = vst.msk [vmem:[%s3535_s13 + $0x168] sm:$0xf] %vm2359_vm0, %v2924_v43  ;;  %v1276_v51 = vadd.f32 %v3524_v24, %v1275_v45  ;;  %v3112_v52 = vpop.f32.mrf.mxu0  ;;  %v3192_v53 = vpop.f32.mrf.mxu1 }
 0x105   : > { %2368 = vst.msk [vmem:[%s3535_s13 + $0x20] sm:$0xf] %vm2359_vm0, %v2842_v46  ;;  %v2845_v54 = vpack.c.bf16 %v1570_v48, %v1570_v48  ;;  %v2925_v55 = vpack.c.bf16 %v1650_v49, %v1650_v49  ;;  %v977_v56 = vadd.f32 %v3112_v52, %v3524_v24  ;;  %v1297_v57 = vadd.f32 %v3192_v53, %v3524_v24 }
 0x106   : > { %2448 = vst.msk [vmem:[%s3535_s13 + $0x160] sm:$0xf] %vm2359_vm0, %v2922_v47  ;;  %v1568_v58 = vmax.f32 %v956_v50, 0.0  ;;  %v1648_v59 = vmax.f32 %v1276_v51, 0.0  ;;  %v968_v60 = vpop.f32.mrf.mxu0  ;;  %v1288_v61 = vpop.f32.mrf.mxu1 }
 0x107   : > { %2371 = vst.msk [vmem:[%s3535_s13 + $0x2c] sm:$0xf] %vm2359_vm0, %v2845_v54  ;;  %2451 = vst.msk [vmem:[%s3535_s13 + $0x16c] sm:$0xf] %vm2359_vm0, %v2925_v55  ;;  %v1573_v62 = vmax.f32 %v977_v56, 0.0  ;;  %v1653_v63 = vmax.f32 %v1297_v57, 0.0  ;;  %v969_v0 = vadd.f32 %v3524_v24, %v968_v60  ;;  %v1289_v1 = vadd.f32 %v3524_v24, %v1288_v61 }
 0x108   : > { %v2843_v2 = vpack.c.bf16 %v1568_v58, %v1568_v58  ;;  %v2923_v3 = vpack.c.bf16 %v1648_v59, %v1648_v59  ;;  %v3113_v4 = vpop.f32.mrf.mxu0  ;;  %v3193_v5 = vpop.f32.mrf.mxu1 }
 0x109   : > { %v2848_v6 = vpack.c.bf16 %v1573_v62, %v1573_v62  ;;  %v2928_v7 = vpack.c.bf16 %v1653_v63, %v1653_v63  ;;  %v1571_v8 = vmax.f32 %v969_v0, 0.0  ;;  %v1651_v9 = vmax.f32 %v1289_v1, 0.0 }
 0x10a   : > { %2369 = vst.msk [vmem:[%s3535_s13 + $0x24] sm:$0xf] %vm2359_vm0, %v2843_v2  ;;  %2449 = vst.msk [vmem:[%s3535_s13 + $0x164] sm:$0xf] %vm2359_vm0, %v2923_v3  ;;  %v980_v10 = vadd.f32 %v3113_v4, %v3524_v24  ;;  %v1300_v11 = vadd.f32 %v3193_v5, %v3524_v24  ;;  %v971_v12 = vpop.f32.mrf.mxu0  ;;  %v1291_v13 = vpop.f32.mrf.mxu1 }
 0x10b   : > { %2374 = vst.msk [vmem:[%s3535_s13 + $0x38] sm:$0xf] %vm2359_vm0, %v2848_v6  ;;  %2454 = vst.msk [vmem:[%s3535_s13 + $0x178] sm:$0xf] %vm2359_vm0, %v2928_v7  ;;  %v2846_v14 = vpack.c.bf16 %v1571_v8, %v1571_v8  ;;  %v2926_v15 = vpack.c.bf16 %v1651_v9, %v1651_v9  ;;  %v972_v16 = vadd.f32 %v3524_v24, %v971_v12 }
 0x10c   : > { %v1292_v17 = vadd.f32 %v3524_v24, %v1291_v13  ;;  %v1574_v18 = vmax.f32 %v980_v10, 0.0  ;;  %v1654_v19 = vmax.f32 %v1300_v11, 0.0  ;;  %v3116_v20 = vpop.f32.mrf.mxu0  ;;  %v3196_v21 = vpop.f32.mrf.mxu1 }
 0x10d   : > { %2372 = vst.msk [vmem:[%s3535_s13 + $0x30] sm:$0xf] %vm2359_vm0, %v2846_v14  ;;  %2452 = vst.msk [vmem:[%s3535_s13 + $0x170] sm:$0xf] %vm2359_vm0, %v2926_v15  ;;  %v1572_v22 = vmax.f32 %v972_v16, 0.0  ;;  %v993_v25 = vadd.f32 %v3116_v20, %v3524_v24  ;;  %v1313_v26 = vadd.f32 %v3196_v21, %v3524_v24 }
 0x10e   : > { %v1652_v23 = vmax.f32 %v1292_v17, 0.0  ;;  %v2849_v27 = vpack.c.bf16 %v1574_v18, %v1574_v18  ;;  %v2929_v28 = vpack.c.bf16 %v1654_v19, %v1654_v19  ;;  %v984_v29 = vpop.f32.mrf.mxu0  ;;  %v1304_v30 = vpop.f32.mrf.mxu1 }
 0x10f   : > { %v2847_v31 = vpack.c.bf16 %v1572_v22, %v1572_v22  ;;  %v1577_v33 = vmax.f32 %v993_v25, 0.0  ;;  %v1657_v34 = vmax.f32 %v1313_v26, 0.0  ;;  %v985_v35 = vadd.f32 %v3524_v24, %v984_v29 }
 0x110   : > { %v2927_v32 = vpack.c.bf16 %v1652_v23, %v1652_v23  ;;  %2375 = vst.msk [vmem:[%s3535_s13 + $0x3c] sm:$0xf] %vm2359_vm0, %v2849_v27  ;;  %2455 = vst.msk [vmem:[%s3535_s13 + $0x17c] sm:$0xf] %vm2359_vm0, %v2929_v28  ;;  %v1305_v36 = vadd.f32 %v3524_v24, %v1304_v30  ;;  %v3117_v37 = vpop.f32.mrf.mxu0  ;;  %v3197_v38 = vpop.f32.mrf.mxu1 }
 0x111   : > { %2373 = vst.msk [vmem:[%s3535_s13 + $0x34] sm:$0xf] %vm2359_vm0, %v2847_v31  ;;  %v2852_v39 = vpack.c.bf16 %v1577_v33, %v1577_v33  ;;  %v2932_v40 = vpack.c.bf16 %v1657_v34, %v1657_v34  ;;  %v996_v41 = vadd.f32 %v3117_v37, %v3524_v24  ;;  %v1316_v42 = vadd.f32 %v3197_v38, %v3524_v24 }
 0x112   : > { %2453 = vst.msk [vmem:[%s3535_s13 + $0x174] sm:$0xf] %vm2359_vm0, %v2927_v32  ;;  %v1575_v43 = vmax.f32 %v985_v35, 0.0  ;;  %v1655_v44 = vmax.f32 %v1305_v36, 0.0  ;;  %v987_v45 = vpop.f32.mrf.mxu0  ;;  %v1307_v46 = vpop.f32.mrf.mxu1 }
 0x113   : > { %2378 = vst.msk [vmem:[%s3535_s13 + $0x48] sm:$0xf] %vm2359_vm0, %v2852_v39  ;;  %2458 = vst.msk [vmem:[%s3535_s13 + $0x188] sm:$0xf] %vm2359_vm0, %v2932_v40  ;;  %v1578_v47 = vmax.f32 %v996_v41, 0.0  ;;  %v1658_v48 = vmax.f32 %v1316_v42, 0.0  ;;  %v988_v49 = vadd.f32 %v3524_v24, %v987_v45  ;;  %v1308_v50 = vadd.f32 %v3524_v24, %v1307_v46 }
 0x114   : > { %v2850_v51 = vpack.c.bf16 %v1575_v43, %v1575_v43  ;;  %v2930_v52 = vpack.c.bf16 %v1655_v44, %v1655_v44  ;;  %v3120_v53 = vpop.f32.mrf.mxu0  ;;  %v3200_v54 = vpop.f32.mrf.mxu1 }
 0x115   : > { %v2853_v55 = vpack.c.bf16 %v1578_v47, %v1578_v47  ;;  %v2933_v56 = vpack.c.bf16 %v1658_v48, %v1658_v48  ;;  %v1576_v57 = vmax.f32 %v988_v49, 0.0  ;;  %v1656_v58 = vmax.f32 %v1308_v50, 0.0 }
 0x116   : > { %2376 = vst.msk [vmem:[%s3535_s13 + $0x40] sm:$0xf] %vm2359_vm0, %v2850_v51  ;;  %2456 = vst.msk [vmem:[%s3535_s13 + $0x180] sm:$0xf] %vm2359_vm0, %v2930_v52  ;;  %v1009_v59 = vadd.f32 %v3120_v53, %v3524_v24  ;;  %v1329_v60 = vadd.f32 %v3200_v54, %v3524_v24  ;;  %v1000_v61 = vpop.f32.mrf.mxu0  ;;  %v1320_v62 = vpop.f32.mrf.mxu1 }
 0x117   : > { %2379 = vst.msk [vmem:[%s3535_s13 + $0x4c] sm:$0xf] %vm2359_vm0, %v2853_v55  ;;  %2459 = vst.msk [vmem:[%s3535_s13 + $0x18c] sm:$0xf] %vm2359_vm0, %v2933_v56  ;;  %v2851_v63 = vpack.c.bf16 %v1576_v57, %v1576_v57  ;;  %v2931_v0 = vpack.c.bf16 %v1656_v58, %v1656_v58  ;;  %v1001_v1 = vadd.f32 %v3524_v24, %v1000_v61 }
 0x118   : > { %v1321_v2 = vadd.f32 %v3524_v24, %v1320_v62  ;;  %v1581_v3 = vmax.f32 %v1009_v59, 0.0  ;;  %v1661_v4 = vmax.f32 %v1329_v60, 0.0  ;;  %v3121_v5 = vpop.f32.mrf.mxu0  ;;  %v3201_v6 = vpop.f32.mrf.mxu1 }
 0x119   : > { %2377 = vst.msk [vmem:[%s3535_s13 + $0x44] sm:$0xf] %vm2359_vm0, %v2851_v63  ;;  %2457 = vst.msk [vmem:[%s3535_s13 + $0x184] sm:$0xf] %vm2359_vm0, %v2931_v0  ;;  %v1579_v7 = vmax.f32 %v1001_v1, 0.0  ;;  %v1012_v9 = vadd.f32 %v3121_v5, %v3524_v24  ;;  %v1332_v10 = vadd.f32 %v3201_v6, %v3524_v24 }
 0x11a   : > { %v1659_v8 = vmax.f32 %v1321_v2, 0.0  ;;  %v2856_v11 = vpack.c.bf16 %v1581_v3, %v1581_v3  ;;  %v2936_v12 = vpack.c.bf16 %v1661_v4, %v1661_v4  ;;  %v1003_v13 = vpop.f32.mrf.mxu0  ;;  %v1323_v14 = vpop.f32.mrf.mxu1 }
 0x11b   : > { %v2854_v15 = vpack.c.bf16 %v1579_v7, %v1579_v7  ;;  %v1582_v17 = vmax.f32 %v1012_v9, 0.0  ;;  %v1662_v18 = vmax.f32 %v1332_v10, 0.0  ;;  %v1004_v19 = vadd.f32 %v3524_v24, %v1003_v13 }
 0x11c   : > { %v2934_v16 = vpack.c.bf16 %v1659_v8, %v1659_v8  ;;  %2382 = vst.msk [vmem:[%s3535_s13 + $0x58] sm:$0xf] %vm2359_vm0, %v2856_v11  ;;  %2462 = vst.msk [vmem:[%s3535_s13 + $0x198] sm:$0xf] %vm2359_vm0, %v2936_v12  ;;  %v1324_v20 = vadd.f32 %v3524_v24, %v1323_v14  ;;  %v3124_v21 = vpop.f32.mrf.mxu0  ;;  %v3204_v22 = vpop.f32.mrf.mxu1 }
 0x11d   : > { %2380 = vst.msk [vmem:[%s3535_s13 + $0x50] sm:$0xf] %vm2359_vm0, %v2854_v15  ;;  %v2857_v23 = vpack.c.bf16 %v1582_v17, %v1582_v17  ;;  %v2937_v25 = vpack.c.bf16 %v1662_v18, %v1662_v18  ;;  %v1025_v26 = vadd.f32 %v3124_v21, %v3524_v24  ;;  %v1345_v27 = vadd.f32 %v3204_v22, %v3524_v24 }
 0x11e   : > { %2460 = vst.msk [vmem:[%s3535_s13 + $0x190] sm:$0xf] %vm2359_vm0, %v2934_v16  ;;  %v1580_v28 = vmax.f32 %v1004_v19, 0.0  ;;  %v1660_v29 = vmax.f32 %v1324_v20, 0.0  ;;  %v1016_v30 = vpop.f32.mrf.mxu0  ;;  %v1336_v31 = vpop.f32.mrf.mxu1 }
 0x11f   : > { %2383 = vst.msk [vmem:[%s3535_s13 + $0x5c] sm:$0xf] %vm2359_vm0, %v2857_v23  ;;  %2463 = vst.msk [vmem:[%s3535_s13 + $0x19c] sm:$0xf] %vm2359_vm0, %v2937_v25  ;;  %v1585_v32 = vmax.f32 %v1025_v26, 0.0  ;;  %v1665_v33 = vmax.f32 %v1345_v27, 0.0  ;;  %v1017_v34 = vadd.f32 %v3524_v24, %v1016_v30  ;;  %v1337_v35 = vadd.f32 %v3524_v24, %v1336_v31 }
 0x120   : > { %v2855_v36 = vpack.c.bf16 %v1580_v28, %v1580_v28  ;;  %v2935_v37 = vpack.c.bf16 %v1660_v29, %v1660_v29  ;;  %v3125_v38 = vpop.f32.mrf.mxu0  ;;  %v3205_v39 = vpop.f32.mrf.mxu1 }
 0x121   : > { %v2860_v40 = vpack.c.bf16 %v1585_v32, %v1585_v32  ;;  %v2940_v41 = vpack.c.bf16 %v1665_v33, %v1665_v33  ;;  %v1583_v42 = vmax.f32 %v1017_v34, 0.0  ;;  %v1663_v43 = vmax.f32 %v1337_v35, 0.0 }
 0x122   : > { %2381 = vst.msk [vmem:[%s3535_s13 + $0x54] sm:$0xf] %vm2359_vm0, %v2855_v36  ;;  %2461 = vst.msk [vmem:[%s3535_s13 + $0x194] sm:$0xf] %vm2359_vm0, %v2935_v37  ;;  %v1028_v44 = vadd.f32 %v3125_v38, %v3524_v24  ;;  %v1348_v45 = vadd.f32 %v3205_v39, %v3524_v24  ;;  %v1019_v46 = vpop.f32.mrf.mxu0  ;;  %v1339_v47 = vpop.f32.mrf.mxu1 }
 0x123   : > { %2386 = vst.msk [vmem:[%s3535_s13 + $0x68] sm:$0xf] %vm2359_vm0, %v2860_v40  ;;  %2466 = vst.msk [vmem:[%s3535_s13 + $0x1a8] sm:$0xf] %vm2359_vm0, %v2940_v41  ;;  %v2858_v48 = vpack.c.bf16 %v1583_v42, %v1583_v42  ;;  %v2938_v49 = vpack.c.bf16 %v1663_v43, %v1663_v43  ;;  %v1020_v50 = vadd.f32 %v3524_v24, %v1019_v46 }
 0x124   : > { %v1340_v51 = vadd.f32 %v3524_v24, %v1339_v47  ;;  %v1586_v52 = vmax.f32 %v1028_v44, 0.0  ;;  %v1666_v53 = vmax.f32 %v1348_v45, 0.0  ;;  %v3128_v54 = vpop.f32.mrf.mxu0  ;;  %v3208_v55 = vpop.f32.mrf.mxu1 }
 0x125   : > { %2384 = vst.msk [vmem:[%s3535_s13 + $0x60] sm:$0xf] %vm2359_vm0, %v2858_v48  ;;  %2464 = vst.msk [vmem:[%s3535_s13 + $0x1a0] sm:$0xf] %vm2359_vm0, %v2938_v49  ;;  %v1584_v56 = vmax.f32 %v1020_v50, 0.0  ;;  %v1041_v58 = vadd.f32 %v3128_v54, %v3524_v24  ;;  %v1361_v59 = vadd.f32 %v3208_v55, %v3524_v24 }
 0x126   : > { %v1664_v57 = vmax.f32 %v1340_v51, 0.0  ;;  %v2861_v60 = vpack.c.bf16 %v1586_v52, %v1586_v52  ;;  %v2941_v61 = vpack.c.bf16 %v1666_v53, %v1666_v53  ;;  %v1032_v62 = vpop.f32.mrf.mxu0  ;;  %v1352_v63 = vpop.f32.mrf.mxu1 }
 0x127   : > { %v2859_v0 = vpack.c.bf16 %v1584_v56, %v1584_v56  ;;  %v1589_v2 = vmax.f32 %v1041_v58, 0.0  ;;  %v1669_v3 = vmax.f32 %v1361_v59, 0.0  ;;  %v1033_v4 = vadd.f32 %v3524_v24, %v1032_v62 }
 0x128   : > { %v2939_v1 = vpack.c.bf16 %v1664_v57, %v1664_v57  ;;  %2387 = vst.msk [vmem:[%s3535_s13 + $0x6c] sm:$0xf] %vm2359_vm0, %v2861_v60  ;;  %2467 = vst.msk [vmem:[%s3535_s13 + $0x1ac] sm:$0xf] %vm2359_vm0, %v2941_v61  ;;  %v1353_v5 = vadd.f32 %v3524_v24, %v1352_v63  ;;  %v3129_v6 = vpop.f32.mrf.mxu0  ;;  %v3209_v7 = vpop.f32.mrf.mxu1 }
 0x129   : > { %2385 = vst.msk [vmem:[%s3535_s13 + $0x64] sm:$0xf] %vm2359_vm0, %v2859_v0  ;;  %v2864_v8 = vpack.c.bf16 %v1589_v2, %v1589_v2  ;;  %v2944_v9 = vpack.c.bf16 %v1669_v3, %v1669_v3  ;;  %v1044_v10 = vadd.f32 %v3129_v6, %v3524_v24  ;;  %v1364_v11 = vadd.f32 %v3209_v7, %v3524_v24 }
 0x12a   : > { %2465 = vst.msk [vmem:[%s3535_s13 + $0x1a4] sm:$0xf] %vm2359_vm0, %v2939_v1  ;;  %v1587_v12 = vmax.f32 %v1033_v4, 0.0  ;;  %v1667_v13 = vmax.f32 %v1353_v5, 0.0  ;;  %v1035_v14 = vpop.f32.mrf.mxu0  ;;  %v1355_v15 = vpop.f32.mrf.mxu1 }
 0x12b   : > { %2390 = vst.msk [vmem:[%s3535_s13 + $0x78] sm:$0xf] %vm2359_vm0, %v2864_v8  ;;  %2470 = vst.msk [vmem:[%s3535_s13 + $0x1b8] sm:$0xf] %vm2359_vm0, %v2944_v9  ;;  %v1590_v16 = vmax.f32 %v1044_v10, 0.0  ;;  %v1670_v17 = vmax.f32 %v1364_v11, 0.0  ;;  %v1036_v18 = vadd.f32 %v3524_v24, %v1035_v14  ;;  %v1356_v19 = vadd.f32 %v3524_v24, %v1355_v15 }
 0x12c   : > { %v2862_v20 = vpack.c.bf16 %v1587_v12, %v1587_v12  ;;  %v2942_v21 = vpack.c.bf16 %v1667_v13, %v1667_v13  ;;  %v3132_v22 = vpop.f32.mrf.mxu0  ;;  %v3212_v23 = vpop.f32.mrf.mxu1 }
 0x12d   : > { %v2865_v25 = vpack.c.bf16 %v1590_v16, %v1590_v16  ;;  %v2945_v26 = vpack.c.bf16 %v1670_v17, %v1670_v17  ;;  %v1588_v27 = vmax.f32 %v1036_v18, 0.0  ;;  %v1668_v28 = vmax.f32 %v1356_v19, 0.0 }
 0x12e   : > { %2388 = vst.msk [vmem:[%s3535_s13 + $0x70] sm:$0xf] %vm2359_vm0, %v2862_v20  ;;  %2468 = vst.msk [vmem:[%s3535_s13 + $0x1b0] sm:$0xf] %vm2359_vm0, %v2942_v21  ;;  %v1057_v29 = vadd.f32 %v3132_v22, %v3524_v24  ;;  %v1377_v30 = vadd.f32 %v3212_v23, %v3524_v24  ;;  %v1048_v31 = vpop.f32.mrf.mxu0  ;;  %v1368_v32 = vpop.f32.mrf.mxu1 }
 0x12f   : > { %2391 = vst.msk [vmem:[%s3535_s13 + $0x7c] sm:$0xf] %vm2359_vm0, %v2865_v25  ;;  %2471 = vst.msk [vmem:[%s3535_s13 + $0x1bc] sm:$0xf] %vm2359_vm0, %v2945_v26  ;;  %v2863_v33 = vpack.c.bf16 %v1588_v27, %v1588_v27  ;;  %v2943_v34 = vpack.c.bf16 %v1668_v28, %v1668_v28  ;;  %v1049_v35 = vadd.f32 %v3524_v24, %v1048_v31 }
 0x130   : > { %v1369_v36 = vadd.f32 %v3524_v24, %v1368_v32  ;;  %v1593_v37 = vmax.f32 %v1057_v29, 0.0  ;;  %v1673_v38 = vmax.f32 %v1377_v30, 0.0  ;;  %v3133_v39 = vpop.f32.mrf.mxu0  ;;  %v3213_v40 = vpop.f32.mrf.mxu1 }
 0x131   : > { %2389 = vst.msk [vmem:[%s3535_s13 + $0x74] sm:$0xf] %vm2359_vm0, %v2863_v33  ;;  %2469 = vst.msk [vmem:[%s3535_s13 + $0x1b4] sm:$0xf] %vm2359_vm0, %v2943_v34  ;;  %v1591_v41 = vmax.f32 %v1049_v35, 0.0  ;;  %v1060_v43 = vadd.f32 %v3133_v39, %v3524_v24  ;;  %v1380_v44 = vadd.f32 %v3213_v40, %v3524_v24 }
 0x132   : > { %v1671_v42 = vmax.f32 %v1369_v36, 0.0  ;;  %v2868_v45 = vpack.c.bf16 %v1593_v37, %v1593_v37  ;;  %v2948_v46 = vpack.c.bf16 %v1673_v38, %v1673_v38  ;;  %v1051_v47 = vpop.f32.mrf.mxu0  ;;  %v1371_v48 = vpop.f32.mrf.mxu1 }
 0x133   : > { %v2866_v49 = vpack.c.bf16 %v1591_v41, %v1591_v41  ;;  %v1594_v51 = vmax.f32 %v1060_v43, 0.0  ;;  %v1674_v52 = vmax.f32 %v1380_v44, 0.0  ;;  %v1052_v53 = vadd.f32 %v3524_v24, %v1051_v47 }
 0x134   : > { %v2946_v50 = vpack.c.bf16 %v1671_v42, %v1671_v42  ;;  %2394 = vst.msk [vmem:[%s3535_s13 + $0x88] sm:$0xf] %vm2359_vm0, %v2868_v45  ;;  %2474 = vst.msk [vmem:[%s3535_s13 + $0x1c8] sm:$0xf] %vm2359_vm0, %v2948_v46  ;;  %v1372_v54 = vadd.f32 %v3524_v24, %v1371_v48  ;;  %v3136_v55 = vpop.f32.mrf.mxu0  ;;  %v3216_v56 = vpop.f32.mrf.mxu1 }
 0x135   : > { %2392 = vst.msk [vmem:[%s3535_s13 + $0x80] sm:$0xf] %vm2359_vm0, %v2866_v49  ;;  %v2869_v57 = vpack.c.bf16 %v1594_v51, %v1594_v51  ;;  %v2949_v58 = vpack.c.bf16 %v1674_v52, %v1674_v52  ;;  %v1073_v59 = vadd.f32 %v3136_v55, %v3524_v24  ;;  %v1393_v60 = vadd.f32 %v3216_v56, %v3524_v24 }
 0x136   : > { %2472 = vst.msk [vmem:[%s3535_s13 + $0x1c0] sm:$0xf] %vm2359_vm0, %v2946_v50  ;;  %v1592_v61 = vmax.f32 %v1052_v53, 0.0  ;;  %v1672_v62 = vmax.f32 %v1372_v54, 0.0  ;;  %v1064_v63 = vpop.f32.mrf.mxu0  ;;  %v1384_v0 = vpop.f32.mrf.mxu1 }
 0x137   : > { %2395 = vst.msk [vmem:[%s3535_s13 + $0x8c] sm:$0xf] %vm2359_vm0, %v2869_v57  ;;  %2475 = vst.msk [vmem:[%s3535_s13 + $0x1cc] sm:$0xf] %vm2359_vm0, %v2949_v58  ;;  %v1597_v1 = vmax.f32 %v1073_v59, 0.0  ;;  %v1677_v2 = vmax.f32 %v1393_v60, 0.0  ;;  %v1065_v3 = vadd.f32 %v3524_v24, %v1064_v63  ;;  %v1385_v4 = vadd.f32 %v3524_v24, %v1384_v0 }
 0x138   : > { %v2867_v5 = vpack.c.bf16 %v1592_v61, %v1592_v61  ;;  %v2947_v6 = vpack.c.bf16 %v1672_v62, %v1672_v62  ;;  %v3137_v7 = vpop.f32.mrf.mxu0  ;;  %v3217_v8 = vpop.f32.mrf.mxu1 }
 0x139   : > { %v2872_v9 = vpack.c.bf16 %v1597_v1, %v1597_v1  ;;  %v2952_v10 = vpack.c.bf16 %v1677_v2, %v1677_v2  ;;  %v1595_v11 = vmax.f32 %v1065_v3, 0.0  ;;  %v1675_v12 = vmax.f32 %v1385_v4, 0.0 }
 0x13a   : > { %2393 = vst.msk [vmem:[%s3535_s13 + $0x84] sm:$0xf] %vm2359_vm0, %v2867_v5  ;;  %2473 = vst.msk [vmem:[%s3535_s13 + $0x1c4] sm:$0xf] %vm2359_vm0, %v2947_v6  ;;  %v1076_v13 = vadd.f32 %v3137_v7, %v3524_v24  ;;  %v1396_v14 = vadd.f32 %v3217_v8, %v3524_v24  ;;  %v1067_v15 = vpop.f32.mrf.mxu0  ;;  %v1387_v16 = vpop.f32.mrf.mxu1 }
 0x13b   : > { %2398 = vst.msk [vmem:[%s3535_s13 + $0x98] sm:$0xf] %vm2359_vm0, %v2872_v9  ;;  %2478 = vst.msk [vmem:[%s3535_s13 + $0x1d8] sm:$0xf] %vm2359_vm0, %v2952_v10  ;;  %v2870_v17 = vpack.c.bf16 %v1595_v11, %v1595_v11  ;;  %v2950_v18 = vpack.c.bf16 %v1675_v12, %v1675_v12  ;;  %v1068_v19 = vadd.f32 %v3524_v24, %v1067_v15 }
 0x13c   : > { %v1388_v20 = vadd.f32 %v3524_v24, %v1387_v16  ;;  %v1598_v21 = vmax.f32 %v1076_v13, 0.0  ;;  %v1678_v22 = vmax.f32 %v1396_v14, 0.0  ;;  %v3140_v23 = vpop.f32.mrf.mxu0  ;;  %v3220_v25 = vpop.f32.mrf.mxu1 }
 0x13d   : > { %2396 = vst.msk [vmem:[%s3535_s13 + $0x90] sm:$0xf] %vm2359_vm0, %v2870_v17  ;;  %2476 = vst.msk [vmem:[%s3535_s13 + $0x1d0] sm:$0xf] %vm2359_vm0, %v2950_v18  ;;  %v1596_v26 = vmax.f32 %v1068_v19, 0.0  ;;  %v1089_v28 = vadd.f32 %v3140_v23, %v3524_v24  ;;  %v1409_v29 = vadd.f32 %v3220_v25, %v3524_v24 }
 0x13e   : > { %v1676_v27 = vmax.f32 %v1388_v20, 0.0  ;;  %v2873_v30 = vpack.c.bf16 %v1598_v21, %v1598_v21  ;;  %v2953_v31 = vpack.c.bf16 %v1678_v22, %v1678_v22  ;;  %v1080_v32 = vpop.f32.mrf.mxu0  ;;  %v1400_v33 = vpop.f32.mrf.mxu1 }
 0x13f   : > { %v2871_v34 = vpack.c.bf16 %v1596_v26, %v1596_v26  ;;  %v1601_v36 = vmax.f32 %v1089_v28, 0.0  ;;  %v1681_v37 = vmax.f32 %v1409_v29, 0.0  ;;  %v1081_v38 = vadd.f32 %v3524_v24, %v1080_v32 }
 0x140   : > { %v2951_v35 = vpack.c.bf16 %v1676_v27, %v1676_v27  ;;  %2399 = vst.msk [vmem:[%s3535_s13 + $0x9c] sm:$0xf] %vm2359_vm0, %v2873_v30  ;;  %2479 = vst.msk [vmem:[%s3535_s13 + $0x1dc] sm:$0xf] %vm2359_vm0, %v2953_v31  ;;  %v1401_v39 = vadd.f32 %v3524_v24, %v1400_v33  ;;  %v3141_v40 = vpop.f32.mrf.mxu0  ;;  %v3221_v41 = vpop.f32.mrf.mxu1 }
 0x141   : > { %2397 = vst.msk [vmem:[%s3535_s13 + $0x94] sm:$0xf] %vm2359_vm0, %v2871_v34  ;;  %v2876_v42 = vpack.c.bf16 %v1601_v36, %v1601_v36  ;;  %v2956_v43 = vpack.c.bf16 %v1681_v37, %v1681_v37  ;;  %v1092_v44 = vadd.f32 %v3141_v40, %v3524_v24  ;;  %v1412_v45 = vadd.f32 %v3221_v41, %v3524_v24 }
 0x142   : > { %2477 = vst.msk [vmem:[%s3535_s13 + $0x1d4] sm:$0xf] %vm2359_vm0, %v2951_v35  ;;  %v1599_v46 = vmax.f32 %v1081_v38, 0.0  ;;  %v1679_v47 = vmax.f32 %v1401_v39, 0.0  ;;  %v1083_v48 = vpop.f32.mrf.mxu0  ;;  %v1403_v49 = vpop.f32.mrf.mxu1 }
 0x143   : > { %2402 = vst.msk [vmem:[%s3535_s13 + $0xa8] sm:$0xf] %vm2359_vm0, %v2876_v42  ;;  %2482 = vst.msk [vmem:[%s3535_s13 + $0x1e8] sm:$0xf] %vm2359_vm0, %v2956_v43  ;;  %v1602_v50 = vmax.f32 %v1092_v44, 0.0  ;;  %v1682_v51 = vmax.f32 %v1412_v45, 0.0  ;;  %v1084_v52 = vadd.f32 %v3524_v24, %v1083_v48  ;;  %v1404_v53 = vadd.f32 %v3524_v24, %v1403_v49 }
 0x144   : > { %v2874_v54 = vpack.c.bf16 %v1599_v46, %v1599_v46  ;;  %v2954_v55 = vpack.c.bf16 %v1679_v47, %v1679_v47  ;;  %v3144_v56 = vpop.f32.mrf.mxu0  ;;  %v3224_v57 = vpop.f32.mrf.mxu1 }
 0x145   : > { %v2877_v58 = vpack.c.bf16 %v1602_v50, %v1602_v50  ;;  %v2957_v59 = vpack.c.bf16 %v1682_v51, %v1682_v51  ;;  %v1600_v60 = vmax.f32 %v1084_v52, 0.0  ;;  %v1680_v61 = vmax.f32 %v1404_v53, 0.0 }
 0x146   : > { %2400 = vst.msk [vmem:[%s3535_s13 + $0xa0] sm:$0xf] %vm2359_vm0, %v2874_v54  ;;  %2480 = vst.msk [vmem:[%s3535_s13 + $0x1e0] sm:$0xf] %vm2359_vm0, %v2954_v55  ;;  %v1105_v62 = vadd.f32 %v3144_v56, %v3524_v24  ;;  %v1425_v63 = vadd.f32 %v3224_v57, %v3524_v24  ;;  %v1096_v0 = vpop.f32.mrf.mxu0  ;;  %v1416_v1 = vpop.f32.mrf.mxu1 }
 0x147   : > { %2403 = vst.msk [vmem:[%s3535_s13 + $0xac] sm:$0xf] %vm2359_vm0, %v2877_v58  ;;  %2483 = vst.msk [vmem:[%s3535_s13 + $0x1ec] sm:$0xf] %vm2359_vm0, %v2957_v59  ;;  %v2875_v2 = vpack.c.bf16 %v1600_v60, %v1600_v60  ;;  %v2955_v3 = vpack.c.bf16 %v1680_v61, %v1680_v61  ;;  %v1097_v4 = vadd.f32 %v3524_v24, %v1096_v0  ;;  %v3840_v61 = vld [vmem:[%s4023_s2] ss:$0 sm:$0xff] }
 0x148   : > { %v1417_v5 = vadd.f32 %v3524_v24, %v1416_v1  ;;  %v1605_v6 = vmax.f32 %v1105_v62, 0.0  ;;  %v1685_v7 = vmax.f32 %v1425_v63, 0.0  ;;  %v3145_v8 = vpop.f32.mrf.mxu0  ;;  %v3225_v9 = vpop.f32.mrf.mxu1 }
 0x149   : > { %2401 = vst.msk [vmem:[%s3535_s13 + $0xa4] sm:$0xf] %vm2359_vm0, %v2875_v2  ;;  %2481 = vst.msk [vmem:[%s3535_s13 + $0x1e4] sm:$0xf] %vm2359_vm0, %v2955_v3  ;;  %v1603_v10 = vmax.f32 %v1097_v4, 0.0  ;;  %v1108_v12 = vadd.f32 %v3145_v8, %v3524_v24  ;;  %v1428_v13 = vadd.f32 %v3225_v9, %v3524_v24 }
 0x14a   : > { %v1683_v11 = vmax.f32 %v1417_v5, 0.0  ;;  %v2880_v14 = vpack.c.bf16 %v1605_v6, %v1605_v6  ;;  %v2960_v15 = vpack.c.bf16 %v1685_v7, %v1685_v7  ;;  %v1099_v16 = vpop.f32.mrf.mxu0  ;;  %v1419_v17 = vpop.f32.mrf.mxu1 }
 0x14b   : > { %v2878_v18 = vpack.c.bf16 %v1603_v10, %v1603_v10  ;;  %v1606_v20 = vmax.f32 %v1108_v12, 0.0  ;;  %v1686_v21 = vmax.f32 %v1428_v13, 0.0  ;;  %v1100_v22 = vadd.f32 %v3524_v24, %v1099_v16 }
 0x14c   : > { %v2958_v19 = vpack.c.bf16 %v1683_v11, %v1683_v11  ;;  %2406 = vst.msk [vmem:[%s3535_s13 + $0xb8] sm:$0xf] %vm2359_vm0, %v2880_v14  ;;  %2486 = vst.msk [vmem:[%s3535_s13 + $0x1f8] sm:$0xf] %vm2359_vm0, %v2960_v15  ;;  %v1420_v23 = vadd.f32 %v3524_v24, %v1419_v17  ;;  %v3148_v25 = vpop.f32.mrf.mxu0  ;;  %v3228_v26 = vpop.f32.mrf.mxu1 }
 0x14d   : > { %2404 = vst.msk [vmem:[%s3535_s13 + $0xb0] sm:$0xf] %vm2359_vm0, %v2878_v18  ;;  %v2881_v27 = vpack.c.bf16 %v1606_v20, %v1606_v20  ;;  %v2961_v28 = vpack.c.bf16 %v1686_v21, %v1686_v21  ;;  %v1121_v29 = vadd.f32 %v3148_v25, %v3524_v24  ;;  %v1441_v30 = vadd.f32 %v3228_v26, %v3524_v24 }
 0x14e   : > { %2484 = vst.msk [vmem:[%s3535_s13 + $0x1f0] sm:$0xf] %vm2359_vm0, %v2958_v19  ;;  %v1604_v31 = vmax.f32 %v1100_v22, 0.0  ;;  %v1684_v32 = vmax.f32 %v1420_v23, 0.0  ;;  %v1112_v33 = vpop.f32.mrf.mxu0  ;;  %v1432_v34 = vpop.f32.mrf.mxu1 }
 0x14f   : > { %2407 = vst.msk [vmem:[%s3535_s13 + $0xbc] sm:$0xf] %vm2359_vm0, %v2881_v27  ;;  %2487 = vst.msk [vmem:[%s3535_s13 + $0x1fc] sm:$0xf] %vm2359_vm0, %v2961_v28  ;;  %v1609_v35 = vmax.f32 %v1121_v29, 0.0  ;;  %v1689_v36 = vmax.f32 %v1441_v30, 0.0  ;;  %v1113_v37 = vadd.f32 %v3524_v24, %v1112_v33  ;;  %v1433_v38 = vadd.f32 %v3524_v24, %v1432_v34 }
 0x150   : > { %v2879_v39 = vpack.c.bf16 %v1604_v31, %v1604_v31  ;;  %v2959_v40 = vpack.c.bf16 %v1684_v32, %v1684_v32  ;;  %v3149_v41 = vpop.f32.mrf.mxu0  ;;  %v3229_v42 = vpop.f32.mrf.mxu1 }
 0x151   : > { %v2884_v43 = vpack.c.bf16 %v1609_v35, %v1609_v35  ;;  %v2964_v44 = vpack.c.bf16 %v1689_v36, %v1689_v36  ;;  %v1607_v45 = vmax.f32 %v1113_v37, 0.0  ;;  %v1687_v46 = vmax.f32 %v1433_v38, 0.0 }
 0x152   : > { %2405 = vst.msk [vmem:[%s3535_s13 + $0xb4] sm:$0xf] %vm2359_vm0, %v2879_v39  ;;  %2485 = vst.msk [vmem:[%s3535_s13 + $0x1f4] sm:$0xf] %vm2359_vm0, %v2959_v40  ;;  %v1124_v47 = vadd.f32 %v3149_v41, %v3524_v24  ;;  %v1444_v48 = vadd.f32 %v3229_v42, %v3524_v24  ;;  %v1115_v49 = vpop.f32.mrf.mxu0  ;;  %v1435_v50 = vpop.f32.mrf.mxu1 }
 0x153   : > { %2410 = vst.msk [vmem:[%s3535_s13 + $0xc8] sm:$0xf] %vm2359_vm0, %v2884_v43  ;;  %2490 = vst.msk [vmem:[%s3535_s13 + $0x208] sm:$0xf] %vm2359_vm0, %v2964_v44  ;;  %v2882_v51 = vpack.c.bf16 %v1607_v45, %v1607_v45  ;;  %v2962_v52 = vpack.c.bf16 %v1687_v46, %v1687_v46  ;;  %v1116_v53 = vadd.f32 %v3524_v24, %v1115_v49 }
 0x154   : > { %v1436_v54 = vadd.f32 %v3524_v24, %v1435_v50  ;;  %v1610_v55 = vmax.f32 %v1124_v47, 0.0  ;;  %v1690_v56 = vmax.f32 %v1444_v48, 0.0  ;;  %v3152_v57 = vpop.f32.mrf.mxu0  ;;  %v3232_v58 = vpop.f32.mrf.mxu1 }
 0x155   : > { %2408 = vst.msk [vmem:[%s3535_s13 + $0xc0] sm:$0xf] %vm2359_vm0, %v2882_v51  ;;  %2488 = vst.msk [vmem:[%s3535_s13 + $0x200] sm:$0xf] %vm2359_vm0, %v2962_v52  ;;  %v1608_v59 = vmax.f32 %v1116_v53, 0.0  ;;  %v1137_v62 = vadd.f32 %v3840_v61, %v3152_v57  ;;  %v1457_v24 = vadd.f32 %v3840_v61, %v3232_v58 }
 0x156   : > { %v1688_v60 = vmax.f32 %v1436_v54, 0.0  ;;  %v2885_v63 = vpack.c.bf16 %v1610_v55, %v1610_v55  ;;  %v2965_v0 = vpack.c.bf16 %v1690_v56, %v1690_v56  ;;  %v1128_v1 = vpop.f32.mrf.mxu0  ;;  %v1448_v2 = vpop.f32.mrf.mxu1 }
 0x157   : > { %v2883_v3 = vpack.c.bf16 %v1608_v59, %v1608_v59  ;;  %v1613_v5 = vmax.f32 %v1137_v62, 0.0  ;;  %v1693_v6 = vmax.f32 %v1457_v24, 0.0  ;;  %v1129_v7 = vadd.f32 %v3840_v61, %v1128_v1 }
 0x158   : > { %v2963_v4 = vpack.c.bf16 %v1688_v60, %v1688_v60  ;;  %2411 = vst.msk [vmem:[%s3535_s13 + $0xcc] sm:$0xf] %vm2359_vm0, %v2885_v63  ;;  %2491 = vst.msk [vmem:[%s3535_s13 + $0x20c] sm:$0xf] %vm2359_vm0, %v2965_v0  ;;  %v1449_v8 = vadd.f32 %v3840_v61, %v1448_v2  ;;  %v3153_v9 = vpop.f32.mrf.mxu0  ;;  %v3233_v10 = vpop.f32.mrf.mxu1 }
 0x159   : > { %2409 = vst.msk [vmem:[%s3535_s13 + $0xc4] sm:$0xf] %vm2359_vm0, %v2883_v3  ;;  %v2888_v11 = vpack.c.bf16 %v1613_v5, %v1613_v5  ;;  %v2968_v12 = vpack.c.bf16 %v1693_v6, %v1693_v6  ;;  %v1140_v13 = vadd.f32 %v3840_v61, %v3153_v9  ;;  %v1460_v14 = vadd.f32 %v3840_v61, %v3233_v10 }
 0x15a   : > { %2489 = vst.msk [vmem:[%s3535_s13 + $0x204] sm:$0xf] %vm2359_vm0, %v2963_v4  ;;  %v1611_v15 = vmax.f32 %v1129_v7, 0.0  ;;  %v1691_v16 = vmax.f32 %v1449_v8, 0.0  ;;  %v1131_v17 = vpop.f32.mrf.mxu0  ;;  %v1451_v18 = vpop.f32.mrf.mxu1 }
 0x15b   : > { %2414 = vst.msk [vmem:[%s3535_s13 + $0xd8] sm:$0xf] %vm2359_vm0, %v2888_v11  ;;  %2494 = vst.msk [vmem:[%s3535_s13 + $0x218] sm:$0xf] %vm2359_vm0, %v2968_v12  ;;  %v1614_v19 = vmax.f32 %v1140_v13, 0.0  ;;  %v1694_v20 = vmax.f32 %v1460_v14, 0.0  ;;  %v1132_v21 = vadd.f32 %v3840_v61, %v1131_v17  ;;  %v1452_v22 = vadd.f32 %v3840_v61, %v1451_v18 }
 0x15c   : > { %v2886_v23 = vpack.c.bf16 %v1611_v15, %v1611_v15  ;;  %v2966_v25 = vpack.c.bf16 %v1691_v16, %v1691_v16  ;;  %v3156_v26 = vpop.f32.mrf.mxu0  ;;  %v3236_v27 = vpop.f32.mrf.mxu1 }
 0x15d   : > { %v2889_v28 = vpack.c.bf16 %v1614_v19, %v1614_v19  ;;  %v2969_v29 = vpack.c.bf16 %v1694_v20, %v1694_v20  ;;  %v1612_v30 = vmax.f32 %v1132_v21, 0.0  ;;  %v1692_v31 = vmax.f32 %v1452_v22, 0.0 }
 0x15e   : > { %2412 = vst.msk [vmem:[%s3535_s13 + $0xd0] sm:$0xf] %vm2359_vm0, %v2886_v23  ;;  %2492 = vst.msk [vmem:[%s3535_s13 + $0x210] sm:$0xf] %vm2359_vm0, %v2966_v25  ;;  %v1153_v32 = vadd.f32 %v3840_v61, %v3156_v26  ;;  %v1473_v33 = vadd.f32 %v3840_v61, %v3236_v27  ;;  %v1144_v34 = vpop.f32.mrf.mxu0  ;;  %v1464_v35 = vpop.f32.mrf.mxu1 }
 0x15f   : > { %2415 = vst.msk [vmem:[%s3535_s13 + $0xdc] sm:$0xf] %vm2359_vm0, %v2889_v28  ;;  %2495 = vst.msk [vmem:[%s3535_s13 + $0x21c] sm:$0xf] %vm2359_vm0, %v2969_v29  ;;  %v2887_v36 = vpack.c.bf16 %v1612_v30, %v1612_v30  ;;  %v2967_v37 = vpack.c.bf16 %v1692_v31, %v1692_v31  ;;  %v1145_v38 = vadd.f32 %v3840_v61, %v1144_v34 }
 0x160   : > { %v1465_v39 = vadd.f32 %v3840_v61, %v1464_v35  ;;  %v1617_v40 = vmax.f32 %v1153_v32, 0.0  ;;  %v1697_v41 = vmax.f32 %v1473_v33, 0.0  ;;  %v3157_v42 = vpop.f32.mrf.mxu0  ;;  %v3237_v43 = vpop.f32.mrf.mxu1 }
 0x161   : > { %2413 = vst.msk [vmem:[%s3535_s13 + $0xd4] sm:$0xf] %vm2359_vm0, %v2887_v36  ;;  %2493 = vst.msk [vmem:[%s3535_s13 + $0x214] sm:$0xf] %vm2359_vm0, %v2967_v37  ;;  %v1615_v44 = vmax.f32 %v1145_v38, 0.0  ;;  %v1156_v46 = vadd.f32 %v3840_v61, %v3157_v42  ;;  %v1476_v47 = vadd.f32 %v3840_v61, %v3237_v43 }
 0x162   : > { %v1695_v45 = vmax.f32 %v1465_v39, 0.0  ;;  %v2892_v48 = vpack.c.bf16 %v1617_v40, %v1617_v40  ;;  %v2972_v49 = vpack.c.bf16 %v1697_v41, %v1697_v41  ;;  %v1147_v50 = vpop.f32.mrf.mxu0  ;;  %v1467_v51 = vpop.f32.mrf.mxu1 }
 0x163   : > { %v2890_v52 = vpack.c.bf16 %v1615_v44, %v1615_v44  ;;  %v1618_v54 = vmax.f32 %v1156_v46, 0.0  ;;  %v1698_v55 = vmax.f32 %v1476_v47, 0.0  ;;  %v1148_v56 = vadd.f32 %v3840_v61, %v1147_v50 }
 0x164   : > { %v2970_v53 = vpack.c.bf16 %v1695_v45, %v1695_v45  ;;  %2418 = vst.msk [vmem:[%s3535_s13 + $0xe8] sm:$0xf] %vm2359_vm0, %v2892_v48  ;;  %2498 = vst.msk [vmem:[%s3535_s13 + $0x228] sm:$0xf] %vm2359_vm0, %v2972_v49  ;;  %v1468_v57 = vadd.f32 %v3840_v61, %v1467_v51  ;;  %v3160_v58 = vpop.f32.mrf.mxu0  ;;  %v3240_v59 = vpop.f32.mrf.mxu1 }
 0x165   : > { %2416 = vst.msk [vmem:[%s3535_s13 + $0xe0] sm:$0xf] %vm2359_vm0, %v2890_v52  ;;  %v2893_v60 = vpack.c.bf16 %v1618_v54, %v1618_v54  ;;  %v2973_v62 = vpack.c.bf16 %v1698_v55, %v1698_v55  ;;  %v1169_v24 = vadd.f32 %v3840_v61, %v3160_v58  ;;  %v1489_v63 = vadd.f32 %v3840_v61, %v3240_v59 }
 0x166   : > { %2496 = vst.msk [vmem:[%s3535_s13 + $0x220] sm:$0xf] %vm2359_vm0, %v2970_v53  ;;  %v1616_v0 = vmax.f32 %v1148_v56, 0.0  ;;  %v1696_v1 = vmax.f32 %v1468_v57, 0.0  ;;  %v1160_v2 = vpop.f32.mrf.mxu0  ;;  %v1480_v3 = vpop.f32.mrf.mxu1 }
 0x167   : > { %2419 = vst.msk [vmem:[%s3535_s13 + $0xec] sm:$0xf] %vm2359_vm0, %v2893_v60  ;;  %2499 = vst.msk [vmem:[%s3535_s13 + $0x22c] sm:$0xf] %vm2359_vm0, %v2973_v62  ;;  %v1621_v4 = vmax.f32 %v1169_v24, 0.0  ;;  %v1701_v5 = vmax.f32 %v1489_v63, 0.0  ;;  %v1161_v6 = vadd.f32 %v3840_v61, %v1160_v2  ;;  %v1481_v7 = vadd.f32 %v3840_v61, %v1480_v3 }
 0x168   : > { %v2891_v8 = vpack.c.bf16 %v1616_v0, %v1616_v0  ;;  %v2971_v9 = vpack.c.bf16 %v1696_v1, %v1696_v1  ;;  %v3161_v10 = vpop.f32.mrf.mxu0  ;;  %v3241_v11 = vpop.f32.mrf.mxu1 }
 0x169   : > { %v2896_v12 = vpack.c.bf16 %v1621_v4, %v1621_v4  ;;  %v2976_v13 = vpack.c.bf16 %v1701_v5, %v1701_v5  ;;  %v1619_v14 = vmax.f32 %v1161_v6, 0.0  ;;  %v1699_v15 = vmax.f32 %v1481_v7, 0.0 }
 0x16a   : > { %2417 = vst.msk [vmem:[%s3535_s13 + $0xe4] sm:$0xf] %vm2359_vm0, %v2891_v8  ;;  %2497 = vst.msk [vmem:[%s3535_s13 + $0x224] sm:$0xf] %vm2359_vm0, %v2971_v9  ;;  %v1172_v16 = vadd.f32 %v3840_v61, %v3161_v10  ;;  %v1492_v17 = vadd.f32 %v3840_v61, %v3241_v11  ;;  %v1163_v18 = vpop.f32.mrf.mxu0  ;;  %v1483_v19 = vpop.f32.mrf.mxu1 }
 0x16b   : > { %2422 = vst.msk [vmem:[%s3535_s13 + $0xf8] sm:$0xf] %vm2359_vm0, %v2896_v12  ;;  %2502 = vst.msk [vmem:[%s3535_s13 + $0x238] sm:$0xf] %vm2359_vm0, %v2976_v13  ;;  %v2894_v20 = vpack.c.bf16 %v1619_v14, %v1619_v14  ;;  %v2974_v21 = vpack.c.bf16 %v1699_v15, %v1699_v15  ;;  %v1164_v22 = vadd.f32 %v3840_v61, %v1163_v18 }
 0x16c   : > { %v1484_v23 = vadd.f32 %v3840_v61, %v1483_v19  ;;  %v1622_v25 = vmax.f32 %v1172_v16, 0.0  ;;  %v1702_v26 = vmax.f32 %v1492_v17, 0.0  ;;  %v3164_v27 = vpop.f32.mrf.mxu0  ;;  %v3244_v28 = vpop.f32.mrf.mxu1 }
 0x16d   : > { %2420 = vst.msk [vmem:[%s3535_s13 + $0xf0] sm:$0xf] %vm2359_vm0, %v2894_v20  ;;  %2500 = vst.msk [vmem:[%s3535_s13 + $0x230] sm:$0xf] %vm2359_vm0, %v2974_v21  ;;  %v1620_v29 = vmax.f32 %v1164_v22, 0.0  ;;  %v1185_v31 = vadd.f32 %v3840_v61, %v3164_v27  ;;  %v1505_v32 = vadd.f32 %v3840_v61, %v3244_v28 }
 0x16e   : > { %v1700_v30 = vmax.f32 %v1484_v23, 0.0  ;;  %v2897_v33 = vpack.c.bf16 %v1622_v25, %v1622_v25  ;;  %v2977_v34 = vpack.c.bf16 %v1702_v26, %v1702_v26  ;;  %v1176_v35 = vpop.f32.mrf.mxu0  ;;  %v1496_v36 = vpop.f32.mrf.mxu1 }
 0x16f   : > { %v2895_v37 = vpack.c.bf16 %v1620_v29, %v1620_v29  ;;  %v1625_v39 = vmax.f32 %v1185_v31, 0.0  ;;  %v1705_v40 = vmax.f32 %v1505_v32, 0.0  ;;  %v1177_v41 = vadd.f32 %v3840_v61, %v1176_v35 }
 0x170   : > { %v2975_v38 = vpack.c.bf16 %v1700_v30, %v1700_v30  ;;  %2423 = vst.msk [vmem:[%s3535_s13 + $0xfc] sm:$0xf] %vm2359_vm0, %v2897_v33  ;;  %2503 = vst.msk [vmem:[%s3535_s13 + $0x23c] sm:$0xf] %vm2359_vm0, %v2977_v34  ;;  %v1497_v42 = vadd.f32 %v3840_v61, %v1496_v36  ;;  %v3165_v43 = vpop.f32.mrf.mxu0  ;;  %v3245_v44 = vpop.f32.mrf.mxu1 }
 0x171   : > { %2421 = vst.msk [vmem:[%s3535_s13 + $0xf4] sm:$0xf] %vm2359_vm0, %v2895_v37  ;;  %v2900_v45 = vpack.c.bf16 %v1625_v39, %v1625_v39  ;;  %v2980_v46 = vpack.c.bf16 %v1705_v40, %v1705_v40  ;;  %v1188_v47 = vadd.f32 %v3840_v61, %v3165_v43  ;;  %v1508_v48 = vadd.f32 %v3840_v61, %v3245_v44 }
 0x172   : > { %2501 = vst.msk [vmem:[%s3535_s13 + $0x234] sm:$0xf] %vm2359_vm0, %v2975_v38  ;;  %v1623_v49 = vmax.f32 %v1177_v41, 0.0  ;;  %v1703_v50 = vmax.f32 %v1497_v42, 0.0  ;;  %v1179_v51 = vpop.f32.mrf.mxu0  ;;  %v1499_v52 = vpop.f32.mrf.mxu1 }
 0x173   : > { %2426 = vst.msk [vmem:[%s3535_s13 + $0x108] sm:$0xf] %vm2359_vm0, %v2900_v45  ;;  %2506 = vst.msk [vmem:[%s3535_s13 + $0x248] sm:$0xf] %vm2359_vm0, %v2980_v46  ;;  %v1626_v53 = vmax.f32 %v1188_v47, 0.0  ;;  %v1706_v54 = vmax.f32 %v1508_v48, 0.0  ;;  %v1180_v55 = vadd.f32 %v3840_v61, %v1179_v51  ;;  %v1500_v56 = vadd.f32 %v3840_v61, %v1499_v52 }
 0x174   : > { %v2898_v57 = vpack.c.bf16 %v1623_v49, %v1623_v49  ;;  %v2978_v58 = vpack.c.bf16 %v1703_v50, %v1703_v50  ;;  %v3168_v59 = vpop.f32.mrf.mxu0  ;;  %v3248_v60 = vpop.f32.mrf.mxu1 }
 0x175   : > { %v2901_v62 = vpack.c.bf16 %v1626_v53, %v1626_v53  ;;  %v2981_v24 = vpack.c.bf16 %v1706_v54, %v1706_v54  ;;  %v1624_v63 = vmax.f32 %v1180_v55, 0.0  ;;  %v1704_v0 = vmax.f32 %v1500_v56, 0.0 }
 0x176   : > { %2424 = vst.msk [vmem:[%s3535_s13 + $0x100] sm:$0xf] %vm2359_vm0, %v2898_v57  ;;  %2504 = vst.msk [vmem:[%s3535_s13 + $0x240] sm:$0xf] %vm2359_vm0, %v2978_v58  ;;  %v1201_v1 = vadd.f32 %v3840_v61, %v3168_v59  ;;  %v1521_v2 = vadd.f32 %v3840_v61, %v3248_v60  ;;  %v1192_v3 = vpop.f32.mrf.mxu0  ;;  %v1512_v4 = vpop.f32.mrf.mxu1 }
 0x177   : > { %2427 = vst.msk [vmem:[%s3535_s13 + $0x10c] sm:$0xf] %vm2359_vm0, %v2901_v62  ;;  %2507 = vst.msk [vmem:[%s3535_s13 + $0x24c] sm:$0xf] %vm2359_vm0, %v2981_v24  ;;  %v2899_v5 = vpack.c.bf16 %v1624_v63, %v1624_v63  ;;  %v2979_v6 = vpack.c.bf16 %v1704_v0, %v1704_v0  ;;  %v1193_v7 = vadd.f32 %v3840_v61, %v1192_v3 }
 0x178   : > { %v1513_v8 = vadd.f32 %v3840_v61, %v1512_v4  ;;  %v1629_v9 = vmax.f32 %v1201_v1, 0.0  ;;  %v1709_v10 = vmax.f32 %v1521_v2, 0.0  ;;  %v3169_v11 = vpop.f32.mrf.mxu0  ;;  %v3249_v12 = vpop.f32.mrf.mxu1 }
 0x179   : > { %2425 = vst.msk [vmem:[%s3535_s13 + $0x104] sm:$0xf] %vm2359_vm0, %v2899_v5  ;;  %2505 = vst.msk [vmem:[%s3535_s13 + $0x244] sm:$0xf] %vm2359_vm0, %v2979_v6  ;;  %v1627_v13 = vmax.f32 %v1193_v7, 0.0  ;;  %v1204_v15 = vadd.f32 %v3840_v61, %v3169_v11  ;;  %v1524_v16 = vadd.f32 %v3840_v61, %v3249_v12 }
 0x17a   : > { %v1707_v14 = vmax.f32 %v1513_v8, 0.0  ;;  %v2904_v17 = vpack.c.bf16 %v1629_v9, %v1629_v9  ;;  %v2984_v18 = vpack.c.bf16 %v1709_v10, %v1709_v10  ;;  %v1195_v19 = vpop.f32.mrf.mxu0  ;;  %v1515_v20 = vpop.f32.mrf.mxu1 }
 0x17b   : > { %v2902_v21 = vpack.c.bf16 %v1627_v13, %v1627_v13  ;;  %v1630_v23 = vmax.f32 %v1204_v15, 0.0  ;;  %v1710_v25 = vmax.f32 %v1524_v16, 0.0  ;;  %v1196_v26 = vadd.f32 %v3840_v61, %v1195_v19 }
 0x17c   : > { %v2982_v22 = vpack.c.bf16 %v1707_v14, %v1707_v14  ;;  %2430 = vst.msk [vmem:[%s3535_s13 + $0x118] sm:$0xf] %vm2359_vm0, %v2904_v17  ;;  %2510 = vst.msk [vmem:[%s3535_s13 + $0x258] sm:$0xf] %vm2359_vm0, %v2984_v18  ;;  %v1516_v27 = vadd.f32 %v3840_v61, %v1515_v20  ;;  %v3172_v28 = vpop.f32.mrf.mxu0  ;;  %v3252_v29 = vpop.f32.mrf.mxu1 }
 0x17d   : > { %2428 = vst.msk [vmem:[%s3535_s13 + $0x110] sm:$0xf] %vm2359_vm0, %v2902_v21  ;;  %v2905_v30 = vpack.c.bf16 %v1630_v23, %v1630_v23  ;;  %v2985_v31 = vpack.c.bf16 %v1710_v25, %v1710_v25  ;;  %v1217_v32 = vadd.f32 %v3840_v61, %v3172_v28  ;;  %v1537_v33 = vadd.f32 %v3840_v61, %v3252_v29 }
 0x17e   : > { %2508 = vst.msk [vmem:[%s3535_s13 + $0x250] sm:$0xf] %vm2359_vm0, %v2982_v22  ;;  %v1628_v34 = vmax.f32 %v1196_v26, 0.0  ;;  %v1708_v35 = vmax.f32 %v1516_v27, 0.0  ;;  %v1208_v36 = vpop.f32.mrf.mxu0  ;;  %v1528_v37 = vpop.f32.mrf.mxu1 }
 0x17f   : > { %2431 = vst.msk [vmem:[%s3535_s13 + $0x11c] sm:$0xf] %vm2359_vm0, %v2905_v30  ;;  %2511 = vst.msk [vmem:[%s3535_s13 + $0x25c] sm:$0xf] %vm2359_vm0, %v2985_v31  ;;  %v1633_v38 = vmax.f32 %v1217_v32, 0.0  ;;  %v1713_v39 = vmax.f32 %v1537_v33, 0.0  ;;  %v1209_v40 = vadd.f32 %v3840_v61, %v1208_v36  ;;  %v1529_v41 = vadd.f32 %v3840_v61, %v1528_v37 }
 0x180   : > { %v2903_v42 = vpack.c.bf16 %v1628_v34, %v1628_v34  ;;  %v2983_v43 = vpack.c.bf16 %v1708_v35, %v1708_v35  ;;  %v3173_v44 = vpop.f32.mrf.mxu0  ;;  %v3253_v45 = vpop.f32.mrf.mxu1 }
 0x181   : > { %v2908_v46 = vpack.c.bf16 %v1633_v38, %v1633_v38  ;;  %v2988_v47 = vpack.c.bf16 %v1713_v39, %v1713_v39  ;;  %v1631_v48 = vmax.f32 %v1209_v40, 0.0  ;;  %v1711_v49 = vmax.f32 %v1529_v41, 0.0 }
 0x182   : > { %2429 = vst.msk [vmem:[%s3535_s13 + $0x114] sm:$0xf] %vm2359_vm0, %v2903_v42  ;;  %2509 = vst.msk [vmem:[%s3535_s13 + $0x254] sm:$0xf] %vm2359_vm0, %v2983_v43  ;;  %v1220_v50 = vadd.f32 %v3840_v61, %v3173_v44  ;;  %v1540_v51 = vadd.f32 %v3840_v61, %v3253_v45  ;;  %v1211_v52 = vpop.f32.mrf.mxu0  ;;  %v1531_v53 = vpop.f32.mrf.mxu1 }
 0x183   : > { %2434 = vst.msk [vmem:[%s3535_s13 + $0x128] sm:$0xf] %vm2359_vm0, %v2908_v46  ;;  %2514 = vst.msk [vmem:[%s3535_s13 + $0x268] sm:$0xf] %vm2359_vm0, %v2988_v47  ;;  %v2906_v54 = vpack.c.bf16 %v1631_v48, %v1631_v48  ;;  %v2986_v55 = vpack.c.bf16 %v1711_v49, %v1711_v49  ;;  %v1212_v56 = vadd.f32 %v3840_v61, %v1211_v52 }
 0x184   : > { %v1532_v57 = vadd.f32 %v3840_v61, %v1531_v53  ;;  %v1634_v58 = vmax.f32 %v1220_v50, 0.0  ;;  %v1714_v59 = vmax.f32 %v1540_v51, 0.0  ;;  %v3176_v60 = vpop.f32.mrf.mxu0  ;;  %v3256_v62 = vpop.f32.mrf.mxu1 }
 0x185   : > { %2432 = vst.msk [vmem:[%s3535_s13 + $0x120] sm:$0xf] %vm2359_vm0, %v2906_v54  ;;  %2512 = vst.msk [vmem:[%s3535_s13 + $0x260] sm:$0xf] %vm2359_vm0, %v2986_v55  ;;  %v1632_v24 = vmax.f32 %v1212_v56, 0.0  ;;  %v1233_v0 = vadd.f32 %v3840_v61, %v3176_v60  ;;  %v1553_v1 = vadd.f32 %v3840_v61, %v3256_v62 }
 0x186   : > { %v1712_v63 = vmax.f32 %v1532_v57, 0.0  ;;  %v2909_v2 = vpack.c.bf16 %v1634_v58, %v1634_v58  ;;  %v2989_v3 = vpack.c.bf16 %v1714_v59, %v1714_v59  ;;  %v1224_v4 = vpop.f32.mrf.mxu0  ;;  %v1544_v5 = vpop.f32.mrf.mxu1 }
 0x187   : > { %v2907_v6 = vpack.c.bf16 %v1632_v24, %v1632_v24  ;;  %v1637_v8 = vmax.f32 %v1233_v0, 0.0  ;;  %v1717_v9 = vmax.f32 %v1553_v1, 0.0  ;;  %v1225_v10 = vadd.f32 %v3840_v61, %v1224_v4 }
 0x188   : > { %v2987_v7 = vpack.c.bf16 %v1712_v63, %v1712_v63  ;;  %2435 = vst.msk [vmem:[%s3535_s13 + $0x12c] sm:$0xf] %vm2359_vm0, %v2909_v2  ;;  %2515 = vst.msk [vmem:[%s3535_s13 + $0x26c] sm:$0xf] %vm2359_vm0, %v2989_v3  ;;  %v1545_v11 = vadd.f32 %v3840_v61, %v1544_v5  ;;  %v3177_v12 = vpop.f32.mrf.mxu0  ;;  %v3257_v13 = vpop.f32.mrf.mxu1 }
 0x189   : > { %2433 = vst.msk [vmem:[%s3535_s13 + $0x124] sm:$0xf] %vm2359_vm0, %v2907_v6  ;;  %v2912_v14 = vpack.c.bf16 %v1637_v8, %v1637_v8  ;;  %v2992_v15 = vpack.c.bf16 %v1717_v9, %v1717_v9  ;;  %v1236_v16 = vadd.f32 %v3840_v61, %v3177_v12  ;;  %v1556_v17 = vadd.f32 %v3840_v61, %v3257_v13 }
 0x18a   : > { %2513 = vst.msk [vmem:[%s3535_s13 + $0x264] sm:$0xf] %vm2359_vm0, %v2987_v7  ;;  %v1635_v18 = vmax.f32 %v1225_v10, 0.0  ;;  %v1715_v19 = vmax.f32 %v1545_v11, 0.0  ;;  %v1227_v20 = vpop.f32.mrf.mxu0  ;;  %v1547_v21 = vpop.f32.mrf.mxu1 }
 0x18b   : > { %2438 = vst.msk [vmem:[%s3535_s13 + $0x138] sm:$0xf] %vm2359_vm0, %v2912_v14  ;;  %2518 = vst.msk [vmem:[%s3535_s13 + $0x278] sm:$0xf] %vm2359_vm0, %v2992_v15  ;;  %v1638_v22 = vmax.f32 %v1236_v16, 0.0  ;;  %v1718_v23 = vmax.f32 %v1556_v17, 0.0  ;;  %v1228_v25 = vadd.f32 %v3840_v61, %v1227_v20  ;;  %v1548_v26 = vadd.f32 %v3840_v61, %v1547_v21 }
 0x18c   : > { %v2910_v27 = vpack.c.bf16 %v1635_v18, %v1635_v18  ;;  %v2990_v28 = vpack.c.bf16 %v1715_v19, %v1715_v19 }
 0x18d   : > { %v2913_v29 = vpack.c.bf16 %v1638_v22, %v1638_v22  ;;  %v2993_v30 = vpack.c.bf16 %v1718_v23, %v1718_v23  ;;  %v1636_v31 = vmax.f32 %v1228_v25, 0.0  ;;  %v1716_v32 = vmax.f32 %v1548_v26, 0.0 }
 0x18e   : > { %2436 = vst.msk [vmem:[%s3535_s13 + $0x130] sm:$0xf] %vm2359_vm0, %v2910_v27  ;;  %2516 = vst.msk [vmem:[%s3535_s13 + $0x270] sm:$0xf] %vm2359_vm0, %v2990_v28 }
 0x18f   : > { %2439 = vst.msk [vmem:[%s3535_s13 + $0x13c] sm:$0xf] %vm2359_vm0, %v2913_v29  ;;  %2519 = vst.msk [vmem:[%s3535_s13 + $0x27c] sm:$0xf] %vm2359_vm0, %v2993_v30  ;;  %v2911_v33 = vpack.c.bf16 %v1636_v31, %v1636_v31  ;;  %v2991_v34 = vpack.c.bf16 %v1716_v32, %v1716_v32 }
 0x191   : > { %2437 = vst.msk [vmem:[%s3535_s13 + $0x134] sm:$0xf] %vm2359_vm0, %v2911_v33  ;;  %2517 = vst.msk [vmem:[%s3535_s13 + $0x274] sm:$0xf] %vm2359_vm0, %v2991_v34 }
 0x192 PF: > { %s13_s12 = sadd.s32 1, %s3377_s12  }
 0x193   : > { %p10_p4 = scmp.ge.s32.totalorder %s13_s12, 4  }
 0x195   :  { %12 = sbr.rel (!%p10_p4) target bundleno = 1 (0x1), region = 62 }

// kernel: forward.5
= control target key start
LH: loop header
LB: loop body
LE: loop exit
PB: predicated region body
PF: predicated region fallthrough
CT: control target
= control target key end

     0   :  { %11 = vsyncpa [#allocation6], 0  ;;  %s5584_s0 = inlined_call_operand.vmem [shape: f32[16,1024], index: 0, kind: input, shape index: {}]   ;;  %s5585_s1 = inlined_call_operand.vmem [shape: bf16[256,1024], index: 1, kind: input, shape index: {}]   ;;  %s5586_s2 = inlined_call_operand.vmem [shape: bf16[512,1024], index: 2, kind: input, shape index: {}]   ;;  %s5587_s3 = inlined_call_operand.vmem [shape: f32[1,1024], index: 3, kind: input, shape index: {}]   ;;  %s5588_s4 = inlined_call_operand.vmem [shape: bf16[256,128], index: 4, kind: input, shape index: {}]   ;;  %s5589_s5 = inlined_call_operand.vmem [shape: f32[1,128], index: 5, kind: input, shape index: {}]   ;;  %s5590_s6 = inlined_call_operand.hbm [shape: f32[2,1,128], index: 6, kind: output, shape index: {}]  }
   0x1   :  { %13 = vsyncpa [#allocation6 + $0x1], 0  ;;  %s4163_s21 = smov 0   ;;  %s4165_s22 = smov 0  }
   0x2   :  { %s4167_s23 = smov 0   ;;  %s4169_s24 = smov 0  }
   0x3 LB: > { %s4184_s25 = sadd.s32 4294967295, %s4124_s24   ;;  %s3494_s26 = sadd.s32 4294967294, %s4124_s24   ;;  %s4124_s24 = sphi %s4169_s24, %s5596_s24   ;;  %s4120_s23 = sphi %s4167_s23, %s5595_s23   ;;  %s4116_s22 = sphi %s4165_s22, %s5594_s22   ;;  %s4112_s21 = sphi %s4163_s21, %s5593_s21  }
   0x4   : > { %s4188_s27 = sadd.s32 1, %s4124_s24   ;;  %s157_s28 = sadd.s32 1, %s4120_s23 }
   0x5   : > { %s154_s29 = ssub.s32 %s4124_s24, %s4188_s27  ;;  %p167_p0 = scmp.ne.s32.totalorder %s4120_s23, %s4116_s22 }
   0x6   : > { %p155_p1 = scmp.eq.s32.totalorder %s154_s29, 0  ;;  %p168_p2 = scmp.eq.s32.totalorder %s4184_s25, 1 }
   0x7   : > { %p173_p3 = scmp.ne.s32.totalorder %s4116_s22, %s4112_s21  ;;  %p174_p4 = scmp.eq.s32.totalorder %s3494_s26, 1 }
   0x8   : > { %s4199_s30 = scalar_select %p155_p1, %s4120_s23, %s157_s28  }
   0x9   : > { %p4201_p5 = por %p168_p2, %p167_p0  ;;  %p4205_p6 = por %p174_p4, %p173_p3 }
   0xa   : > { %p3497_p7 = scmp.ge.s32.totalorder %s4124_s24, 1  ;;  %p215_p8 = scmp.lt.s32.totalorder %s4124_s24, 3 }
   0xc   : > { %p216_p9 = pnand %p3497_p7, %p215_p8 }
   0xd   : > { %s242_s9 = sand.u32 (!%p216_p9), 1, %s4116_s22   ;;  %p244_p10 = scmp.lt.s32.totalorder (!%p216_p9), %s4184_s25, 1 }
   0xe   : > { %219 = sbr.rel (%p216_p9) target bundleno = 1075 (0x433), region = 44  ;;  %s4221_s15 = scalar_lea.vmem (!%p216_p9), [#allocation5], %s242_s9 }
   0xf   : > { %p3500_p11 = scmp.ne.s32.totalorder (!%p216_p9), %s4184_s25, 0 }
  0x13   : > { %s245_s10 = scalar_select %p244_p10, %s4184_s25, 1 }
  0x14   : > { %253 = sbr.rel (%p3500_p11) target bundleno = 30 (0x1e), region = 48 }
  0x15   : > { %s3917_s11 = sshll.u32 %s245_s10, 6 }
  0x16   : > { %s4217_s14 = scalar_lea.vmem %s5584_s0, %s3917_s11 }
  0x19   : > { %v4126_v0 = vmov 0.0  }
  0x1a   : > { %254 = vst [vmem:[#allocation2 + $0x10] sm:$0xff] %v4126_v0  ;;  %255 = vst [vmem:[#allocation2] sm:$0xff] %v4126_v0 }
  0x1b   : > { %256 = vst [vmem:[#allocation2 + $0x18] sm:$0xff] %v4126_v0  ;;  %257 = vst [vmem:[#allocation2 + $0x8] sm:$0xff] %v4126_v0 }
  0x1c   : > { %258 = vst [vmem:[#allocation3] sm:$0xff] %v4126_v0  ;;  %259 = vst [vmem:[#allocation3 + $0x8] sm:$0xff] %v4126_v0 }
  0x1d   : > { %260 = vst [vmem:[#allocation4] sm:$0xff] %v4126_v0  ;;  %261 = vst [vmem:[#allocation4 + $0x8] sm:$0xff] %v4126_v0 }
  0x1e PF: > { %v330_v1 = vld [vmem:[%s5585_s1 + $0x1c0] sm:$0xff]  ;;  %v331_v3 = vld [vmem:[%s5585_s1 + $0x1c8] sm:$0xff]  ;;  %s3914_s13 = sshll.u32 %s4184_s25, 4  ;;  %s3439_s16 = sshll.u32 %s4221_s15, 4  ;;  %s3440_s16 = int_to_ptr.vmem [resolvable:$true] %s3439_s16 }
  0x1f   : > { %v334_v2 = vld [vmem:[%s5585_s1 + $0x1e0] sm:$0xff]  ;;  %v335_v5 = vld [vmem:[%s5585_s1 + $0x1e8] sm:$0xff]  ;;  %s5546_s19 = scalar_lea.hbm %s5590_s6, %s3914_s13  ;;  %s3427_s20 = scalar_lea.sflag [#allocation6], %s242_s9 }
  0x20   : > { %v3558_v4 = vcombine.high %v330_v1, %v334_v2  ;;  %v3557_v6 = vcombine.low %v330_v1, %v334_v2  ;;  %v322_v7 = vld [vmem:[%s5585_s1 + $0x180] sm:$0xff]  ;;  %v3560_v9 = vcombine.high %v331_v3, %v335_v5  ;;  %v3559_v10 = vcombine.low %v331_v3, %v335_v5  ;;  %v323_v12 = vld [vmem:[%s5585_s1 + $0x188] sm:$0xff]  ;;  %s4127_s26 = smov [#allocation5]  }
  0x21   : > { %v326_v8 = vld [vmem:[%s5585_s1 + $0x1a0] sm:$0xff]  ;;  %v327_v13 = vld [vmem:[%s5585_s1 + $0x1a8] sm:$0xff]  ;;  %s4068_s28 = sshll.u32 %s4127_s26, 4  ;;  %s4069_s28 = int_to_ptr.vmem [resolvable:$false] %s4068_s28 }
  0x22   : > { %v3550_v11 = vcombine.high %v322_v7, %v326_v8  ;;  %v314_v14 = vld [vmem:[%s5585_s1 + $0x140] sm:$0xff]  ;;  %1042 = vmatprep.subr.bf16.mxu0 %v3558_v4  ;;  %v3552_v15 = vcombine.high %v323_v12, %v327_v13  ;;  %v315_v17 = vld [vmem:[%s5585_s1 + $0x148] sm:$0xff]  ;;  %1083 = vmatprep.subr.bf16.mxu1 %v3560_v9  ;;  %v3549_v19 = vcombine.low %v322_v7, %v326_v8  ;;  %s4070_s25 = scalar_lea.vmem %s4069_s28, 32  ;;  %p4071_p1 = scmp.lt.s32.totalorder %s3440_s16, %s4069_s28 }
  0x23   : > { %v318_v16 = vld [vmem:[%s5585_s1 + $0x160] sm:$0xff]  ;;  %v319_v18 = vld [vmem:[%s5585_s1 + $0x168] sm:$0xff]  ;;  %1043 = vmatpush1.bf16.msra.mxu0 %v3557_v6  ;;  %1084 = vmatpush1.bf16.msra.mxu1 %v3559_v10  ;;  %v3551_v20 = vcombine.low %v323_v12, %v327_v13 }
  0x24   : > { %1044 = vmatprep.subr.bf16.mxu0 %v3550_v11  ;;  %v3542_v21 = vcombine.high %v314_v14, %v318_v16  ;;  %1085 = vmatprep.subr.bf16.mxu1 %v3552_v15  ;;  %v3544_v22 = vcombine.high %v315_v17, %v319_v18  ;;  %v306_v23 = vld [vmem:[%s5585_s1 + $0x100] sm:$0xff]  ;;  %v307_v25 = vld [vmem:[%s5585_s1 + $0x108] sm:$0xff]  ;;  %v3541_v27 = vcombine.low %v314_v14, %v318_v16 }
  0x25   : > { %v310_v24 = vld [vmem:[%s5585_s1 + $0x120] sm:$0xff]  ;;  %v311_v26 = vld [vmem:[%s5585_s1 + $0x128] sm:$0xff]  ;;  %v3543_v28 = vcombine.low %v315_v17, %v319_v18 }
  0x26   : > { %v3534_v29 = vcombine.high %v306_v23, %v310_v24  ;;  %v3536_v30 = vcombine.high %v307_v25, %v311_v26  ;;  %v298_v31 = vld [vmem:[%s5585_s1 + $0xc0] sm:$0xff]  ;;  %v299_v33 = vld [vmem:[%s5585_s1 + $0xc8] sm:$0xff]  ;;  %v3533_v35 = vcombine.low %v306_v23, %v310_v24  ;;  %v3535_v36 = vcombine.low %v307_v25, %v311_v26 }
  0x27   : > { %1045 = vmatpush1.bf16.msra.mxu0 %v3549_v19  ;;  %1086 = vmatpush1.bf16.msra.mxu1 %v3551_v20  ;;  %v302_v32 = vld [vmem:[%s5585_s1 + $0xe0] sm:$0xff]  ;;  %v303_v34 = vld [vmem:[%s5585_s1 + $0xe8] sm:$0xff] }
  0x28   : > { %1046 = vmatprep.subr.bf16.mxu0 %v3542_v21  ;;  %1087 = vmatprep.subr.bf16.mxu1 %v3544_v22  ;;  %v3526_v37 = vcombine.high %v298_v31, %v302_v32  ;;  %v3528_v38 = vcombine.high %v299_v33, %v303_v34  ;;  %v290_v39 = vld [vmem:[%s5585_s1 + $0x80] sm:$0xff]  ;;  %v291_v41 = vld [vmem:[%s5585_s1 + $0x88] sm:$0xff]  ;;  %v3525_v43 = vcombine.low %v298_v31, %v302_v32 }
  0x29   : > { %v294_v40 = vld [vmem:[%s5585_s1 + $0xa0] sm:$0xff]  ;;  %v295_v42 = vld [vmem:[%s5585_s1 + $0xa8] sm:$0xff]  ;;  %v3527_v44 = vcombine.low %v299_v33, %v303_v34 }
  0x2a   : > { %v3518_v45 = vcombine.high %v290_v39, %v294_v40  ;;  %v3520_v46 = vcombine.high %v291_v41, %v295_v42  ;;  %v282_v47 = vld [vmem:[%s5585_s1 + $0x40] sm:$0xff]  ;;  %v283_v49 = vld [vmem:[%s5585_s1 + $0x48] sm:$0xff]  ;;  %v3517_v51 = vcombine.low %v290_v39, %v294_v40  ;;  %v3519_v52 = vcombine.low %v291_v41, %v295_v42 }
  0x2b   : > { %1047 = vmatpush1.bf16.msra.mxu0 %v3541_v27  ;;  %1088 = vmatpush1.bf16.msra.mxu1 %v3543_v28  ;;  %v286_v48 = vld [vmem:[%s5585_s1 + $0x60] sm:$0xff]  ;;  %v287_v50 = vld [vmem:[%s5585_s1 + $0x68] sm:$0xff] }
  0x2c   : > { %1048 = vmatprep.subr.bf16.mxu0 %v3534_v29  ;;  %1089 = vmatprep.subr.bf16.mxu1 %v3536_v30  ;;  %v3510_v53 = vcombine.high %v282_v47, %v286_v48  ;;  %v263_v54 = vld [vmem:[#allocation2] sm:$0xff]  ;;  %v3512_v55 = vcombine.high %v283_v49, %v287_v50  ;;  %v275_v59 = vld [vmem:[%s5585_s1 + $0x8] sm:$0xff]  ;;  %v3509_v61 = vcombine.low %v282_v47, %v286_v48 }
  0x2d   : > { %v274_v56 = vld [vmem:[%s5585_s1] sm:$0xff]  ;;  %v4314_v58 = vpack.c.bf16 %v263_v54, %v263_v54  ;;  %v279_v60 = vld [vmem:[%s5585_s1 + $0x28] sm:$0xff]  ;;  %v3511_v62 = vcombine.low %v283_v49, %v287_v50 }
  0x2e   : > { %v278_v57 = vld [vmem:[%s5585_s1 + $0x20] sm:$0xff]  ;;  %v3504_v0 = vcombine.high %v275_v59, %v279_v60  ;;  %v395_v3 = vld [vmem:[%s5585_s1 + $0x3c8] sm:$0xff]  ;;  %v3503_v6 = vcombine.low %v275_v59, %v279_v60 }
  0x2f   : > { %1049 = vmatpush1.bf16.msra.mxu0 %v3533_v35  ;;  %1090 = vmatpush1.bf16.msra.mxu1 %v3535_v36  ;;  %v3502_v63 = vcombine.high %v274_v56, %v278_v57  ;;  %v394_v1 = vld [vmem:[%s5585_s1 + $0x3c0] sm:$0xff]  ;;  %v399_v4 = vld [vmem:[%s5585_s1 + $0x3e8] sm:$0xff]  ;;  %v3501_v5 = vcombine.low %v274_v56, %v278_v57 }
  0x30   : > { %1050 = vmatprep.subr.bf16.mxu0 %v3526_v37  ;;  %1091 = vmatprep.subr.bf16.mxu1 %v3528_v38  ;;  %v398_v2 = vld [vmem:[%s5585_s1 + $0x3e0] sm:$0xff]  ;;  %v3624_v8 = vcombine.high %v395_v3, %v399_v4  ;;  %v387_v11 = vld [vmem:[%s5585_s1 + $0x388] sm:$0xff]  ;;  %v3623_v14 = vcombine.low %v395_v3, %v399_v4  ;;  %v336_v3 = vld [vmem:[%s5585_s1 + $0x1f0] sm:$0xff] }
  0x31   : > { %1074 = vmatprep.mubr.bf16.mxu0 %v4314_v58  ;;  %1115 = vmatprep.mubr.bf16.mxu1 %v4314_v58  ;;  %v3622_v7 = vcombine.high %v394_v1, %v398_v2  ;;  %v386_v9 = vld [vmem:[%s5585_s1 + $0x380] sm:$0xff]  ;;  %v391_v12 = vld [vmem:[%s5585_s1 + $0x3a8] sm:$0xff]  ;;  %v3621_v13 = vcombine.low %v394_v1, %v398_v2  ;;  %v332_v2 = vld [vmem:[%s5585_s1 + $0x1d0] sm:$0xff] }
  0x32   : > { %v390_v10 = vld [vmem:[%s5585_s1 + $0x3a0] sm:$0xff]  ;;  %v3616_v16 = vcombine.high %v387_v11, %v391_v12  ;;  %v379_v19 = vld [vmem:[%s5585_s1 + $0x348] sm:$0xff]  ;;  %v3615_v22 = vcombine.low %v387_v11, %v391_v12  ;;  %v333_v4 = vld [vmem:[%s5585_s1 + $0x1d8] sm:$0xff] }
  0x33   : > { %1051 = vmatpush1.bf16.msra.mxu0 %v3525_v43  ;;  %1092 = vmatpush1.bf16.msra.mxu1 %v3527_v44  ;;  %v3614_v15 = vcombine.high %v386_v9, %v390_v10  ;;  %v378_v17 = vld [vmem:[%s5585_s1 + $0x340] sm:$0xff]  ;;  %v383_v20 = vld [vmem:[%s5585_s1 + $0x368] sm:$0xff]  ;;  %v3613_v21 = vcombine.low %v386_v9, %v390_v10  ;;  %v3562_v9 = vcombine.high %v332_v2, %v336_v3  ;;  %v324_v11 = vld [vmem:[%s5585_s1 + $0x190] sm:$0xff] }
  0x34   : > { %1052 = vmatprep.subr.bf16.mxu0 %v3518_v45  ;;  %1093 = vmatprep.subr.bf16.mxu1 %v3520_v46  ;;  %v382_v18 = vld [vmem:[%s5585_s1 + $0x360] sm:$0xff]  ;;  %v3608_v24 = vcombine.high %v379_v19, %v383_v20  ;;  %v371_v27 = vld [vmem:[%s5585_s1 + $0x308] sm:$0xff]  ;;  %v3607_v30 = vcombine.low %v379_v19, %v383_v20  ;;  %v328_v12 = vld [vmem:[%s5585_s1 + $0x1b0] sm:$0xff] }
  0x35   : > { %v3606_v23 = vcombine.high %v378_v17, %v382_v18  ;;  %v370_v25 = vld [vmem:[%s5585_s1 + $0x300] sm:$0xff]  ;;  %v375_v28 = vld [vmem:[%s5585_s1 + $0x328] sm:$0xff]  ;;  %v3605_v29 = vcombine.low %v378_v17, %v382_v18  ;;  %v3554_v18 = vcombine.high %v324_v11, %v328_v12  ;;  %v316_v20 = vld [vmem:[%s5585_s1 + $0x150] sm:$0xff] }
  0x36   : > { %v374_v26 = vld [vmem:[%s5585_s1 + $0x320] sm:$0xff]  ;;  %v3600_v32 = vcombine.high %v371_v27, %v375_v28  ;;  %v363_v35 = vld [vmem:[%s5585_s1 + $0x2c8] sm:$0xff]  ;;  %v3599_v40 = vcombine.low %v371_v27, %v375_v28  ;;  %v308_v28 = vld [vmem:[%s5585_s1 + $0x110] sm:$0xff] }
  0x37   : > { %1053 = vmatpush1.bf16.msra.mxu0 %v3517_v51  ;;  %1094 = vmatpush1.bf16.msra.mxu1 %v3519_v52  ;;  %v3598_v31 = vcombine.high %v370_v25, %v374_v26  ;;  %v362_v33 = vld [vmem:[%s5585_s1 + $0x2c0] sm:$0xff]  ;;  %v367_v36 = vld [vmem:[%s5585_s1 + $0x2e8] sm:$0xff]  ;;  %v3597_v37 = vcombine.low %v370_v25, %v374_v26 }
  0x38   : > { %1054 = vmatprep.subr.bf16.mxu0 %v3510_v53  ;;  %1095 = vmatprep.subr.bf16.mxu1 %v3512_v55  ;;  %v366_v34 = vld [vmem:[%s5585_s1 + $0x2e0] sm:$0xff]  ;;  %v355_v42 = vld [vmem:[%s5585_s1 + $0x288] sm:$0xff]  ;;  %v3592_v44 = vcombine.high %v363_v35, %v367_v36  ;;  %v3591_v48 = vcombine.low %v363_v35, %v367_v36  ;;  %v300_v36 = vld [vmem:[%s5585_s1 + $0xd0] sm:$0xff] }
  0x39   : > { %v354_v38 = vld [vmem:[%s5585_s1 + $0x280] sm:$0xff]  ;;  %v3590_v41 = vcombine.high %v362_v33, %v366_v34  ;;  %v359_v43 = vld [vmem:[%s5585_s1 + $0x2a8] sm:$0xff]  ;;  %v3589_v45 = vcombine.low %v362_v33, %v366_v34 }
  0x3a   : > { %v358_v39 = vld [vmem:[%s5585_s1 + $0x2a0] sm:$0xff]  ;;  %v347_v50 = vld [vmem:[%s5585_s1 + $0x248] sm:$0xff]  ;;  %v3584_v52 = vcombine.high %v355_v42, %v359_v43  ;;  %v3583_v54 = vcombine.low %v355_v42, %v359_v43  ;;  %v292_v43 = vld [vmem:[%s5585_s1 + $0x90] sm:$0xff] }
  0x3b   : > { %1055 = vmatpush1.bf16.msra.mxu0 %v3509_v61  ;;  %1096 = vmatpush1.bf16.msra.mxu1 %v3511_v62  ;;  %v346_v46 = vld [vmem:[%s5585_s1 + $0x240] sm:$0xff]  ;;  %v3582_v49 = vcombine.high %v354_v38, %v358_v39  ;;  %v351_v51 = vld [vmem:[%s5585_s1 + $0x268] sm:$0xff]  ;;  %v3581_v53 = vcombine.low %v354_v38, %v358_v39  ;;  %v305_v38 = vld [vmem:[%s5585_s1 + $0xf8] sm:$0xff] }
  0x3c   : > { %1056 = vmatprep.subr.bf16.mxu0 %v3502_v63  ;;  %1097 = vmatprep.subr.bf16.mxu1 %v3504_v0  ;;  %v350_v47 = vld [vmem:[%s5585_s1 + $0x260] sm:$0xff]  ;;  %v3576_v56 = vcombine.high %v347_v50, %v351_v51  ;;  %v339_v60 = vld [vmem:[%s5585_s1 + $0x208] sm:$0xff]  ;;  %v3575_v63 = vcombine.low %v347_v50, %v351_v51  ;;  %v284_v51 = vld [vmem:[%s5585_s1 + $0x50] sm:$0xff] }
  0x3d   : > { %v3574_v55 = vcombine.high %v346_v46, %v350_v47  ;;  %v338_v57 = vld [vmem:[%s5585_s1 + $0x200] sm:$0xff]  ;;  %v343_v61 = vld [vmem:[%s5585_s1 + $0x228] sm:$0xff]  ;;  %v3573_v62 = vcombine.low %v346_v46, %v350_v47  ;;  %v297_v46 = vld [vmem:[%s5585_s1 + $0xb8] sm:$0xff] }
  0x3e   : > { %v342_v59 = vld [vmem:[%s5585_s1 + $0x220] sm:$0xff]  ;;  %v3568_v1 = vcombine.high %v339_v60, %v343_v61 }
  0x3f   : > { %1057 = vmatpush1.bf16.msra.mxu0 %v3501_v5  ;;  %1098 = vmatpush1.bf16.msra.mxu1 %v3503_v6  ;;  %v3566_v0 = vcombine.high %v338_v57, %v342_v59  ;;  %v337_v5 = vld [vmem:[%s5585_s1 + $0x1f8] sm:$0xff]  ;;  %v3565_v6 = vcombine.low %v338_v57, %v342_v59 }
  0x40   : > { %1058 = vmatprep.subr.bf16.mxu0 %v3622_v7  ;;  %1099 = vmatprep.subr.bf16.mxu1 %v3624_v8  ;;  %v262_v7 = vld [vmem:[#allocation2 + $0x10] sm:$0xff]  ;;  %v3567_v8 = vcombine.low %v339_v60, %v343_v61  ;;  %v3564_v10 = vcombine.high %v333_v4, %v337_v5  ;;  %v3563_v17 = vcombine.low %v333_v4, %v337_v5 }
  0x41   : > { %v276_v60 = vld [vmem:[%s5585_s1 + $0x10] sm:$0xff] }
  0x42   : > { %v280_v61 = vld [vmem:[%s5585_s1 + $0x30] sm:$0xff] }
  0x43   : > { %1059 = vmatpush2.bf16.msra.mxu0 %v3621_v13  ;;  %1100 = vmatpush2.bf16.msra.mxu1 %v3623_v14  ;;  %v4438_v13 = vpack.c.bf16 %v262_v7, %v262_v7  ;;  %v325_v14 = vld [vmem:[%s5585_s1 + $0x198] sm:$0xff]  ;;  %v396_v4 = vld [vmem:[%s5585_s1 + $0x3d0] sm:$0xff] }
  0x44   : > { %1060 = vmatprep.subr.bf16.mxu0 %v3614_v15  ;;  %1101 = vmatprep.subr.bf16.mxu1 %v3616_v16  ;;  %v329_v15 = vld [vmem:[%s5585_s1 + $0x1b8] sm:$0xff]  ;;  %v3561_v16 = vcombine.low %v332_v2, %v336_v3  ;;  %v3506_v2 = vcombine.high %v276_v60, %v280_v61  ;;  %v400_v5 = vld [vmem:[%s5585_s1 + $0x3f0] sm:$0xff] }
  0x45   : > { %v3556_v19 = vcombine.high %v325_v14, %v329_v15  ;;  %v3555_v25 = vcombine.low %v325_v14, %v329_v15  ;;  %v401_v7 = vld [vmem:[%s5585_s1 + $0x3f8] sm:$0xff]  ;;  %v392_v14 = vld [vmem:[%s5585_s1 + $0x3b0] sm:$0xff] }
  0x46   : > { %v389_v15 = vld [vmem:[%s5585_s1 + $0x398] sm:$0xff] }
  0x47   : > { %1061 = vmatpush2.bf16.msra.mxu0 %v3613_v21  ;;  %1102 = vmatpush2.bf16.msra.mxu1 %v3615_v22  ;;  %v320_v21 = vld [vmem:[%s5585_s1 + $0x170] sm:$0xff]  ;;  %v317_v22 = vld [vmem:[%s5585_s1 + $0x158] sm:$0xff] }
  0x48   : > { %1062 = vmatprep.subr.bf16.mxu0 %v3606_v23  ;;  %1103 = vmatprep.subr.bf16.mxu1 %v3608_v24  ;;  %v321_v23 = vld [vmem:[%s5585_s1 + $0x178] sm:$0xff]  ;;  %v3553_v24 = vcombine.low %v324_v11, %v328_v12  ;;  %v3546_v26 = vcombine.high %v316_v20, %v320_v21  ;;  %v388_v12 = vld [vmem:[%s5585_s1 + $0x390] sm:$0xff] }
  0x49   : > { %v3548_v27 = vcombine.high %v317_v22, %v321_v23  ;;  %v3547_v33 = vcombine.low %v317_v22, %v321_v23  ;;  %v384_v22 = vld [vmem:[%s5585_s1 + $0x370] sm:$0xff]  ;;  %v381_v23 = vld [vmem:[%s5585_s1 + $0x358] sm:$0xff] }
  0x4b   : > { %1063 = vmatpush2.bf16.msra.mxu0 %v3605_v29  ;;  %1104 = vmatpush2.bf16.msra.mxu1 %v3607_v30  ;;  %v312_v29 = vld [vmem:[%s5585_s1 + $0x130] sm:$0xff]  ;;  %v309_v30 = vld [vmem:[%s5585_s1 + $0x118] sm:$0xff] }
  0x4c   : > { %1064 = vmatprep.subr.bf16.mxu0 %v3598_v31  ;;  %1105 = vmatprep.subr.bf16.mxu1 %v3600_v32  ;;  %v313_v31 = vld [vmem:[%s5585_s1 + $0x138] sm:$0xff]  ;;  %v3545_v32 = vcombine.low %v316_v20, %v320_v21  ;;  %v3538_v34 = vcombine.high %v308_v28, %v312_v29  ;;  %v3537_v39 = vcombine.low %v308_v28, %v312_v29  ;;  %v380_v21 = vld [vmem:[%s5585_s1 + $0x350] sm:$0xff] }
  0x4d   : > { %v3540_v35 = vcombine.high %v309_v30, %v313_v31  ;;  %v372_v29 = vld [vmem:[%s5585_s1 + $0x310] sm:$0xff] }
  0x4f   : > { %1065 = vmatpush2.bf16.msra.mxu0 %v3597_v37  ;;  %1106 = vmatpush2.bf16.msra.mxu1 %v3599_v40  ;;  %v304_v37 = vld [vmem:[%s5585_s1 + $0xf0] sm:$0xff]  ;;  %v3539_v40 = vcombine.low %v309_v30, %v313_v31  ;;  %v373_v31 = vld [vmem:[%s5585_s1 + $0x318] sm:$0xff] }
  0x50   : > { %1066 = vmatprep.subr.bf16.mxu0 %v3590_v41  ;;  %1107 = vmatprep.subr.bf16.mxu1 %v3592_v44  ;;  %v3530_v41 = vcombine.high %v300_v36, %v304_v37  ;;  %v296_v44 = vld [vmem:[%s5585_s1 + $0xb0] sm:$0xff]  ;;  %v3529_v47 = vcombine.low %v300_v36, %v304_v37 }
  0x51   : > { %v376_v30 = vld [vmem:[%s5585_s1 + $0x330] sm:$0xff] }
  0x52   : > { %v364_v37 = vld [vmem:[%s5585_s1 + $0x2d0] sm:$0xff] }
  0x53   : > { %1067 = vmatpush2.bf16.msra.mxu0 %v3589_v45  ;;  %1108 = vmatpush2.bf16.msra.mxu1 %v3591_v48  ;;  %v293_v45 = vld [vmem:[%s5585_s1 + $0x98] sm:$0xff] }
  0x54   : > { %1068 = vmatprep.subr.bf16.mxu0 %v3582_v49  ;;  %1109 = vmatprep.subr.bf16.mxu1 %v3584_v52  ;;  %v3522_v49 = vcombine.high %v292_v43, %v296_v44  ;;  %v3524_v50 = vcombine.high %v293_v45, %v297_v46  ;;  %v288_v52 = vld [vmem:[%s5585_s1 + $0x70] sm:$0xff] }
  0x55   : > { %v3514_v57 = vcombine.high %v284_v51, %v288_v52 }
  0x57   : > { %1069 = vmatpush2.bf16.msra.mxu0 %v3581_v53  ;;  %1110 = vmatpush2.bf16.msra.mxu1 %v3583_v54  ;;  %v285_v53 = vld [vmem:[%s5585_s1 + $0x58] sm:$0xff] }
  0x58   : > { %1070 = vmatprep.subr.bf16.mxu0 %v3574_v55  ;;  %1111 = vmatprep.subr.bf16.mxu1 %v3576_v56  ;;  %v289_v54 = vld [vmem:[%s5585_s1 + $0x78] sm:$0xff]  ;;  %v3521_v55 = vcombine.low %v292_v43, %v296_v44  ;;  %v3523_v56 = vcombine.low %v293_v45, %v297_v46  ;;  %v356_v44 = vld [vmem:[%s5585_s1 + $0x290] sm:$0xff] }
  0x59   : > { %v3516_v59 = vcombine.high %v285_v53, %v289_v54  ;;  %v360_v45 = vld [vmem:[%s5585_s1 + $0x2b0] sm:$0xff]  ;;  %v357_v46 = vld [vmem:[%s5585_s1 + $0x298] sm:$0xff] }
  0x5b   : > { %1071 = vmatpush2.bf16.msra.mxu0 %v3573_v62  ;;  %1112 = vmatpush2.bf16.msra.mxu1 %v3575_v63  ;;  %v277_v62 = vld [vmem:[%s5585_s1 + $0x18] sm:$0xff] }
  0x5c   : > { %1072 = vmatprep.subr.bf16.mxu0 %v3566_v0  ;;  %1113 = vmatprep.subr.bf16.mxu1 %v3568_v1  ;;  %v281_v63 = vld [vmem:[%s5585_s1 + $0x38] sm:$0xff]  ;;  %v3513_v0 = vcombine.low %v284_v51, %v288_v52  ;;  %v3515_v1 = vcombine.low %v285_v53, %v289_v54  ;;  %v348_v52 = vld [vmem:[%s5585_s1 + $0x250] sm:$0xff] }
  0x5d   : > { %v3508_v3 = vcombine.high %v277_v62, %v281_v63  ;;  %v352_v53 = vld [vmem:[%s5585_s1 + $0x270] sm:$0xff]  ;;  %v349_v54 = vld [vmem:[%s5585_s1 + $0x258] sm:$0xff] }
  0x5f   : > { %1073 = vmatpush2.bf16.msra.mxu0 %v3565_v6  ;;  %1114 = vmatpush2.bf16.msra.mxu1 %v3567_v8  ;;  %v397_v6 = vld [vmem:[%s5585_s1 + $0x3d8] sm:$0xff]  ;;  %v3505_v8 = vcombine.low %v276_v60, %v280_v61  ;;  %v340_v61 = vld [vmem:[%s5585_s1 + $0x210] sm:$0xff] }
  0x60   : > { %1124 = vmatprep.subr.bf16.mxu0 %v3562_v9  ;;  %1165 = vmatprep.subr.bf16.mxu1 %v3564_v10  ;;  %v3507_v9 = vcombine.low %v277_v62, %v281_v63  ;;  %v3626_v10 = vcombine.high %v396_v4, %v400_v5  ;;  %v3628_v11 = vcombine.high %v397_v6, %v401_v7  ;;  %v344_v62 = vld [vmem:[%s5585_s1 + $0x230] sm:$0xff]  ;;  %v341_v63 = vld [vmem:[%s5585_s1 + $0x218] sm:$0xff] }
  0x62   : > { %1075 = vmatmul.mubr.bf16.vlgmr.msra.gmra.mxu0 %v4438_v13  ;;  %1116 = vmatmul.mubr.bf16.vlgmr.msra.gmra.mxu1 %v4438_v13 }
  0x63   : > { %1125 = vmatpush1.bf16.msra.mxu0 %v3561_v16  ;;  %1166 = vmatpush1.bf16.msra.mxu1 %v3563_v17  ;;  %v393_v16 = vld [vmem:[%s5585_s1 + $0x3b8] sm:$0xff]  ;;  %v3625_v17 = vcombine.low %v396_v4, %v400_v5  ;;  %v3569_v5 = vcombine.low %v340_v61, %v344_v62 }
  0x64   : > { %1126 = vmatprep.subr.bf16.mxu0 %v3554_v18  ;;  %1167 = vmatprep.subr.bf16.mxu1 %v3556_v19  ;;  %v3627_v18 = vcombine.low %v397_v6, %v401_v7  ;;  %v3618_v19 = vcombine.high %v388_v12, %v392_v14  ;;  %v3620_v20 = vcombine.high %v389_v15, %v393_v16  ;;  %v1460_v7 = vld [vmem:[%s5586_s2 + $0x5c0] sm:$0xff] }
  0x65   : > { %1156 = vmatprep.mubr.bf16.mxu0 %v4314_v58  ;;  %1197 = vmatprep.mubr.bf16.mxu1 %v4314_v58  ;;  %v301_v58 = vld [vmem:[%s5585_s1 + $0xd8] sm:$0xff] }
  0x66   : > { %v3532_v42 = vcombine.high %v301_v58, %v305_v38  ;;  %v3531_v48 = vcombine.low %v301_v58, %v305_v38  ;;  %v368_v58 = vld [vmem:[%s5585_s1 + $0x2f0] sm:$0xff]  ;;  %v365_v38 = vld [vmem:[%s5585_s1 + $0x2d8] sm:$0xff] }
  0x67   : > { %1127 = vmatpush1.bf16.msra.mxu0 %v3553_v24  ;;  %1168 = vmatpush1.bf16.msra.mxu1 %v3555_v25  ;;  %v385_v24 = vld [vmem:[%s5585_s1 + $0x378] sm:$0xff]  ;;  %v3617_v25 = vcombine.low %v388_v12, %v392_v14  ;;  %v1336_v12 = vld [vmem:[%s5586_s2 + $0x1e0] sm:$0xff] }
  0x68   : > { %1128 = vmatprep.subr.bf16.mxu0 %v3546_v26  ;;  %1169 = vmatprep.subr.bf16.mxu1 %v3548_v27  ;;  %v3619_v26 = vcombine.low %v389_v15, %v393_v16  ;;  %v3610_v27 = vcombine.high %v380_v21, %v384_v22  ;;  %v3612_v28 = vcombine.high %v381_v23, %v385_v24  ;;  %v1456_v14 = vld [vmem:[%s5586_s2 + $0x5a0] sm:$0xff] }
  0x6b   : > { %1129 = vmatpush1.bf16.msra.mxu0 %v3545_v32  ;;  %1170 = vmatpush1.bf16.msra.mxu1 %v3547_v33  ;;  %v377_v32 = vld [vmem:[%s5585_s1 + $0x338] sm:$0xff]  ;;  %v3609_v33 = vcombine.low %v380_v21, %v384_v22  ;;  %v1448_v22 = vld [vmem:[%s5586_s2 + $0x560] sm:$0xff] }
  0x6c   : > { %1130 = vmatprep.subr.bf16.mxu0 %v3538_v34  ;;  %1171 = vmatprep.subr.bf16.mxu1 %v3540_v35  ;;  %v3611_v34 = vcombine.low %v381_v23, %v385_v24  ;;  %v3602_v35 = vcombine.high %v372_v29, %v376_v30  ;;  %v3604_v36 = vcombine.high %v373_v31, %v377_v32  ;;  %v1316_v23 = vld [vmem:[%s5586_s2 + $0x140] sm:$0xff] }
  0x6d   : > { %v1320_v24 = vld [vmem:[%s5586_s2 + $0x160] sm:$0xff] }
  0x6f   : > { %1131 = vmatpush1.bf16.msra.mxu0 %v3537_v39  ;;  %1172 = vmatpush1.bf16.msra.mxu1 %v3539_v40  ;;  %v369_v39 = vld [vmem:[%s5585_s1 + $0x2f8] sm:$0xff]  ;;  %v3601_v40 = vcombine.low %v372_v29, %v376_v30  ;;  %v1436_v29 = vld [vmem:[%s5586_s2 + $0x500] sm:$0xff] }
  0x70   : > { %1132 = vmatprep.subr.bf16.mxu0 %v3530_v41  ;;  %1173 = vmatprep.subr.bf16.mxu1 %v3532_v42  ;;  %v3603_v41 = vcombine.low %v373_v31, %v377_v32  ;;  %v3594_v42 = vcombine.high %v364_v37, %v368_v58  ;;  %v3596_v43 = vcombine.high %v365_v38, %v369_v39  ;;  %v1440_v30 = vld [vmem:[%s5586_s2 + $0x520] sm:$0xff] }
  0x71   : > { %v1308_v31 = vld [vmem:[%s5586_s2 + $0x100] sm:$0xff] }
  0x72   : > { %v1312_v32 = vld [vmem:[%s5586_s2 + $0x120] sm:$0xff] }
  0x73   : > { %1133 = vmatpush1.bf16.msra.mxu0 %v3529_v47  ;;  %1174 = vmatpush1.bf16.msra.mxu1 %v3531_v48  ;;  %v361_v47 = vld [vmem:[%s5585_s1 + $0x2b8] sm:$0xff]  ;;  %v3593_v48 = vcombine.low %v364_v37, %v368_v58  ;;  %v1428_v37 = vld [vmem:[%s5586_s2 + $0x4c0] sm:$0xff] }
  0x74   : > { %1134 = vmatprep.subr.bf16.mxu0 %v3522_v49  ;;  %1175 = vmatprep.subr.bf16.mxu1 %v3524_v50  ;;  %v3595_v49 = vcombine.low %v365_v38, %v369_v39  ;;  %v3586_v50 = vcombine.high %v356_v44, %v360_v45  ;;  %v3588_v51 = vcombine.high %v357_v46, %v361_v47  ;;  %v1432_v58 = vld [vmem:[%s5586_s2 + $0x4e0] sm:$0xff] }
  0x75   : > { %v3795_v38 = vcombine.low %v1436_v29, %v1440_v30  ;;  %v3667_v39 = vcombine.low %v1308_v31, %v1312_v32 }
  0x77   : > { %1135 = vmatpush1.bf16.msra.mxu0 %v3521_v55  ;;  %1176 = vmatpush1.bf16.msra.mxu1 %v3523_v56  ;;  %v353_v55 = vld [vmem:[%s5585_s1 + $0x278] sm:$0xff]  ;;  %v3585_v56 = vcombine.low %v356_v44, %v360_v45  ;;  %v1420_v44 = vld [vmem:[%s5586_s2 + $0x480] sm:$0xff] }
  0x78   : > { %1136 = vmatprep.subr.bf16.mxu0 %v3514_v57  ;;  %1177 = vmatprep.subr.bf16.mxu1 %v3516_v59  ;;  %v3587_v57 = vcombine.low %v357_v46, %v361_v47  ;;  %v3578_v59 = vcombine.high %v348_v52, %v352_v53  ;;  %v3580_v60 = vcombine.high %v349_v54, %v353_v55  ;;  %v1424_v46 = vld [vmem:[%s5586_s2 + $0x4a0] sm:$0xff] }
  0x7b   : > { %1137 = vmatpush1.bf16.msra.mxu0 %v3513_v0  ;;  %1178 = vmatpush1.bf16.msra.mxu1 %v3515_v1  ;;  %v345_v0 = vld [vmem:[%s5585_s1 + $0x238] sm:$0xff]  ;;  %v3577_v1 = vcombine.low %v348_v52, %v352_v53  ;;  %v1412_v52 = vld [vmem:[%s5586_s2 + $0x440] sm:$0xff] }
  0x7c   : > { %1138 = vmatprep.subr.bf16.mxu0 %v3506_v2  ;;  %1179 = vmatprep.subr.bf16.mxu1 %v3508_v3  ;;  %v3579_v2 = vcombine.low %v349_v54, %v353_v55  ;;  %v3570_v3 = vcombine.high %v340_v61, %v344_v62  ;;  %v3572_v4 = vcombine.high %v341_v63, %v345_v0  ;;  %v1416_v54 = vld [vmem:[%s5586_s2 + $0x460] sm:$0xff] }
  0x7d   : > { %v3571_v6 = vcombine.low %v341_v63, %v345_v0  ;;  %v1404_v61 = vld [vmem:[%s5586_s2 + $0x400] sm:$0xff] }
  0x7e   : > { %v1408_v63 = vld [vmem:[%s5586_s2 + $0x420] sm:$0xff] }
  0x7f   : > { %1139 = vmatpush1.bf16.msra.mxu0 %v3505_v8  ;;  %1180 = vmatpush1.bf16.msra.mxu1 %v3507_v9  ;;  %v1464_v8 = vld [vmem:[%s5586_s2 + $0x5e0] sm:$0xff] }
  0x80   : > { %1140 = vmatprep.subr.bf16.mxu0 %v3626_v10  ;;  %1181 = vmatprep.subr.bf16.mxu1 %v3628_v11  ;;  %v1332_v9 = vld [vmem:[%s5586_s2 + $0x1c0] sm:$0xff]  ;;  %v3819_v10 = vcombine.low %v1460_v7, %v1464_v8  ;;  %v3820_v11 = vcombine.high %v1460_v7, %v1464_v8 }
  0x81   : > { %v3691_v15 = vcombine.low %v1332_v9, %v1336_v12  ;;  %v3692_v16 = vcombine.high %v1332_v9, %v1336_v12  ;;  %v1400_v12 = vld [vmem:[%s5586_s2 + $0x3e0] sm:$0xff] }
  0x83   : > { %1141 = vmatpush2.bf16.msra.mxu0 %v3625_v17  ;;  %1182 = vmatpush2.bf16.msra.mxu1 %v3627_v18  ;;  %v1324_v18 = vld [vmem:[%s5586_s2 + $0x180] sm:$0xff] }
  0x84   : > { %1142 = vmatprep.subr.bf16.mxu0 %v3618_v19  ;;  %1183 = vmatprep.subr.bf16.mxu1 %v3620_v20  ;;  %v1328_v19 = vld [vmem:[%s5586_s2 + $0x1a0] sm:$0xff] }
  0x85   : > { %v1444_v20 = vld [vmem:[%s5586_s2 + $0x540] sm:$0xff]  ;;  %v3684_v21 = vcombine.high %v1324_v18, %v1328_v19 }
  0x87   : > { %1143 = vmatpush2.bf16.msra.mxu0 %v3617_v25  ;;  %1184 = vmatpush2.bf16.msra.mxu1 %v3619_v26  ;;  %v3683_v26 = vcombine.low %v1324_v18, %v1328_v19  ;;  %v1388_v19 = vld [vmem:[%s5586_s2 + $0x380] sm:$0xff] }
  0x88   : > { %1144 = vmatprep.subr.bf16.mxu0 %v3610_v27  ;;  %1185 = vmatprep.subr.bf16.mxu1 %v3612_v28  ;;  %v3804_v27 = vcombine.high %v1444_v20, %v1448_v22  ;;  %v3676_v28 = vcombine.high %v1316_v23, %v1320_v24 }
  0x8b   : > { %1145 = vmatpush2.bf16.msra.mxu0 %v3609_v33  ;;  %1186 = vmatpush2.bf16.msra.mxu1 %v3611_v34  ;;  %v3803_v33 = vcombine.low %v1444_v20, %v1448_v22  ;;  %v3675_v34 = vcombine.low %v1316_v23, %v1320_v24  ;;  %v1392_v20 = vld [vmem:[%s5586_s2 + $0x3a0] sm:$0xff] }
  0x8c   : > { %1146 = vmatprep.subr.bf16.mxu0 %v3602_v35  ;;  %1187 = vmatprep.subr.bf16.mxu1 %v3604_v36  ;;  %v3796_v35 = vcombine.high %v1436_v29, %v1440_v30  ;;  %v3668_v36 = vcombine.high %v1308_v31, %v1312_v32  ;;  %v3748_v22 = vcombine.high %v1388_v19, %v1392_v20  ;;  %v1512_v23 = vld [vmem:[%s5586_s2 + $0x760] sm:$0xff] }
  0x8d   : > { %v3747_v24 = vcombine.low %v1388_v19, %v1392_v20  ;;  %v1500_v29 = vld [vmem:[%s5586_s2 + $0x700] sm:$0xff]  ;;  %v1457_v19 = vld [vmem:[%s5586_s2 + $0x5a8] sm:$0xff] }
  0x8e   : > { %v1504_v31 = vld [vmem:[%s5586_s2 + $0x720] sm:$0xff] }
  0x8f   : > { %1147 = vmatpush2.bf16.msra.mxu0 %v3601_v40  ;;  %1188 = vmatpush2.bf16.msra.mxu1 %v3603_v41  ;;  %v3788_v40 = vcombine.high %v1428_v37, %v1432_v58  ;;  %v3787_v41 = vcombine.low %v1428_v37, %v1432_v58  ;;  %v1492_v37 = vld [vmem:[%s5586_s2 + $0x6c0] sm:$0xff] }
  0x90   : > { %1148 = vmatprep.subr.bf16.mxu0 %v3594_v42  ;;  %1189 = vmatprep.subr.bf16.mxu1 %v3596_v43  ;;  %v1300_v42 = vld [vmem:[%s5586_s2 + $0xc0] sm:$0xff] }
  0x91   : > { %v1304_v43 = vld [vmem:[%s5586_s2 + $0xe0] sm:$0xff] }
  0x92   : > { %v3660_v45 = vcombine.high %v1300_v42, %v1304_v43  ;;  %v3659_v47 = vcombine.low %v1300_v42, %v1304_v43  ;;  %v1364_v42 = vld [vmem:[%s5586_s2 + $0x2c0] sm:$0xff] }
  0x93   : > { %1149 = vmatpush2.bf16.msra.mxu0 %v3593_v48  ;;  %1190 = vmatpush2.bf16.msra.mxu1 %v3595_v49  ;;  %v3779_v48 = vcombine.low %v1420_v44, %v1424_v46  ;;  %v3780_v49 = vcombine.high %v1420_v44, %v1424_v46  ;;  %v1368_v43 = vld [vmem:[%s5586_s2 + $0x2e0] sm:$0xff] }
  0x94   : > { %1150 = vmatprep.subr.bf16.mxu0 %v3586_v50  ;;  %1191 = vmatprep.subr.bf16.mxu1 %v3588_v51  ;;  %v1292_v50 = vld [vmem:[%s5586_s2 + $0x80] sm:$0xff] }
  0x95   : > { %v1296_v51 = vld [vmem:[%s5586_s2 + $0xa0] sm:$0xff] }
  0x96   : > { %v3652_v53 = vcombine.high %v1292_v50, %v1296_v51  ;;  %v3651_v55 = vcombine.low %v1292_v50, %v1296_v51  ;;  %v1484_v44 = vld [vmem:[%s5586_s2 + $0x680] sm:$0xff] }
  0x97   : > { %1151 = vmatpush2.bf16.msra.mxu0 %v3585_v56  ;;  %1192 = vmatpush2.bf16.msra.mxu1 %v3587_v57  ;;  %v3771_v56 = vcombine.low %v1412_v52, %v1416_v54  ;;  %v3772_v57 = vcombine.high %v1412_v52, %v1416_v54  ;;  %v1488_v46 = vld [vmem:[%s5586_s2 + $0x6a0] sm:$0xff] }
  0x98   : > { %1152 = vmatprep.subr.bf16.mxu0 %v3578_v59  ;;  %1193 = vmatprep.subr.bf16.mxu1 %v3580_v60  ;;  %v1284_v59 = vld [vmem:[%s5586_s2 + $0x40] sm:$0xff] }
  0x99   : > { %v1288_v60 = vld [vmem:[%s5586_s2 + $0x60] sm:$0xff] }
  0x9a   : > { %v3644_v62 = vcombine.high %v1284_v59, %v1288_v60  ;;  %v3643_v0 = vcombine.low %v1284_v59, %v1288_v60  ;;  %v1356_v50 = vld [vmem:[%s5586_s2 + $0x280] sm:$0xff] }
  0x9b   : > { %1153 = vmatpush2.bf16.msra.mxu0 %v3577_v1  ;;  %1194 = vmatpush2.bf16.msra.mxu1 %v3579_v2  ;;  %v3763_v1 = vcombine.low %v1404_v61, %v1408_v63  ;;  %v3764_v2 = vcombine.high %v1404_v61, %v1408_v63  ;;  %v1360_v51 = vld [vmem:[%s5586_s2 + $0x2a0] sm:$0xff] }
  0x9c   : > { %1154 = vmatprep.subr.bf16.mxu0 %v3570_v3  ;;  %1195 = vmatprep.subr.bf16.mxu1 %v3572_v4  ;;  %v1276_v3 = vld [vmem:[%s5586_s2] sm:$0xff] }
  0x9d   : > { %v1280_v4 = vld [vmem:[%s5586_s2 + $0x20] sm:$0xff] }
  0x9e   : > { %v3635_v7 = vcombine.low %v1276_v3, %v1280_v4  ;;  %v3636_v8 = vcombine.high %v1276_v3, %v1280_v4  ;;  %v1476_v52 = vld [vmem:[%s5586_s2 + $0x640] sm:$0xff] }
  0x9f   : > { %1155 = vmatpush2.bf16.msra.mxu0 %v3569_v5  ;;  %1196 = vmatpush2.bf16.msra.mxu1 %v3571_v6  ;;  %v1524_v5 = vld [vmem:[%s5586_s2 + $0x7c0] sm:$0xff] }
  0xa0   : > { %2895 = vmatprep.subr.bf16.mxu1 %v3820_v11  ;;  %2854 = vmatprep.subr.bf16.mxu0 %v3692_v16  ;;  %v1528_v6 = vld [vmem:[%s5586_s2 + $0x7e0] sm:$0xff] }
  0xa1   : > { %v3883_v9 = vcombine.low %v1524_v5, %v1528_v6  ;;  %v1396_v11 = vld [vmem:[%s5586_s2 + $0x3c0] sm:$0xff] }
  0xa2   : > { %1157 = vmatmul.mubr.bf16.vlgmr.msra.gmra.mxu0 %v4438_v13  ;;  %1198 = vmatmul.mubr.bf16.vlgmr.msra.gmra.mxu1 %v4438_v13  ;;  %v1452_v13 = vld [vmem:[%s5586_s2 + $0x580] sm:$0xff]  ;;  %v3755_v16 = vcombine.low %v1396_v11, %v1400_v12 }
  0xa3   : > { %v3812_v17 = vcombine.high %v1452_v13, %v1456_v14  ;;  %2896 = vmatpush1.bf16.msra.mxu1 %v3819_v10  ;;  %v3811_v25 = vcombine.low %v1452_v13, %v1456_v14  ;;  %2855 = vmatpush1.bf16.msra.mxu0 %v3691_v15  ;;  %v3884_v10 = vcombine.high %v1524_v5, %v1528_v6  ;;  %v1516_v13 = vld [vmem:[%s5586_s2 + $0x780] sm:$0xff]  ;;  %v1271_v5 = vld [vmem:[#allocation2 + $0x8] sm:$0xff] }
  0xa4   : > { %2856 = vmatprep.subr.bf16.mxu0 %v3684_v21  ;;  %v3756_v14 = vcombine.high %v1396_v11, %v1400_v12  ;;  %v1520_v15 = vld [vmem:[%s5586_s2 + $0x7a0] sm:$0xff] }
  0xa5   : > { %2897 = vmatprep.subr.bf16.mxu1 %v3812_v17  ;;  %v3875_v17 = vcombine.low %v1516_v13, %v1520_v15  ;;  %v3876_v18 = vcombine.high %v1516_v13, %v1520_v15  ;;  %v1508_v21 = vld [vmem:[%s5586_s2 + $0x740] sm:$0xff]  ;;  %v4827_v15 = vld [vmem:[%s5586_s2 + $0x1c8] sm:$0xff] }
  0xa6   : > { %v1480_v54 = vld [vmem:[%s5586_s2 + $0x660] sm:$0xff] }
  0xa7   : > { %2898 = vmatpush1.bf16.msra.mxu1 %v3811_v25  ;;  %2857 = vmatpush1.bf16.msra.mxu0 %v3683_v26  ;;  %v3867_v25 = vcombine.low %v1508_v21, %v1512_v23  ;;  %v3868_v26 = vcombine.high %v1508_v21, %v1512_v23  ;;  %v1348_v59 = vld [vmem:[%s5586_s2 + $0x240] sm:$0xff]  ;;  %v1445_v23 = vld [vmem:[%s5586_s2 + $0x548] sm:$0xff] }
  0xa8   : > { %2899 = vmatprep.subr.bf16.mxu1 %v3804_v27  ;;  %2858 = vmatprep.subr.bf16.mxu0 %v3676_v28  ;;  %v1380_v27 = vld [vmem:[%s5586_s2 + $0x340] sm:$0xff] }
  0xa9   : > { %v1384_v28 = vld [vmem:[%s5586_s2 + $0x360] sm:$0xff] }
  0xaa   : > { %v3740_v30 = vcombine.high %v1380_v27, %v1384_v28  ;;  %v3739_v32 = vcombine.low %v1380_v27, %v1384_v28  ;;  %v1352_v60 = vld [vmem:[%s5586_s2 + $0x260] sm:$0xff]  ;;  %v1437_v27 = vld [vmem:[%s5586_s2 + $0x508] sm:$0xff] }
  0xab   : > { %2900 = vmatpush1.bf16.msra.mxu1 %v3803_v33  ;;  %2859 = vmatpush1.bf16.msra.mxu0 %v3675_v34  ;;  %v3859_v33 = vcombine.low %v1500_v29, %v1504_v31  ;;  %v3860_v34 = vcombine.high %v1500_v29, %v1504_v31  ;;  %v1468_v61 = vld [vmem:[%s5586_s2 + $0x600] sm:$0xff]  ;;  %v1441_v28 = vld [vmem:[%s5586_s2 + $0x528] sm:$0xff] }
  0xac   : > { %2901 = vmatprep.subr.bf16.mxu1 %v3796_v35  ;;  %2860 = vmatprep.subr.bf16.mxu0 %v3668_v36  ;;  %v1372_v35 = vld [vmem:[%s5586_s2 + $0x300] sm:$0xff]  ;;  %v3797_v29 = vcombine.low %v1437_v27, %v1441_v28  ;;  %v1429_v31 = vld [vmem:[%s5586_s2 + $0x4c8] sm:$0xff] }
  0xad   : > { %v1376_v36 = vld [vmem:[%s5586_s2 + $0x320] sm:$0xff] }
  0xae   : > { %v3732_v58 = vcombine.high %v1372_v35, %v1376_v36  ;;  %v1472_v63 = vld [vmem:[%s5586_s2 + $0x620] sm:$0xff] }
  0xaf   : > { %2902 = vmatpush1.bf16.msra.mxu1 %v3795_v38  ;;  %2861 = vmatpush1.bf16.msra.mxu0 %v3667_v39  ;;  %v1496_v38 = vld [vmem:[%s5586_s2 + $0x6e0] sm:$0xff]  ;;  %v3731_v39 = vcombine.low %v1372_v35, %v1376_v36  ;;  %v1421_v35 = vld [vmem:[%s5586_s2 + $0x488] sm:$0xff] }
  0xb0   : > { %2903 = vmatprep.subr.bf16.mxu1 %v3788_v40  ;;  %2862 = vmatprep.subr.bf16.mxu0 %v3660_v45  ;;  %v3851_v40 = vcombine.low %v1492_v37, %v1496_v38  ;;  %v3724_v45 = vcombine.high %v1364_v42, %v1368_v43  ;;  %v1340_v3 = vld [vmem:[%s5586_s2 + $0x200] sm:$0xff]  ;;  %v1425_v36 = vld [vmem:[%s5586_s2 + $0x4a8] sm:$0xff] }
  0xb1   : > { %v1344_v4 = vld [vmem:[%s5586_s2 + $0x220] sm:$0xff] }
  0xb2   : > { %v3700_v6 = vcombine.high %v1340_v3, %v1344_v4  ;;  %v3699_v11 = vcombine.low %v1340_v3, %v1344_v4  ;;  %v1501_v3 = vld [vmem:[%s5586_s2 + $0x708] sm:$0xff] }
  0xb3   : > { %2904 = vmatpush1.bf16.msra.mxu1 %v3787_v41  ;;  %2863 = vmatpush1.bf16.msra.mxu0 %v3659_v47  ;;  %v3852_v41 = vcombine.high %v1492_v37, %v1496_v38  ;;  %v3723_v47 = vcombine.low %v1364_v42, %v1368_v43  ;;  %v3781_v37 = vcombine.low %v1421_v35, %v1425_v36  ;;  %v1413_v38 = vld [vmem:[%s5586_s2 + $0x448] sm:$0xff] }
  0xb4   : > { %2905 = vmatprep.subr.bf16.mxu1 %v3780_v49  ;;  %2864 = vmatprep.subr.bf16.mxu0 %v3652_v53  ;;  %v3844_v49 = vcombine.high %v1484_v44, %v1488_v46  ;;  %v3716_v53 = vcombine.high %v1356_v50, %v1360_v51  ;;  %v1405_v43 = vld [vmem:[%s5586_s2 + $0x408] sm:$0xff] }
  0xb5   : > { %v1505_v4 = vld [vmem:[%s5586_s2 + $0x728] sm:$0xff] }
  0xb7   : > { %2906 = vmatpush1.bf16.msra.mxu1 %v3779_v48  ;;  %2865 = vmatpush1.bf16.msra.mxu0 %v3651_v55  ;;  %v3843_v48 = vcombine.low %v1484_v44, %v1488_v46  ;;  %v3715_v55 = vcombine.low %v1356_v50, %v1360_v51  ;;  %v1525_v51 = vld [vmem:[%s5586_s2 + $0x7c8] sm:$0xff] }
  0xb8   : > { %2907 = vmatprep.subr.bf16.mxu1 %v3772_v57  ;;  %2866 = vmatprep.subr.bf16.mxu0 %v3644_v62  ;;  %v3836_v57 = vcombine.high %v1476_v52, %v1480_v54  ;;  %v3708_v62 = vcombine.high %v1348_v59, %v1352_v60 }
  0xbb   : > { %2908 = vmatpush1.bf16.msra.mxu1 %v3771_v56  ;;  %2867 = vmatpush1.bf16.msra.mxu0 %v3643_v0  ;;  %v3835_v56 = vcombine.low %v1476_v52, %v1480_v54  ;;  %v3707_v0 = vcombine.low %v1348_v59, %v1352_v60  ;;  %v1517_v59 = vld [vmem:[%s5586_s2 + $0x788] sm:$0xff] }
  0xbc   : > { %2909 = vmatprep.subr.bf16.mxu1 %v3764_v2  ;;  %2868 = vmatprep.subr.bf16.mxu0 %v3636_v8  ;;  %v3828_v2 = vcombine.high %v1468_v61, %v1472_v63  ;;  %v1461_v8 = vld [vmem:[%s5586_s2 + $0x5c8] sm:$0xff] }
  0xbd   : > { %v1521_v60 = vld [vmem:[%s5586_s2 + $0x7a8] sm:$0xff] }
  0xbf   : > { %2910 = vmatpush1.bf16.msra.mxu1 %v3763_v1  ;;  %2869 = vmatpush1.bf16.msra.mxu0 %v3635_v7  ;;  %v3827_v1 = vcombine.low %v1468_v61, %v1472_v63  ;;  %v4812_v7 = vpack.c.bf16 %v1271_v5, %v1271_v5  ;;  %v3877_v61 = vcombine.low %v1517_v59, %v1521_v60  ;;  %v1509_v63 = vld [vmem:[%s5586_s2 + $0x748] sm:$0xff] }
  0xc0   : > { %2911 = vmatprep.subr.bf16.mxu1 %v3884_v10  ;;  %2870 = vmatprep.subr.bf16.mxu0 %v3756_v14  ;;  %v1270_v10 = vld [vmem:[#allocation2 + $0x18] sm:$0xff]  ;;  %v3861_v5 = vcombine.low %v1501_v3, %v1505_v4 }
  0xc1   : > { %v4820_v14 = vpack.c.bf16 %v1270_v10, %v1270_v10  ;;  %2927 = vmatprep.mubr.bf16.mxu1 %v4812_v7 }
  0xc3   : > { %2912 = vmatpush2.bf16.msra.mxu1 %v3883_v9  ;;  %2871 = vmatpush2.bf16.msra.mxu0 %v3755_v16  ;;  %v1465_v9 = vld [vmem:[%s5586_s2 + $0x5e8] sm:$0xff] }
  0xc4   : > { %2913 = vmatprep.subr.bf16.mxu1 %v3876_v18  ;;  %2872 = vmatprep.subr.bf16.mxu0 %v3748_v22  ;;  %v3821_v12 = vcombine.low %v1461_v8, %v1465_v9  ;;  %v3822_v13 = vcombine.high %v1461_v8, %v1465_v9  ;;  %v4832_v16 = vld [vmem:[%s5586_s2 + $0x1e8] sm:$0xff] }
  0xc5   : > { %v3694_v18 = vcombine.high %v4827_v15, %v4832_v16  ;;  %v3693_v20 = vcombine.low %v4827_v15, %v4832_v16  ;;  %v1493_v8 = vld [vmem:[%s5586_s2 + $0x6c8] sm:$0xff] }
  0xc6   : > { %v1497_v9 = vld [vmem:[%s5586_s2 + $0x6e8] sm:$0xff] }
  0xc7   : > { %2914 = vmatpush2.bf16.msra.mxu1 %v3875_v17  ;;  %2873 = vmatpush2.bf16.msra.mxu0 %v3747_v24  ;;  %v1453_v17 = vld [vmem:[%s5586_s2 + $0x588] sm:$0xff]  ;;  %v3853_v10 = vcombine.low %v1493_v8, %v1497_v9 }
  0xc8   : > { %2915 = vmatprep.subr.bf16.mxu1 %v3868_v26  ;;  %2874 = vmatprep.subr.bf16.mxu0 %v3740_v30  ;;  %v3813_v21 = vcombine.low %v1453_v17, %v1457_v19  ;;  %v3814_v22 = vcombine.high %v1453_v17, %v1457_v19  ;;  %v1449_v24 = vld [vmem:[%s5586_s2 + $0x568] sm:$0xff]  ;;  %v3798_v30 = vcombine.high %v1437_v27, %v1441_v28  ;;  %v268_v27 = vld [vmem:[%s4217_s14 + $0x10] sm:$0xff] }
  0xc9   : > { %v3806_v26 = vcombine.high %v1445_v23, %v1449_v24  ;;  %v1477_v19 = vld [vmem:[%s5586_s2 + $0x648] sm:$0xff] }
  0xca   : > { %v1313_v15 = vld [vmem:[%s5586_s2 + $0x128] sm:$0xff] }
  0xcb   : > { %2916 = vmatpush2.bf16.msra.mxu1 %v3867_v25  ;;  %2875 = vmatpush2.bf16.msra.mxu0 %v3739_v32  ;;  %v3805_v25 = vcombine.low %v1445_v23, %v1449_v24  ;;  %v1433_v32 = vld [vmem:[%s5586_s2 + $0x4e8] sm:$0xff] }
  0xcc   : > { %2917 = vmatprep.subr.bf16.mxu1 %v3860_v34  ;;  %2876 = vmatprep.subr.bf16.mxu0 %v3732_v58  ;;  %v3790_v34 = vcombine.high %v1429_v31, %v1433_v32  ;;  %v3782_v58 = vcombine.high %v1421_v35, %v1425_v36  ;;  %v1469_v24 = vld [vmem:[%s5586_s2 + $0x608] sm:$0xff]  ;;  %v1466_v35 = vld [vmem:[%s5586_s2 + $0x5f0] sm:$0xff] }
  0xcf   : > { %2918 = vmatpush2.bf16.msra.mxu1 %v3859_v33  ;;  %2877 = vmatpush2.bf16.msra.mxu0 %v3731_v39  ;;  %v3789_v33 = vcombine.low %v1429_v31, %v1433_v32  ;;  %v1417_v39 = vld [vmem:[%s5586_s2 + $0x468] sm:$0xff]  ;;  %v1462_v32 = vld [vmem:[%s5586_s2 + $0x5d0] sm:$0xff] }
  0xd0   : > { %2919 = vmatprep.subr.bf16.mxu1 %v3852_v41  ;;  %2878 = vmatprep.subr.bf16.mxu0 %v3724_v45  ;;  %v3774_v41 = vcombine.high %v1413_v38, %v1417_v39  ;;  %v1409_v45 = vld [vmem:[%s5586_s2 + $0x428] sm:$0xff] }
  0xd3   : > { %2920 = vmatpush2.bf16.msra.mxu1 %v3851_v40  ;;  %2879 = vmatpush2.bf16.msra.mxu0 %v3723_v47  ;;  %v3773_v40 = vcombine.low %v1413_v38, %v1417_v39  ;;  %v3765_v47 = vcombine.low %v1405_v43, %v1409_v45 }
  0xd4   : > { %2921 = vmatprep.subr.bf16.mxu1 %v3844_v49  ;;  %2880 = vmatprep.subr.bf16.mxu0 %v3716_v53  ;;  %v1529_v53 = vld [vmem:[%s5586_s2 + $0x7e8] sm:$0xff] }
  0xd7   : > { %2922 = vmatpush2.bf16.msra.mxu1 %v3843_v48  ;;  %2881 = vmatpush2.bf16.msra.mxu0 %v3715_v55  ;;  %v3766_v48 = vcombine.high %v1405_v43, %v1409_v45  ;;  %v3885_v55 = vcombine.low %v1525_v51, %v1529_v53 }
  0xd8   : > { %2923 = vmatprep.subr.bf16.mxu1 %v3836_v57  ;;  %2882 = vmatprep.subr.bf16.mxu0 %v3708_v62  ;;  %v3878_v62 = vcombine.high %v1517_v59, %v1521_v60  ;;  %v1422_v60 = vld [vmem:[%s5586_s2 + $0x490] sm:$0xff] }
  0xdb   : > { %2924 = vmatpush2.bf16.msra.mxu1 %v3835_v56  ;;  %2883 = vmatpush2.bf16.msra.mxu0 %v3707_v0  ;;  %v3886_v56 = vcombine.high %v1525_v51, %v1529_v53  ;;  %v1513_v0 = vld [vmem:[%s5586_s2 + $0x768] sm:$0xff]  ;;  %v1438_v51 = vld [vmem:[%s5586_s2 + $0x510] sm:$0xff] }
  0xdc   : > { %2925 = vmatprep.subr.bf16.mxu1 %v3828_v2  ;;  %2884 = vmatprep.subr.bf16.mxu0 %v3700_v6  ;;  %v3870_v2 = vcombine.high %v1509_v63, %v1513_v0  ;;  %v3862_v6 = vcombine.high %v1501_v3, %v1505_v4  ;;  %v1414_v4 = vld [vmem:[%s5586_s2 + $0x450] sm:$0xff] }
  0xdf   : > { %2926 = vmatpush2.bf16.msra.mxu1 %v3827_v1  ;;  %2885 = vmatpush2.bf16.msra.mxu0 %v3699_v11  ;;  %v3869_v1 = vcombine.low %v1509_v63, %v1513_v0  ;;  %v3854_v11 = vcombine.high %v1493_v8, %v1497_v9  ;;  %v1418_v8 = vld [vmem:[%s5586_s2 + $0x470] sm:$0xff] }
  0xe0   : > { %2977 = vmatprep.subr.bf16.mxu1 %v3822_v13  ;;  %2936 = vmatprep.subr.bf16.mxu0 %v3694_v18  ;;  %v1489_v13 = vld [vmem:[%s5586_s2 + $0x6a8] sm:$0xff] }
  0xe2   : > { %2928 = vmatmul.mubr.bf16.vlgmr.msra.gmra.mxu1 %v4820_v14 }
  0xe3   : > { %2978 = vmatpush1.bf16.msra.mxu1 %v3821_v12  ;;  %3009 = vmatprep.mubr.bf16.mxu1 %v4812_v7  ;;  %v1485_v12 = vld [vmem:[%s5586_s2 + $0x688] sm:$0xff] }
  0xe4   : > { %2979 = vmatprep.subr.bf16.mxu1 %v3814_v22  ;;  %v3845_v17 = vcombine.low %v1485_v12, %v1489_v13  ;;  %v3846_v18 = vcombine.high %v1485_v12, %v1489_v13  ;;  %v3776_v12 = vcombine.high %v1414_v4, %v1418_v8  ;;  %v272_v13 = vld [vmem:[%s4217_s14 + $0x30] sm:$0xff] }
  0xe7   : > { %2980 = vmatpush1.bf16.msra.mxu1 %v3813_v21  ;;  %v1481_v21 = vld [vmem:[%s5586_s2 + $0x668] sm:$0xff] }
  0xe8   : > { %2981 = vmatprep.subr.bf16.mxu1 %v3806_v26  ;;  %v3837_v22 = vcombine.low %v1477_v19, %v1481_v21  ;;  %v3838_v23 = vcombine.high %v1477_v19, %v1481_v21  ;;  %v1473_v26 = vld [vmem:[%s5586_s2 + $0x628] sm:$0xff]  ;;  %v1406_v21 = vld [vmem:[%s5586_s2 + $0x410] sm:$0xff] }
  0xe9   : > { %v3829_v28 = vcombine.low %v1469_v24, %v1473_v26  ;;  %v271_v19 = vld [vmem:[%s4217_s14 + $0x28] sm:$0xff] }
  0xeb   : > { %2982 = vmatpush1.bf16.msra.mxu1 %v3805_v25  ;;  %v266_v25 = vld [vmem:[%s4217_s14] sm:$0xff] }
  0xec   : > { %2983 = vmatprep.subr.bf16.mxu1 %v3798_v30  ;;  %v269_v30 = vld [vmem:[%s4217_s14 + $0x18] sm:$0xff] }
  0xef   : > { %2984 = vmatpush1.bf16.msra.mxu1 %v3797_v29  ;;  %v3830_v29 = vcombine.high %v1469_v24, %v1473_v26  ;;  %v273_v24 = vld [vmem:[%s4217_s14 + $0x38] sm:$0xff] }
  0xf0   : > { %2985 = vmatprep.subr.bf16.mxu1 %v3790_v34  ;;  %v267_v34 = vld [vmem:[%s4217_s14 + $0x8] sm:$0xff] }
  0xf3   : > { %2986 = vmatpush1.bf16.msra.mxu1 %v3789_v33 }
  0xf4   : > { %2987 = vmatprep.subr.bf16.mxu1 %v3782_v58  ;;  %v3824_v58 = vcombine.high %v1462_v32, %v1466_v35 }
  0xf7   : > { %2988 = vmatpush1.bf16.msra.mxu1 %v3781_v37  ;;  %v3823_v37 = vcombine.low %v1462_v32, %v1466_v35  ;;  %v1526_v35 = vld [vmem:[%s5586_s2 + $0x7d0] sm:$0xff] }
  0xf8   : > { %2989 = vmatprep.subr.bf16.mxu1 %v3774_v41 }
  0xfb   : > { %2990 = vmatpush1.bf16.msra.mxu1 %v3773_v40  ;;  %v1454_v40 = vld [vmem:[%s5586_s2 + $0x590] sm:$0xff] }
  0xfc   : > { %2991 = vmatprep.subr.bf16.mxu1 %v3766_v48  ;;  %v1450_v48 = vld [vmem:[%s5586_s2 + $0x570] sm:$0xff] }
  0xff   : > { %2992 = vmatpush1.bf16.msra.mxu1 %v3765_v47  ;;  %v1446_v47 = vld [vmem:[%s5586_s2 + $0x550] sm:$0xff] }
 0x100   : > { %2993 = vmatprep.subr.bf16.mxu1 %v3886_v56  ;;  %v1434_v56 = vld [vmem:[%s5586_s2 + $0x4f0] sm:$0xff] }
 0x103   : > { %2994 = vmatpush2.bf16.msra.mxu1 %v3885_v55  ;;  %v1430_v55 = vld [vmem:[%s5586_s2 + $0x4d0] sm:$0xff] }
 0x104   : > { %2995 = vmatprep.subr.bf16.mxu1 %v3878_v62  ;;  %v3792_v59 = vcombine.high %v1430_v55, %v1434_v56  ;;  %v1426_v62 = vld [vmem:[%s5586_s2 + $0x4b0] sm:$0xff] }
 0x105   : > { %v3783_v0 = vcombine.low %v1422_v60, %v1426_v62 }
 0x107   : > { %2996 = vmatpush2.bf16.msra.mxu1 %v3877_v61 }
 0x108   : > { %2997 = vmatprep.subr.bf16.mxu1 %v3870_v2 }
 0x10b   : > { %2998 = vmatpush2.bf16.msra.mxu1 %v3869_v1  ;;  %v3784_v1 = vcombine.high %v1422_v60, %v1426_v62 }
 0x10c   : > { %2999 = vmatprep.subr.bf16.mxu1 %v3862_v6 }
 0x10f   : > { %3000 = vmatpush2.bf16.msra.mxu1 %v3861_v5 }
 0x110   : > { %3001 = vmatprep.subr.bf16.mxu1 %v3854_v11  ;;  %v3775_v11 = vcombine.low %v1414_v4, %v1418_v8 }
 0x113   : > { %3002 = vmatpush2.bf16.msra.mxu1 %v3853_v10  ;;  %v270_v10 = vld [vmem:[%s4217_s14 + $0x20] sm:$0xff]  ;;  %s4064_s14 = scalar_lea.vmem %s3440_s16, 16 }
 0x114   : > { %3003 = vmatprep.subr.bf16.mxu1 %v3846_v18  ;;  %p4065_p12 = scmp.ne.s32.totalorder %s3440_s16, %s4064_s14  ;;  %p4072_p2 = scmp.lt.s32.totalorder %s4070_s25, %s4064_s14 }
 0x116   : > { %p4066_p13 = pnand %p4065_p12, %p4201_p5  ;;  %p4073_p3 = por %p4072_p2, %p4071_p1 }
 0x117   : > { %3004 = vmatpush2.bf16.msra.mxu1 %v3845_v17 }
 0x118   : > { %3005 = vmatprep.subr.bf16.mxu1 %v3838_v23  ;;  %p4067_p0 = pneg %p4066_p13 }
 0x11a   : > { %p4074_p4 = pnand %p4073_p3, %p4067_p0 }
 0x11b   : > { %3006 = vmatpush2.bf16.msra.mxu1 %v3837_v22 }
 0x11c   : > { %3007 = vmatprep.subr.bf16.mxu1 %v3830_v29 }
 0x11f   : > { %3008 = vmatpush2.bf16.msra.mxu1 %v3829_v28 }
 0x120   : > { %3059 = vmatprep.subr.bf16.mxu1 %v3824_v58 }
 0x122   : > { %v4875_v42 = vpop.f32.mrf.mxu0  ;;  %v4880_v44 = vpop.f32.mrf.mxu1  ;;  %3010 = vmatmul.mubr.bf16.vlgmr.msra.gmra.mxu1 %v4820_v14 }
 0x123   : > { %v1206_v31 = vadd.f32 %v4875_v42, %v266_v25  ;;  %v1208_v33 = vadd.f32 %v4880_v44, %v268_v27  ;;  %3060 = vmatpush1.bf16.msra.mxu1 %v3823_v37  ;;  %v1458_v42 = vld [vmem:[%s5586_s2 + $0x5b0] sm:$0xff]  ;;  %3091 = vmatprep.mubr.bf16.mxu1 %v4812_v7 }
 0x124   : > { %v4885_v46 = vpop.f32.mrf.mxu0  ;;  %v4887_v49 = vpop.f32.mrf.mxu1  ;;  %v3815_v44 = vcombine.low %v1454_v40, %v1458_v42  ;;  %v3816_v45 = vcombine.high %v1454_v40, %v1458_v42  ;;  %v1410_v25 = vld [vmem:[%s5586_s2 + $0x430] sm:$0xff] }
 0x125   : > { %v1209_v36 = vadd.f32 %v4887_v49, %v269_v30  ;;  %v3629_v38 = vmul.f32 -1.442695, %v1206_v31  ;;  %v1207_v39 = vadd.f32 %v4885_v46, %v267_v34  ;;  %v3631_v41 = vmul.f32 -1.442695, %v1208_v33  ;;  %v1530_v37 = vld [vmem:[%s5586_s2 + $0x7f0] sm:$0xff] }
 0x126   : > { %v1080_v50 = vpop.f32.mrf.mxu0  ;;  %v1121_v52 = vpop.f32.mrf.mxu1  ;;  %3061 = vmatprep.subr.bf16.mxu1 %v3816_v45  ;;  %v3807_v49 = vcombine.low %v1446_v47, %v1450_v48  ;;  %v3767_v28 = vcombine.low %v1406_v21, %v1410_v25  ;;  %v3768_v29 = vcombine.high %v1406_v21, %v1410_v25  ;;  %v3888_v40 = vcombine.high %v1526_v35, %v1530_v37  ;;  %v1518_v42 = vld [vmem:[%s5586_s2 + $0x790] sm:$0xff] }
 0x127   : > { %v3632_v43 = vmul.f32 -1.442695, %v1209_v36  ;;  %3996 = vpow2.f32 %v3629_v38  ;;  %v3630_v46 = vmul.f32 -1.442695, %v1207_v39  ;;  %3062 = vmatpush1.bf16.msra.mxu1 %v3815_v44  ;;  %v3808_v50 = vcombine.high %v1446_v47, %v1450_v48  ;;  %v1442_v52 = vld [vmem:[%s5586_s2 + $0x530] sm:$0xff] }
 0x128   : > { %v1081_v54 = vpop.f32.mrf.mxu0  ;;  %v1122_v57 = vpop.f32.mrf.mxu1  ;;  %3998 = vpow2.f32 %v3631_v41  ;;  %v3799_v53 = vcombine.low %v1438_v51, %v1442_v52  ;;  %v3887_v39 = vcombine.low %v1526_v35, %v1530_v37  ;;  %v1514_v48 = vld [vmem:[%s5586_s2 + $0x770] sm:$0xff] }
 0x129   : > { %4000 = vpow2.f32 %v3632_v43  ;;  %3063 = vmatprep.subr.bf16.mxu1 %v3808_v50  ;;  %v3800_v54 = vcombine.high %v1438_v51, %v1442_v52  ;;  %v3791_v57 = vcombine.low %v1430_v55, %v1434_v56  ;;  %v1522_v43 = vld [vmem:[%s5586_s2 + $0x7b0] sm:$0xff]  ;;  %v1214_v50 = vld [vmem:[#allocation3] sm:$0xff]  ;;  %v1215_v55 = vld [vmem:[#allocation3 + $0x8] sm:$0xff] }
 0x12a   : > { %4002 = vpow2.f32 %v3630_v46  ;;  %v3879_v44 = vcombine.low %v1518_v42, %v1522_v43  ;;  %v3880_v45 = vcombine.high %v1518_v42, %v1522_v43  ;;  %v1510_v46 = vld [vmem:[%s5586_s2 + $0x750] sm:$0xff]  ;;  %v1455_v42 = vld [vmem:[%s5586_s2 + $0x598] sm:$0xff] }
 0x12b   : > { %3064 = vmatpush1.bf16.msra.mxu1 %v3807_v49  ;;  %v3871_v51 = vcombine.low %v1510_v46, %v1514_v48  ;;  %v3872_v52 = vcombine.high %v1510_v46, %v1514_v48  ;;  %v1502_v56 = vld [vmem:[%s5586_s2 + $0x710] sm:$0xff]  ;;  %v1317_v46 = vld [vmem:[%s5586_s2 + $0x148] sm:$0xff] }
 0x12c   : > { %3065 = vmatprep.subr.bf16.mxu1 %v3800_v54 }
 0x12f   : > { %3066 = vmatpush1.bf16.msra.mxu1 %v3799_v53 }
 0x130   : > { %3067 = vmatprep.subr.bf16.mxu1 %v3792_v59 }
 0x133   : > { %3068 = vmatpush1.bf16.msra.mxu1 %v3791_v57 }
 0x134   : > { %v3997_v61 = vpop.eup %3996  ;;  %3069 = vmatprep.subr.bf16.mxu1 %v3784_v1 }
 0x135   : > { %v3999_v63 = vpop.eup %3998  ;;  %v1222_v3 = vadd.f32 1.0, %v3997_v61  ;;  %v1506_v61 = vld [vmem:[%s5586_s2 + $0x730] sm:$0xff] }
 0x136   : > { %v4001_v2 = vpop.eup %4000  ;;  %v1234_v6 = vadd.f32 1.0, %v3999_v63  ;;  %v3863_v63 = vcombine.low %v1502_v56, %v1506_v61 }
 0x137   : > { %v4003_v5 = vpop.eup %4002  ;;  %3070 = vmatpush1.bf16.msra.mxu1 %v3783_v0  ;;  %v1235_v9 = vadd.f32 1.0, %v4001_v2  ;;  %4004 = vrcp.f32 %v1222_v3  ;;  %v3864_v0 = vcombine.high %v1502_v56, %v1506_v61 }
 0x138   : > { %v1223_v17 = vadd.f32 1.0, %v4003_v5  ;;  %3071 = vmatprep.subr.bf16.mxu1 %v3776_v12  ;;  %4006 = vrcp.f32 %v1234_v6  ;;  %v1494_v6 = vld [vmem:[%s5586_s2 + $0x6d0] sm:$0xff] }
 0x139   : > { %4008 = vrcp.f32 %v1235_v9 }
 0x13b   : > { %3072 = vmatpush1.bf16.msra.mxu1 %v3775_v11 }
 0x13c   : > { %3073 = vmatprep.subr.bf16.mxu1 %v3768_v29 }
 0x13f   : > { %3074 = vmatpush1.bf16.msra.mxu1 %v3767_v28 }
 0x140   : > { %3075 = vmatprep.subr.bf16.mxu1 %v3888_v40 }
 0x143   : > { %3076 = vmatpush2.bf16.msra.mxu1 %v3887_v39 }
 0x144   : > { %3077 = vmatprep.subr.bf16.mxu1 %v3880_v45  ;;  %v4005_v47 = vpop.eup %4004  ;;  %v1459_v45 = vld [vmem:[%s5586_s2 + $0x5b8] sm:$0xff] }
 0x145   : > { %v4007_v49 = vpop.eup %4006  ;;  %v3817_v48 = vcombine.low %v1455_v42, %v1459_v45 }
 0x146   : > { %v4009_v53 = vpop.eup %4008  ;;  %v1254_v59 = vmul.f32 %v4007_v49, %v1214_v50  ;;  %v3818_v49 = vcombine.high %v1455_v42, %v1459_v45  ;;  %v1447_v50 = vld [vmem:[%s5586_s2 + $0x558] sm:$0xff] }
 0x147   : > { %3078 = vmatpush2.bf16.msra.mxu1 %v3879_v44  ;;  %v1255_v3 = vmul.f32 %v4009_v53, %v1215_v55  ;;  %v1309_v53 = vld [vmem:[%s5586_s2 + $0x108] sm:$0xff]  ;;  %v1439_v55 = vld [vmem:[%s5586_s2 + $0x518] sm:$0xff] }
 0x148   : > { %3079 = vmatprep.subr.bf16.mxu1 %v3872_v52  ;;  %v1451_v52 = vld [vmem:[%s5586_s2 + $0x578] sm:$0xff]  ;;  %v3670_v56 = vcombine.high %v1309_v53, %v1313_v15 }
 0x149   : > { %v3809_v16 = vcombine.low %v1447_v50, %v1451_v52 }
 0x14b   : > { %3080 = vmatpush2.bf16.msra.mxu1 %v3871_v51 }
 0x14c   : > { %3081 = vmatprep.subr.bf16.mxu1 %v3864_v0  ;;  %v1431_v0 = vld [vmem:[%s5586_s2 + $0x4d8] sm:$0xff] }
 0x14f   : > { %3082 = vmatpush2.bf16.msra.mxu1 %v3863_v63  ;;  %v3669_v63 = vcombine.low %v1309_v53, %v1313_v15  ;;  %v1511_v53 = vld [vmem:[%s5586_s2 + $0x758] sm:$0xff] }
 0x162   : > { %v1158_v18 = vpop.f32.mrf.mxu0  ;;  %v1199_v23 = vpop.f32.mrf.mxu1 }
 0x163   : > { %v1210_v22 = vadd.f32 %v1158_v18, %v270_v10  ;;  %v1212_v26 = vadd.f32 %v1199_v23, %v272_v13  ;;  %v1498_v10 = vld [vmem:[%s5586_s2 + $0x6f0] sm:$0xff] }
 0x164   : > { %v1160_v27 = vpop.f32.mrf.mxu0  ;;  %v1201_v31 = vpop.f32.mrf.mxu1  ;;  %v3855_v12 = vcombine.low %v1494_v6, %v1498_v10  ;;  %v3856_v13 = vcombine.high %v1494_v6, %v1498_v10  ;;  %v1490_v18 = vld [vmem:[%s5586_s2 + $0x6b0] sm:$0xff] }
 0x165   : > { %4010 = vtanh.f32 %v1210_v22  ;;  %v1211_v30 = vadd.f32 %v1160_v27, %v271_v19  ;;  %v3633_v32 = vmul.f32 -1.442695, %v1212_v26  ;;  %v1213_v33 = vadd.f32 %v1201_v31, %v273_v24  ;;  %v1478_v22 = vld [vmem:[%s5586_s2 + $0x650] sm:$0xff] }
 0x166   : > { %4012 = vrcp.f32 %v1223_v17  ;;  %v1162_v34 = vpop.f32.mrf.mxu0  ;;  %v1203_v36 = vpop.f32.mrf.mxu1  ;;  %3083 = vmatprep.subr.bf16.mxu1 %v3856_v13  ;;  %v1486_v17 = vld [vmem:[%s5586_s2 + $0x690] sm:$0xff]  ;;  %v1289_v13 = vld [vmem:[%s5586_s2 + $0x68] sm:$0xff] }
 0x167   : > { %4014 = vtanh.f32 %v1211_v30  ;;  %v3634_v58 = vmul.f32 -1.442695, %v1213_v33  ;;  %3084 = vmatpush2.bf16.msra.mxu1 %v3855_v12  ;;  %v3847_v19 = vcombine.low %v1486_v17, %v1490_v18  ;;  %v3848_v21 = vcombine.high %v1486_v17, %v1490_v18  ;;  %v1482_v23 = vld [vmem:[%s5586_s2 + $0x670] sm:$0xff]  ;;  %v1463_v34 = vld [vmem:[%s5586_s2 + $0x5d8] sm:$0xff]  ;;  %v1285_v12 = vld [vmem:[%s5586_s2 + $0x48] sm:$0xff] }
 0x168   : > { %4016 = vpow2.f32 %v3633_v32  ;;  %v1163_v38 = vpop.f32.mrf.mxu0  ;;  %v1204_v41 = vpop.f32.mrf.mxu1  ;;  %v3839_v24 = vcombine.low %v1478_v22, %v1482_v23  ;;  %v3840_v25 = vcombine.high %v1478_v22, %v1482_v23  ;;  %v1470_v26 = vld [vmem:[%s5586_s2 + $0x610] sm:$0xff]  ;;  %v1467_v36 = vld [vmem:[%s5586_s2 + $0x5f8] sm:$0xff]  ;;  %v3646_v22 = vcombine.high %v1285_v12, %v1289_v13 }
 0x169   : > { %4018 = vpow2.f32 %v3634_v58  ;;  %3085 = vmatprep.subr.bf16.mxu1 %v3848_v21  ;;  %v1474_v27 = vld [vmem:[%s5586_s2 + $0x630] sm:$0xff]  ;;  %v1325_v58 = vld [vmem:[%s5586_s2 + $0x188] sm:$0xff]  ;;  %v3825_v39 = vcombine.low %v1463_v34, %v1467_v36  ;;  %v3826_v40 = vcombine.high %v1463_v34, %v1467_v36  ;;  %v1415_v21 = vld [vmem:[%s5586_s2 + $0x458] sm:$0xff] }
 0x16a   : > { %v3831_v29 = vcombine.low %v1470_v26, %v1474_v27  ;;  %v3832_v30 = vcombine.high %v1470_v26, %v1474_v27  ;;  %v1329_v38 = vld [vmem:[%s5586_s2 + $0x1a8] sm:$0xff]  ;;  %v1419_v23 = vld [vmem:[%s5586_s2 + $0x478] sm:$0xff] }
 0x16b   : > { %3086 = vmatpush2.bf16.msra.mxu1 %v3847_v19  ;;  %v3686_v44 = vcombine.high %v1325_v58, %v1329_v38  ;;  %v3777_v26 = vcombine.low %v1415_v21, %v1419_v23  ;;  %v3778_v27 = vcombine.high %v1415_v21, %v1419_v23 }
 0x16c   : > { %3087 = vmatprep.subr.bf16.mxu1 %v3840_v25  ;;  %v1281_v25 = vld [vmem:[%s5586_s2 + $0x28] sm:$0xff] }
 0x16f   : > { %3088 = vmatpush2.bf16.msra.mxu1 %v3839_v24  ;;  %v1277_v24 = vld [vmem:[%s5586_s2 + $0x8] sm:$0xff] }
 0x170   : > { %3089 = vmatprep.subr.bf16.mxu1 %v3832_v30  ;;  %v3638_v30 = vcombine.high %v1277_v24, %v1281_v25  ;;  %v3637_v36 = vcombine.low %v1277_v24, %v1281_v25  ;;  %v1479_v24 = vld [vmem:[%s5586_s2 + $0x658] sm:$0xff] }
 0x172   : > { %v4011_v54 = vpop.eup %4010 }
 0x173   : > { %v4013_v57 = vpop.eup %4012  ;;  %v1256_v60 = vmul.f32 %v4011_v54, %v4005_v47  ;;  %3090 = vmatpush2.bf16.msra.mxu1 %v3831_v29  ;;  %v1321_v47 = vld [vmem:[%s5586_s2 + $0x168] sm:$0xff]  ;;  %v1407_v29 = vld [vmem:[%s5586_s2 + $0x418] sm:$0xff] }
 0x174   : > { %v4015_v62 = vpop.eup %4014  ;;  %3141 = vmatprep.subr.bf16.mxu1 %v3826_v40  ;;  %v3678_v51 = vcombine.high %v1317_v46, %v1321_v47  ;;  %v3677_v54 = vcombine.low %v1317_v46, %v1321_v47  ;;  %v1393_v40 = vld [vmem:[%s5586_s2 + $0x3a8] sm:$0xff]  ;;  %v1519_v46 = vld [vmem:[%s5586_s2 + $0x798] sm:$0xff] }
 0x175   : > { %v4017_v1 = vpop.eup %4016  ;;  %v1258_v2 = vadd.f32 %v1256_v60, %v1254_v59  ;;  %v1257_v4 = vmul.f32 %v4015_v62, %v4013_v57  ;;  %v1443_v57 = vld [vmem:[%s5586_s2 + $0x538] sm:$0xff]  ;;  %v1301_v59 = vld [vmem:[%s5586_s2 + $0xc8] sm:$0xff] }
 0x176   : > { %v1248_v5 = vadd.f32 1.0, %v4017_v1  ;;  %v4019_v8 = vpop.eup %4018  ;;  %3092 = vmatmul.mubr.bf16.vlgmr.msra.gmra.mxu1 %v4820_v14  ;;  %v1305_v60 = vld [vmem:[%s5586_s2 + $0xe8] sm:$0xff]  ;;  %v3801_v61 = vcombine.low %v1439_v55, %v1443_v57  ;;  %v3802_v62 = vcombine.high %v1439_v55, %v1443_v57 }
 0x177   : > { %4020 = vtanh.f32 %v1258_v2  ;;  %1264 = vst [vmem:[#allocation3] sm:$0xff] %v1258_v2  ;;  %v1259_v9 = vadd.f32 %v1257_v4, %v1255_v3  ;;  %v1249_v11 = vadd.f32 1.0, %v4019_v8  ;;  %3142 = vmatpush1.bf16.msra.mxu1 %v3825_v39  ;;  %3173 = vmatprep.mubr.bf16.mxu1 %v4812_v7  ;;  %v3685_v7 = vcombine.low %v1325_v58, %v1329_v38  ;;  %v1435_v2 = vld [vmem:[%s5586_s2 + $0x4f8] sm:$0xff]  ;;  %v1293_v3 = vld [vmem:[%s5586_s2 + $0x88] sm:$0xff] }
 0x178   : > { %4022 = vrcp.f32 %v1248_v5  ;;  %3143 = vmatprep.subr.bf16.mxu1 %v3818_v49  ;;  %v3662_v1 = vcombine.high %v1301_v59, %v1305_v60  ;;  %v1297_v4 = vld [vmem:[%s5586_s2 + $0xa8] sm:$0xff]  ;;  %v3793_v5 = vcombine.low %v1431_v0, %v1435_v2  ;;  %v3794_v6 = vcombine.high %v1431_v0, %v1435_v2  ;;  %v1531_v38 = vld [vmem:[%s5586_s2 + $0x7f8] sm:$0xff] }
 0x179   : > { %4024 = vtanh.f32 %v1259_v9  ;;  %1265 = vst [vmem:[#allocation3 + $0x8] sm:$0xff] %v1259_v9  ;;  %v3661_v8 = vcombine.low %v1301_v59, %v1305_v60  ;;  %v1423_v9 = vld [vmem:[%s5586_s2 + $0x498] sm:$0xff]  ;;  %v3654_v10 = vcombine.high %v1293_v3, %v1297_v4  ;;  %v3653_v19 = vcombine.low %v1293_v3, %v1297_v4  ;;  %v1389_v39 = vld [vmem:[%s5586_s2 + $0x388] sm:$0xff] }
 0x17a   : > { %4026 = vrcp.f32 %v1249_v11  ;;  %v1427_v11 = vld [vmem:[%s5586_s2 + $0x4b8] sm:$0xff]  ;;  %v3750_v47 = vcombine.high %v1389_v39, %v1393_v40  ;;  %v1381_v49 = vld [vmem:[%s5586_s2 + $0x348] sm:$0xff] }
 0x17b   : > { %3144 = vmatpush1.bf16.msra.mxu1 %v3817_v48  ;;  %v3785_v17 = vcombine.low %v1423_v9, %v1427_v11  ;;  %v3786_v18 = vcombine.high %v1423_v9, %v1427_v11  ;;  %v1523_v48 = vld [vmem:[%s5586_s2 + $0x7b8] sm:$0xff] }
 0x17c   : > { %v1503_v59 = vld [vmem:[%s5586_s2 + $0x718] sm:$0xff] }
 0x17d   : > { %v1495_v3 = vld [vmem:[%s5586_s2 + $0x6d8] sm:$0xff] }
 0x184   : > { %v4021_v28 = vpop.eup %4020 }
 0x185   : > { %v4023_v31 = vpop.eup %4022 }
 0x186   : > { %v4025_v32 = vpop.eup %4024  ;;  %v1262_v33 = vmul.f32 %v4023_v31, %v4021_v28  ;;  %v3645_v28 = vcombine.low %v1285_v12, %v1289_v13  ;;  %v1411_v31 = vld [vmem:[%s5586_s2 + $0x438] sm:$0xff] }
 0x187   : > { %v4027_v35 = vpop.eup %4026  ;;  %v3769_v34 = vcombine.low %v1407_v29, %v1411_v31  ;;  %v1487_v12 = vld [vmem:[%s5586_s2 + $0x698] sm:$0xff] }
 0x188   : > { %1266 = vst [vmem:[#allocation2 + $0x10] sm:$0xff] %v1262_v33  ;;  %v1263_v37 = vmul.f32 %v4027_v35, %v4025_v32  ;;  %v5065_v43 = vpack.c.bf16 %v1262_v33, %v1262_v33  ;;  %v1397_v32 = vld [vmem:[%s5586_s2 + $0x3c8] sm:$0xff]  ;;  %v3770_v35 = vcombine.high %v1407_v29, %v1411_v31 }
 0x189   : > { %v1401_v33 = vld [vmem:[%s5586_s2 + $0x3e8] sm:$0xff] }
 0x18a   : > { %1267 = vst [vmem:[#allocation2] sm:$0xff] %v1263_v37  ;;  %v5059_v41 = vpack.c.bf16 %v1263_v37, %v1263_v37  ;;  %v1527_v37 = vld [vmem:[%s5586_s2 + $0x7d8] sm:$0xff]  ;;  %v3758_v58 = vcombine.high %v1397_v32, %v1401_v33  ;;  %v3757_v45 = vcombine.low %v1397_v32, %v1401_v33 }
 0x18b   : > { %v3889_v42 = vcombine.low %v1527_v37, %v1531_v38  ;;  %v1471_v32 = vld [vmem:[%s5586_s2 + $0x618] sm:$0xff] }
 0x18c   : > { %2886 = vmatprep.mubr.bf16.mxu0 %v5059_v41 }
 0x18d   : > { %2887 = vmatmul.mubr.bf16.vlgmr.msra.gmra.mxu0 %v5065_v43 }
 0x18e   : > { %2937 = vmatpush1.bf16.msra.mxu0 %v3693_v20  ;;  %2968 = vmatprep.mubr.bf16.mxu0 %v5059_v41  ;;  %v3810_v20 = vcombine.high %v1447_v50, %v1451_v52  ;;  %v3881_v50 = vcombine.low %v1519_v46, %v1523_v48  ;;  %v3749_v52 = vcombine.low %v1389_v39, %v1393_v40  ;;  %v1326_v40 = vld [vmem:[%s5586_s2 + $0x190] sm:$0xff] }
 0x18f   : > { %2938 = vmatprep.subr.bf16.mxu0 %v3686_v44  ;;  %v3890_v44 = vcombine.high %v1527_v37, %v1531_v38 }
 0x190   : > { %3145 = vmatprep.subr.bf16.mxu1 %v3810_v20  ;;  %v1373_v20 = vld [vmem:[%s5586_s2 + $0x308] sm:$0xff] }
 0x191   : > { %3146 = vmatpush1.bf16.msra.mxu1 %v3809_v16  ;;  %v1515_v16 = vld [vmem:[%s5586_s2 + $0x778] sm:$0xff] }
 0x192   : > { %2939 = vmatpush1.bf16.msra.mxu0 %v3685_v7  ;;  %3147 = vmatprep.subr.bf16.mxu1 %v3802_v62  ;;  %v1385_v7 = vld [vmem:[%s5586_s2 + $0x368] sm:$0xff]  ;;  %v3873_v55 = vcombine.low %v1511_v53, %v1515_v16 }
 0x193   : > { %2940 = vmatprep.subr.bf16.mxu0 %v3678_v51  ;;  %v3882_v51 = vcombine.high %v1519_v46, %v1523_v48  ;;  %v3742_v15 = vcombine.high %v1381_v49, %v1385_v7  ;;  %v3741_v57 = vcombine.low %v1381_v49, %v1385_v7  ;;  %v1365_v62 = vld [vmem:[%s5586_s2 + $0x2c8] sm:$0xff]  ;;  %v1318_v48 = vld [vmem:[%s5586_s2 + $0x150] sm:$0xff] }
 0x194   : > { %v1322_v49 = vld [vmem:[%s5586_s2 + $0x170] sm:$0xff] }
 0x195   : > { %3148 = vmatpush1.bf16.msra.mxu1 %v3801_v61  ;;  %v1507_v61 = vld [vmem:[%s5586_s2 + $0x738] sm:$0xff] }
 0x196   : > { %2941 = vmatpush1.bf16.msra.mxu0 %v3677_v54  ;;  %3149 = vmatprep.subr.bf16.mxu1 %v3794_v6  ;;  %v1377_v54 = vld [vmem:[%s5586_s2 + $0x328] sm:$0xff]  ;;  %v3865_v0 = vcombine.low %v1503_v59, %v1507_v61 }
 0x197   : > { %2942 = vmatprep.subr.bf16.mxu0 %v3670_v56  ;;  %v3874_v56 = vcombine.high %v1511_v53, %v1515_v16  ;;  %v3734_v60 = vcombine.high %v1373_v20, %v1377_v54  ;;  %v3733_v2 = vcombine.low %v1373_v20, %v1377_v54  ;;  %v1357_v6 = vld [vmem:[%s5586_s2 + $0x288] sm:$0xff]  ;;  %v1314_v53 = vld [vmem:[%s5586_s2 + $0x130] sm:$0xff] }
 0x198   : > { %v1302_v20 = vld [vmem:[%s5586_s2 + $0xd0] sm:$0xff] }
 0x199   : > { %3150 = vmatpush1.bf16.msra.mxu1 %v3793_v5  ;;  %v1499_v5 = vld [vmem:[%s5586_s2 + $0x6f8] sm:$0xff]  ;;  %v1306_v54 = vld [vmem:[%s5586_s2 + $0xf0] sm:$0xff] }
 0x19a   : > { %2943 = vmatpush1.bf16.msra.mxu0 %v3669_v63  ;;  %3151 = vmatprep.subr.bf16.mxu1 %v3786_v18  ;;  %v1369_v63 = vld [vmem:[%s5586_s2 + $0x2e8] sm:$0xff]  ;;  %v3857_v9 = vcombine.low %v1495_v3, %v1499_v5 }
 0x19b   : > { %2944 = vmatprep.subr.bf16.mxu0 %v3662_v1  ;;  %v3866_v1 = vcombine.high %v1503_v59, %v1507_v61  ;;  %v3726_v4 = vcombine.high %v1365_v62, %v1369_v63  ;;  %v3725_v11 = vcombine.low %v1365_v62, %v1369_v63  ;;  %v1349_v18 = vld [vmem:[%s5586_s2 + $0x248] sm:$0xff]  ;;  %v1298_v59 = vld [vmem:[%s5586_s2 + $0xb0] sm:$0xff] }
 0x19c   : > { %v1286_v62 = vld [vmem:[%s5586_s2 + $0x50] sm:$0xff] }
 0x19d   : > { %3152 = vmatpush1.bf16.msra.mxu1 %v3785_v17  ;;  %v1491_v17 = vld [vmem:[%s5586_s2 + $0x6b8] sm:$0xff]  ;;  %v1290_v63 = vld [vmem:[%s5586_s2 + $0x70] sm:$0xff] }
 0x19e   : > { %2945 = vmatpush1.bf16.msra.mxu0 %v3661_v8  ;;  %3153 = vmatprep.subr.bf16.mxu1 %v3778_v27  ;;  %v1361_v8 = vld [vmem:[%s5586_s2 + $0x2a8] sm:$0xff]  ;;  %v3849_v21 = vcombine.low %v1487_v12, %v1491_v17 }
 0x19f   : > { %2946 = vmatprep.subr.bf16.mxu0 %v3654_v10  ;;  %v3858_v10 = vcombine.high %v1495_v3, %v1499_v5  ;;  %v3718_v13 = vcombine.high %v1357_v6, %v1361_v8  ;;  %v3717_v23 = vcombine.low %v1357_v6, %v1361_v8  ;;  %v1341_v27 = vld [vmem:[%s5586_s2 + $0x208] sm:$0xff]  ;;  %v1282_v3 = vld [vmem:[%s5586_s2 + $0x30] sm:$0xff] }
 0x1a0   : > { %v1398_v6 = vld [vmem:[%s5586_s2 + $0x3d0] sm:$0xff] }
 0x1a1   : > { %3154 = vmatpush1.bf16.msra.mxu1 %v3777_v26  ;;  %v1483_v26 = vld [vmem:[%s5586_s2 + $0x678] sm:$0xff]  ;;  %v1402_v8 = vld [vmem:[%s5586_s2 + $0x3f0] sm:$0xff] }
 0x1a2   : > { %2947 = vmatpush1.bf16.msra.mxu0 %v3653_v19  ;;  %3155 = vmatprep.subr.bf16.mxu1 %v3770_v35  ;;  %v1353_v19 = vld [vmem:[%s5586_s2 + $0x268] sm:$0xff]  ;;  %v3841_v29 = vcombine.low %v1479_v24, %v1483_v26  ;;  %v1334_v35 = vld [vmem:[%s5586_s2 + $0x1d0] sm:$0xff] }
 0x1a3   : > { %2948 = vmatprep.subr.bf16.mxu0 %v3646_v22  ;;  %v3850_v22 = vcombine.high %v1487_v12, %v1491_v17  ;;  %v3710_v25 = vcombine.high %v1349_v18, %v1353_v19  ;;  %v3709_v31 = vcombine.low %v1349_v18, %v1353_v19  ;;  %v1394_v12 = vld [vmem:[%s5586_s2 + $0x3b0] sm:$0xff] }
 0x1a4   : > { %v1382_v18 = vld [vmem:[%s5586_s2 + $0x350] sm:$0xff] }
 0x1a5   : > { %3156 = vmatpush1.bf16.msra.mxu1 %v3769_v34  ;;  %v1475_v34 = vld [vmem:[%s5586_s2 + $0x638] sm:$0xff]  ;;  %v1386_v19 = vld [vmem:[%s5586_s2 + $0x370] sm:$0xff] }
 0x1a6   : > { %2949 = vmatpush1.bf16.msra.mxu0 %v3645_v28  ;;  %3157 = vmatprep.subr.bf16.mxu1 %v3890_v44  ;;  %v1345_v28 = vld [vmem:[%s5586_s2 + $0x228] sm:$0xff]  ;;  %v3833_v37 = vcombine.low %v1471_v32, %v1475_v34  ;;  %v5257_v44 = vpop.f32.mrf.mxu1 }
 0x1a7   : > { %2950 = vmatprep.subr.bf16.mxu0 %v3638_v30  ;;  %v3842_v30 = vcombine.high %v1479_v24, %v1483_v26  ;;  %v3702_v33 = vcombine.high %v1341_v27, %v1345_v28  ;;  %v3701_v38 = vcombine.low %v1341_v27, %v1345_v28  ;;  %v1378_v24 = vld [vmem:[%s5586_s2 + $0x330] sm:$0xff] }
 0x1a8   : > { %v1366_v27 = vld [vmem:[%s5586_s2 + $0x2d0] sm:$0xff] }
 0x1a9   : > { %3158 = vmatpush2.bf16.msra.mxu1 %v3889_v42  ;;  %v1330_v42 = vld [vmem:[%s5586_s2 + $0x1b0] sm:$0xff] }
 0x1aa   : > { %2951 = vmatpush1.bf16.msra.mxu0 %v3637_v36  ;;  %3159 = vmatprep.subr.bf16.mxu1 %v3882_v51  ;;  %v1338_v36 = vld [vmem:[%s5586_s2 + $0x1f0] sm:$0xff]  ;;  %v3688_v46 = vcombine.high %v1326_v40, %v1330_v42  ;;  %v3680_v51 = vcombine.high %v1318_v48, %v1322_v49 }
 0x1ab   : > { %2952 = vmatprep.subr.bf16.mxu0 %v3758_v58  ;;  %v3834_v58 = vcombine.high %v1471_v32, %v1475_v34  ;;  %v3696_v39 = vcombine.high %v1334_v35, %v1338_v36  ;;  %v1370_v28 = vld [vmem:[%s5586_s2 + $0x2f0] sm:$0xff] }
 0x1ac   : > { %v1362_v32 = vld [vmem:[%s5586_s2 + $0x2b0] sm:$0xff] }
 0x1ad   : > { %3160 = vmatpush2.bf16.msra.mxu1 %v3881_v50  ;;  %v3687_v50 = vcombine.low %v1326_v40, %v1330_v42 }
 0x1ae   : > { %2953 = vmatpush2.bf16.msra.mxu0 %v3757_v45  ;;  %3161 = vmatprep.subr.bf16.mxu1 %v3874_v56  ;;  %v3695_v45 = vcombine.low %v1334_v35, %v1338_v36  ;;  %v3664_v56 = vcombine.high %v1302_v20, %v1306_v54  ;;  %v1350_v35 = vld [vmem:[%s5586_s2 + $0x250] sm:$0xff] }
 0x1af   : > { %2954 = vmatprep.subr.bf16.mxu0 %v3750_v47  ;;  %v5260_v47 = vpop.f32.mrf.mxu1  ;;  %v1354_v36 = vld [vmem:[%s5586_s2 + $0x270] sm:$0xff] }
 0x1b0   : > { %v3711_v40 = vcombine.low %v1350_v35, %v1354_v36 }
 0x1b1   : > { %3162 = vmatpush2.bf16.msra.mxu1 %v3873_v55  ;;  %v2933_v7 = vpop.f32.mrf.mxu1 }
 0x1b2   : > { %2955 = vmatpush2.bf16.msra.mxu0 %v3749_v52  ;;  %3163 = vmatprep.subr.bf16.mxu1 %v3866_v1  ;;  %v1310_v52 = vld [vmem:[%s5586_s2 + $0x110] sm:$0xff]  ;;  %v3648_v1 = vcombine.high %v1286_v62, %v1290_v63  ;;  %v1327_v7 = vld [vmem:[%s5586_s2 + $0x198] sm:$0xff] }
 0x1b3   : > { %2956 = vmatprep.subr.bf16.mxu0 %v3742_v15  ;;  %v3679_v15 = vcombine.low %v1318_v48, %v1322_v49  ;;  %v3672_v16 = vcombine.high %v1310_v52, %v1314_v53  ;;  %v3671_v55 = vcombine.low %v1310_v52, %v1314_v53  ;;  %v1319_v53 = vld [vmem:[%s5586_s2 + $0x158] sm:$0xff] }
 0x1b5   : > { %3164 = vmatpush2.bf16.msra.mxu1 %v3865_v0 }
 0x1b6   : > { %2957 = vmatpush2.bf16.msra.mxu0 %v3741_v57  ;;  %3165 = vmatprep.subr.bf16.mxu1 %v3858_v10  ;;  %v1294_v57 = vld [vmem:[%s5586_s2 + $0x90] sm:$0xff]  ;;  %v3760_v10 = vcombine.high %v1398_v6, %v1402_v8 }
 0x1b7   : > { %2958 = vmatprep.subr.bf16.mxu0 %v3734_v60  ;;  %v3663_v60 = vcombine.low %v1302_v20, %v1306_v54  ;;  %v3656_v61 = vcombine.high %v1294_v57, %v1298_v59  ;;  %v3655_v0 = vcombine.low %v1294_v57, %v1298_v59  ;;  %v1315_v57 = vld [vmem:[%s5586_s2 + $0x138] sm:$0xff] }
 0x1b9   : > { %3166 = vmatpush2.bf16.msra.mxu1 %v3857_v9 }
 0x1ba   : > { %2959 = vmatpush2.bf16.msra.mxu0 %v3733_v2  ;;  %3167 = vmatprep.subr.bf16.mxu1 %v3850_v22  ;;  %v1278_v2 = vld [vmem:[%s5586_s2 + $0x10] sm:$0xff]  ;;  %v3744_v22 = vcombine.high %v1382_v18, %v1386_v19 }
 0x1bb   : > { %2960 = vmatprep.subr.bf16.mxu0 %v3726_v4  ;;  %v3647_v4 = vcombine.low %v1286_v62, %v1290_v63  ;;  %v3640_v5 = vcombine.high %v1278_v2, %v1282_v3  ;;  %v3639_v9 = vcombine.low %v1278_v2, %v1282_v3  ;;  %v1307_v62 = vld [vmem:[%s5586_s2 + $0xf8] sm:$0xff] }
 0x1bc   : > { %v1299_v2 = vld [vmem:[%s5586_s2 + $0xb8] sm:$0xff] }
 0x1bd   : > { %3168 = vmatpush2.bf16.msra.mxu1 %v3849_v21 }
 0x1be   : > { %2961 = vmatpush2.bf16.msra.mxu0 %v3725_v11  ;;  %3169 = vmatprep.subr.bf16.mxu1 %v3842_v30  ;;  %v1390_v11 = vld [vmem:[%s5586_s2 + $0x390] sm:$0xff]  ;;  %v3728_v30 = vcombine.high %v1366_v27, %v1370_v28 }
 0x1bf   : > { %2962 = vmatprep.subr.bf16.mxu0 %v3718_v13  ;;  %v3759_v13 = vcombine.low %v1398_v6, %v1402_v8  ;;  %v3752_v17 = vcombine.high %v1390_v11, %v1394_v12  ;;  %v3751_v21 = vcombine.low %v1390_v11, %v1394_v12  ;;  %v1291_v6 = vld [vmem:[%s5586_s2 + $0x78] sm:$0xff] }
 0x1c0   : > { %v1283_v11 = vld [vmem:[%s5586_s2 + $0x38] sm:$0xff] }
 0x1c1   : > { %3170 = vmatpush2.bf16.msra.mxu1 %v3841_v29 }
 0x1c2   : > { %2963 = vmatpush2.bf16.msra.mxu0 %v3717_v23  ;;  %3171 = vmatprep.subr.bf16.mxu1 %v3834_v58  ;;  %v1374_v23 = vld [vmem:[%s5586_s2 + $0x310] sm:$0xff]  ;;  %v3712_v58 = vcombine.high %v1350_v35, %v1354_v36  ;;  %v1371_v35 = vld [vmem:[%s5586_s2 + $0x2f8] sm:$0xff] }
 0x1c3   : > { %2964 = vmatprep.subr.bf16.mxu0 %v3710_v25  ;;  %v3743_v25 = vcombine.low %v1382_v18, %v1386_v19  ;;  %v3736_v26 = vcombine.high %v1374_v23, %v1378_v24  ;;  %v3735_v29 = vcombine.low %v1374_v23, %v1378_v24  ;;  %v1403_v18 = vld [vmem:[%s5586_s2 + $0x3f8] sm:$0xff] }
 0x1c4   : > { %v1395_v23 = vld [vmem:[%s5586_s2 + $0x3b8] sm:$0xff] }
 0x1c5   : > { %3172 = vmatpush2.bf16.msra.mxu1 %v3833_v37 }
 0x1c6   : > { %2965 = vmatpush2.bf16.msra.mxu0 %v3709_v31  ;;  %v1358_v31 = vld [vmem:[%s5586_s2 + $0x290] sm:$0xff] }
 0x1c7   : > { %2966 = vmatprep.subr.bf16.mxu0 %v3702_v33  ;;  %v3727_v33 = vcombine.low %v1366_v27, %v1370_v28  ;;  %v3720_v34 = vcombine.high %v1358_v31, %v1362_v32  ;;  %v3719_v37 = vcombine.low %v1358_v31, %v1362_v32  ;;  %v1387_v27 = vld [vmem:[%s5586_s2 + $0x378] sm:$0xff] }
 0x1c8   : > { %3174 = vmatmul.mubr.bf16.vlgmr.msra.gmra.mxu1 %v4820_v14  ;;  %v2934_v14 = vpop.f32.mrf.mxu1  ;;  %v1379_v31 = vld [vmem:[%s5586_s2 + $0x338] sm:$0xff] }
 0x1ca   : > { %2967 = vmatpush2.bf16.msra.mxu0 %v3701_v38  ;;  %v1342_v38 = vld [vmem:[%s5586_s2 + $0x210] sm:$0xff] }
 0x1cb   : > { %3018 = vmatprep.subr.bf16.mxu0 %v3696_v39  ;;  %v1346_v39 = vld [vmem:[%s5586_s2 + $0x230] sm:$0xff] }
 0x1cc   : > { %v3704_v42 = vcombine.high %v1342_v38, %v1346_v39  ;;  %v3703_v48 = vcombine.low %v1342_v38, %v1346_v39  ;;  %v1363_v38 = vld [vmem:[%s5586_s2 + $0x2b8] sm:$0xff] }
 0x1cd   : > { %2969 = vmatmul.mubr.bf16.vlgmr.msra.gmra.mxu0 %v5065_v43 }
 0x1ce   : > { %3019 = vmatpush1.bf16.msra.mxu0 %v3695_v45  ;;  %3050 = vmatprep.mubr.bf16.mxu0 %v5059_v41  ;;  %v1335_v45 = vld [vmem:[%s5586_s2 + $0x1d8] sm:$0xff] }
 0x1cf   : > { %3020 = vmatprep.subr.bf16.mxu0 %v3688_v46  ;;  %v1339_v46 = vld [vmem:[%s5586_s2 + $0x1f8] sm:$0xff] }
 0x1d0   : > { %v3698_v49 = vcombine.high %v1335_v45, %v1339_v46 }
 0x1d2   : > { %3021 = vmatpush1.bf16.msra.mxu0 %v3687_v50  ;;  %v1331_v50 = vld [vmem:[%s5586_s2 + $0x1b8] sm:$0xff] }
 0x1d3   : > { %3022 = vmatprep.subr.bf16.mxu0 %v3680_v51  ;;  %v3697_v51 = vcombine.low %v1335_v45, %v1339_v46  ;;  %v3690_v52 = vcombine.high %v1327_v7, %v1331_v50  ;;  %v3689_v20 = vcombine.low %v1327_v7, %v1331_v50  ;;  %v1355_v45 = vld [vmem:[%s5586_s2 + $0x278] sm:$0xff] }
 0x1d4   : > { %v1347_v7 = vld [vmem:[%s5586_s2 + $0x238] sm:$0xff] }
 0x1d6   : > { %3023 = vmatpush1.bf16.msra.mxu0 %v3679_v15  ;;  %v1323_v15 = vld [vmem:[%s5586_s2 + $0x178] sm:$0xff] }
 0x1d7   : > { %3024 = vmatprep.subr.bf16.mxu0 %v3672_v16 }
 0x1da   : > { %3025 = vmatpush1.bf16.msra.mxu0 %v3671_v55  ;;  %v3682_v55 = vcombine.high %v1319_v53, %v1323_v15 }
 0x1db   : > { %3026 = vmatprep.subr.bf16.mxu0 %v3664_v56  ;;  %v1311_v56 = vld [vmem:[%s5586_s2 + $0x118] sm:$0xff] }
 0x1dc   : > { %v3673_v63 = vcombine.low %v1311_v56, %v1315_v57 }
 0x1de   : > { %3027 = vmatpush1.bf16.msra.mxu0 %v3663_v60  ;;  %v3681_v60 = vcombine.low %v1319_v53, %v1323_v15 }
 0x1df   : > { %3028 = vmatprep.subr.bf16.mxu0 %v3656_v61  ;;  %v3674_v61 = vcombine.high %v1311_v56, %v1315_v57 }
 0x1e2   : > { %3029 = vmatpush1.bf16.msra.mxu0 %v3655_v0  ;;  %v5360_v14 = vpop.f32.mrf.mxu1 }
 0x1e3   : > { %3030 = vmatprep.subr.bf16.mxu0 %v3648_v1  ;;  %v1295_v1 = vld [vmem:[%s5586_s2 + $0x98] sm:$0xff] }
 0x1e4   : > { %v5368_v16 = vpop.f32.mrf.mxu1  ;;  %v3657_v8 = vcombine.low %v1295_v1, %v1299_v2 }
 0x1e6   : > { %3031 = vmatpush1.bf16.msra.mxu0 %v3647_v4  ;;  %v3015_v54 = vpop.f32.mrf.mxu1  ;;  %v3658_v4 = vcombine.high %v1295_v1, %v1299_v2 }
 0x1e7   : > { %3032 = vmatprep.subr.bf16.mxu0 %v3640_v5  ;;  %v1287_v5 = vld [vmem:[%s5586_s2 + $0x58] sm:$0xff] }
 0x1e8   : > { %v3016_v59 = vpop.f32.mrf.mxu1  ;;  %v3649_v12 = vcombine.low %v1287_v5, %v1291_v6 }
 0x1ea   : > { %3033 = vmatpush1.bf16.msra.mxu0 %v3639_v9  ;;  %v3650_v9 = vcombine.high %v1287_v5, %v1291_v6  ;;  %v3982_v5 = vld [vmem:[%s5588_s4 + $0x70] sm:$0xff]  }
 0x1eb   : > { %3034 = vmatprep.subr.bf16.mxu0 %v3760_v10  ;;  %v1279_v10 = vld [vmem:[%s5586_s2 + $0x18] sm:$0xff]  ;;  %v3983_v6 = vld [vmem:[%s5588_s4 + $0x30] sm:$0xff]  }
 0x1ec   : > { %v3641_v19 = vcombine.low %v1279_v10, %v1283_v11 }
 0x1ee   : > { %3035 = vmatpush2.bf16.msra.mxu0 %v3759_v13  ;;  %v3642_v13 = vcombine.high %v1279_v10, %v1283_v11  ;;  %v3985_v10 = vld [vmem:[%s5588_s4 + $0x28] sm:$0xff]   ;;  %v3986_v11 = vld [vmem:[%s5588_s4 + $0x60] sm:$0xff]  }
 0x1ef   : > { %3036 = vmatprep.subr.bf16.mxu0 %v3752_v17  ;;  %v1399_v17 = vld [vmem:[%s5586_s2 + $0x3d8] sm:$0xff] }
 0x1f0   : > { %v3761_v24 = vcombine.low %v1399_v17, %v1403_v18 }
 0x1f2   : > { %3037 = vmatpush2.bf16.msra.mxu0 %v3751_v21  ;;  %v3762_v21 = vcombine.high %v1399_v17, %v1403_v18  ;;  %v3987_v18 = vld [vmem:[%s5588_s4 + $0x20] sm:$0xff]  }
 0x1f3   : > { %3038 = vmatprep.subr.bf16.mxu0 %v3744_v22  ;;  %v1391_v22 = vld [vmem:[%s5586_s2 + $0x398] sm:$0xff] }
 0x1f4   : > { %v3753_v28 = vcombine.low %v1391_v22, %v1395_v23 }
 0x1f6   : > { %3039 = vmatpush2.bf16.msra.mxu0 %v3743_v25  ;;  %v3754_v25 = vcombine.high %v1391_v22, %v1395_v23 }
 0x1f7   : > { %3040 = vmatprep.subr.bf16.mxu0 %v3736_v26  ;;  %v1383_v26 = vld [vmem:[%s5586_s2 + $0x358] sm:$0xff] }
 0x1f8   : > { %v3745_v32 = vcombine.low %v1383_v26, %v1387_v27 }
 0x1fa   : > { %3041 = vmatpush2.bf16.msra.mxu0 %v3735_v29  ;;  %v3746_v29 = vcombine.high %v1383_v26, %v1387_v27  ;;  %v3990_v27 = vld [vmem:[%s5588_s4 + $0x50] sm:$0xff]  }
 0x1fb   : > { %3042 = vmatprep.subr.bf16.mxu0 %v3728_v30  ;;  %v1375_v30 = vld [vmem:[%s5586_s2 + $0x318] sm:$0xff] }
 0x1fc   : > { %v3737_v36 = vcombine.low %v1375_v30, %v1379_v31 }
 0x1fe   : > { %3043 = vmatpush2.bf16.msra.mxu0 %v3727_v33  ;;  %v3738_v33 = vcombine.high %v1375_v30, %v1379_v31  ;;  %v3991_v31 = vld [vmem:[%s5588_s4 + $0x10] sm:$0xff]  }
 0x1ff   : > { %3044 = vmatprep.subr.bf16.mxu0 %v3720_v34  ;;  %v1367_v34 = vld [vmem:[%s5586_s2 + $0x2d8] sm:$0xff] }
 0x200   : > { %v3729_v39 = vcombine.low %v1367_v34, %v1371_v35 }
 0x202   : > { %3045 = vmatpush2.bf16.msra.mxu0 %v3719_v37  ;;  %v3730_v37 = vcombine.high %v1367_v34, %v1371_v35 }
 0x203   : > { %3046 = vmatprep.subr.bf16.mxu0 %v3712_v58  ;;  %v1359_v58 = vld [vmem:[%s5586_s2 + $0x298] sm:$0xff] }
 0x204   : > { %v3721_v46 = vcombine.low %v1359_v58, %v1363_v38 }
 0x206   : > { %3047 = vmatpush2.bf16.msra.mxu0 %v3711_v40  ;;  %v3722_v40 = vcombine.high %v1359_v58, %v1363_v38  ;;  %v3994_v38 = vld [vmem:[%s5588_s4 + $0x40] sm:$0xff]  }
 0x207   : > { %3048 = vmatprep.subr.bf16.mxu0 %v3704_v42  ;;  %v1351_v42 = vld [vmem:[%s5586_s2 + $0x258] sm:$0xff] }
 0x208   : > { %v3713_v50 = vcombine.low %v1351_v42, %v1355_v45 }
 0x20a   : > { %3049 = vmatpush2.bf16.msra.mxu0 %v3703_v48  ;;  %v3714_v48 = vcombine.high %v1351_v42, %v1355_v45 }
 0x20b   : > { %3100 = vmatprep.subr.bf16.mxu0 %v3698_v49  ;;  %v1343_v49 = vld [vmem:[%s5586_s2 + $0x218] sm:$0xff] }
 0x20d   : > { %3051 = vmatmul.mubr.bf16.vlgmr.msra.gmra.mxu0 %v5065_v43 }
 0x20e   : > { %3101 = vmatpush1.bf16.msra.mxu0 %v3697_v51  ;;  %3132 = vmatprep.mubr.bf16.mxu0 %v5059_v41  ;;  %v1303_v41 = vld [vmem:[%s5586_s2 + $0xd8] sm:$0xff]  ;;  %v3706_v51 = vcombine.high %v1343_v49, %v1347_v7 }
 0x20f   : > { %3102 = vmatprep.subr.bf16.mxu0 %v3690_v52  ;;  %v3666_v0 = vcombine.high %v1303_v41, %v1307_v62  ;;  %v3665_v3 = vcombine.low %v1303_v41, %v1307_v62  ;;  %v3705_v52 = vcombine.low %v1343_v49, %v1347_v7 }
 0x212   : > { %3103 = vmatpush1.bf16.msra.mxu0 %v3689_v20 }
 0x213   : > { %3104 = vmatprep.subr.bf16.mxu0 %v3682_v55 }
 0x216   : > { %3105 = vmatpush1.bf16.msra.mxu0 %v3681_v60 }
 0x217   : > { %3106 = vmatprep.subr.bf16.mxu0 %v3674_v61 }
 0x21a   : > { %3107 = vmatpush1.bf16.msra.mxu0 %v3673_v63 }
 0x21b   : > { %3108 = vmatprep.subr.bf16.mxu0 %v3666_v0 }
 0x21e   : > { %3109 = vmatpush1.bf16.msra.mxu0 %v3665_v3  ;;  %v3981_v3 = vld [vmem:[%s5588_s4 + $0x38] sm:$0xff]  }
 0x21f   : > { %3110 = vmatprep.subr.bf16.mxu0 %v3658_v4  ;;  %v1534_v4 = vlaneseq }
 0x222   : > { %3111 = vmatpush1.bf16.msra.mxu0 %v3657_v8  ;;  %v5471_v8 = vshrl.u32 %v1534_v4, 7 }
 0x223   : > { %3112 = vmatprep.subr.bf16.mxu0 %v3650_v9  ;;  %v3984_v9 = vld [vmem:[%s5588_s4 + $0x68] sm:$0xff]  }
 0x224   : > { %v1544_v17 = vsub.s32 2, %v5471_v8  ;;  %v1540_v23 = vsub.s32 1, %v5471_v8 }
 0x226   : > { %3113 = vmatpush1.bf16.msra.mxu0 %v3649_v12  ;;  %v1536_v12 = vsub.s32 0, %v5471_v8 }
 0x227   : > { %3114 = vmatprep.subr.bf16.mxu0 %v3642_v13  ;;  %v5486_v13 = vld [vmem:[%s5587_s3] sm:$0xff] }
 0x228   : > { %v1537_v22 = vrot.slane %v5486_v13, %v1536_v12 }
 0x22a   : > { %3115 = vmatpush1.bf16.msra.mxu0 %v3641_v19  ;;  %v1548_v19 = vsub.s32 3, %v5471_v8 }
 0x22b   : > { %3116 = vmatprep.subr.bf16.mxu0 %v3762_v21  ;;  %v3988_v21 = vld [vmem:[%s5588_s4 + $0x58] sm:$0xff]  }
 0x22c   : > { %v1549_v26 = vrot.slane %v5486_v13, %v1548_v19 }
 0x22e   : > { %3117 = vmatpush2.bf16.msra.mxu0 %v3761_v24  ;;  %v1545_v24 = vrot.slane %v5486_v13, %v1544_v17 }
 0x22f   : > { %3118 = vmatprep.subr.bf16.mxu0 %v3754_v25  ;;  %v3989_v25 = vld [vmem:[%s5588_s4 + $0x18] sm:$0xff]  }
 0x232   : > { %3119 = vmatpush2.bf16.msra.mxu0 %v3753_v28 }
 0x233   : > { %3120 = vmatprep.subr.bf16.mxu0 %v3746_v29  ;;  %v1541_v29 = vrot.slane %v5486_v13, %v1540_v23 }
 0x236   : > { %3121 = vmatpush2.bf16.msra.mxu0 %v3745_v32  ;;  %v5450_v53 = vpop.f32.mrf.mxu1 }
 0x237   : > { %3122 = vmatprep.subr.bf16.mxu0 %v3738_v33  ;;  %v3992_v33 = vld [vmem:[%s5588_s4 + $0x48] sm:$0xff]  }
 0x238   : > { %v5452_v15 = vpop.f32.mrf.mxu1 }
 0x23a   : > { %3123 = vmatpush2.bf16.msra.mxu0 %v3737_v36  ;;  %v3097_v54 = vpop.f32.mrf.mxu1 }
 0x23b   : > { %3124 = vmatprep.subr.bf16.mxu0 %v3730_v37  ;;  %v3993_v37 = vld [vmem:[%s5588_s4 + $0x8] sm:$0xff]  }
 0x23c   : > { %v3098_v56 = vpop.f32.mrf.mxu1 }
 0x23e   : > { %3125 = vmatpush2.bf16.msra.mxu0 %v3729_v39 }
 0x23f   : > { %3126 = vmatprep.subr.bf16.mxu0 %v3722_v40 }
 0x242   : > { %3127 = vmatpush2.bf16.msra.mxu0 %v3721_v46 }
 0x243   : > { %3128 = vmatprep.subr.bf16.mxu0 %v3714_v48  ;;  %v1556_v48 = vsub.s32 5, %v5471_v8 }
 0x246   : > { %3129 = vmatpush2.bf16.msra.mxu0 %v3713_v50 }
 0x247   : > { %3130 = vmatprep.subr.bf16.mxu0 %v3706_v51 }
 0x24a   : > { %3131 = vmatpush2.bf16.msra.mxu0 %v3705_v52 }
 0x24d   : > { %3133 = vmatmul.mubr.bf16.vlgmr.msra.gmra.mxu0 %v5065_v43  ;;  %v2888_v20 = vpop.f32.mrf.mxu0  ;;  %v3980_v43 = vld [vmem:[%s5588_s4 + $0x78] sm:$0xff]  }
 0x24e   : > { %3918 = vmatprep.subr.bf16.mxu0 %v3980_v43  ;;  %v2889_v28 = vadd.f32 %v2888_v20, %v1537_v22  ;;  %v1557_v20 = vrot.slane %v5486_v13, %v1556_v48 }
 0x24f   : > { %v2890_v55 = vpop.f32.mrf.mxu0  ;;  %3919 = vmatpush3.bf16.msra.mxu0 %v3981_v3  ;;  %v3182_v3 = vld [vmem:[#allocation4] sm:$0xff] }
 0x250   : > { %3920 = vmatprep.subr.bf16.mxu0 %v3982_v5  ;;  %v2930_v34 = vadd.f32 %v5257_v44, %v2889_v28  ;;  %v2891_v35 = vadd.f32 %v2890_v55, %v1541_v29  ;;  %v3995_v44 = vld [vmem:[%s5588_s4] sm:$0xff]  }
 0x251   : > { %v2892_v57 = vpop.f32.mrf.mxu0 }
 0x252   : > { %v3891_v39 = vmul.f32 -1.442695, %v2930_v34  ;;  %v2932_v40 = vadd.f32 %v5260_v47, %v2891_v35 }
 0x253   : > { %v2893_v59 = vpop.f32.mrf.mxu0  ;;  %3921 = vmatpush3.bf16.msra.mxu0 %v3983_v6  ;;  %v3183_v6 = vld [vmem:[#allocation4 + $0x8] sm:$0xff] }
 0x254   : > { %3922 = vmatprep.subr.bf16.mxu0 %v3984_v9  ;;  %4028 = vpow2.f32 %v3891_v39  ;;  %v3892_v45 = vmul.f32 -1.442695, %v2932_v40 }
 0x257   : > { %3923 = vmatpush3.bf16.msra.mxu0 %v3985_v10 }
 0x258   : > { %3924 = vmatprep.subr.bf16.mxu0 %v3986_v11 }
 0x25b   : > { %3925 = vmatpush3.bf16.msra.mxu0 %v3987_v18 }
 0x25c   : > { %3926 = vmatprep.subr.bf16.mxu0 %v3988_v21  ;;  %v1564_v21 = vsub.s32 7, %v5471_v8 }
 0x25e   : > { %v1565_v23 = vrot.slane %v5486_v13, %v1564_v21 }
 0x25f   : > { %3927 = vmatpush3.bf16.msra.mxu0 %v3989_v25 }
 0x260   : > { %3928 = vmatprep.subr.bf16.mxu0 %v3990_v27 }
 0x261   : > { %v4029_v46 = vpop.eup %4028 }
 0x262   : > { %v3190_v50 = vadd.f32 1.0, %v4029_v46 }
 0x263   : > { %3929 = vmatpush3.bf16.msra.mxu0 %v3991_v31 }
 0x264   : > { %3930 = vmatprep.subr.bf16.mxu0 %v3992_v33 }
 0x267   : > { %3931 = vmatpush3.bf16.msra.mxu0 %v3993_v37 }
 0x268   : > { %3932 = vmatprep.subr.bf16.mxu0 %v3994_v38 }
 0x26b   : > { %3933 = vmatpush3.bf16.msra.mxu0 %v3995_v44 }
 0x288   : > { %v5455_v60 = vpop.f32.mrf.mxu1 }
 0x28a   : > { %v5457_v41 = vpop.f32.mrf.mxu1 }
 0x28c   : > { %v3179_v63 = vpop.f32.mrf.mxu1 }
 0x28d   : > { %v2970_v61 = vpop.f32.mrf.mxu0 }
 0x28e   : > { %v3180_v1 = vpop.f32.mrf.mxu1  ;;  %v2971_v30 = vadd.f32 %v2970_v61, %v1545_v24 }
 0x28f   : > { %v2972_v62 = vpop.f32.mrf.mxu0 }
 0x290   : > { %v2973_v32 = vadd.f32 %v2972_v62, %v1549_v26  ;;  %v3012_v36 = vadd.f32 %v5360_v14, %v2971_v30 }
 0x291   : > { %v2974_v0 = vpop.f32.mrf.mxu0 }
 0x292   : > { %v3014_v58 = vadd.f32 %v5368_v16, %v2973_v32  ;;  %v3893_v42 = vmul.f32 -1.442695, %v3012_v36  ;;  %v1552_v16 = vsub.s32 4, %v5471_v8 }
 0x293   : > { %v2975_v2 = vpop.f32.mrf.mxu0 }
 0x294   : > { %v3894_v14 = vmul.f32 -1.442695, %v3014_v58  ;;  %4030 = vpow2.f32 %v3893_v42  ;;  %v1553_v7 = vrot.slane %v5486_v13, %v1552_v16 }
 0x296   : > { %4032 = vpow2.f32 %v3894_v14 }
 0x297   : > { %4034 = vpow2.f32 %v3892_v45 }
 0x298   : > { %4036 = vrcp.f32 %v3190_v50 }
 0x2a1   : > { %v4031_v47 = vpop.eup %4030 }
 0x2a2   : > { %v3202_v52 = vadd.f32 1.0, %v4031_v47  ;;  %v3272_v47 = vld [vmem:[%s5589_s5] sm:$0x1] }
 0x2a3   : > { %v4033_v49 = vpop.eup %4032 }
 0x2a4   : > { %v4035_v51 = vpop.eup %4034  ;;  %v3203_v54 = vadd.f32 1.0, %v4033_v49  ;;  %4038 = vrcp.f32 %v3202_v52 }
 0x2a5   : > { %v3191_v57 = vadd.f32 1.0, %v4035_v51  ;;  %v4037_v2 = vpop.eup %4036 }
 0x2a6   : > { %4040 = vrcp.f32 %v3203_v54 }
 0x2b1   : > { %v4039_v43 = vpop.eup %4038 }
 0x2b2   : > { %v3222_v10 = vmul.f32 %v4039_v43, %v3182_v3 }
 0x2b3   : > { %v4041_v4 = vpop.eup %4040 }
 0x2b4   : > { %v3223_v17 = vmul.f32 %v4041_v4, %v3183_v6 }
 0x2cd   : > { %v3052_v55 = vpop.f32.mrf.mxu0 }
 0x2ce   : > { %v3053_v56 = vadd.f32 %v3052_v55, %v1553_v7 }
 0x2cf   : > { %v3054_v59 = vpop.f32.mrf.mxu0 }
 0x2d0   : > { %v3094_v61 = vadd.f32 %v5450_v53, %v3053_v56  ;;  %v3055_v62 = vadd.f32 %v3054_v59, %v1557_v20 }
 0x2d1   : > { %v3056_v63 = vpop.f32.mrf.mxu0 }
 0x2d2   : > { %4042 = vtanh.f32 %v3094_v61  ;;  %v3096_v0 = vadd.f32 %v5452_v15, %v3055_v62  ;;  %v1560_v15 = vsub.s32 6, %v5471_v8 }
 0x2d3   : > { %4044 = vrcp.f32 %v3191_v57  ;;  %v3057_v1 = vpop.f32.mrf.mxu0 }
 0x2d4   : > { %4046 = vtanh.f32 %v3096_v0  ;;  %v1561_v22 = vrot.slane %v5486_v13, %v1560_v15 }
 0x2df   : > { %v4043_v5 = vpop.eup %4042 }
 0x2e0   : > { %v4045_v9 = vpop.eup %4044  ;;  %v3224_v11 = vmul.f32 %v4043_v5, %v4037_v2 }
 0x2e1   : > { %v4047_v12 = vpop.eup %4046 }
 0x2e2   : > { %v3226_v53 = vadd.f32 %v3224_v11, %v3222_v10  ;;  %v3225_v18 = vmul.f32 %v4047_v12, %v4045_v9 }
 0x2e4   : > { %3232 = vst [vmem:[#allocation4] sm:$0xff] %v3226_v53  ;;  %v3227_v19 = vadd.f32 %v3225_v18, %v3223_v17 }
 0x2e6   : > { %3233 = vst [vmem:[#allocation4 + $0x8] sm:$0xff] %v3227_v19 }
 0x30d   : > { %v3134_v24 = vpop.f32.mrf.mxu0 }
 0x30e   : > { %v3135_v25 = vadd.f32 %v3134_v24, %v1561_v22 }
 0x30f   : > { %v3136_v26 = vpop.f32.mrf.mxu0 }
 0x310   : > { %v3176_v27 = vadd.f32 %v5455_v60, %v3135_v25  ;;  %v3137_v28 = vadd.f32 %v3136_v26, %v1565_v23 }
 0x311   : > { %v3138_v29 = vpop.f32.mrf.mxu0 }
 0x312   : > { %v3895_v30 = vmul.f32 -1.442695, %v3176_v27  ;;  %v3178_v31 = vadd.f32 %v5457_v41, %v3137_v28 }
 0x313   : > { %v3139_v32 = vpop.f32.mrf.mxu0 }
 0x314   : > { %4048 = vpow2.f32 %v3895_v30  ;;  %v3896_v33 = vmul.f32 -1.442695, %v3178_v31 }
 0x316   : > { %4050 = vpow2.f32 %v3896_v33 }
 0x317   : > { %4052 = vtanh.f32 %v3226_v53 }
 0x321   : > { %v4049_v34 = vpop.eup %4048 }
 0x322   : > { %v3216_v8 = vadd.f32 1.0, %v4049_v34 }
 0x323   : > { %v4051_v35 = vpop.eup %4050 }
 0x324   : > { %4054 = vrcp.f32 %v3216_v8  ;;  %v3217_v13 = vadd.f32 1.0, %v4051_v35  ;;  %v4053_v36 = vpop.eup %4052 }
 0x325   : > { %4056 = vtanh.f32 %v3227_v19 }
 0x326   : > { %4058 = vrcp.f32 %v3217_v13 }
 0x331   : > { %v4055_v37 = vpop.eup %4054 }
 0x332   : > { %v4057_v60 = vpop.eup %4056  ;;  %v3230_v58 = vmul.f32 %v4055_v37, %v4053_v36 }
 0x333   : > { %v4059_v38 = vpop.eup %4058 }
 0x334   : > { %v3231_v39 = vmul.f32 %v4059_v38, %v4057_v60  ;;  %3234 = vst [vmem:[#allocation2 + $0x18] sm:$0xff] %v3230_v58  ;;  %v3236_v41 = vmax.f32 %v3230_v58, 0.0 }
 0x336   : > { %3235 = vst [vmem:[#allocation2 + $0x8] sm:$0xff] %v3231_v39  ;;  %v3237_v40 = vmax.f32 %v3231_v39, 0.0  ;;  %v3238_v42 = vpack.c.bf16 %v3236_v41, %v3236_v41 }
 0x338   : > { %v3239_v44 = vpack.c.bf16 %v3237_v40, %v3237_v40  ;;  %v3274_v14 = vshrl.u32 %v3238_v42, 16 }
 0x33a   : > { %v3278_v45 = vshrl.u32 %v3239_v44, 16  ;;  %v3276_v46 = vrot.slane %v3274_v14, 1 }
 0x33c   : > { %v3280_v16 = vrot.slane %v3278_v45, 1 }
 0x33e   : > { %3411 = vmatprep.mubr.bf16.mxu0 %v3280_v16 }
 0x33f   : > { %3412 = vmatmul.mubr.bf16.vlgmr.msra.gmra.mxu0 %v3276_v46 }
 0x3ff   : > { %v3934_v48 = vpop.f32.mrf.mxu0 }
 0x401   : > { %v3935_v49 = vpop.f32.mrf.mxu0 }
 0x402   : > { %v3936_v7 = vadd.f32 %v3935_v49, %v3934_v48 }
 0x403   : > { %v3937_v50 = vpop.f32.mrf.mxu0 }
 0x404   : > { %v3414_v51 = vadd.f32 %v3936_v7, %v3272_v47 }
 0x405   : > { %v3938_v52 = vpop.f32.mrf.mxu0 }
 0x406   : > { %v3913_v20 = vmul.f32 -1.442695, %v3414_v51 }
 0x408   : > { %4060 = vpow2.f32 %v3913_v20 }
 0x415   : > { %v4061_v54 = vpop.eup %4060 }
 0x416   : > { %v3422_v55 = vadd.f32 1.0, %v4061_v54 }
 0x418   : > { %4062 = vrcp.f32 %v3422_v55 }
 0x425   : > { %v4063_v56 = vpop.eup %4062 }
 0x426   : > { %3425 = vst [vmem:[%s4221_s15] sm:$0x1] %v4063_v56 }
 0x427   : > { %4077 = shalt.err (!%p4074_p4)
}
 0x428   : > { %s4078_s15 = scalar_lea.hbm %s5546_s19, 16  ;;  %s4082_s10 = scalar_lea.hbm %s5590_s6, 32 }
 0x429   : > { %p4079_p7 = scmp.ne.s32.totalorder %s5546_s19, %s4078_s15  ;;  %p4083_p10 = scmp.lt.s32.totalorder %s5546_s19, %s5590_s6 }
 0x42a   : > { %p4084_p11 = scmp.lt.s32.totalorder %s4082_s10, %s4078_s15 }
 0x42b   : > { %p4080_p8 = pnand %p4079_p7, %p4201_p5 }
 0x42c   : > { %p4085_p12 = por %p4084_p11, %p4083_p10 }
 0x42d   : > { %p4081_p9 = pneg %p4080_p8 }
 0x42f   : > { %p4086_p13 = pnand %p4085_p12, %p4081_p9 }
 0x431   : > { %4089 = shalt.err (!%p4086_p13)
}
 0x432   : > { %3940 = dma.vmem_to_hbm [thread:$0]  (%p4201_p5), %s3440_s16, 16, %s5546_s19, %s3427_s20  }
 0x433 PF: > { %p3946_p0 = scmp.ge.s32.totalorder %s4124_s24, 2  ;;  %s3451_s13 = sand.u32 1, %s4112_s21  }
 0x434   : > { %s3452_s17 = scalar_lea.sflag [#allocation6], %s3451_s13 }
 0x435   : > { %p3943_p1 = pnand %p3946_p0, %p4205_p6 }
 0x437   : > { %p3944_p2 = pneg %p3943_p1 }
 0x439   : > { %4107 = dma.done.wait (%p3944_p2), %s3452_s17, 16  }
 0x43a   : > { %4109 = vsyncadd (%p3944_p2), %s3452_s17, 4294967280  ;;  %p16_p3 = scmp.ge.s32.totalorder %s4188_s27, 4   ;;  %s5593_s21 = smov %s4116_s22 }
 0x43b   : > { %s5594_s22 = smov %s4120_s23  ;;  %s5595_s23 = smov %s4199_s30 }
 0x43c   : > { %s5596_s24 = smov %s4188_s27  ;;  %18 = sbr.rel (!%p16_p3) target bundleno = 3 (0x3), region = 83 }
 0x441   :  { %3456 = vsyncpa [#allocation6], 1 }
 0x442   :  { %3458 = vsyncpa [#allocation6 + $0x1], 1 }

// kernel: forward.4
= control target key start
LH: loop header
LB: loop body
LE: loop exit
PB: predicated region body
PF: predicated region fallthrough
CT: control target
= control target key end

     0   :  { %s11047_s12 = smov 0   ;;  %s15232_s0 = inlined_call_operand.vmem [shape: bf16[16,2560], index: 0, kind: input, shape index: {}]   ;;  %s15233_s1 = inlined_call_operand.vmem [shape: bf16[2560,1024], index: 1, kind: input, shape index: {}]   ;;  %s15234_s2 = inlined_call_operand.vmem [shape: f32[1,1024], index: 2, kind: input, shape index: {}]   ;;  %s15235_s3 = inlined_call_operand.vmem [shape: f32[16,1024], index: 3, kind: output, shape index: {}]  }
   0x1 LB: > { %s9676_s13 = sadd.s32 4294967295, %s11025_s12   ;;  %p9680_p0 = scmp.ge.s32.totalorder %s11025_s12, 1  ;;  %s11025_s12 = sphi %s11047_s12, %s13_s12  }
   0x2   : > { %p137_p1 = scmp.lt.s32.totalorder %s11025_s12, 3 }
   0x4   : > { %p138_p2 = pnand %p9680_p0, %p137_p1 }
   0x5   : > { %p161_p3 = scmp.lt.s32.totalorder (!%p138_p2), %s9676_s13, 1 }
   0x6   : > { %141 = sbr.rel (%p138_p2) target bundleno = 1500 (0x5dc), region = 32 }
   0xb   : > { %v237_v0 = vld [vmem:[%s15233_s1 + $0x1c0] sm:$0xff]  ;;  %s15237_s13 = smov (!%p161_p3, %s9676_s13), 1 }
   0xc   : > { %v241_v1 = vld [vmem:[%s15233_s1 + $0x1e0] sm:$0xff]  ;;  %s10987_s6 = smul.u32 80, %s15237_s13  ;;  %s10986_s29 = sshll.u32 %s15237_s13, 6 }
   0xd   : > { %v365_v2 = vld [vmem:[%s15233_s1 + $0x5c0] sm:$0xff]  ;;  %v9761_v3 = vcombine.high %v237_v0, %v241_v1  ;;  %v9760_v5 = vcombine.low %v237_v0, %v241_v1  ;;  %s12822_s14 = scalar_lea.vmem %s15235_s3, %s10986_s29 }
   0xe   : > { %v369_v4 = vld [vmem:[%s15233_s1 + $0x5e0] sm:$0xff]  ;;  %s11143_s19 = scalar_lea.vmem %s15232_s0, %s10987_s6 }
   0xf   : > { %v229_v6 = vld [vmem:[%s15233_s1 + $0x180] sm:$0xff]  ;;  %v9889_v8 = vcombine.high %v365_v2, %v369_v4  ;;  %v9888_v9 = vcombine.low %v365_v2, %v369_v4  ;;  %7973 = vmatprep.subr.bf16.mxu0 %v9761_v3  ;;  %v11155_v54 = vld [vmem:[%s11143_s19 + $0x8] sm:$0xff] }
  0x10   : > { %v233_v7 = vld [vmem:[%s15233_s1 + $0x1a0] sm:$0xff]  ;;  %7974 = vmatpush1.bf16.msra.mxu0 %v9760_v5  ;;  %v11169_v59 = vcombine.high %v11155_v54, %v11155_v54 }
  0x11   : > { %v9753_v10 = vcombine.high %v229_v6, %v233_v7  ;;  %v357_v11 = vld [vmem:[%s15233_s1 + $0x580] sm:$0xff]  ;;  %8014 = vmatprep.subr.bf16.mxu1 %v9889_v8  ;;  %v9752_v18 = vcombine.low %v229_v6, %v233_v7 }
  0x12   : > { %v361_v12 = vld [vmem:[%s15233_s1 + $0x5a0] sm:$0xff]  ;;  %8015 = vmatpush1.bf16.msra.mxu1 %v9888_v9  ;;  %8046 = vmatprep.mubr.bf16.mxu1 %v11169_v59 }
  0x13   : > { %v221_v13 = vld [vmem:[%s15233_s1 + $0x140] sm:$0xff]  ;;  %v9881_v14 = vcombine.high %v357_v11, %v361_v12  ;;  %7975 = vmatprep.subr.bf16.mxu0 %v9753_v10  ;;  %v9880_v19 = vcombine.low %v357_v11, %v361_v12 }
  0x14   : > { %v225_v15 = vld [vmem:[%s15233_s1 + $0x160] sm:$0xff]  ;;  %7976 = vmatpush1.bf16.msra.mxu0 %v9752_v18 }
  0x15   : > { %v349_v16 = vld [vmem:[%s15233_s1 + $0x540] sm:$0xff]  ;;  %v9745_v20 = vcombine.high %v221_v13, %v225_v15  ;;  %8016 = vmatprep.subr.bf16.mxu1 %v9881_v14  ;;  %v9744_v26 = vcombine.low %v221_v13, %v225_v15 }
  0x16   : > { %v353_v17 = vld [vmem:[%s15233_s1 + $0x560] sm:$0xff]  ;;  %8017 = vmatpush1.bf16.msra.mxu1 %v9880_v19 }
  0x17   : > { %v9873_v21 = vcombine.high %v349_v16, %v353_v17  ;;  %v213_v22 = vld [vmem:[%s15233_s1 + $0x100] sm:$0xff]  ;;  %7977 = vmatprep.subr.bf16.mxu0 %v9745_v20  ;;  %v9872_v27 = vcombine.low %v349_v16, %v353_v17 }
  0x18   : > { %v217_v23 = vld [vmem:[%s15233_s1 + $0x120] sm:$0xff]  ;;  %7978 = vmatpush1.bf16.msra.mxu0 %v9744_v26 }
  0x19   : > { %v341_v24 = vld [vmem:[%s15233_s1 + $0x500] sm:$0xff]  ;;  %v9737_v28 = vcombine.high %v213_v22, %v217_v23  ;;  %8018 = vmatprep.subr.bf16.mxu1 %v9873_v21  ;;  %v9736_v34 = vcombine.low %v213_v22, %v217_v23 }
  0x1a   : > { %v345_v25 = vld [vmem:[%s15233_s1 + $0x520] sm:$0xff]  ;;  %8019 = vmatpush1.bf16.msra.mxu1 %v9872_v27 }
  0x1b   : > { %v9865_v29 = vcombine.high %v341_v24, %v345_v25  ;;  %v205_v30 = vld [vmem:[%s15233_s1 + $0xc0] sm:$0xff]  ;;  %7979 = vmatprep.subr.bf16.mxu0 %v9737_v28  ;;  %v9864_v35 = vcombine.low %v341_v24, %v345_v25 }
  0x1c   : > { %v209_v31 = vld [vmem:[%s15233_s1 + $0xe0] sm:$0xff]  ;;  %7980 = vmatpush1.bf16.msra.mxu0 %v9736_v34 }
  0x1d   : > { %v333_v32 = vld [vmem:[%s15233_s1 + $0x4c0] sm:$0xff]  ;;  %v9729_v36 = vcombine.high %v205_v30, %v209_v31  ;;  %8020 = vmatprep.subr.bf16.mxu1 %v9865_v29  ;;  %v9728_v42 = vcombine.low %v205_v30, %v209_v31 }
  0x1e   : > { %v337_v33 = vld [vmem:[%s15233_s1 + $0x4e0] sm:$0xff]  ;;  %8021 = vmatpush1.bf16.msra.mxu1 %v9864_v35 }
  0x1f   : > { %v9857_v37 = vcombine.high %v333_v32, %v337_v33  ;;  %v197_v38 = vld [vmem:[%s15233_s1 + $0x80] sm:$0xff]  ;;  %7981 = vmatprep.subr.bf16.mxu0 %v9729_v36  ;;  %v9856_v43 = vcombine.low %v333_v32, %v337_v33 }
  0x20   : > { %v201_v39 = vld [vmem:[%s15233_s1 + $0xa0] sm:$0xff]  ;;  %7982 = vmatpush1.bf16.msra.mxu0 %v9728_v42 }
  0x21   : > { %v325_v40 = vld [vmem:[%s15233_s1 + $0x480] sm:$0xff]  ;;  %v9721_v44 = vcombine.high %v197_v38, %v201_v39  ;;  %8022 = vmatprep.subr.bf16.mxu1 %v9857_v37  ;;  %v9720_v50 = vcombine.low %v197_v38, %v201_v39 }
  0x22   : > { %v329_v41 = vld [vmem:[%s15233_s1 + $0x4a0] sm:$0xff]  ;;  %8023 = vmatpush1.bf16.msra.mxu1 %v9856_v43 }
  0x23   : > { %v9849_v45 = vcombine.high %v325_v40, %v329_v41  ;;  %v189_v46 = vld [vmem:[%s15233_s1 + $0x40] sm:$0xff]  ;;  %7983 = vmatprep.subr.bf16.mxu0 %v9721_v44  ;;  %v9848_v51 = vcombine.low %v325_v40, %v329_v41 }
  0x24   : > { %v193_v47 = vld [vmem:[%s15233_s1 + $0x60] sm:$0xff]  ;;  %7984 = vmatpush1.bf16.msra.mxu0 %v9720_v50 }
  0x25   : > { %v317_v48 = vld [vmem:[%s15233_s1 + $0x440] sm:$0xff]  ;;  %v9713_v52 = vcombine.high %v189_v46, %v193_v47  ;;  %8024 = vmatprep.subr.bf16.mxu1 %v9849_v45  ;;  %v9712_v62 = vcombine.low %v189_v46, %v193_v47 }
  0x26   : > { %v321_v49 = vld [vmem:[%s15233_s1 + $0x460] sm:$0xff]  ;;  %8025 = vmatpush1.bf16.msra.mxu1 %v9848_v51 }
  0x27   : > { %v11152_v53 = vld [vmem:[%s11143_s19] sm:$0xff]  ;;  %v9841_v55 = vcombine.high %v317_v48, %v321_v49  ;;  %7985 = vmatprep.subr.bf16.mxu0 %v9713_v52  ;;  %v9840_v63 = vcombine.low %v317_v48, %v321_v49 }
  0x28   : > { %v181_v56 = vld [vmem:[%s15233_s1] sm:$0xff]  ;;  %v11165_v58 = vcombine.high %v11152_v53, %v11152_v53  ;;  %7986 = vmatpush1.bf16.msra.mxu0 %v9712_v62 }
  0x29   : > { %v185_v57 = vld [vmem:[%s15233_s1 + $0x20] sm:$0xff]  ;;  %8026 = vmatprep.subr.bf16.mxu1 %v9841_v55 }
  0x2a   : > { %v309_v60 = vld [vmem:[%s15233_s1 + $0x400] sm:$0xff]  ;;  %8005 = vmatprep.mubr.bf16.mxu0 %v11165_v58  ;;  %v9705_v0 = vcombine.high %v181_v56, %v185_v57  ;;  %v9704_v6 = vcombine.low %v181_v56, %v185_v57  ;;  %8027 = vmatpush1.bf16.msra.mxu1 %v9840_v63 }
  0x2b   : > { %v313_v61 = vld [vmem:[%s15233_s1 + $0x420] sm:$0xff] }
  0x2c   : > { %v9833_v1 = vcombine.high %v309_v60, %v313_v61  ;;  %v301_v2 = vld [vmem:[%s15233_s1 + $0x3c0] sm:$0xff]  ;;  %7987 = vmatprep.subr.bf16.mxu0 %v9705_v0  ;;  %v9832_v7 = vcombine.low %v309_v60, %v313_v61 }
  0x2d   : > { %v305_v3 = vld [vmem:[%s15233_s1 + $0x3e0] sm:$0xff]  ;;  %7988 = vmatpush1.bf16.msra.mxu0 %v9704_v6 }
  0x2e   : > { %v429_v4 = vld [vmem:[%s15233_s1 + $0x7c0] sm:$0xff]  ;;  %v9825_v8 = vcombine.high %v301_v2, %v305_v3  ;;  %8028 = vmatprep.subr.bf16.mxu1 %v9833_v1  ;;  %v9824_v14 = vcombine.low %v301_v2, %v305_v3 }
  0x2f   : > { %v433_v5 = vld [vmem:[%s15233_s1 + $0x7e0] sm:$0xff]  ;;  %8029 = vmatpush1.bf16.msra.mxu1 %v9832_v7 }
  0x30   : > { %v9953_v9 = vcombine.high %v429_v4, %v433_v5  ;;  %v293_v10 = vld [vmem:[%s15233_s1 + $0x380] sm:$0xff]  ;;  %7989 = vmatprep.subr.bf16.mxu0 %v9825_v8  ;;  %v9952_v15 = vcombine.low %v429_v4, %v433_v5 }
  0x31   : > { %v297_v11 = vld [vmem:[%s15233_s1 + $0x3a0] sm:$0xff]  ;;  %7990 = vmatpush2.bf16.msra.mxu0 %v9824_v14 }
  0x32   : > { %v421_v12 = vld [vmem:[%s15233_s1 + $0x780] sm:$0xff]  ;;  %v9817_v16 = vcombine.high %v293_v10, %v297_v11  ;;  %8030 = vmatprep.subr.bf16.mxu1 %v9953_v9  ;;  %v9816_v22 = vcombine.low %v293_v10, %v297_v11 }
  0x33   : > { %v425_v13 = vld [vmem:[%s15233_s1 + $0x7a0] sm:$0xff]  ;;  %8031 = vmatpush2.bf16.msra.mxu1 %v9952_v15 }
  0x34   : > { %v9945_v17 = vcombine.high %v421_v12, %v425_v13  ;;  %v285_v18 = vld [vmem:[%s15233_s1 + $0x340] sm:$0xff]  ;;  %7991 = vmatprep.subr.bf16.mxu0 %v9817_v16  ;;  %v9944_v23 = vcombine.low %v421_v12, %v425_v13  ;;  %v11295_v16 = vcombine.low %v11152_v53, %v11152_v53 }
  0x35   : > { %v289_v19 = vld [vmem:[%s15233_s1 + $0x360] sm:$0xff]  ;;  %7992 = vmatpush2.bf16.msra.mxu0 %v9816_v22  ;;  %v11311_v22 = vld [vmem:[%s11143_s19 + $0x18] sm:$0xff] }
  0x36   : > { %v413_v20 = vld [vmem:[%s15233_s1 + $0x740] sm:$0xff]  ;;  %v9809_v24 = vcombine.high %v285_v18, %v289_v19  ;;  %8032 = vmatprep.subr.bf16.mxu1 %v9945_v17  ;;  %v9808_v30 = vcombine.low %v285_v18, %v289_v19  ;;  %v11304_v19 = vld [vmem:[%s11143_s19 + $0x10] sm:$0xff] }
  0x37   : > { %v417_v21 = vld [vmem:[%s15233_s1 + $0x760] sm:$0xff]  ;;  %8033 = vmatpush2.bf16.msra.mxu1 %v9944_v23 }
  0x38   : > { %v9937_v25 = vcombine.high %v413_v20, %v417_v21  ;;  %v277_v26 = vld [vmem:[%s15233_s1 + $0x300] sm:$0xff]  ;;  %7993 = vmatprep.subr.bf16.mxu0 %v9809_v24  ;;  %v9936_v31 = vcombine.low %v413_v20, %v417_v21  ;;  %v11308_v20 = vcombine.low %v11155_v54, %v11155_v54  ;;  %v11321_v54 = vcombine.high %v11304_v19, %v11304_v19 }
  0x39   : > { %v281_v27 = vld [vmem:[%s15233_s1 + $0x320] sm:$0xff]  ;;  %7994 = vmatpush2.bf16.msra.mxu0 %v9808_v30 }
  0x3a   : > { %v405_v28 = vld [vmem:[%s15233_s1 + $0x700] sm:$0xff]  ;;  %v9801_v32 = vcombine.high %v277_v26, %v281_v27  ;;  %8034 = vmatprep.subr.bf16.mxu1 %v9937_v25  ;;  %v9800_v38 = vcombine.low %v277_v26, %v281_v27 }
  0x3b   : > { %v409_v29 = vld [vmem:[%s15233_s1 + $0x720] sm:$0xff]  ;;  %8035 = vmatpush2.bf16.msra.mxu1 %v9936_v31 }
  0x3c   : > { %v9929_v33 = vcombine.high %v405_v28, %v409_v29  ;;  %v269_v34 = vld [vmem:[%s15233_s1 + $0x2c0] sm:$0xff]  ;;  %7995 = vmatprep.subr.bf16.mxu0 %v9801_v32  ;;  %v9928_v39 = vcombine.low %v405_v28, %v409_v29  ;;  %v11332_v29 = vcombine.high %v11311_v22, %v11311_v22 }
  0x3d   : > { %v273_v35 = vld [vmem:[%s15233_s1 + $0x2e0] sm:$0xff]  ;;  %7996 = vmatpush2.bf16.msra.mxu0 %v9800_v38 }
  0x3e   : > { %v397_v36 = vld [vmem:[%s15233_s1 + $0x6c0] sm:$0xff]  ;;  %v9793_v40 = vcombine.high %v269_v34, %v273_v35  ;;  %8036 = vmatprep.subr.bf16.mxu1 %v9929_v33  ;;  %v9792_v46 = vcombine.low %v269_v34, %v273_v35 }
  0x3f   : > { %v401_v37 = vld [vmem:[%s15233_s1 + $0x6e0] sm:$0xff]  ;;  %8037 = vmatpush2.bf16.msra.mxu1 %v9928_v39 }
  0x40   : > { %v9921_v41 = vcombine.high %v397_v36, %v401_v37  ;;  %v261_v42 = vld [vmem:[%s15233_s1 + $0x280] sm:$0xff]  ;;  %7997 = vmatprep.subr.bf16.mxu0 %v9793_v40  ;;  %v9920_v47 = vcombine.low %v397_v36, %v401_v37 }
  0x41   : > { %v265_v43 = vld [vmem:[%s15233_s1 + $0x2a0] sm:$0xff]  ;;  %7998 = vmatpush2.bf16.msra.mxu0 %v9792_v46 }
  0x42   : > { %v389_v44 = vld [vmem:[%s15233_s1 + $0x680] sm:$0xff]  ;;  %v9785_v48 = vcombine.high %v261_v42, %v265_v43  ;;  %8038 = vmatprep.subr.bf16.mxu1 %v9921_v41  ;;  %v9784_v56 = vcombine.low %v261_v42, %v265_v43 }
  0x43   : > { %v393_v45 = vld [vmem:[%s15233_s1 + $0x6a0] sm:$0xff]  ;;  %8039 = vmatpush2.bf16.msra.mxu1 %v9920_v47 }
  0x44   : > { %v9913_v49 = vcombine.high %v389_v44, %v393_v45  ;;  %v253_v50 = vld [vmem:[%s15233_s1 + $0x240] sm:$0xff]  ;;  %7999 = vmatprep.subr.bf16.mxu0 %v9785_v48  ;;  %v9912_v57 = vcombine.low %v389_v44, %v393_v45 }
  0x45   : > { %v257_v51 = vld [vmem:[%s15233_s1 + $0x260] sm:$0xff]  ;;  %8000 = vmatpush2.bf16.msra.mxu0 %v9784_v56 }
  0x46   : > { %v381_v52 = vld [vmem:[%s15233_s1 + $0x640] sm:$0xff]  ;;  %v9777_v60 = vcombine.high %v253_v50, %v257_v51  ;;  %8040 = vmatprep.subr.bf16.mxu1 %v9913_v49  ;;  %v9776_v2 = vcombine.low %v253_v50, %v257_v51 }
  0x47   : > { %v385_v55 = vld [vmem:[%s15233_s1 + $0x660] sm:$0xff]  ;;  %8041 = vmatpush2.bf16.msra.mxu1 %v9912_v57 }
  0x48   : > { %v9905_v61 = vcombine.high %v381_v52, %v385_v55  ;;  %v245_v62 = vld [vmem:[%s15233_s1 + $0x200] sm:$0xff]  ;;  %8001 = vmatprep.subr.bf16.mxu0 %v9777_v60  ;;  %v9904_v3 = vcombine.low %v381_v52, %v385_v55 }
  0x49   : > { %v249_v63 = vld [vmem:[%s15233_s1 + $0x220] sm:$0xff]  ;;  %8002 = vmatpush2.bf16.msra.mxu0 %v9776_v2 }
  0x4a   : > { %v373_v0 = vld [vmem:[%s15233_s1 + $0x600] sm:$0xff]  ;;  %v9769_v4 = vcombine.high %v245_v62, %v249_v63  ;;  %8042 = vmatprep.subr.bf16.mxu1 %v9905_v61  ;;  %v9768_v10 = vcombine.low %v245_v62, %v249_v63 }
  0x4b   : > { %v377_v1 = vld [vmem:[%s15233_s1 + $0x620] sm:$0xff]  ;;  %8043 = vmatpush2.bf16.msra.mxu1 %v9904_v3 }
  0x4c   : > { %v9897_v5 = vcombine.high %v373_v0, %v377_v1  ;;  %v493_v6 = vld [vmem:[%s15233_s1 + $0x9c0] sm:$0xff]  ;;  %8003 = vmatprep.subr.bf16.mxu0 %v9769_v4  ;;  %v9896_v11 = vcombine.low %v373_v0, %v377_v1 }
  0x4d   : > { %v497_v7 = vld [vmem:[%s15233_s1 + $0x9e0] sm:$0xff]  ;;  %8004 = vmatpush2.bf16.msra.mxu0 %v9768_v10 }
  0x4e   : > { %v621_v8 = vld [vmem:[%s15233_s1 + $0xdc0] sm:$0xff]  ;;  %v10017_v12 = vcombine.high %v493_v6, %v497_v7  ;;  %8044 = vmatprep.subr.bf16.mxu1 %v9897_v5  ;;  %v10016_v21 = vcombine.low %v493_v6, %v497_v7 }
  0x4f   : > { %v625_v9 = vld [vmem:[%s15233_s1 + $0xde0] sm:$0xff]  ;;  %8045 = vmatpush2.bf16.msra.mxu1 %v9896_v11 }
  0x50   : > { %v10145_v13 = vcombine.high %v621_v8, %v625_v9  ;;  %v485_v14 = vld [vmem:[%s15233_s1 + $0x980] sm:$0xff]  ;;  %8055 = vmatprep.subr.bf16.mxu0 %v10017_v12  ;;  %v10144_v53 = vcombine.low %v621_v8, %v625_v9  ;;  %8006 = vmatmul.mubr.bf16.vlgmr.msra.gmra.mxu0 %v11295_v16 }
  0x51   : > { %v489_v15 = vld [vmem:[%s15233_s1 + $0x9a0] sm:$0xff]  ;;  %8056 = vmatpush1.bf16.msra.mxu0 %v10016_v21  ;;  %8087 = vmatprep.mubr.bf16.mxu0 %v11321_v54 }
  0x52   : > { %v613_v17 = vld [vmem:[%s15233_s1 + $0xd80] sm:$0xff]  ;;  %v10009_v23 = vcombine.high %v485_v14, %v489_v15  ;;  %8096 = vmatprep.subr.bf16.mxu1 %v10145_v13  ;;  %8047 = vmatmul.mubr.bf16.vlgmr.msra.gmra.mxu1 %v11308_v20  ;;  %v10008_v30 = vcombine.low %v485_v14, %v489_v15 }
  0x53   : > { %v617_v18 = vld [vmem:[%s15233_s1 + $0xda0] sm:$0xff]  ;;  %8097 = vmatpush1.bf16.msra.mxu1 %v10144_v53  ;;  %8128 = vmatprep.mubr.bf16.mxu1 %v11332_v29 }
  0x54   : > { %v10137_v24 = vcombine.high %v613_v17, %v617_v18  ;;  %v477_v25 = vld [vmem:[%s15233_s1 + $0x940] sm:$0xff]  ;;  %8057 = vmatprep.subr.bf16.mxu0 %v10009_v23  ;;  %v10136_v31 = vcombine.low %v613_v17, %v617_v18 }
  0x55   : > { %v481_v26 = vld [vmem:[%s15233_s1 + $0x960] sm:$0xff]  ;;  %8058 = vmatpush1.bf16.msra.mxu0 %v10008_v30 }
  0x56   : > { %v605_v27 = vld [vmem:[%s15233_s1 + $0xd40] sm:$0xff]  ;;  %v10001_v32 = vcombine.high %v477_v25, %v481_v26  ;;  %8098 = vmatprep.subr.bf16.mxu1 %v10137_v24  ;;  %v10000_v38 = vcombine.low %v477_v25, %v481_v26 }
  0x57   : > { %v609_v28 = vld [vmem:[%s15233_s1 + $0xd60] sm:$0xff]  ;;  %8099 = vmatpush1.bf16.msra.mxu1 %v10136_v31 }
  0x58   : > { %v10129_v33 = vcombine.high %v605_v27, %v609_v28  ;;  %v469_v34 = vld [vmem:[%s15233_s1 + $0x900] sm:$0xff]  ;;  %8059 = vmatprep.subr.bf16.mxu0 %v10001_v32  ;;  %v10128_v39 = vcombine.low %v605_v27, %v609_v28 }
  0x59   : > { %v473_v35 = vld [vmem:[%s15233_s1 + $0x920] sm:$0xff]  ;;  %8060 = vmatpush1.bf16.msra.mxu0 %v10000_v38 }
  0x5a   : > { %v597_v36 = vld [vmem:[%s15233_s1 + $0xd00] sm:$0xff]  ;;  %v9993_v40 = vcombine.high %v469_v34, %v473_v35  ;;  %8100 = vmatprep.subr.bf16.mxu1 %v10129_v33  ;;  %v9992_v46 = vcombine.low %v469_v34, %v473_v35 }
  0x5b   : > { %v601_v37 = vld [vmem:[%s15233_s1 + $0xd20] sm:$0xff]  ;;  %8101 = vmatpush1.bf16.msra.mxu1 %v10128_v39 }
  0x5c   : > { %v10121_v41 = vcombine.high %v597_v36, %v601_v37  ;;  %v461_v42 = vld [vmem:[%s15233_s1 + $0x8c0] sm:$0xff]  ;;  %8061 = vmatprep.subr.bf16.mxu0 %v9993_v40  ;;  %v10120_v47 = vcombine.low %v597_v36, %v601_v37 }
  0x5d   : > { %v465_v43 = vld [vmem:[%s15233_s1 + $0x8e0] sm:$0xff]  ;;  %8062 = vmatpush1.bf16.msra.mxu0 %v9992_v46 }
  0x5e   : > { %v589_v44 = vld [vmem:[%s15233_s1 + $0xcc0] sm:$0xff]  ;;  %v9985_v48 = vcombine.high %v461_v42, %v465_v43  ;;  %8102 = vmatprep.subr.bf16.mxu1 %v10121_v41  ;;  %v9984_v56 = vcombine.low %v461_v42, %v465_v43 }
  0x5f   : > { %v593_v45 = vld [vmem:[%s15233_s1 + $0xce0] sm:$0xff]  ;;  %8103 = vmatpush1.bf16.msra.mxu1 %v10120_v47 }
  0x60   : > { %v10113_v49 = vcombine.high %v589_v44, %v593_v45  ;;  %v453_v50 = vld [vmem:[%s15233_s1 + $0x880] sm:$0xff]  ;;  %8063 = vmatprep.subr.bf16.mxu0 %v9985_v48  ;;  %v10112_v57 = vcombine.low %v589_v44, %v593_v45 }
  0x61   : > { %v457_v51 = vld [vmem:[%s15233_s1 + $0x8a0] sm:$0xff]  ;;  %8064 = vmatpush1.bf16.msra.mxu0 %v9984_v56 }
  0x62   : > { %v581_v52 = vld [vmem:[%s15233_s1 + $0xc80] sm:$0xff]  ;;  %v9977_v60 = vcombine.high %v453_v50, %v457_v51  ;;  %8104 = vmatprep.subr.bf16.mxu1 %v10113_v49  ;;  %v9976_v2 = vcombine.low %v453_v50, %v457_v51 }
  0x63   : > { %v585_v55 = vld [vmem:[%s15233_s1 + $0xca0] sm:$0xff]  ;;  %8105 = vmatpush1.bf16.msra.mxu1 %v10112_v57 }
  0x64   : > { %v10105_v61 = vcombine.high %v581_v52, %v585_v55  ;;  %v445_v62 = vld [vmem:[%s15233_s1 + $0x840] sm:$0xff]  ;;  %8065 = vmatprep.subr.bf16.mxu0 %v9977_v60  ;;  %v10104_v3 = vcombine.low %v581_v52, %v585_v55 }
  0x65   : > { %v449_v63 = vld [vmem:[%s15233_s1 + $0x860] sm:$0xff]  ;;  %8066 = vmatpush1.bf16.msra.mxu0 %v9976_v2 }
  0x66   : > { %v573_v0 = vld [vmem:[%s15233_s1 + $0xc40] sm:$0xff]  ;;  %v9969_v4 = vcombine.high %v445_v62, %v449_v63  ;;  %8106 = vmatprep.subr.bf16.mxu1 %v10105_v61  ;;  %v9968_v10 = vcombine.low %v445_v62, %v449_v63 }
  0x67   : > { %v577_v1 = vld [vmem:[%s15233_s1 + $0xc60] sm:$0xff]  ;;  %8107 = vmatpush1.bf16.msra.mxu1 %v10104_v3 }
  0x68   : > { %v10097_v5 = vcombine.high %v573_v0, %v577_v1  ;;  %v437_v6 = vld [vmem:[%s15233_s1 + $0x800] sm:$0xff]  ;;  %8067 = vmatprep.subr.bf16.mxu0 %v9969_v4  ;;  %v10096_v11 = vcombine.low %v573_v0, %v577_v1 }
  0x69   : > { %v441_v7 = vld [vmem:[%s15233_s1 + $0x820] sm:$0xff]  ;;  %8068 = vmatpush1.bf16.msra.mxu0 %v9968_v10 }
  0x6a   : > { %v565_v8 = vld [vmem:[%s15233_s1 + $0xc00] sm:$0xff]  ;;  %v9961_v12 = vcombine.high %v437_v6, %v441_v7  ;;  %8108 = vmatprep.subr.bf16.mxu1 %v10097_v5  ;;  %v9960_v21 = vcombine.low %v437_v6, %v441_v7 }
  0x6b   : > { %v569_v9 = vld [vmem:[%s15233_s1 + $0xc20] sm:$0xff]  ;;  %8109 = vmatpush1.bf16.msra.mxu1 %v10096_v11 }
  0x6c   : > { %v10089_v13 = vcombine.high %v565_v8, %v569_v9  ;;  %v557_v14 = vld [vmem:[%s15233_s1 + $0xbc0] sm:$0xff]  ;;  %8069 = vmatprep.subr.bf16.mxu0 %v9961_v12  ;;  %v10088_v53 = vcombine.low %v565_v8, %v569_v9 }
  0x6d   : > { %v561_v15 = vld [vmem:[%s15233_s1 + $0xbe0] sm:$0xff]  ;;  %8070 = vmatpush1.bf16.msra.mxu0 %v9960_v21 }
  0x6e   : > { %v685_v17 = vld [vmem:[%s15233_s1 + $0xfc0] sm:$0xff]  ;;  %v10081_v23 = vcombine.high %v557_v14, %v561_v15  ;;  %8110 = vmatprep.subr.bf16.mxu1 %v10089_v13  ;;  %v10080_v30 = vcombine.low %v557_v14, %v561_v15 }
  0x6f   : > { %v689_v18 = vld [vmem:[%s15233_s1 + $0xfe0] sm:$0xff]  ;;  %8111 = vmatpush1.bf16.msra.mxu1 %v10088_v53 }
  0x70   : > { %v10209_v24 = vcombine.high %v685_v17, %v689_v18  ;;  %v549_v25 = vld [vmem:[%s15233_s1 + $0xb80] sm:$0xff]  ;;  %8071 = vmatprep.subr.bf16.mxu0 %v10081_v23  ;;  %v10208_v31 = vcombine.low %v685_v17, %v689_v18 }
  0x71   : > { %v553_v26 = vld [vmem:[%s15233_s1 + $0xba0] sm:$0xff]  ;;  %8072 = vmatpush2.bf16.msra.mxu0 %v10080_v30 }
  0x72   : > { %v677_v27 = vld [vmem:[%s15233_s1 + $0xf80] sm:$0xff]  ;;  %v10073_v32 = vcombine.high %v549_v25, %v553_v26  ;;  %8112 = vmatprep.subr.bf16.mxu1 %v10209_v24  ;;  %v10072_v38 = vcombine.low %v549_v25, %v553_v26 }
  0x73   : > { %v681_v28 = vld [vmem:[%s15233_s1 + $0xfa0] sm:$0xff]  ;;  %8113 = vmatpush2.bf16.msra.mxu1 %v10208_v31 }
  0x74   : > { %v10201_v33 = vcombine.high %v677_v27, %v681_v28  ;;  %v541_v34 = vld [vmem:[%s15233_s1 + $0xb40] sm:$0xff]  ;;  %8073 = vmatprep.subr.bf16.mxu0 %v10073_v32  ;;  %v10200_v39 = vcombine.low %v677_v27, %v681_v28 }
  0x75   : > { %v545_v35 = vld [vmem:[%s15233_s1 + $0xb60] sm:$0xff]  ;;  %8074 = vmatpush2.bf16.msra.mxu0 %v10072_v38 }
  0x76   : > { %v669_v36 = vld [vmem:[%s15233_s1 + $0xf40] sm:$0xff]  ;;  %v10065_v40 = vcombine.high %v541_v34, %v545_v35  ;;  %8114 = vmatprep.subr.bf16.mxu1 %v10201_v33  ;;  %v10064_v46 = vcombine.low %v541_v34, %v545_v35 }
  0x77   : > { %v673_v37 = vld [vmem:[%s15233_s1 + $0xf60] sm:$0xff]  ;;  %8115 = vmatpush2.bf16.msra.mxu1 %v10200_v39 }
  0x78   : > { %v10193_v41 = vcombine.high %v669_v36, %v673_v37  ;;  %v533_v42 = vld [vmem:[%s15233_s1 + $0xb00] sm:$0xff]  ;;  %8075 = vmatprep.subr.bf16.mxu0 %v10065_v40  ;;  %v10192_v47 = vcombine.low %v669_v36, %v673_v37  ;;  %v11513_v36 = vcombine.low %v11304_v19, %v11304_v19  ;;  %v11526_v40 = vcombine.low %v11311_v22, %v11311_v22 }
  0x79   : > { %v537_v43 = vld [vmem:[%s15233_s1 + $0xb20] sm:$0xff]  ;;  %8076 = vmatpush2.bf16.msra.mxu0 %v10064_v46 }
  0x7a   : > { %v661_v44 = vld [vmem:[%s15233_s1 + $0xf00] sm:$0xff]  ;;  %v10057_v48 = vcombine.high %v533_v42, %v537_v43  ;;  %8116 = vmatprep.subr.bf16.mxu1 %v10193_v41  ;;  %v10056_v56 = vcombine.low %v533_v42, %v537_v43  ;;  %v11529_v42 = vld [vmem:[%s11143_s19 + $0x28] sm:$0xff] }
  0x7b   : > { %v665_v45 = vld [vmem:[%s15233_s1 + $0xf20] sm:$0xff]  ;;  %8117 = vmatpush2.bf16.msra.mxu1 %v10192_v47 }
  0x7c   : > { %v10185_v49 = vcombine.high %v661_v44, %v665_v45  ;;  %v525_v50 = vld [vmem:[%s15233_s1 + $0xac0] sm:$0xff]  ;;  %8077 = vmatprep.subr.bf16.mxu0 %v10057_v48  ;;  %v10184_v57 = vcombine.low %v661_v44, %v665_v45 }
  0x7d   : > { %v529_v51 = vld [vmem:[%s15233_s1 + $0xae0] sm:$0xff]  ;;  %8078 = vmatpush2.bf16.msra.mxu0 %v10056_v56 }
  0x7e   : > { %v653_v52 = vld [vmem:[%s15233_s1 + $0xec0] sm:$0xff]  ;;  %v10049_v60 = vcombine.high %v525_v50, %v529_v51  ;;  %8118 = vmatprep.subr.bf16.mxu1 %v10185_v49  ;;  %v10048_v2 = vcombine.low %v525_v50, %v529_v51  ;;  %v11550_v49 = vcombine.high %v11529_v42, %v11529_v42 }
  0x7f   : > { %v657_v55 = vld [vmem:[%s15233_s1 + $0xee0] sm:$0xff]  ;;  %8119 = vmatpush2.bf16.msra.mxu1 %v10184_v57 }
  0x80   : > { %v10177_v61 = vcombine.high %v653_v52, %v657_v55  ;;  %v517_v62 = vld [vmem:[%s15233_s1 + $0xa80] sm:$0xff]  ;;  %8079 = vmatprep.subr.bf16.mxu0 %v10049_v60  ;;  %v10176_v3 = vcombine.low %v653_v52, %v657_v55 }
  0x81   : > { %v521_v63 = vld [vmem:[%s15233_s1 + $0xaa0] sm:$0xff]  ;;  %8080 = vmatpush2.bf16.msra.mxu0 %v10048_v2 }
  0x82   : > { %v645_v0 = vld [vmem:[%s15233_s1 + $0xe80] sm:$0xff]  ;;  %v10041_v4 = vcombine.high %v517_v62, %v521_v63  ;;  %8120 = vmatprep.subr.bf16.mxu1 %v10177_v61  ;;  %v10040_v10 = vcombine.low %v517_v62, %v521_v63 }
  0x83   : > { %v649_v1 = vld [vmem:[%s15233_s1 + $0xea0] sm:$0xff]  ;;  %8121 = vmatpush2.bf16.msra.mxu1 %v10176_v3 }
  0x84   : > { %v10169_v5 = vcombine.high %v645_v0, %v649_v1  ;;  %v509_v6 = vld [vmem:[%s15233_s1 + $0xa40] sm:$0xff]  ;;  %8081 = vmatprep.subr.bf16.mxu0 %v10041_v4  ;;  %v10168_v11 = vcombine.low %v645_v0, %v649_v1 }
  0x85   : > { %v513_v7 = vld [vmem:[%s15233_s1 + $0xa60] sm:$0xff]  ;;  %8082 = vmatpush2.bf16.msra.mxu0 %v10040_v10 }
  0x86   : > { %v637_v8 = vld [vmem:[%s15233_s1 + $0xe40] sm:$0xff]  ;;  %v10033_v12 = vcombine.high %v509_v6, %v513_v7  ;;  %8122 = vmatprep.subr.bf16.mxu1 %v10169_v5  ;;  %v10032_v21 = vcombine.low %v509_v6, %v513_v7 }
  0x87   : > { %v641_v9 = vld [vmem:[%s15233_s1 + $0xe60] sm:$0xff]  ;;  %8123 = vmatpush2.bf16.msra.mxu1 %v10168_v11 }
  0x88   : > { %v10161_v13 = vcombine.high %v637_v8, %v641_v9  ;;  %v501_v14 = vld [vmem:[%s15233_s1 + $0xa00] sm:$0xff]  ;;  %8083 = vmatprep.subr.bf16.mxu0 %v10033_v12  ;;  %v10160_v53 = vcombine.low %v637_v8, %v641_v9 }
  0x89   : > { %v505_v15 = vld [vmem:[%s15233_s1 + $0xa20] sm:$0xff]  ;;  %8084 = vmatpush2.bf16.msra.mxu0 %v10032_v21 }
  0x8a   : > { %v629_v17 = vld [vmem:[%s15233_s1 + $0xe00] sm:$0xff]  ;;  %v10025_v23 = vcombine.high %v501_v14, %v505_v15  ;;  %8124 = vmatprep.subr.bf16.mxu1 %v10161_v13  ;;  %v10024_v30 = vcombine.low %v501_v14, %v505_v15 }
  0x8b   : > { %v633_v18 = vld [vmem:[%s15233_s1 + $0xe20] sm:$0xff]  ;;  %8125 = vmatpush2.bf16.msra.mxu1 %v10160_v53 }
  0x8c   : > { %v10153_v24 = vcombine.high %v629_v17, %v633_v18  ;;  %v749_v25 = vld [vmem:[%s15233_s1 + $0x11c0] sm:$0xff]  ;;  %8085 = vmatprep.subr.bf16.mxu0 %v10025_v23  ;;  %v10152_v31 = vcombine.low %v629_v17, %v633_v18 }
  0x8d   : > { %v753_v26 = vld [vmem:[%s15233_s1 + $0x11e0] sm:$0xff]  ;;  %8086 = vmatpush2.bf16.msra.mxu0 %v10024_v30 }
  0x8e   : > { %v877_v27 = vld [vmem:[%s15233_s1 + $0x15c0] sm:$0xff]  ;;  %v10273_v32 = vcombine.high %v749_v25, %v753_v26  ;;  %8126 = vmatprep.subr.bf16.mxu1 %v10153_v24  ;;  %v10272_v41 = vcombine.low %v749_v25, %v753_v26 }
  0x8f   : > { %v881_v28 = vld [vmem:[%s15233_s1 + $0x15e0] sm:$0xff]  ;;  %8127 = vmatpush2.bf16.msra.mxu1 %v10152_v31 }
  0x90   : > { %v10401_v33 = vcombine.high %v877_v27, %v881_v28  ;;  %v741_v34 = vld [vmem:[%s15233_s1 + $0x1180] sm:$0xff]  ;;  %8137 = vmatprep.subr.bf16.mxu0 %v10273_v32  ;;  %v10400_v19 = vcombine.low %v877_v27, %v881_v28  ;;  %8088 = vmatmul.mubr.bf16.vlgmr.msra.gmra.mxu0 %v11513_v36 }
  0x91   : > { %v745_v35 = vld [vmem:[%s15233_s1 + $0x11a0] sm:$0xff]  ;;  %8138 = vmatpush1.bf16.msra.mxu0 %v10272_v41 }
  0x92   : > { %v869_v37 = vld [vmem:[%s15233_s1 + $0x1580] sm:$0xff]  ;;  %v10265_v43 = vcombine.high %v741_v34, %v745_v35  ;;  %8178 = vmatprep.subr.bf16.mxu1 %v10401_v33  ;;  %8129 = vmatmul.mubr.bf16.vlgmr.msra.gmra.mxu1 %v11526_v40  ;;  %v10264_v50 = vcombine.low %v741_v34, %v745_v35 }
  0x93   : > { %v873_v38 = vld [vmem:[%s15233_s1 + $0x15a0] sm:$0xff]  ;;  %8179 = vmatpush1.bf16.msra.mxu1 %v10400_v19  ;;  %8210 = vmatprep.mubr.bf16.mxu1 %v11550_v49 }
  0x94   : > { %v11522_v39 = vld [vmem:[%s11143_s19 + $0x20] sm:$0xff]  ;;  %v10393_v44 = vcombine.high %v869_v37, %v873_v38  ;;  %8139 = vmatprep.subr.bf16.mxu0 %v10265_v43  ;;  %v10392_v51 = vcombine.low %v869_v37, %v873_v38 }
  0x95   : > { %v733_v45 = vld [vmem:[%s15233_s1 + $0x1140] sm:$0xff]  ;;  %v11539_v22 = vcombine.high %v11522_v39, %v11522_v39  ;;  %8140 = vmatpush1.bf16.msra.mxu0 %v10264_v50 }
  0x96   : > { %v737_v46 = vld [vmem:[%s15233_s1 + $0x1160] sm:$0xff]  ;;  %8180 = vmatprep.subr.bf16.mxu1 %v10393_v44 }
  0x97   : > { %v861_v47 = vld [vmem:[%s15233_s1 + $0x1540] sm:$0xff]  ;;  %v10257_v52 = vcombine.high %v733_v45, %v737_v46  ;;  %8169 = vmatprep.mubr.bf16.mxu0 %v11539_v22  ;;  %v10256_v62 = vcombine.low %v733_v45, %v737_v46  ;;  %8181 = vmatpush1.bf16.msra.mxu1 %v10392_v51 }
  0x98   : > { %v865_v48 = vld [vmem:[%s15233_s1 + $0x1560] sm:$0xff] }
  0x99   : > { %v10385_v55 = vcombine.high %v861_v47, %v865_v48  ;;  %v725_v56 = vld [vmem:[%s15233_s1 + $0x1100] sm:$0xff]  ;;  %8141 = vmatprep.subr.bf16.mxu0 %v10257_v52  ;;  %v10384_v63 = vcombine.low %v861_v47, %v865_v48 }
  0x9a   : > { %v729_v57 = vld [vmem:[%s15233_s1 + $0x1120] sm:$0xff]  ;;  %8142 = vmatpush1.bf16.msra.mxu0 %v10256_v62 }
  0x9b   : > { %v853_v60 = vld [vmem:[%s15233_s1 + $0x1500] sm:$0xff]  ;;  %v10249_v0 = vcombine.high %v725_v56, %v729_v57  ;;  %8182 = vmatprep.subr.bf16.mxu1 %v10385_v55  ;;  %v10248_v6 = vcombine.low %v725_v56, %v729_v57 }
  0x9c   : > { %v857_v61 = vld [vmem:[%s15233_s1 + $0x1520] sm:$0xff]  ;;  %8183 = vmatpush1.bf16.msra.mxu1 %v10384_v63 }
  0x9d   : > { %v10377_v1 = vcombine.high %v853_v60, %v857_v61  ;;  %v717_v2 = vld [vmem:[%s15233_s1 + $0x10c0] sm:$0xff]  ;;  %8143 = vmatprep.subr.bf16.mxu0 %v10249_v0  ;;  %v10376_v7 = vcombine.low %v853_v60, %v857_v61 }
  0x9e   : > { %v721_v3 = vld [vmem:[%s15233_s1 + $0x10e0] sm:$0xff]  ;;  %8144 = vmatpush1.bf16.msra.mxu0 %v10248_v6 }
  0x9f   : > { %v845_v4 = vld [vmem:[%s15233_s1 + $0x14c0] sm:$0xff]  ;;  %v10241_v8 = vcombine.high %v717_v2, %v721_v3  ;;  %8184 = vmatprep.subr.bf16.mxu1 %v10377_v1  ;;  %v10240_v14 = vcombine.low %v717_v2, %v721_v3 }
  0xa0   : > { %v849_v5 = vld [vmem:[%s15233_s1 + $0x14e0] sm:$0xff]  ;;  %8185 = vmatpush1.bf16.msra.mxu1 %v10376_v7 }
  0xa1   : > { %v10369_v9 = vcombine.high %v845_v4, %v849_v5  ;;  %v709_v10 = vld [vmem:[%s15233_s1 + $0x1080] sm:$0xff]  ;;  %8145 = vmatprep.subr.bf16.mxu0 %v10241_v8  ;;  %v10368_v15 = vcombine.low %v845_v4, %v849_v5 }
  0xa2   : > { %v713_v11 = vld [vmem:[%s15233_s1 + $0x10a0] sm:$0xff]  ;;  %8146 = vmatpush1.bf16.msra.mxu0 %v10240_v14 }
  0xa3   : > { %v837_v12 = vld [vmem:[%s15233_s1 + $0x1480] sm:$0xff]  ;;  %v10233_v17 = vcombine.high %v709_v10, %v713_v11  ;;  %8186 = vmatprep.subr.bf16.mxu1 %v10369_v9  ;;  %v10232_v25 = vcombine.low %v709_v10, %v713_v11 }
  0xa4   : > { %v841_v13 = vld [vmem:[%s15233_s1 + $0x14a0] sm:$0xff]  ;;  %8187 = vmatpush1.bf16.msra.mxu1 %v10368_v15 }
  0xa5   : > { %v10361_v18 = vcombine.high %v837_v12, %v841_v13  ;;  %v701_v21 = vld [vmem:[%s15233_s1 + $0x1040] sm:$0xff]  ;;  %8147 = vmatprep.subr.bf16.mxu0 %v10233_v17  ;;  %v10360_v26 = vcombine.low %v837_v12, %v841_v13 }
  0xa6   : > { %v705_v53 = vld [vmem:[%s15233_s1 + $0x1060] sm:$0xff]  ;;  %8148 = vmatpush1.bf16.msra.mxu0 %v10232_v25 }
  0xa7   : > { %v829_v23 = vld [vmem:[%s15233_s1 + $0x1440] sm:$0xff]  ;;  %v10225_v27 = vcombine.high %v701_v21, %v705_v53  ;;  %8188 = vmatprep.subr.bf16.mxu1 %v10361_v18  ;;  %v10224_v34 = vcombine.low %v701_v21, %v705_v53 }
  0xa8   : > { %v833_v24 = vld [vmem:[%s15233_s1 + $0x1460] sm:$0xff]  ;;  %8189 = vmatpush1.bf16.msra.mxu1 %v10360_v26 }
  0xa9   : > { %v10353_v28 = vcombine.high %v829_v23, %v833_v24  ;;  %v693_v30 = vld [vmem:[%s15233_s1 + $0x1000] sm:$0xff]  ;;  %8149 = vmatprep.subr.bf16.mxu0 %v10225_v27  ;;  %v10352_v35 = vcombine.low %v829_v23, %v833_v24 }
  0xaa   : > { %v697_v31 = vld [vmem:[%s15233_s1 + $0x1020] sm:$0xff]  ;;  %8150 = vmatpush1.bf16.msra.mxu0 %v10224_v34 }
  0xab   : > { %v821_v32 = vld [vmem:[%s15233_s1 + $0x1400] sm:$0xff]  ;;  %v10217_v37 = vcombine.high %v693_v30, %v697_v31  ;;  %8190 = vmatprep.subr.bf16.mxu1 %v10353_v28  ;;  %v10216_v45 = vcombine.low %v693_v30, %v697_v31 }
  0xac   : > { %v825_v33 = vld [vmem:[%s15233_s1 + $0x1420] sm:$0xff]  ;;  %8191 = vmatpush1.bf16.msra.mxu1 %v10352_v35 }
  0xad   : > { %v10345_v38 = vcombine.high %v821_v32, %v825_v33  ;;  %v813_v41 = vld [vmem:[%s15233_s1 + $0x13c0] sm:$0xff]  ;;  %8151 = vmatprep.subr.bf16.mxu0 %v10217_v37  ;;  %v10344_v46 = vcombine.low %v821_v32, %v825_v33 }
  0xae   : > { %v817_v19 = vld [vmem:[%s15233_s1 + $0x13e0] sm:$0xff]  ;;  %8152 = vmatpush1.bf16.msra.mxu0 %v10216_v45 }
  0xaf   : > { %v941_v43 = vld [vmem:[%s15233_s1 + $0x17c0] sm:$0xff]  ;;  %v10337_v47 = vcombine.high %v813_v41, %v817_v19  ;;  %8192 = vmatprep.subr.bf16.mxu1 %v10345_v38  ;;  %v10336_v56 = vcombine.low %v813_v41, %v817_v19 }
  0xb0   : > { %v945_v44 = vld [vmem:[%s15233_s1 + $0x17e0] sm:$0xff]  ;;  %8193 = vmatpush1.bf16.msra.mxu1 %v10344_v46 }
  0xb1   : > { %v10465_v48 = vcombine.high %v941_v43, %v945_v44  ;;  %v805_v50 = vld [vmem:[%s15233_s1 + $0x1380] sm:$0xff]  ;;  %8153 = vmatprep.subr.bf16.mxu0 %v10337_v47  ;;  %v10464_v57 = vcombine.low %v941_v43, %v945_v44 }
  0xb2   : > { %v809_v51 = vld [vmem:[%s15233_s1 + $0x13a0] sm:$0xff]  ;;  %8154 = vmatpush2.bf16.msra.mxu0 %v10336_v56 }
  0xb3   : > { %v933_v52 = vld [vmem:[%s15233_s1 + $0x1780] sm:$0xff]  ;;  %v10329_v60 = vcombine.high %v805_v50, %v809_v51  ;;  %8194 = vmatprep.subr.bf16.mxu1 %v10465_v48  ;;  %v10328_v2 = vcombine.low %v805_v50, %v809_v51 }
  0xb4   : > { %v937_v55 = vld [vmem:[%s15233_s1 + $0x17a0] sm:$0xff]  ;;  %8195 = vmatpush2.bf16.msra.mxu1 %v10464_v57 }
  0xb5   : > { %v10457_v61 = vcombine.high %v933_v52, %v937_v55  ;;  %v797_v62 = vld [vmem:[%s15233_s1 + $0x1340] sm:$0xff]  ;;  %8155 = vmatprep.subr.bf16.mxu0 %v10329_v60  ;;  %v10456_v3 = vcombine.low %v933_v52, %v937_v55 }
  0xb6   : > { %v801_v63 = vld [vmem:[%s15233_s1 + $0x1360] sm:$0xff]  ;;  %8156 = vmatpush2.bf16.msra.mxu0 %v10328_v2 }
  0xb7   : > { %v925_v0 = vld [vmem:[%s15233_s1 + $0x1740] sm:$0xff]  ;;  %v10321_v4 = vcombine.high %v797_v62, %v801_v63  ;;  %8196 = vmatprep.subr.bf16.mxu1 %v10457_v61  ;;  %v10320_v10 = vcombine.low %v797_v62, %v801_v63 }
  0xb8   : > { %v929_v1 = vld [vmem:[%s15233_s1 + $0x1760] sm:$0xff]  ;;  %8197 = vmatpush2.bf16.msra.mxu1 %v10456_v3 }
  0xb9   : > { %v10449_v5 = vcombine.high %v925_v0, %v929_v1  ;;  %v789_v6 = vld [vmem:[%s15233_s1 + $0x1300] sm:$0xff]  ;;  %8157 = vmatprep.subr.bf16.mxu0 %v10321_v4  ;;  %v10448_v11 = vcombine.low %v925_v0, %v929_v1  ;;  %v11731_v4 = vcombine.low %v11522_v39, %v11522_v39 }
  0xba   : > { %v793_v7 = vld [vmem:[%s15233_s1 + $0x1320] sm:$0xff]  ;;  %8158 = vmatpush2.bf16.msra.mxu0 %v10320_v10  ;;  %v11747_v10 = vld [vmem:[%s11143_s19 + $0x38] sm:$0xff] }
  0xbb   : > { %v917_v8 = vld [vmem:[%s15233_s1 + $0x1700] sm:$0xff]  ;;  %v10313_v12 = vcombine.high %v789_v6, %v793_v7  ;;  %8198 = vmatprep.subr.bf16.mxu1 %v10449_v5  ;;  %v10312_v21 = vcombine.low %v789_v6, %v793_v7  ;;  %v11740_v7 = vld [vmem:[%s11143_s19 + $0x30] sm:$0xff] }
  0xbc   : > { %v921_v9 = vld [vmem:[%s15233_s1 + $0x1720] sm:$0xff]  ;;  %8199 = vmatpush2.bf16.msra.mxu1 %v10448_v11 }
  0xbd   : > { %v10441_v13 = vcombine.high %v917_v8, %v921_v9  ;;  %v781_v14 = vld [vmem:[%s15233_s1 + $0x12c0] sm:$0xff]  ;;  %8159 = vmatprep.subr.bf16.mxu0 %v10313_v12  ;;  %v10440_v53 = vcombine.low %v917_v8, %v921_v9  ;;  %v11744_v8 = vcombine.low %v11529_v42, %v11529_v42  ;;  %v11757_v42 = vcombine.high %v11740_v7, %v11740_v7 }
  0xbe   : > { %v785_v15 = vld [vmem:[%s15233_s1 + $0x12e0] sm:$0xff]  ;;  %8160 = vmatpush2.bf16.msra.mxu0 %v10312_v21 }
  0xbf   : > { %v909_v17 = vld [vmem:[%s15233_s1 + $0x16c0] sm:$0xff]  ;;  %v10305_v23 = vcombine.high %v781_v14, %v785_v15  ;;  %8200 = vmatprep.subr.bf16.mxu1 %v10441_v13  ;;  %v10304_v30 = vcombine.low %v781_v14, %v785_v15 }
  0xc0   : > { %v913_v18 = vld [vmem:[%s15233_s1 + $0x16e0] sm:$0xff]  ;;  %8201 = vmatpush2.bf16.msra.mxu1 %v10440_v53 }
  0xc1   : > { %v10433_v24 = vcombine.high %v909_v17, %v913_v18  ;;  %v773_v25 = vld [vmem:[%s15233_s1 + $0x1280] sm:$0xff]  ;;  %8161 = vmatprep.subr.bf16.mxu0 %v10305_v23  ;;  %v10432_v31 = vcombine.low %v909_v17, %v913_v18  ;;  %v11768_v18 = vcombine.high %v11747_v10, %v11747_v10 }
  0xc2   : > { %v777_v26 = vld [vmem:[%s15233_s1 + $0x12a0] sm:$0xff]  ;;  %8162 = vmatpush2.bf16.msra.mxu0 %v10304_v30 }
  0xc3   : > { %v901_v27 = vld [vmem:[%s15233_s1 + $0x1680] sm:$0xff]  ;;  %v10297_v32 = vcombine.high %v773_v25, %v777_v26  ;;  %8202 = vmatprep.subr.bf16.mxu1 %v10433_v24  ;;  %v10296_v41 = vcombine.low %v773_v25, %v777_v26 }
  0xc4   : > { %v905_v28 = vld [vmem:[%s15233_s1 + $0x16a0] sm:$0xff]  ;;  %8203 = vmatpush2.bf16.msra.mxu1 %v10432_v31 }
  0xc5   : > { %v10425_v33 = vcombine.high %v901_v27, %v905_v28  ;;  %v765_v34 = vld [vmem:[%s15233_s1 + $0x1240] sm:$0xff]  ;;  %8163 = vmatprep.subr.bf16.mxu0 %v10297_v32  ;;  %v10424_v19 = vcombine.low %v901_v27, %v905_v28 }
  0xc6   : > { %v769_v35 = vld [vmem:[%s15233_s1 + $0x1260] sm:$0xff]  ;;  %8164 = vmatpush2.bf16.msra.mxu0 %v10296_v41 }
  0xc7   : > { %v893_v37 = vld [vmem:[%s15233_s1 + $0x1640] sm:$0xff]  ;;  %v10289_v43 = vcombine.high %v765_v34, %v769_v35  ;;  %8204 = vmatprep.subr.bf16.mxu1 %v10425_v33  ;;  %v10288_v50 = vcombine.low %v765_v34, %v769_v35 }
  0xc8   : > { %v897_v38 = vld [vmem:[%s15233_s1 + $0x1660] sm:$0xff]  ;;  %8205 = vmatpush2.bf16.msra.mxu1 %v10424_v19 }
  0xc9   : > { %v10417_v44 = vcombine.high %v893_v37, %v897_v38  ;;  %v757_v45 = vld [vmem:[%s15233_s1 + $0x1200] sm:$0xff]  ;;  %8165 = vmatprep.subr.bf16.mxu0 %v10289_v43  ;;  %v10416_v51 = vcombine.low %v893_v37, %v897_v38 }
  0xca   : > { %v761_v46 = vld [vmem:[%s15233_s1 + $0x1220] sm:$0xff]  ;;  %8166 = vmatpush2.bf16.msra.mxu0 %v10288_v50 }
  0xcb   : > { %v885_v47 = vld [vmem:[%s15233_s1 + $0x1600] sm:$0xff]  ;;  %v10281_v52 = vcombine.high %v757_v45, %v761_v46  ;;  %8206 = vmatprep.subr.bf16.mxu1 %v10417_v44  ;;  %v10280_v62 = vcombine.low %v757_v45, %v761_v46 }
  0xcc   : > { %v889_v48 = vld [vmem:[%s15233_s1 + $0x1620] sm:$0xff]  ;;  %8207 = vmatpush2.bf16.msra.mxu1 %v10416_v51 }
  0xcd   : > { %v10409_v55 = vcombine.high %v885_v47, %v889_v48  ;;  %v1005_v56 = vld [vmem:[%s15233_s1 + $0x19c0] sm:$0xff]  ;;  %8167 = vmatprep.subr.bf16.mxu0 %v10281_v52  ;;  %v10408_v63 = vcombine.low %v885_v47, %v889_v48 }
  0xce   : > { %v1009_v57 = vld [vmem:[%s15233_s1 + $0x19e0] sm:$0xff]  ;;  %8168 = vmatpush2.bf16.msra.mxu0 %v10280_v62 }
  0xcf   : > { %v1133_v60 = vld [vmem:[%s15233_s1 + $0x1dc0] sm:$0xff]  ;;  %v10529_v0 = vcombine.high %v1005_v56, %v1009_v57  ;;  %8208 = vmatprep.subr.bf16.mxu1 %v10409_v55  ;;  %v10528_v9 = vcombine.low %v1005_v56, %v1009_v57 }
  0xd0   : > { %v1137_v61 = vld [vmem:[%s15233_s1 + $0x1de0] sm:$0xff]  ;;  %8209 = vmatpush2.bf16.msra.mxu1 %v10408_v63 }
  0xd1   : > { %v10657_v1 = vcombine.high %v1133_v60, %v1137_v61  ;;  %v997_v2 = vld [vmem:[%s15233_s1 + $0x1980] sm:$0xff]  ;;  %8219 = vmatprep.subr.bf16.mxu0 %v10529_v0  ;;  %v10656_v39 = vcombine.low %v1133_v60, %v1137_v61  ;;  %8170 = vmatmul.mubr.bf16.vlgmr.msra.gmra.mxu0 %v11731_v4 }
  0xd2   : > { %v1001_v3 = vld [vmem:[%s15233_s1 + $0x19a0] sm:$0xff]  ;;  %8220 = vmatpush1.bf16.msra.mxu0 %v10528_v9  ;;  %8251 = vmatprep.mubr.bf16.mxu0 %v11757_v42 }
  0xd3   : > { %v1125_v5 = vld [vmem:[%s15233_s1 + $0x1d80] sm:$0xff]  ;;  %v10521_v11 = vcombine.high %v997_v2, %v1001_v3  ;;  %8260 = vmatprep.subr.bf16.mxu1 %v10657_v1  ;;  %8211 = vmatmul.mubr.bf16.vlgmr.msra.gmra.mxu1 %v11744_v8  ;;  %v10520_v21 = vcombine.low %v997_v2, %v1001_v3 }
  0xd4   : > { %v1129_v6 = vld [vmem:[%s15233_s1 + $0x1da0] sm:$0xff]  ;;  %8261 = vmatpush1.bf16.msra.mxu1 %v10656_v39  ;;  %8292 = vmatprep.mubr.bf16.mxu1 %v11768_v18 }
  0xd5   : > { %v10649_v12 = vcombine.high %v1125_v5, %v1129_v6  ;;  %v989_v13 = vld [vmem:[%s15233_s1 + $0x1940] sm:$0xff]  ;;  %8221 = vmatprep.subr.bf16.mxu0 %v10521_v11  ;;  %v10648_v53 = vcombine.low %v1125_v5, %v1129_v6 }
  0xd6   : > { %v993_v14 = vld [vmem:[%s15233_s1 + $0x1960] sm:$0xff]  ;;  %8222 = vmatpush1.bf16.msra.mxu0 %v10520_v21 }
  0xd7   : > { %v1117_v15 = vld [vmem:[%s15233_s1 + $0x1d40] sm:$0xff]  ;;  %v10513_v23 = vcombine.high %v989_v13, %v993_v14  ;;  %8262 = vmatprep.subr.bf16.mxu1 %v10649_v12  ;;  %v10512_v30 = vcombine.low %v989_v13, %v993_v14 }
  0xd8   : > { %v1121_v17 = vld [vmem:[%s15233_s1 + $0x1d60] sm:$0xff]  ;;  %8263 = vmatpush1.bf16.msra.mxu1 %v10648_v53 }
  0xd9   : > { %v10641_v24 = vcombine.high %v1117_v15, %v1121_v17  ;;  %v981_v25 = vld [vmem:[%s15233_s1 + $0x1900] sm:$0xff]  ;;  %8223 = vmatprep.subr.bf16.mxu0 %v10513_v23  ;;  %v10640_v31 = vcombine.low %v1117_v15, %v1121_v17 }
  0xda   : > { %v985_v26 = vld [vmem:[%s15233_s1 + $0x1920] sm:$0xff]  ;;  %8224 = vmatpush1.bf16.msra.mxu0 %v10512_v30 }
  0xdb   : > { %v1109_v27 = vld [vmem:[%s15233_s1 + $0x1d00] sm:$0xff]  ;;  %v10505_v32 = vcombine.high %v981_v25, %v985_v26  ;;  %8264 = vmatprep.subr.bf16.mxu1 %v10641_v24  ;;  %v10504_v41 = vcombine.low %v981_v25, %v985_v26 }
  0xdc   : > { %v1113_v28 = vld [vmem:[%s15233_s1 + $0x1d20] sm:$0xff]  ;;  %8265 = vmatpush1.bf16.msra.mxu1 %v10640_v31 }
  0xdd   : > { %v10633_v33 = vcombine.high %v1109_v27, %v1113_v28  ;;  %v973_v34 = vld [vmem:[%s15233_s1 + $0x18c0] sm:$0xff]  ;;  %8225 = vmatprep.subr.bf16.mxu0 %v10505_v32  ;;  %v10632_v19 = vcombine.low %v1109_v27, %v1113_v28 }
  0xde   : > { %v977_v35 = vld [vmem:[%s15233_s1 + $0x18e0] sm:$0xff]  ;;  %8226 = vmatpush1.bf16.msra.mxu0 %v10504_v41 }
  0xdf   : > { %v1101_v37 = vld [vmem:[%s15233_s1 + $0x1cc0] sm:$0xff]  ;;  %v10497_v43 = vcombine.high %v973_v34, %v977_v35  ;;  %8266 = vmatprep.subr.bf16.mxu1 %v10633_v33  ;;  %v10496_v50 = vcombine.low %v973_v34, %v977_v35 }
  0xe0   : > { %v1105_v38 = vld [vmem:[%s15233_s1 + $0x1ce0] sm:$0xff]  ;;  %8267 = vmatpush1.bf16.msra.mxu1 %v10632_v19 }
  0xe1   : > { %v10625_v44 = vcombine.high %v1101_v37, %v1105_v38  ;;  %v965_v45 = vld [vmem:[%s15233_s1 + $0x1880] sm:$0xff]  ;;  %8227 = vmatprep.subr.bf16.mxu0 %v10497_v43  ;;  %v10624_v51 = vcombine.low %v1101_v37, %v1105_v38 }
  0xe2   : > { %v969_v46 = vld [vmem:[%s15233_s1 + $0x18a0] sm:$0xff]  ;;  %8228 = vmatpush1.bf16.msra.mxu0 %v10496_v50 }
  0xe3   : > { %v1093_v47 = vld [vmem:[%s15233_s1 + $0x1c80] sm:$0xff]  ;;  %v10489_v52 = vcombine.high %v965_v45, %v969_v46  ;;  %8268 = vmatprep.subr.bf16.mxu1 %v10625_v44  ;;  %v10488_v62 = vcombine.low %v965_v45, %v969_v46 }
  0xe4   : > { %v1097_v48 = vld [vmem:[%s15233_s1 + $0x1ca0] sm:$0xff]  ;;  %8269 = vmatpush1.bf16.msra.mxu1 %v10624_v51 }
  0xe5   : > { %v10617_v55 = vcombine.high %v1093_v47, %v1097_v48  ;;  %v957_v56 = vld [vmem:[%s15233_s1 + $0x1840] sm:$0xff]  ;;  %8229 = vmatprep.subr.bf16.mxu0 %v10489_v52  ;;  %v10616_v63 = vcombine.low %v1093_v47, %v1097_v48 }
  0xe6   : > { %v961_v57 = vld [vmem:[%s15233_s1 + $0x1860] sm:$0xff]  ;;  %8230 = vmatpush1.bf16.msra.mxu0 %v10488_v62 }
  0xe7   : > { %v1085_v60 = vld [vmem:[%s15233_s1 + $0x1c40] sm:$0xff]  ;;  %v10481_v0 = vcombine.high %v957_v56, %v961_v57  ;;  %8270 = vmatprep.subr.bf16.mxu1 %v10617_v55  ;;  %v10480_v9 = vcombine.low %v957_v56, %v961_v57 }
  0xe8   : > { %v1089_v61 = vld [vmem:[%s15233_s1 + $0x1c60] sm:$0xff]  ;;  %8271 = vmatpush1.bf16.msra.mxu1 %v10616_v63 }
  0xe9   : > { %v10609_v1 = vcombine.high %v1085_v60, %v1089_v61  ;;  %v949_v2 = vld [vmem:[%s15233_s1 + $0x1800] sm:$0xff]  ;;  %8231 = vmatprep.subr.bf16.mxu0 %v10481_v0  ;;  %v10608_v39 = vcombine.low %v1085_v60, %v1089_v61 }
  0xea   : > { %v953_v3 = vld [vmem:[%s15233_s1 + $0x1820] sm:$0xff]  ;;  %8232 = vmatpush1.bf16.msra.mxu0 %v10480_v9 }
  0xeb   : > { %v1077_v5 = vld [vmem:[%s15233_s1 + $0x1c00] sm:$0xff]  ;;  %v10473_v11 = vcombine.high %v949_v2, %v953_v3  ;;  %8272 = vmatprep.subr.bf16.mxu1 %v10609_v1  ;;  %v10472_v21 = vcombine.low %v949_v2, %v953_v3 }
  0xec   : > { %v1081_v6 = vld [vmem:[%s15233_s1 + $0x1c20] sm:$0xff]  ;;  %8273 = vmatpush1.bf16.msra.mxu1 %v10608_v39 }
  0xed   : > { %v10601_v12 = vcombine.high %v1077_v5, %v1081_v6  ;;  %v1069_v13 = vld [vmem:[%s15233_s1 + $0x1bc0] sm:$0xff]  ;;  %8233 = vmatprep.subr.bf16.mxu0 %v10473_v11  ;;  %v10600_v53 = vcombine.low %v1077_v5, %v1081_v6 }
  0xee   : > { %v1073_v14 = vld [vmem:[%s15233_s1 + $0x1be0] sm:$0xff]  ;;  %8234 = vmatpush1.bf16.msra.mxu0 %v10472_v21 }
  0xef   : > { %v1197_v15 = vld [vmem:[%s15233_s1 + $0x1fc0] sm:$0xff]  ;;  %v10593_v23 = vcombine.high %v1069_v13, %v1073_v14  ;;  %8274 = vmatprep.subr.bf16.mxu1 %v10601_v12  ;;  %v10592_v30 = vcombine.low %v1069_v13, %v1073_v14 }
  0xf0   : > { %v1201_v17 = vld [vmem:[%s15233_s1 + $0x1fe0] sm:$0xff]  ;;  %8275 = vmatpush1.bf16.msra.mxu1 %v10600_v53  ;;  %v1463_v53 = vlaneseq }
  0xf1   : > { %v10721_v24 = vcombine.high %v1197_v15, %v1201_v17  ;;  %v1061_v25 = vld [vmem:[%s15233_s1 + $0x1b80] sm:$0xff]  ;;  %8235 = vmatprep.subr.bf16.mxu0 %v10593_v23  ;;  %v10720_v31 = vcombine.low %v1197_v15, %v1201_v17 }
  0xf2   : > { %v1065_v26 = vld [vmem:[%s15233_s1 + $0x1ba0] sm:$0xff]  ;;  %8236 = vmatpush2.bf16.msra.mxu0 %v10592_v30 }
  0xf3   : > { %v1189_v27 = vld [vmem:[%s15233_s1 + $0x1f80] sm:$0xff]  ;;  %v10585_v32 = vcombine.high %v1061_v25, %v1065_v26  ;;  %8276 = vmatprep.subr.bf16.mxu1 %v10721_v24  ;;  %v10584_v41 = vcombine.low %v1061_v25, %v1065_v26 }
  0xf4   : > { %v1193_v28 = vld [vmem:[%s15233_s1 + $0x1fa0] sm:$0xff]  ;;  %8277 = vmatpush2.bf16.msra.mxu1 %v10720_v31 }
  0xf5   : > { %v10713_v33 = vcombine.high %v1189_v27, %v1193_v28  ;;  %v1053_v34 = vld [vmem:[%s15233_s1 + $0x1b40] sm:$0xff]  ;;  %8237 = vmatprep.subr.bf16.mxu0 %v10585_v32  ;;  %v10712_v19 = vcombine.low %v1189_v27, %v1193_v28  ;;  %v11929_v32 = vshrl.u32 %v1463_v53, 7 }
  0xf6   : > { %v1057_v35 = vld [vmem:[%s15233_s1 + $0x1b60] sm:$0xff]  ;;  %8238 = vmatpush2.bf16.msra.mxu0 %v10584_v41 }
  0xf7   : > { %v1181_v37 = vld [vmem:[%s15233_s1 + $0x1f40] sm:$0xff]  ;;  %v10577_v43 = vcombine.high %v1053_v34, %v1057_v35  ;;  %8278 = vmatprep.subr.bf16.mxu1 %v10713_v33  ;;  %v10576_v50 = vcombine.low %v1053_v34, %v1057_v35 }
  0xf8   : > { %v1185_v38 = vld [vmem:[%s15233_s1 + $0x1f60] sm:$0xff]  ;;  %8279 = vmatpush2.bf16.msra.mxu1 %v10712_v19 }
  0xf9   : > { %v10705_v44 = vcombine.high %v1181_v37, %v1185_v38  ;;  %v1045_v45 = vld [vmem:[%s15233_s1 + $0x1b00] sm:$0xff]  ;;  %8239 = vmatprep.subr.bf16.mxu0 %v10577_v43  ;;  %v10704_v51 = vcombine.low %v1181_v37, %v1185_v38 }
  0xfa   : > { %v1049_v46 = vld [vmem:[%s15233_s1 + $0x1b20] sm:$0xff]  ;;  %8240 = vmatpush2.bf16.msra.mxu0 %v10576_v50  ;;  %v1469_v50 = vsub.s32 1, %v11929_v32 }
  0xfb   : > { %v1173_v47 = vld [vmem:[%s15233_s1 + $0x1f00] sm:$0xff]  ;;  %v10569_v52 = vcombine.high %v1045_v45, %v1049_v46  ;;  %8280 = vmatprep.subr.bf16.mxu1 %v10705_v44  ;;  %v10568_v62 = vcombine.low %v1045_v45, %v1049_v46  ;;  %v1465_v44 = vsub.s32 0, %v11929_v32 }
  0xfc   : > { %v1177_v48 = vld [vmem:[%s15233_s1 + $0x1f20] sm:$0xff]  ;;  %8281 = vmatpush2.bf16.msra.mxu1 %v10704_v51 }
  0xfd   : > { %v10697_v55 = vcombine.high %v1173_v47, %v1177_v48  ;;  %v1037_v56 = vld [vmem:[%s15233_s1 + $0x1ac0] sm:$0xff]  ;;  %8241 = vmatprep.subr.bf16.mxu0 %v10569_v52  ;;  %v10696_v63 = vcombine.low %v1173_v47, %v1177_v48 }
  0xfe   : > { %v1041_v57 = vld [vmem:[%s15233_s1 + $0x1ae0] sm:$0xff]  ;;  %8242 = vmatpush2.bf16.msra.mxu0 %v10568_v62  ;;  %v11969_v62 = vcombine.low %v11747_v10, %v11747_v10 }
  0xff   : > { %v1165_v60 = vld [vmem:[%s15233_s1 + $0x1ec0] sm:$0xff]  ;;  %v10561_v0 = vcombine.high %v1037_v56, %v1041_v57  ;;  %8282 = vmatprep.subr.bf16.mxu1 %v10697_v55  ;;  %v10560_v9 = vcombine.low %v1037_v56, %v1041_v57  ;;  %v11956_v55 = vcombine.low %v11740_v7, %v11740_v7 }
 0x100   : > { %v1169_v61 = vld [vmem:[%s15233_s1 + $0x1ee0] sm:$0xff]  ;;  %8283 = vmatpush2.bf16.msra.mxu1 %v10696_v63 }
 0x101   : > { %v10689_v1 = vcombine.high %v1165_v60, %v1169_v61  ;;  %v1029_v2 = vld [vmem:[%s15233_s1 + $0x1a80] sm:$0xff]  ;;  %8243 = vmatprep.subr.bf16.mxu0 %v10561_v0  ;;  %v10688_v39 = vcombine.low %v1165_v60, %v1169_v61  ;;  %v11972_v0 = vld [vmem:[%s11143_s19 + $0x48] sm:$0xff] }
 0x102   : > { %v1033_v3 = vld [vmem:[%s15233_s1 + $0x1aa0] sm:$0xff]  ;;  %8244 = vmatpush2.bf16.msra.mxu0 %v10560_v9 }
 0x103   : > { %v1157_v5 = vld [vmem:[%s15233_s1 + $0x1e80] sm:$0xff]  ;;  %v10553_v11 = vcombine.high %v1029_v2, %v1033_v3  ;;  %8284 = vmatprep.subr.bf16.mxu1 %v10689_v1  ;;  %v10552_v21 = vcombine.low %v1029_v2, %v1033_v3 }
 0x104   : > { %v1161_v6 = vld [vmem:[%s15233_s1 + $0x1ea0] sm:$0xff]  ;;  %8285 = vmatpush2.bf16.msra.mxu1 %v10688_v39 }
 0x105   : > { %v10681_v12 = vcombine.high %v1157_v5, %v1161_v6  ;;  %v1021_v13 = vld [vmem:[%s15233_s1 + $0x1a40] sm:$0xff]  ;;  %8245 = vmatprep.subr.bf16.mxu0 %v10553_v11  ;;  %v10680_v23 = vcombine.low %v1157_v5, %v1161_v6 }
 0x106   : > { %v1025_v14 = vld [vmem:[%s15233_s1 + $0x1a60] sm:$0xff]  ;;  %8246 = vmatpush2.bf16.msra.mxu0 %v10552_v21 }
 0x107   : > { %v1149_v15 = vld [vmem:[%s15233_s1 + $0x1e40] sm:$0xff]  ;;  %v10545_v24 = vcombine.high %v1021_v13, %v1025_v14  ;;  %8286 = vmatprep.subr.bf16.mxu1 %v10681_v12  ;;  %v10544_v31 = vcombine.low %v1021_v13, %v1025_v14  ;;  %v11993_v12 = vcombine.high %v11972_v0, %v11972_v0 }
 0x108   : > { %v1153_v17 = vld [vmem:[%s15233_s1 + $0x1e60] sm:$0xff]  ;;  %8287 = vmatpush2.bf16.msra.mxu1 %v10680_v23 }
 0x109   : > { %v10673_v25 = vcombine.high %v1149_v15, %v1153_v17  ;;  %v1013_v26 = vld [vmem:[%s15233_s1 + $0x1a00] sm:$0xff]  ;;  %8247 = vmatprep.subr.bf16.mxu0 %v10545_v24  ;;  %v10672_v33 = vcombine.low %v1149_v15, %v1153_v17 }
 0x10a   : > { %v1017_v27 = vld [vmem:[%s15233_s1 + $0x1a20] sm:$0xff]  ;;  %8248 = vmatpush2.bf16.msra.mxu0 %v10544_v31 }
 0x10b   : > { %v1141_v28 = vld [vmem:[%s15233_s1 + $0x1e00] sm:$0xff]  ;;  %v10537_v34 = vcombine.high %v1013_v26, %v1017_v27  ;;  %8288 = vmatprep.subr.bf16.mxu1 %v10673_v25  ;;  %v10536_v43 = vcombine.low %v1013_v26, %v1017_v27 }
 0x10c   : > { %v1145_v30 = vld [vmem:[%s15233_s1 + $0x1e20] sm:$0xff]  ;;  %8289 = vmatpush2.bf16.msra.mxu1 %v10672_v33 }
 0x10d   : > { %v10665_v35 = vcombine.high %v1141_v28, %v1145_v30  ;;  %v1261_v37 = vld [vmem:[%s15233_s1 + $0x21c0] sm:$0xff]  ;;  %8249 = vmatprep.subr.bf16.mxu0 %v10537_v34  ;;  %v10664_v45 = vcombine.low %v1141_v28, %v1145_v30 }
 0x10e   : > { %v1265_v38 = vld [vmem:[%s15233_s1 + $0x21e0] sm:$0xff]  ;;  %8250 = vmatpush2.bf16.msra.mxu0 %v10536_v43 }
 0x10f   : > { %v1389_v41 = vld [vmem:[%s15233_s1 + $0x25c0] sm:$0xff]  ;;  %v10785_v47 = vcombine.high %v1261_v37, %v1265_v38  ;;  %8290 = vmatprep.subr.bf16.mxu1 %v10665_v35  ;;  %v10784_v63 = vcombine.low %v1261_v37, %v1265_v38 }
 0x110   : > { %v1393_v19 = vld [vmem:[%s15233_s1 + $0x25e0] sm:$0xff]  ;;  %8291 = vmatpush2.bf16.msra.mxu1 %v10664_v45  ;;  %v8007_v9 = vpop.f32.mrf.mxu0 }
 0x111   : > { %v1461_v46 = vld [vmem:[%s15234_s2] sm:$0xff]  ;;  %v10913_v48 = vcombine.high %v1389_v41, %v1393_v19  ;;  %8301 = vmatprep.subr.bf16.mxu0 %v10785_v47  ;;  %v10912_v7 = vcombine.low %v1389_v41, %v1393_v19  ;;  %8252 = vmatmul.mubr.bf16.vlgmr.msra.gmra.mxu0 %v11956_v55 }
 0x112   : > { %v1253_v51 = vld [vmem:[%s15233_s1 + $0x2180] sm:$0xff]  ;;  %v1466_v61 = vrot.slane %v1461_v46, %v1465_v44  ;;  %v1470_v2 = vrot.slane %v1461_v46, %v1469_v50  ;;  %v8048_v14 = vpop.f32.mrf.mxu1  ;;  %8302 = vmatpush1.bf16.msra.mxu0 %v10784_v63  ;;  %v8009_v17 = vpop.f32.mrf.mxu0 }
 0x113   : > { %v1257_v52 = vld [vmem:[%s15233_s1 + $0x21a0] sm:$0xff]  ;;  %8342 = vmatprep.subr.bf16.mxu1 %v10913_v48  ;;  %8293 = vmatmul.mubr.bf16.vlgmr.msra.gmra.mxu1 %v11969_v62 }
 0x114   : > { %v1381_v56 = vld [vmem:[%s15233_s1 + $0x2580] sm:$0xff]  ;;  %v10777_v1 = vcombine.high %v1253_v51, %v1257_v52  ;;  %v8008_v13 = vadd.f32 %v8007_v9, %v1466_v61  ;;  %v10776_v15 = vcombine.low %v1253_v51, %v1257_v52  ;;  %8343 = vmatpush1.bf16.msra.mxu1 %v10912_v7  ;;  %v8010_v24 = vadd.f32 %v8009_v17, %v1470_v2  ;;  %v8050_v25 = vpop.f32.mrf.mxu1  ;;  %v8011_v30 = vpop.f32.mrf.mxu0 }
 0x115   : > { %v1385_v57 = vld [vmem:[%s15233_s1 + $0x25a0] sm:$0xff]  ;;  %8374 = vmatprep.mubr.bf16.mxu1 %v11993_v12 }
 0x116   : > { %v11965_v60 = vld [vmem:[%s11143_s19 + $0x40] sm:$0xff]  ;;  %v10905_v3 = vcombine.high %v1381_v56, %v1385_v57  ;;  %8303 = vmatprep.subr.bf16.mxu0 %v10777_v1  ;;  %v10904_v21 = vcombine.low %v1381_v56, %v1385_v57  ;;  %v11996_v23 = vadd.f32 %v8048_v14, %v8008_v13  ;;  %v12012_v34 = vadd.f32 %v8050_v25, %v8010_v24  ;;  %v8052_v35 = vpop.f32.mrf.mxu1  ;;  %v8012_v38 = vpop.f32.mrf.mxu0 }
 0x117   : > { %v1245_v5 = vld [vmem:[%s15233_s1 + $0x2140] sm:$0xff]  ;;  %v11982_v10 = vcombine.high %v11965_v60, %v11965_v60  ;;  %8304 = vmatpush1.bf16.msra.mxu0 %v10776_v15 }
 0x118   : > { %v1249_v6 = vld [vmem:[%s15233_s1 + $0x2160] sm:$0xff]  ;;  %8344 = vmatprep.subr.bf16.mxu1 %v10905_v3  ;;  %v8053_v43 = vpop.f32.mrf.mxu1 }
 0x119   : > { %v1373_v39 = vld [vmem:[%s15233_s1 + $0x2540] sm:$0xff]  ;;  %v10769_v53 = vcombine.high %v1245_v5, %v1249_v6  ;;  %8333 = vmatprep.mubr.bf16.mxu0 %v11982_v10  ;;  %v10768_v37 = vcombine.low %v1245_v5, %v1249_v6  ;;  %8345 = vmatpush1.bf16.msra.mxu1 %v10904_v21 }
 0x11a   : > { %v1377_v11 = vld [vmem:[%s15233_s1 + $0x2560] sm:$0xff] }
 0x11b   : > { %v10897_v26 = vcombine.high %v1373_v39, %v1377_v11  ;;  %v1237_v27 = vld [vmem:[%s15233_s1 + $0x2100] sm:$0xff]  ;;  %8305 = vmatprep.subr.bf16.mxu0 %v10769_v53  ;;  %v10896_v41 = vcombine.low %v1373_v39, %v1377_v11 }
 0x11c   : > { %v1241_v28 = vld [vmem:[%s15233_s1 + $0x2120] sm:$0xff]  ;;  %8306 = vmatpush1.bf16.msra.mxu0 %v10768_v37 }
 0x11d   : > { %v1365_v31 = vld [vmem:[%s15233_s1 + $0x2500] sm:$0xff]  ;;  %v10761_v19 = vcombine.high %v1237_v27, %v1241_v28  ;;  %8346 = vmatprep.subr.bf16.mxu1 %v10897_v26  ;;  %v10760_v50 = vcombine.low %v1237_v27, %v1241_v28 }
 0x11e   : > { %v1369_v33 = vld [vmem:[%s15233_s1 + $0x2520] sm:$0xff]  ;;  %8347 = vmatpush1.bf16.msra.mxu1 %v10896_v41 }
 0x11f   : > { %v10889_v44 = vcombine.high %v1365_v31, %v1369_v33  ;;  %v1229_v45 = vld [vmem:[%s15233_s1 + $0x20c0] sm:$0xff]  ;;  %8307 = vmatprep.subr.bf16.mxu0 %v10761_v19  ;;  %v10888_v51 = vcombine.low %v1365_v31, %v1369_v33 }
 0x120   : > { %v1233_v46 = vld [vmem:[%s15233_s1 + $0x20e0] sm:$0xff]  ;;  %8308 = vmatpush1.bf16.msra.mxu0 %v10760_v50 }
 0x121   : > { %v1357_v47 = vld [vmem:[%s15233_s1 + $0x24c0] sm:$0xff]  ;;  %v10753_v52 = vcombine.high %v1229_v45, %v1233_v46  ;;  %8348 = vmatprep.subr.bf16.mxu1 %v10889_v44  ;;  %v10752_v1 = vcombine.low %v1229_v45, %v1233_v46 }
 0x122   : > { %v1361_v48 = vld [vmem:[%s15233_s1 + $0x24e0] sm:$0xff]  ;;  %8349 = vmatpush1.bf16.msra.mxu1 %v10888_v51 }
 0x123   : > { %v10881_v56 = vcombine.high %v1357_v47, %v1361_v48  ;;  %v1221_v57 = vld [vmem:[%s15233_s1 + $0x2080] sm:$0xff]  ;;  %8309 = vmatprep.subr.bf16.mxu0 %v10753_v52  ;;  %v10880_v2 = vcombine.low %v1357_v47, %v1361_v48 }
 0x124   : > { %v1225_v61 = vld [vmem:[%s15233_s1 + $0x20a0] sm:$0xff]  ;;  %8310 = vmatpush1.bf16.msra.mxu0 %v10752_v1 }
 0x125   : > { %v1349_v63 = vld [vmem:[%s15233_s1 + $0x2480] sm:$0xff]  ;;  %v10745_v3 = vcombine.high %v1221_v57, %v1225_v61  ;;  %8350 = vmatprep.subr.bf16.mxu1 %v10881_v56  ;;  %v10744_v13 = vcombine.low %v1221_v57, %v1225_v61 }
 0x126   : > { %v1353_v7 = vld [vmem:[%s15233_s1 + $0x24a0] sm:$0xff]  ;;  %8351 = vmatpush1.bf16.msra.mxu1 %v10880_v2 }
 0x127   : > { %v10873_v5 = vcombine.high %v1349_v63, %v1353_v7  ;;  %v1213_v6 = vld [vmem:[%s15233_s1 + $0x2040] sm:$0xff]  ;;  %8311 = vmatprep.subr.bf16.mxu0 %v10745_v3  ;;  %v10872_v14 = vcombine.low %v1349_v63, %v1353_v7 }
 0x128   : > { %v1217_v9 = vld [vmem:[%s15233_s1 + $0x2060] sm:$0xff]  ;;  %8312 = vmatpush1.bf16.msra.mxu0 %v10744_v13 }
 0x129   : > { %v1341_v39 = vld [vmem:[%s15233_s1 + $0x2440] sm:$0xff]  ;;  %v10737_v15 = vcombine.high %v1213_v6, %v1217_v9  ;;  %8352 = vmatprep.subr.bf16.mxu1 %v10873_v5  ;;  %v10736_v26 = vcombine.low %v1213_v6, %v1217_v9 }
 0x12a   : > { %v1345_v11 = vld [vmem:[%s15233_s1 + $0x2460] sm:$0xff]  ;;  %8353 = vmatpush1.bf16.msra.mxu1 %v10872_v14 }
 0x12b   : > { %v10865_v17 = vcombine.high %v1341_v39, %v1345_v11  ;;  %v1205_v21 = vld [vmem:[%s15233_s1 + $0x2000] sm:$0xff]  ;;  %8313 = vmatprep.subr.bf16.mxu0 %v10737_v15  ;;  %v10864_v27 = vcombine.low %v1341_v39, %v1345_v11 }
 0x12c   : > { %v1209_v53 = vld [vmem:[%s15233_s1 + $0x2020] sm:$0xff]  ;;  %8314 = vmatpush1.bf16.msra.mxu0 %v10736_v26 }
 0x12d   : > { %v1333_v24 = vld [vmem:[%s15233_s1 + $0x2400] sm:$0xff]  ;;  %v10729_v28 = vcombine.high %v1205_v21, %v1209_v53  ;;  %8354 = vmatprep.subr.bf16.mxu1 %v10865_v17  ;;  %v10728_v38 = vcombine.low %v1205_v21, %v1209_v53 }
 0x12e   : > { %v1337_v25 = vld [vmem:[%s15233_s1 + $0x2420] sm:$0xff]  ;;  %8355 = vmatpush1.bf16.msra.mxu1 %v10864_v27 }
 0x12f   : > { %v10857_v30 = vcombine.high %v1333_v24, %v1337_v25  ;;  %v1325_v31 = vld [vmem:[%s15233_s1 + $0x23c0] sm:$0xff]  ;;  %8315 = vmatprep.subr.bf16.mxu0 %v10729_v28  ;;  %v10856_v41 = vcombine.low %v1333_v24, %v1337_v25 }
 0x130   : > { %v1329_v33 = vld [vmem:[%s15233_s1 + $0x23e0] sm:$0xff]  ;;  %8316 = vmatpush1.bf16.msra.mxu0 %v10728_v38 }
 0x131   : > { %v1453_v35 = vld [vmem:[%s15233_s1 + $0x27c0] sm:$0xff]  ;;  %v10849_v19 = vcombine.high %v1325_v31, %v1329_v33  ;;  %8356 = vmatprep.subr.bf16.mxu1 %v10857_v30  ;;  %v10848_v48 = vcombine.low %v1325_v31, %v1329_v33 }
 0x132   : > { %v1457_v37 = vld [vmem:[%s15233_s1 + $0x27e0] sm:$0xff]  ;;  %8357 = vmatpush1.bf16.msra.mxu1 %v10856_v41 }
 0x133   : > { %v10977_v43 = vcombine.high %v1453_v35, %v1457_v37  ;;  %v1317_v44 = vld [vmem:[%s15233_s1 + $0x2380] sm:$0xff]  ;;  %8317 = vmatprep.subr.bf16.mxu0 %v10849_v19  ;;  %v10976_v50 = vcombine.low %v1453_v35, %v1457_v37 }
 0x134   : > { %v1321_v45 = vld [vmem:[%s15233_s1 + $0x23a0] sm:$0xff]  ;;  %8318 = vmatpush2.bf16.msra.mxu0 %v10848_v48 }
 0x135   : > { %v1445_v46 = vld [vmem:[%s15233_s1 + $0x2780] sm:$0xff]  ;;  %v10841_v51 = vcombine.high %v1317_v44, %v1321_v45  ;;  %8358 = vmatprep.subr.bf16.mxu1 %v10977_v43  ;;  %v10840_v7 = vcombine.low %v1317_v44, %v1321_v45 }
 0x136   : > { %v1449_v47 = vld [vmem:[%s15233_s1 + $0x27a0] sm:$0xff]  ;;  %8359 = vmatpush2.bf16.msra.mxu1 %v10976_v50 }
 0x137   : > { %v10969_v52 = vcombine.high %v1445_v46, %v1449_v47  ;;  %v1309_v56 = vld [vmem:[%s15233_s1 + $0x2340] sm:$0xff]  ;;  %8319 = vmatprep.subr.bf16.mxu0 %v10841_v51  ;;  %v10968_v1 = vcombine.low %v1445_v46, %v1449_v47 }
 0x138   : > { %v1313_v57 = vld [vmem:[%s15233_s1 + $0x2360] sm:$0xff]  ;;  %8320 = vmatpush2.bf16.msra.mxu0 %v10840_v7 }
 0x139   : > { %v1437_v61 = vld [vmem:[%s15233_s1 + $0x2740] sm:$0xff]  ;;  %v10833_v2 = vcombine.high %v1309_v56, %v1313_v57  ;;  %8360 = vmatprep.subr.bf16.mxu1 %v10969_v52  ;;  %v10832_v11 = vcombine.low %v1309_v56, %v1313_v57 }
 0x13a   : > { %v1441_v63 = vld [vmem:[%s15233_s1 + $0x2760] sm:$0xff]  ;;  %8361 = vmatpush2.bf16.msra.mxu1 %v10968_v1 }
 0x13b   : > { %v10961_v3 = vcombine.high %v1437_v61, %v1441_v63  ;;  %v1301_v5 = vld [vmem:[%s15233_s1 + $0x2300] sm:$0xff]  ;;  %8321 = vmatprep.subr.bf16.mxu0 %v10833_v2  ;;  %v10960_v13 = vcombine.low %v1437_v61, %v1441_v63 }
 0x13c   : > { %v1305_v6 = vld [vmem:[%s15233_s1 + $0x2320] sm:$0xff]  ;;  %8322 = vmatpush2.bf16.msra.mxu0 %v10832_v11 }
 0x13d   : > { %v1429_v9 = vld [vmem:[%s15233_s1 + $0x2700] sm:$0xff]  ;;  %v10825_v14 = vcombine.high %v1301_v5, %v1305_v6  ;;  %8362 = vmatprep.subr.bf16.mxu1 %v10961_v3  ;;  %v10824_v25 = vcombine.low %v1301_v5, %v1305_v6  ;;  %v238_v3 = vld [vmem:[%s15233_s1 + $0x1c8] sm:$0xff] }
 0x13e   : > { %v1433_v39 = vld [vmem:[%s15233_s1 + $0x2720] sm:$0xff]  ;;  %8363 = vmatpush2.bf16.msra.mxu1 %v10960_v13  ;;  %v242_v5 = vld [vmem:[%s15233_s1 + $0x1e8] sm:$0xff] }
 0x13f   : > { %v10953_v15 = vcombine.high %v1429_v9, %v1433_v39  ;;  %v1293_v17 = vld [vmem:[%s15233_s1 + $0x22c0] sm:$0xff]  ;;  %8323 = vmatprep.subr.bf16.mxu0 %v10825_v14  ;;  %v10952_v26 = vcombine.low %v1429_v9, %v1433_v39  ;;  %v366_v6 = vld [vmem:[%s15233_s1 + $0x5c8] sm:$0xff]  ;;  %v9763_v13 = vcombine.high %v238_v3, %v242_v5 }
 0x140   : > { %v1297_v21 = vld [vmem:[%s15233_s1 + $0x22e0] sm:$0xff]  ;;  %8324 = vmatpush2.bf16.msra.mxu0 %v10824_v25  ;;  %v370_v9 = vld [vmem:[%s15233_s1 + $0x5e8] sm:$0xff]  ;;  %v12188_v25 = vcombine.low %v11972_v0, %v11972_v0 }
 0x141   : > { %v1421_v53 = vld [vmem:[%s15233_s1 + $0x26c0] sm:$0xff]  ;;  %v10817_v27 = vcombine.high %v1293_v17, %v1297_v21  ;;  %8364 = vmatprep.subr.bf16.mxu1 %v10953_v15  ;;  %v10816_v37 = vcombine.low %v1293_v17, %v1297_v21  ;;  %v9891_v14 = vcombine.high %v366_v6, %v370_v9  ;;  %v230_v15 = vld [vmem:[%s15233_s1 + $0x188] sm:$0xff]  ;;  %v12178_v21 = vcombine.low %v11965_v60, %v11965_v60 }
 0x142   : > { %v1425_v24 = vld [vmem:[%s15233_s1 + $0x26e0] sm:$0xff]  ;;  %8365 = vmatpush2.bf16.msra.mxu1 %v10952_v26  ;;  %v234_v17 = vld [vmem:[%s15233_s1 + $0x1a8] sm:$0xff]  ;;  %v9762_v26 = vcombine.low %v238_v3, %v242_v5 }
 0x143   : > { %v10945_v28 = vcombine.high %v1421_v53, %v1425_v24  ;;  %v1285_v30 = vld [vmem:[%s15233_s1 + $0x2280] sm:$0xff]  ;;  %8325 = vmatprep.subr.bf16.mxu0 %v10817_v27  ;;  %v10944_v38 = vcombine.low %v1421_v53, %v1425_v24  ;;  %v358_v53 = vld [vmem:[%s15233_s1 + $0x588] sm:$0xff]  ;;  %v9890_v27 = vcombine.low %v366_v6, %v370_v9 }
 0x144   : > { %v1289_v31 = vld [vmem:[%s15233_s1 + $0x22a0] sm:$0xff]  ;;  %8326 = vmatpush2.bf16.msra.mxu0 %v10816_v37  ;;  %v362_v24 = vld [vmem:[%s15233_s1 + $0x5a8] sm:$0xff] }
 0x145   : > { %v1413_v33 = vld [vmem:[%s15233_s1 + $0x2680] sm:$0xff]  ;;  %v10809_v41 = vcombine.high %v1285_v30, %v1289_v31  ;;  %8366 = vmatprep.subr.bf16.mxu1 %v10945_v28  ;;  %v10808_v47 = vcombine.low %v1285_v30, %v1289_v31  ;;  %v9755_v28 = vcombine.high %v230_v15, %v234_v17  ;;  %v9883_v60 = vcombine.high %v358_v53, %v362_v24  ;;  %v222_v30 = vld [vmem:[%s15233_s1 + $0x148] sm:$0xff] }
 0x146   : > { %v1417_v35 = vld [vmem:[%s15233_s1 + $0x26a0] sm:$0xff]  ;;  %8367 = vmatpush2.bf16.msra.mxu1 %v10944_v38  ;;  %v226_v31 = vld [vmem:[%s15233_s1 + $0x168] sm:$0xff] }
 0x147   : > { %v10937_v19 = vcombine.high %v1413_v33, %v1417_v35  ;;  %v1277_v43 = vld [vmem:[%s15233_s1 + $0x2240] sm:$0xff]  ;;  %8327 = vmatprep.subr.bf16.mxu0 %v10809_v41  ;;  %v10936_v48 = vcombine.low %v1413_v33, %v1417_v35  ;;  %v350_v0 = vld [vmem:[%s15233_s1 + $0x548] sm:$0xff]  ;;  %v9754_v41 = vcombine.low %v230_v15, %v234_v17 }
 0x148   : > { %v1281_v44 = vld [vmem:[%s15233_s1 + $0x2260] sm:$0xff]  ;;  %8328 = vmatpush2.bf16.msra.mxu0 %v10808_v47  ;;  %v354_v35 = vld [vmem:[%s15233_s1 + $0x568] sm:$0xff] }
 0x149   : > { %v1405_v45 = vld [vmem:[%s15233_s1 + $0x2640] sm:$0xff]  ;;  %v10801_v50 = vcombine.high %v1277_v43, %v1281_v44  ;;  %8368 = vmatprep.subr.bf16.mxu1 %v10937_v19  ;;  %v10800_v63 = vcombine.low %v1277_v43, %v1281_v44  ;;  %v9882_v43 = vcombine.low %v358_v53, %v362_v24  ;;  %v9747_v44 = vcombine.high %v222_v30, %v226_v31  ;;  %v206_v5 = vld [vmem:[%s15233_s1 + $0xc8] sm:$0xff] }
 0x14a   : > { %v1409_v46 = vld [vmem:[%s15233_s1 + $0x2660] sm:$0xff]  ;;  %8369 = vmatpush2.bf16.msra.mxu1 %v10936_v48  ;;  %v9875_v48 = vcombine.high %v350_v0, %v354_v35  ;;  %v210_v6 = vld [vmem:[%s15233_s1 + $0xe8] sm:$0xff] }
 0x14b   : > { %v10929_v51 = vcombine.high %v1405_v45, %v1409_v46  ;;  %v1269_v52 = vld [vmem:[%s15233_s1 + $0x2200] sm:$0xff]  ;;  %8329 = vmatprep.subr.bf16.mxu0 %v10801_v50  ;;  %v10928_v7 = vcombine.low %v1405_v45, %v1409_v46  ;;  %v218_v50 = vld [vmem:[%s15233_s1 + $0x128] sm:$0xff] }
 0x14c   : > { %v1273_v56 = vld [vmem:[%s15233_s1 + $0x2220] sm:$0xff]  ;;  %8330 = vmatpush2.bf16.msra.mxu0 %v10800_v63  ;;  %v334_v9 = vld [vmem:[%s15233_s1 + $0x4c8] sm:$0xff] }
 0x14d   : > { %v1397_v57 = vld [vmem:[%s15233_s1 + $0x2600] sm:$0xff]  ;;  %v10793_v1 = vcombine.high %v1269_v52, %v1273_v56  ;;  %8370 = vmatprep.subr.bf16.mxu1 %v10929_v51  ;;  %v10792_v39 = vcombine.low %v1269_v52, %v1273_v56  ;;  %v342_v52 = vld [vmem:[%s15233_s1 + $0x508] sm:$0xff] }
 0x14e   : > { %v1401_v61 = vld [vmem:[%s15233_s1 + $0x2620] sm:$0xff]  ;;  %8371 = vmatpush2.bf16.msra.mxu1 %v10928_v7  ;;  %v9874_v7 = vcombine.low %v350_v0, %v354_v35  ;;  %v198_v17 = vld [vmem:[%s15233_s1 + $0x88] sm:$0xff] }
 0x14f   : > { %v10921_v2 = vcombine.high %v1397_v57, %v1401_v61  ;;  %8331 = vmatprep.subr.bf16.mxu0 %v10793_v1  ;;  %v10920_v11 = vcombine.low %v1397_v57, %v1401_v61  ;;  %v9746_v61 = vcombine.low %v222_v30, %v226_v31  ;;  %v202_v53 = vld [vmem:[%s15233_s1 + $0xa8] sm:$0xff] }
 0x150   : > { %8332 = vmatpush2.bf16.msra.mxu0 %v10792_v39  ;;  %v8089_v33 = vpop.f32.mrf.mxu0  ;;  %v338_v39 = vld [vmem:[%s15233_s1 + $0x4e8] sm:$0xff] }
 0x151   : > { %8372 = vmatprep.subr.bf16.mxu1 %v10921_v2  ;;  %8383 = vmatprep.subr.bf16.mxu0 %v9763_v13  ;;  %v8090_v37 = vadd.f32 %v8089_v33, %v11996_v23  ;;  %v214_v23 = vld [vmem:[%s15233_s1 + $0x108] sm:$0xff]  ;;  %v9859_v15 = vcombine.high %v334_v9, %v338_v39 }
 0x152   : > { %8373 = vmatpush2.bf16.msra.mxu1 %v10920_v11  ;;  %v8130_v38 = vpop.f32.mrf.mxu1  ;;  %v8091_v19 = vpop.f32.mrf.mxu0  ;;  %v9739_v1 = vcombine.high %v214_v23, %v218_v50  ;;  %v9738_v11 = vcombine.low %v214_v23, %v218_v50  ;;  %v326_v24 = vld [vmem:[%s15233_s1 + $0x488] sm:$0xff] }
 0x153   : > { %8424 = vmatprep.subr.bf16.mxu1 %v9891_v14  ;;  %8334 = vmatmul.mubr.bf16.vlgmr.msra.gmra.mxu0 %v12178_v21  ;;  %v12205_v45 = vadd.f32 %v8130_v38, %v8090_v37  ;;  %v8092_v46 = vadd.f32 %v8091_v19, %v12012_v34  ;;  %v346_v34 = vld [vmem:[%s15233_s1 + $0x528] sm:$0xff]  ;;  %v9731_v14 = vcombine.high %v206_v5, %v210_v6 }
 0x154   : > { %8384 = vmatpush1.bf16.msra.mxu0 %v9762_v26  ;;  %v8132_v47 = vpop.f32.mrf.mxu1  ;;  %8415 = vmatprep.mubr.bf16.mxu0 %v11165_v58  ;;  %v8093_v51 = vpop.f32.mrf.mxu0  ;;  %v9867_v3 = vcombine.high %v342_v52, %v346_v34  ;;  %v9866_v13 = vcombine.low %v342_v52, %v346_v34  ;;  %v330_v26 = vld [vmem:[%s15233_s1 + $0x4a8] sm:$0xff]  ;;  %v9722_v37 = vcombine.low %v198_v17, %v202_v53 }
 0x155   : > { %8375 = vmatmul.mubr.bf16.vlgmr.msra.gmra.mxu1 %v12188_v25  ;;  %8385 = vmatprep.subr.bf16.mxu0 %v9755_v28  ;;  %v12222_v56 = vadd.f32 %v8132_v47, %v8092_v46  ;;  %v9858_v28 = vcombine.low %v334_v9, %v338_v39  ;;  %v9851_v30 = vcombine.high %v326_v24, %v330_v26  ;;  %v190_v31 = vld [vmem:[%s15233_s1 + $0x48] sm:$0xff] }
 0x156   : > { %8425 = vmatpush1.bf16.msra.mxu1 %v9890_v27  ;;  %8456 = vmatprep.mubr.bf16.mxu1 %v11169_v59  ;;  %v8134_v57 = vpop.f32.mrf.mxu1  ;;  %v8094_v63 = vpop.f32.mrf.mxu0  ;;  %v9730_v27 = vcombine.low %v206_v5, %v210_v6  ;;  %v194_v33 = vld [vmem:[%s15233_s1 + $0x68] sm:$0xff]  ;;  %v9850_v38 = vcombine.low %v326_v24, %v330_v26 }
 0x157   : > { %8426 = vmatprep.subr.bf16.mxu1 %v9883_v60  ;;  %v9723_v60 = vcombine.high %v198_v17, %v202_v53  ;;  %v318_v0 = vld [vmem:[%s15233_s1 + $0x448] sm:$0xff] }
 0x158   : > { %8386 = vmatpush1.bf16.msra.mxu0 %v9754_v41  ;;  %v8135_v2 = vpop.f32.mrf.mxu1  ;;  %v322_v35 = vld [vmem:[%s15233_s1 + $0x468] sm:$0xff]  ;;  %v9715_v41 = vcombine.high %v190_v31, %v194_v33 }
 0x159   : > { %8387 = vmatprep.subr.bf16.mxu0 %v9747_v44  ;;  %v9843_v19 = vcombine.high %v318_v0, %v322_v35  ;;  %v186_v44 = vld [vmem:[%s15233_s1 + $0x28] sm:$0xff]  ;;  %v9842_v23 = vcombine.low %v318_v0, %v322_v35 }
 0x15a   : > { %8427 = vmatpush1.bf16.msra.mxu1 %v9882_v43  ;;  %v182_v43 = vld [vmem:[%s15233_s1 + $0x8] sm:$0xff] }
 0x15b   : > { %8428 = vmatprep.subr.bf16.mxu1 %v9875_v48  ;;  %v310_v46 = vld [vmem:[%s15233_s1 + $0x408] sm:$0xff]  ;;  %v9714_v48 = vcombine.low %v190_v31, %v194_v33  ;;  %v9707_v50 = vcombine.high %v182_v43, %v186_v44  ;;  %v9706_v63 = vcombine.low %v182_v43, %v186_v44 }
 0x15c   : > { %8388 = vmatpush1.bf16.msra.mxu0 %v9746_v61  ;;  %v314_v47 = vld [vmem:[%s15233_s1 + $0x428] sm:$0xff] }
 0x15d   : > { %8389 = vmatprep.subr.bf16.mxu0 %v9739_v1  ;;  %v9835_v51 = vcombine.high %v310_v46, %v314_v47  ;;  %v302_v52 = vld [vmem:[%s15233_s1 + $0x3c8] sm:$0xff] }
 0x15e   : > { %8429 = vmatpush1.bf16.msra.mxu1 %v9874_v7  ;;  %v306_v34 = vld [vmem:[%s15233_s1 + $0x3e8] sm:$0xff]  ;;  %v9834_v7 = vcombine.low %v310_v46, %v314_v47 }
 0x15f   : > { %8430 = vmatprep.subr.bf16.mxu1 %v9867_v3  ;;  %v430_v57 = vld [vmem:[%s15233_s1 + $0x7c8] sm:$0xff]  ;;  %v9827_v1 = vcombine.high %v302_v52, %v306_v34  ;;  %v9826_v39 = vcombine.low %v302_v52, %v306_v34 }
 0x160   : > { %8390 = vmatpush1.bf16.msra.mxu0 %v9738_v11  ;;  %v434_v61 = vld [vmem:[%s15233_s1 + $0x7e8] sm:$0xff] }
 0x161   : > { %8391 = vmatprep.subr.bf16.mxu0 %v9731_v14  ;;  %v9955_v2 = vcombine.high %v430_v57, %v434_v61  ;;  %v294_v3 = vld [vmem:[%s15233_s1 + $0x388] sm:$0xff]  ;;  %v9954_v11 = vcombine.low %v430_v57, %v434_v61 }
 0x162   : > { %8431 = vmatpush1.bf16.msra.mxu1 %v9866_v13  ;;  %v298_v5 = vld [vmem:[%s15233_s1 + $0x3a8] sm:$0xff] }
 0x163   : > { %8432 = vmatprep.subr.bf16.mxu1 %v9859_v15  ;;  %v422_v6 = vld [vmem:[%s15233_s1 + $0x788] sm:$0xff]  ;;  %v9819_v13 = vcombine.high %v294_v3, %v298_v5  ;;  %v9818_v26 = vcombine.low %v294_v3, %v298_v5 }
 0x164   : > { %8392 = vmatpush1.bf16.msra.mxu0 %v9730_v27  ;;  %v426_v9 = vld [vmem:[%s15233_s1 + $0x7a8] sm:$0xff] }
 0x165   : > { %8393 = vmatprep.subr.bf16.mxu0 %v9723_v60  ;;  %v9947_v14 = vcombine.high %v422_v6, %v426_v9  ;;  %v286_v15 = vld [vmem:[%s15233_s1 + $0x348] sm:$0xff]  ;;  %v9946_v27 = vcombine.low %v422_v6, %v426_v9 }
 0x166   : > { %8433 = vmatpush1.bf16.msra.mxu1 %v9858_v28  ;;  %v290_v17 = vld [vmem:[%s15233_s1 + $0x368] sm:$0xff] }
 0x167   : > { %8434 = vmatprep.subr.bf16.mxu1 %v9851_v30  ;;  %v414_v53 = vld [vmem:[%s15233_s1 + $0x748] sm:$0xff]  ;;  %v9811_v28 = vcombine.high %v286_v15, %v290_v17  ;;  %v9810_v35 = vcombine.low %v286_v15, %v290_v17 }
 0x168   : > { %8394 = vmatpush1.bf16.msra.mxu0 %v9722_v37  ;;  %v418_v24 = vld [vmem:[%s15233_s1 + $0x768] sm:$0xff] }
 0x169   : > { %8395 = vmatprep.subr.bf16.mxu0 %v9715_v41  ;;  %v9939_v60 = vcombine.high %v414_v53, %v418_v24  ;;  %v278_v30 = vld [vmem:[%s15233_s1 + $0x308] sm:$0xff]  ;;  %v9938_v37 = vcombine.low %v414_v53, %v418_v24 }
 0x16a   : > { %8435 = vmatpush1.bf16.msra.mxu1 %v9850_v38  ;;  %v282_v31 = vld [vmem:[%s15233_s1 + $0x328] sm:$0xff] }
 0x16b   : > { %8436 = vmatprep.subr.bf16.mxu1 %v9843_v19  ;;  %v406_v33 = vld [vmem:[%s15233_s1 + $0x708] sm:$0xff]  ;;  %v9803_v38 = vcombine.high %v278_v30, %v282_v31  ;;  %v9802_v47 = vcombine.low %v278_v30, %v282_v31 }
 0x16c   : > { %8396 = vmatpush1.bf16.msra.mxu0 %v9714_v48  ;;  %v410_v0 = vld [vmem:[%s15233_s1 + $0x728] sm:$0xff] }
 0x16d   : > { %8397 = vmatprep.subr.bf16.mxu0 %v9707_v50  ;;  %v9931_v41 = vcombine.high %v406_v33, %v410_v0  ;;  %v270_v19 = vld [vmem:[%s15233_s1 + $0x2c8] sm:$0xff]  ;;  %v9930_v48 = vcombine.low %v406_v33, %v410_v0 }
 0x16e   : > { %8437 = vmatpush1.bf16.msra.mxu1 %v9842_v23  ;;  %v274_v43 = vld [vmem:[%s15233_s1 + $0x2e8] sm:$0xff] }
 0x16f   : > { %8438 = vmatprep.subr.bf16.mxu1 %v9835_v51  ;;  %v398_v44 = vld [vmem:[%s15233_s1 + $0x6c8] sm:$0xff]  ;;  %v9795_v23 = vcombine.high %v270_v19, %v274_v43  ;;  %v9794_v61 = vcombine.low %v270_v19, %v274_v43 }
 0x170   : > { %8398 = vmatpush1.bf16.msra.mxu0 %v9706_v63  ;;  %v402_v46 = vld [vmem:[%s15233_s1 + $0x6e8] sm:$0xff] }
 0x171   : > { %8399 = vmatprep.subr.bf16.mxu0 %v9827_v1  ;;  %v9923_v50 = vcombine.high %v398_v44, %v402_v46  ;;  %v262_v51 = vld [vmem:[%s15233_s1 + $0x288] sm:$0xff]  ;;  %v9922_v63 = vcombine.low %v398_v44, %v402_v46 }
 0x172   : > { %8439 = vmatpush1.bf16.msra.mxu1 %v9834_v7  ;;  %v266_v52 = vld [vmem:[%s15233_s1 + $0x2a8] sm:$0xff] }
 0x173   : > { %8440 = vmatprep.subr.bf16.mxu1 %v9955_v2  ;;  %v390_v34 = vld [vmem:[%s15233_s1 + $0x688] sm:$0xff]  ;;  %v9787_v7 = vcombine.high %v262_v51, %v266_v52  ;;  %v9786_v9 = vcombine.low %v262_v51, %v266_v52 }
 0x174   : > { %8400 = vmatpush2.bf16.msra.mxu0 %v9826_v39  ;;  %v394_v57 = vld [vmem:[%s15233_s1 + $0x6a8] sm:$0xff] }
 0x175   : > { %8401 = vmatprep.subr.bf16.mxu0 %v9819_v13  ;;  %v9915_v1 = vcombine.high %v390_v34, %v394_v57  ;;  %v254_v2 = vld [vmem:[%s15233_s1 + $0x248] sm:$0xff]  ;;  %v9914_v39 = vcombine.low %v390_v34, %v394_v57 }
 0x176   : > { %8441 = vmatpush2.bf16.msra.mxu1 %v9954_v11  ;;  %v258_v3 = vld [vmem:[%s15233_s1 + $0x268] sm:$0xff] }
 0x177   : > { %8442 = vmatprep.subr.bf16.mxu1 %v9947_v14  ;;  %v382_v5 = vld [vmem:[%s15233_s1 + $0x648] sm:$0xff]  ;;  %v9779_v11 = vcombine.high %v254_v2, %v258_v3  ;;  %v9778_v24 = vcombine.low %v254_v2, %v258_v3 }
 0x178   : > { %8402 = vmatpush2.bf16.msra.mxu0 %v9818_v26  ;;  %v386_v6 = vld [vmem:[%s15233_s1 + $0x668] sm:$0xff] }
 0x179   : > { %8403 = vmatprep.subr.bf16.mxu0 %v9811_v28  ;;  %v9907_v13 = vcombine.high %v382_v5, %v386_v6  ;;  %v246_v14 = vld [vmem:[%s15233_s1 + $0x208] sm:$0xff]  ;;  %v9906_v26 = vcombine.low %v382_v5, %v386_v6 }
 0x17a   : > { %8443 = vmatpush2.bf16.msra.mxu1 %v9946_v27  ;;  %v250_v15 = vld [vmem:[%s15233_s1 + $0x228] sm:$0xff] }
 0x17b   : > { %8444 = vmatprep.subr.bf16.mxu1 %v9939_v60  ;;  %v374_v17 = vld [vmem:[%s15233_s1 + $0x608] sm:$0xff]  ;;  %v9771_v27 = vcombine.high %v246_v14, %v250_v15  ;;  %v9770_v0 = vcombine.low %v246_v14, %v250_v15 }
 0x17c   : > { %8404 = vmatpush2.bf16.msra.mxu0 %v9810_v35  ;;  %v378_v53 = vld [vmem:[%s15233_s1 + $0x628] sm:$0xff] }
 0x17d   : > { %8405 = vmatprep.subr.bf16.mxu0 %v9803_v38  ;;  %v9899_v28 = vcombine.high %v374_v17, %v378_v53  ;;  %v494_v60 = vld [vmem:[%s15233_s1 + $0x9c8] sm:$0xff]  ;;  %v9898_v35 = vcombine.low %v374_v17, %v378_v53 }
 0x17e   : > { %8445 = vmatpush2.bf16.msra.mxu1 %v9938_v37  ;;  %v498_v30 = vld [vmem:[%s15233_s1 + $0x9e8] sm:$0xff] }
 0x17f   : > { %8446 = vmatprep.subr.bf16.mxu1 %v9931_v41  ;;  %v622_v31 = vld [vmem:[%s15233_s1 + $0xdc8] sm:$0xff]  ;;  %v10019_v37 = vcombine.high %v494_v60, %v498_v30  ;;  %v10018_v46 = vcombine.low %v494_v60, %v498_v30 }
 0x180   : > { %8406 = vmatpush2.bf16.msra.mxu0 %v9802_v47  ;;  %v626_v33 = vld [vmem:[%s15233_s1 + $0xde8] sm:$0xff] }
 0x181   : > { %8407 = vmatprep.subr.bf16.mxu0 %v9795_v23  ;;  %v10147_v38 = vcombine.high %v622_v31, %v626_v33  ;;  %v486_v41 = vld [vmem:[%s15233_s1 + $0x988] sm:$0xff]  ;;  %v10146_v47 = vcombine.low %v622_v31, %v626_v33 }
 0x182   : > { %8447 = vmatpush2.bf16.msra.mxu1 %v9930_v48  ;;  %v490_v19 = vld [vmem:[%s15233_s1 + $0x9a8] sm:$0xff] }
 0x183   : > { %8448 = vmatprep.subr.bf16.mxu1 %v9923_v50  ;;  %v614_v43 = vld [vmem:[%s15233_s1 + $0xd88] sm:$0xff]  ;;  %v10011_v48 = vcombine.high %v486_v41, %v490_v19 }
 0x184   : > { %8408 = vmatpush2.bf16.msra.mxu0 %v9794_v61  ;;  %v618_v44 = vld [vmem:[%s15233_s1 + $0xda8] sm:$0xff] }
 0x185   : > { %8409 = vmatprep.subr.bf16.mxu0 %v9787_v7  ;;  %v10139_v23 = vcombine.high %v614_v43, %v618_v44  ;;  %v478_v50 = vld [vmem:[%s15233_s1 + $0x948] sm:$0xff]  ;;  %v10010_v7 = vcombine.low %v486_v41, %v490_v19  ;;  %v10138_v2 = vcombine.low %v614_v43, %v618_v44 }
 0x186   : > { %8449 = vmatpush2.bf16.msra.mxu1 %v9922_v63  ;;  %v482_v51 = vld [vmem:[%s15233_s1 + $0x968] sm:$0xff] }
 0x187   : > { %8450 = vmatprep.subr.bf16.mxu1 %v9915_v1  ;;  %v606_v34 = vld [vmem:[%s15233_s1 + $0xd48] sm:$0xff]  ;;  %v10003_v3 = vcombine.high %v478_v50, %v482_v51  ;;  %v10002_v53 = vcombine.low %v478_v50, %v482_v51 }
 0x188   : > { %8410 = vmatpush2.bf16.msra.mxu0 %v9786_v9  ;;  %v610_v57 = vld [vmem:[%s15233_s1 + $0xd68] sm:$0xff] }
 0x189   : > { %8411 = vmatprep.subr.bf16.mxu0 %v9779_v11  ;;  %v474_v11 = vld [vmem:[%s15233_s1 + $0x928] sm:$0xff] }
 0x18a   : > { %8451 = vmatpush2.bf16.msra.mxu1 %v9914_v39  ;;  %v10131_v39 = vcombine.high %v606_v34, %v610_v57  ;;  %v598_v14 = vld [vmem:[%s15233_s1 + $0xd08] sm:$0xff] }
 0x18b   : > { %8452 = vmatprep.subr.bf16.mxu1 %v9907_v13  ;;  %v462_v30 = vld [vmem:[%s15233_s1 + $0x8c8] sm:$0xff] }
 0x18c   : > { %8412 = vmatpush2.bf16.msra.mxu0 %v9778_v24  ;;  %v466_v31 = vld [vmem:[%s15233_s1 + $0x8e8] sm:$0xff] }
 0x18d   : > { %8413 = vmatprep.subr.bf16.mxu0 %v9771_v27  ;;  %v590_v33 = vld [vmem:[%s15233_s1 + $0xcc8] sm:$0xff] }
 0x18e   : > { %8453 = vmatpush2.bf16.msra.mxu1 %v9906_v26  ;;  %v10130_v26 = vcombine.low %v606_v34, %v610_v57  ;;  %v454_v19 = vld [vmem:[%s15233_s1 + $0x888] sm:$0xff] }
 0x18f   : > { %8454 = vmatprep.subr.bf16.mxu1 %v9899_v28  ;;  %v458_v43 = vld [vmem:[%s15233_s1 + $0x8a8] sm:$0xff] }
 0x190   : > { %8414 = vmatpush2.bf16.msra.mxu0 %v9770_v0  ;;  %v594_v0 = vld [vmem:[%s15233_s1 + $0xce8] sm:$0xff] }
 0x191   : > { %8465 = vmatprep.subr.bf16.mxu0 %v10019_v37  ;;  %v8171_v52 = vpop.f32.mrf.mxu0  ;;  %v10115_v41 = vcombine.high %v590_v33, %v594_v0  ;;  %v582_v44 = vld [vmem:[%s15233_s1 + $0xc88] sm:$0xff] }
 0x192   : > { %8455 = vmatpush2.bf16.msra.mxu1 %v9898_v35  ;;  %v8172_v61 = vadd.f32 %v8171_v52, %v12205_v45  ;;  %v470_v45 = vld [vmem:[%s15233_s1 + $0x908] sm:$0xff] }
 0x193   : > { %8506 = vmatprep.subr.bf16.mxu1 %v10147_v38  ;;  %8416 = vmatmul.mubr.bf16.vlgmr.msra.gmra.mxu0 %v11295_v16  ;;  %v8212_v63 = vpop.f32.mrf.mxu1  ;;  %v8173_v1 = vpop.f32.mrf.mxu0  ;;  %v9995_v27 = vcombine.high %v470_v45, %v474_v11  ;;  %v9994_v35 = vcombine.low %v470_v45, %v474_v11  ;;  %v9987_v38 = vcombine.high %v462_v30, %v466_v31  ;;  %v446_v51 = vld [vmem:[%s15233_s1 + $0x848] sm:$0xff] }
 0x194   : > { %8466 = vmatpush1.bf16.msra.mxu0 %v10018_v46  ;;  %v12407_v5 = vadd.f32 %v8212_v63, %v8172_v61  ;;  %v8174_v6 = vadd.f32 %v8173_v1, %v12222_v56  ;;  %8497 = vmatprep.mubr.bf16.mxu0 %v11321_v54  ;;  %v602_v56 = vld [vmem:[%s15233_s1 + $0xd28] sm:$0xff]  ;;  %v9978_v61 = vcombine.low %v454_v19, %v458_v43 }
 0x195   : > { %8457 = vmatmul.mubr.bf16.vlgmr.msra.gmra.mxu1 %v11308_v20  ;;  %8467 = vmatprep.subr.bf16.mxu0 %v10011_v48  ;;  %v8214_v9 = vpop.f32.mrf.mxu1  ;;  %v8175_v13 = vpop.f32.mrf.mxu0  ;;  %v10123_v60 = vcombine.high %v598_v14, %v602_v56  ;;  %v10122_v37 = vcombine.low %v598_v14, %v602_v56  ;;  %v586_v46 = vld [vmem:[%s15233_s1 + $0xca8] sm:$0xff]  ;;  %v10114_v48 = vcombine.low %v590_v33, %v594_v0 }
 0x196   : > { %8507 = vmatpush1.bf16.msra.mxu1 %v10146_v47  ;;  %8538 = vmatprep.mubr.bf16.mxu1 %v11332_v29  ;;  %v12424_v15 = vadd.f32 %v8214_v9, %v8174_v6  ;;  %v9986_v47 = vcombine.low %v462_v30, %v466_v31  ;;  %v10107_v50 = vcombine.high %v582_v44, %v586_v46  ;;  %v450_v52 = vld [vmem:[%s15233_s1 + $0x868] sm:$0xff] }
 0x197   : > { %8508 = vmatprep.subr.bf16.mxu1 %v10139_v23  ;;  %v8216_v17 = vpop.f32.mrf.mxu1  ;;  %v8176_v24 = vpop.f32.mrf.mxu0  ;;  %v9979_v23 = vcombine.high %v454_v19, %v458_v43  ;;  %v574_v34 = vld [vmem:[%s15233_s1 + $0xc48] sm:$0xff]  ;;  %v10106_v63 = vcombine.low %v582_v44, %v586_v46 }
 0x198   : > { %8468 = vmatpush1.bf16.msra.mxu0 %v10010_v7  ;;  %v578_v57 = vld [vmem:[%s15233_s1 + $0xc68] sm:$0xff]  ;;  %v9971_v7 = vcombine.high %v446_v51, %v450_v52 }
 0x199   : > { %8469 = vmatprep.subr.bf16.mxu0 %v10003_v3  ;;  %v8217_v28 = vpop.f32.mrf.mxu1  ;;  %v10099_v1 = vcombine.high %v574_v34, %v578_v57  ;;  %v442_v3 = vld [vmem:[%s15233_s1 + $0x828] sm:$0xff]  ;;  %v10098_v45 = vcombine.low %v574_v34, %v578_v57 }
 0x19a   : > { %8509 = vmatpush1.bf16.msra.mxu1 %v10138_v2  ;;  %v438_v2 = vld [vmem:[%s15233_s1 + $0x808] sm:$0xff] }
 0x19b   : > { %8510 = vmatprep.subr.bf16.mxu1 %v10131_v39  ;;  %v566_v6 = vld [vmem:[%s15233_s1 + $0xc08] sm:$0xff]  ;;  %v9970_v39 = vcombine.low %v446_v51, %v450_v52  ;;  %v9963_v11 = vcombine.high %v438_v2, %v442_v3  ;;  %v9962_v24 = vcombine.low %v438_v2, %v442_v3 }
 0x19c   : > { %8470 = vmatpush1.bf16.msra.mxu0 %v10002_v53  ;;  %v570_v9 = vld [vmem:[%s15233_s1 + $0xc28] sm:$0xff] }
 0x19d   : > { %8471 = vmatprep.subr.bf16.mxu0 %v9995_v27  ;;  %v10091_v13 = vcombine.high %v566_v6, %v570_v9  ;;  %v558_v14 = vld [vmem:[%s15233_s1 + $0xbc8] sm:$0xff] }
 0x19e   : > { %8511 = vmatpush1.bf16.msra.mxu1 %v10130_v26  ;;  %v562_v56 = vld [vmem:[%s15233_s1 + $0xbe8] sm:$0xff]  ;;  %v10090_v26 = vcombine.low %v566_v6, %v570_v9 }
 0x19f   : > { %8512 = vmatprep.subr.bf16.mxu1 %v10123_v60  ;;  %v686_v17 = vld [vmem:[%s15233_s1 + $0xfc8] sm:$0xff]  ;;  %v10083_v27 = vcombine.high %v558_v14, %v562_v56  ;;  %v10082_v0 = vcombine.low %v558_v14, %v562_v56 }
 0x1a0   : > { %8472 = vmatpush1.bf16.msra.mxu0 %v9994_v35  ;;  %v690_v53 = vld [vmem:[%s15233_s1 + $0xfe8] sm:$0xff] }
 0x1a1   : > { %8473 = vmatprep.subr.bf16.mxu0 %v9987_v38  ;;  %v10211_v28 = vcombine.high %v686_v17, %v690_v53  ;;  %v550_v60 = vld [vmem:[%s15233_s1 + $0xb88] sm:$0xff]  ;;  %v10210_v35 = vcombine.low %v686_v17, %v690_v53 }
 0x1a2   : > { %8513 = vmatpush1.bf16.msra.mxu1 %v10122_v37  ;;  %v554_v30 = vld [vmem:[%s15233_s1 + $0xba8] sm:$0xff] }
 0x1a3   : > { %8514 = vmatprep.subr.bf16.mxu1 %v10115_v41  ;;  %v678_v31 = vld [vmem:[%s15233_s1 + $0xf88] sm:$0xff]  ;;  %v10075_v37 = vcombine.high %v550_v60, %v554_v30  ;;  %v10074_v46 = vcombine.low %v550_v60, %v554_v30 }
 0x1a4   : > { %8474 = vmatpush1.bf16.msra.mxu0 %v9986_v47  ;;  %v682_v33 = vld [vmem:[%s15233_s1 + $0xfa8] sm:$0xff] }
 0x1a5   : > { %8475 = vmatprep.subr.bf16.mxu0 %v9979_v23  ;;  %v10203_v38 = vcombine.high %v678_v31, %v682_v33  ;;  %v542_v41 = vld [vmem:[%s15233_s1 + $0xb48] sm:$0xff]  ;;  %v10202_v47 = vcombine.low %v678_v31, %v682_v33 }
 0x1a6   : > { %8515 = vmatpush1.bf16.msra.mxu1 %v10114_v48  ;;  %v546_v19 = vld [vmem:[%s15233_s1 + $0xb68] sm:$0xff] }
 0x1a7   : > { %8516 = vmatprep.subr.bf16.mxu1 %v10107_v50  ;;  %v670_v43 = vld [vmem:[%s15233_s1 + $0xf48] sm:$0xff]  ;;  %v10067_v48 = vcombine.high %v542_v41, %v546_v19  ;;  %v10066_v57 = vcombine.low %v542_v41, %v546_v19 }
 0x1a8   : > { %8476 = vmatpush1.bf16.msra.mxu0 %v9978_v61  ;;  %v674_v44 = vld [vmem:[%s15233_s1 + $0xf68] sm:$0xff] }
 0x1a9   : > { %8477 = vmatprep.subr.bf16.mxu0 %v9971_v7  ;;  %v10195_v23 = vcombine.high %v670_v43, %v674_v44  ;;  %v534_v50 = vld [vmem:[%s15233_s1 + $0xb08] sm:$0xff]  ;;  %v10194_v61 = vcombine.low %v670_v43, %v674_v44 }
 0x1aa   : > { %8517 = vmatpush1.bf16.msra.mxu1 %v10106_v63  ;;  %v538_v51 = vld [vmem:[%s15233_s1 + $0xb28] sm:$0xff] }
 0x1ab   : > { %8518 = vmatprep.subr.bf16.mxu1 %v10099_v1  ;;  %v662_v52 = vld [vmem:[%s15233_s1 + $0xf08] sm:$0xff]  ;;  %v10059_v63 = vcombine.high %v534_v50, %v538_v51  ;;  %v10058_v9 = vcombine.low %v534_v50, %v538_v51 }
 0x1ac   : > { %8478 = vmatpush1.bf16.msra.mxu0 %v9970_v39  ;;  %v666_v34 = vld [vmem:[%s15233_s1 + $0xf28] sm:$0xff] }
 0x1ad   : > { %8479 = vmatprep.subr.bf16.mxu0 %v9963_v11  ;;  %v10187_v7 = vcombine.high %v662_v52, %v666_v34  ;;  %v526_v1 = vld [vmem:[%s15233_s1 + $0xac8] sm:$0xff]  ;;  %v10186_v39 = vcombine.low %v662_v52, %v666_v34 }
 0x1ae   : > { %8519 = vmatpush1.bf16.msra.mxu1 %v10098_v45  ;;  %v530_v2 = vld [vmem:[%s15233_s1 + $0xae8] sm:$0xff] }
 0x1af   : > { %8520 = vmatprep.subr.bf16.mxu1 %v10091_v13  ;;  %v654_v3 = vld [vmem:[%s15233_s1 + $0xec8] sm:$0xff]  ;;  %v10051_v45 = vcombine.high %v526_v1, %v530_v2  ;;  %v10050_v53 = vcombine.low %v526_v1, %v530_v2 }
 0x1b0   : > { %8480 = vmatpush1.bf16.msra.mxu0 %v9962_v24  ;;  %v658_v6 = vld [vmem:[%s15233_s1 + $0xee8] sm:$0xff] }
 0x1b1   : > { %8481 = vmatprep.subr.bf16.mxu0 %v10083_v27  ;;  %v10179_v11 = vcombine.high %v654_v3, %v658_v6  ;;  %v518_v13 = vld [vmem:[%s15233_s1 + $0xa88] sm:$0xff]  ;;  %v10178_v24 = vcombine.low %v654_v3, %v658_v6 }
 0x1b2   : > { %8521 = vmatpush1.bf16.msra.mxu1 %v10090_v26  ;;  %v522_v14 = vld [vmem:[%s15233_s1 + $0xaa8] sm:$0xff] }
 0x1b3   : > { %8522 = vmatprep.subr.bf16.mxu1 %v10211_v28  ;;  %v646_v56 = vld [vmem:[%s15233_s1 + $0xe88] sm:$0xff]  ;;  %v10043_v26 = vcombine.high %v518_v13, %v522_v14  ;;  %v10042_v33 = vcombine.low %v518_v13, %v522_v14 }
 0x1b4   : > { %8482 = vmatpush2.bf16.msra.mxu0 %v10082_v0  ;;  %v650_v17 = vld [vmem:[%s15233_s1 + $0xea8] sm:$0xff] }
 0x1b5   : > { %8483 = vmatprep.subr.bf16.mxu0 %v10075_v37  ;;  %v10171_v27 = vcombine.high %v646_v56, %v650_v17  ;;  %v510_v28 = vld [vmem:[%s15233_s1 + $0xa48] sm:$0xff]  ;;  %v10170_v0 = vcombine.low %v646_v56, %v650_v17 }
 0x1b6   : > { %8523 = vmatpush2.bf16.msra.mxu1 %v10210_v35  ;;  %v514_v60 = vld [vmem:[%s15233_s1 + $0xa68] sm:$0xff] }
 0x1b7   : > { %8524 = vmatprep.subr.bf16.mxu1 %v10203_v38  ;;  %v638_v30 = vld [vmem:[%s15233_s1 + $0xe48] sm:$0xff]  ;;  %v10035_v35 = vcombine.high %v510_v28, %v514_v60  ;;  %v10034_v44 = vcombine.low %v510_v28, %v514_v60 }
 0x1b8   : > { %8484 = vmatpush2.bf16.msra.mxu0 %v10074_v46  ;;  %v642_v31 = vld [vmem:[%s15233_s1 + $0xe68] sm:$0xff] }
 0x1b9   : > { %8485 = vmatprep.subr.bf16.mxu0 %v10067_v48  ;;  %v10163_v37 = vcombine.high %v638_v30, %v642_v31  ;;  %v502_v38 = vld [vmem:[%s15233_s1 + $0xa08] sm:$0xff]  ;;  %v10162_v46 = vcombine.low %v638_v30, %v642_v31 }
 0x1ba   : > { %8525 = vmatpush2.bf16.msra.mxu1 %v10202_v47  ;;  %v506_v41 = vld [vmem:[%s15233_s1 + $0xa28] sm:$0xff] }
 0x1bb   : > { %8526 = vmatprep.subr.bf16.mxu1 %v10195_v23  ;;  %v630_v19 = vld [vmem:[%s15233_s1 + $0xe08] sm:$0xff]  ;;  %v10027_v47 = vcombine.high %v502_v38, %v506_v41  ;;  %v10026_v34 = vcombine.low %v502_v38, %v506_v41 }
 0x1bc   : > { %8486 = vmatpush2.bf16.msra.mxu0 %v10066_v57  ;;  %v634_v43 = vld [vmem:[%s15233_s1 + $0xe28] sm:$0xff] }
 0x1bd   : > { %8487 = vmatprep.subr.bf16.mxu0 %v10059_v63  ;;  %v10155_v48 = vcombine.high %v630_v19, %v634_v43  ;;  %v750_v23 = vld [vmem:[%s15233_s1 + $0x11c8] sm:$0xff]  ;;  %v10154_v57 = vcombine.low %v630_v19, %v634_v43 }
 0x1be   : > { %8527 = vmatpush2.bf16.msra.mxu1 %v10194_v61  ;;  %v754_v50 = vld [vmem:[%s15233_s1 + $0x11e8] sm:$0xff] }
 0x1bf   : > { %8528 = vmatprep.subr.bf16.mxu1 %v10187_v7  ;;  %v878_v51 = vld [vmem:[%s15233_s1 + $0x15c8] sm:$0xff]  ;;  %v10275_v61 = vcombine.high %v750_v23, %v754_v50  ;;  %v10274_v6 = vcombine.low %v750_v23, %v754_v50 }
 0x1c0   : > { %8488 = vmatpush2.bf16.msra.mxu0 %v10058_v9  ;;  %v882_v52 = vld [vmem:[%s15233_s1 + $0x15e8] sm:$0xff] }
 0x1c1   : > { %8489 = vmatprep.subr.bf16.mxu0 %v10051_v45  ;;  %v10403_v63 = vcombine.high %v878_v51, %v882_v52  ;;  %v742_v7 = vld [vmem:[%s15233_s1 + $0x1188] sm:$0xff]  ;;  %v10402_v9 = vcombine.low %v878_v51, %v882_v52 }
 0x1c2   : > { %8529 = vmatpush2.bf16.msra.mxu1 %v10186_v39  ;;  %v746_v1 = vld [vmem:[%s15233_s1 + $0x11a8] sm:$0xff] }
 0x1c3   : > { %8530 = vmatprep.subr.bf16.mxu1 %v10179_v11  ;;  %v870_v2 = vld [vmem:[%s15233_s1 + $0x1588] sm:$0xff]  ;;  %v10267_v39 = vcombine.high %v742_v7, %v746_v1 }
 0x1c4   : > { %8490 = vmatpush2.bf16.msra.mxu0 %v10050_v53  ;;  %v874_v3 = vld [vmem:[%s15233_s1 + $0x15a8] sm:$0xff] }
 0x1c5   : > { %8491 = vmatprep.subr.bf16.mxu0 %v10043_v26  ;;  %v10395_v45 = vcombine.high %v870_v2, %v874_v3  ;;  %v734_v11 = vld [vmem:[%s15233_s1 + $0x1148] sm:$0xff] }
 0x1c6   : > { %8531 = vmatpush2.bf16.msra.mxu1 %v10178_v24  ;;  %v738_v13 = vld [vmem:[%s15233_s1 + $0x1168] sm:$0xff]  ;;  %v10266_v24 = vcombine.low %v742_v7, %v746_v1 }
 0x1c7   : > { %8532 = vmatprep.subr.bf16.mxu1 %v10171_v27  ;;  %v862_v56 = vld [vmem:[%s15233_s1 + $0x1548] sm:$0xff]  ;;  %v10394_v27 = vcombine.low %v870_v2, %v874_v3  ;;  %v10259_v28 = vcombine.high %v734_v11, %v738_v13  ;;  %v10258_v41 = vcombine.low %v734_v11, %v738_v13 }
 0x1c8   : > { %8492 = vmatpush2.bf16.msra.mxu0 %v10042_v33  ;;  %v866_v17 = vld [vmem:[%s15233_s1 + $0x1568] sm:$0xff] }
 0x1c9   : > { %8493 = vmatprep.subr.bf16.mxu0 %v10035_v35  ;;  %v10387_v30 = vcombine.high %v862_v56, %v866_v17  ;;  %v726_v31 = vld [vmem:[%s15233_s1 + $0x1108] sm:$0xff]  ;;  %v10386_v43 = vcombine.low %v862_v56, %v866_v17 }
 0x1ca   : > { %8533 = vmatpush2.bf16.msra.mxu1 %v10170_v0  ;;  %v730_v33 = vld [vmem:[%s15233_s1 + $0x1128] sm:$0xff] }
 0x1cb   : > { %8534 = vmatprep.subr.bf16.mxu1 %v10163_v37  ;;  %v854_v35 = vld [vmem:[%s15233_s1 + $0x1508] sm:$0xff]  ;;  %v10250_v52 = vcombine.low %v726_v31, %v730_v33 }
 0x1cc   : > { %8494 = vmatpush2.bf16.msra.mxu0 %v10034_v44  ;;  %v858_v37 = vld [vmem:[%s15233_s1 + $0x1528] sm:$0xff]  ;;  %v10251_v44 = vcombine.high %v726_v31, %v730_v33 }
 0x1cd   : > { %8495 = vmatprep.subr.bf16.mxu0 %v10027_v47  ;;  %v10379_v47 = vcombine.high %v854_v35, %v858_v37  ;;  %v722_v23 = vld [vmem:[%s15233_s1 + $0x10e8] sm:$0xff] }
 0x1ce   : > { %8535 = vmatpush2.bf16.msra.mxu1 %v10162_v46  ;;  %v846_v50 = vld [vmem:[%s15233_s1 + $0x14c8] sm:$0xff] }
 0x1cf   : > { %8536 = vmatprep.subr.bf16.mxu1 %v10155_v48  ;;  %v718_v48 = vld [vmem:[%s15233_s1 + $0x10c8] sm:$0xff] }
 0x1d0   : > { %8496 = vmatpush2.bf16.msra.mxu0 %v10026_v34  ;;  %v850_v51 = vld [vmem:[%s15233_s1 + $0x14e8] sm:$0xff]  ;;  %v10378_v34 = vcombine.low %v854_v35, %v858_v37  ;;  %v10242_v3 = vcombine.low %v718_v48, %v722_v23 }
 0x1d1   : > { %8547 = vmatprep.subr.bf16.mxu0 %v10275_v61  ;;  %v12600_v14 = vpop.f32.mrf.mxu0  ;;  %v10371_v61 = vcombine.high %v846_v50, %v850_v51  ;;  %v714_v7 = vld [vmem:[%s15233_s1 + $0x10a8] sm:$0xff] }
 0x1d2   : > { %8537 = vmatpush2.bf16.msra.mxu1 %v10154_v57  ;;  %v10243_v57 = vcombine.high %v718_v48, %v722_v23  ;;  %v838_v1 = vld [vmem:[%s15233_s1 + $0x1488] sm:$0xff] }
 0x1d3   : > { %8588 = vmatprep.subr.bf16.mxu1 %v10403_v63  ;;  %8498 = vmatmul.mubr.bf16.vlgmr.msra.gmra.mxu0 %v11513_v36  ;;  %v12609_v53 = vpop.f32.mrf.mxu1  ;;  %v12612_v26 = vpop.f32.mrf.mxu0  ;;  %v710_v63 = vld [vmem:[%s15233_s1 + $0x1088] sm:$0xff] }
 0x1d4   : > { %8548 = vmatpush1.bf16.msra.mxu0 %v10274_v6  ;;  %8579 = vmatprep.mubr.bf16.mxu0 %v11539_v22  ;;  %v842_v2 = vld [vmem:[%s15233_s1 + $0x14a8] sm:$0xff]  ;;  %v10370_v6 = vcombine.low %v846_v50, %v850_v51  ;;  %v10234_v17 = vcombine.low %v710_v63, %v714_v7 }
 0x1d5   : > { %8539 = vmatmul.mubr.bf16.vlgmr.msra.gmra.mxu1 %v11526_v40  ;;  %8549 = vmatprep.subr.bf16.mxu0 %v10267_v39  ;;  %v12614_v60 = vpop.f32.mrf.mxu1  ;;  %v8257_v0 = vpop.f32.mrf.mxu0  ;;  %v10363_v39 = vcombine.high %v838_v1, %v842_v2  ;;  %v706_v11 = vld [vmem:[%s15233_s1 + $0x1068] sm:$0xff] }
 0x1d6   : > { %8589 = vmatpush1.bf16.msra.mxu1 %v10402_v9  ;;  %8620 = vmatprep.mubr.bf16.mxu1 %v11550_v49  ;;  %v10235_v9 = vcombine.high %v710_v63, %v714_v7  ;;  %v830_v13 = vld [vmem:[%s15233_s1 + $0x1448] sm:$0xff] }
 0x1d7   : > { %8590 = vmatprep.subr.bf16.mxu1 %v10395_v45  ;;  %v8298_v38 = vpop.f32.mrf.mxu1  ;;  %v8258_v19 = vpop.f32.mrf.mxu0  ;;  %v702_v45 = vld [vmem:[%s15233_s1 + $0x1048] sm:$0xff] }
 0x1d8   : > { %8550 = vmatpush1.bf16.msra.mxu0 %v10266_v24  ;;  %v834_v56 = vld [vmem:[%s15233_s1 + $0x1468] sm:$0xff]  ;;  %v10362_v24 = vcombine.low %v838_v1, %v842_v2  ;;  %v10226_v35 = vcombine.low %v702_v45, %v706_v11 }
 0x1d9   : > { %8551 = vmatprep.subr.bf16.mxu0 %v10259_v28  ;;  %v8299_v46 = vpop.f32.mrf.mxu1  ;;  %v10355_v28 = vcombine.high %v830_v13, %v834_v56  ;;  %v698_v31 = vld [vmem:[%s15233_s1 + $0x1028] sm:$0xff]  ;;  %v10354_v37 = vcombine.low %v830_v13, %v834_v56 }
 0x1da   : > { %8591 = vmatpush1.bf16.msra.mxu1 %v10394_v27  ;;  %v10227_v27 = vcombine.high %v702_v45, %v706_v11  ;;  %v822_v33 = vld [vmem:[%s15233_s1 + $0x1408] sm:$0xff] }
 0x1db   : > { %8592 = vmatprep.subr.bf16.mxu1 %v10387_v30  ;;  %v694_v30 = vld [vmem:[%s15233_s1 + $0x1008] sm:$0xff] }
 0x1dc   : > { %8552 = vmatpush1.bf16.msra.mxu0 %v10258_v41  ;;  %v826_v0 = vld [vmem:[%s15233_s1 + $0x1428] sm:$0xff]  ;;  %v10219_v38 = vcombine.high %v694_v30, %v698_v31 }
 0x1dd   : > { %8553 = vmatprep.subr.bf16.mxu0 %v10251_v44  ;;  %v10347_v41 = vcombine.high %v822_v33, %v826_v0  ;;  %v814_v19 = vld [vmem:[%s15233_s1 + $0x13c8] sm:$0xff]  ;;  %v10346_v48 = vcombine.low %v822_v33, %v826_v0 }
 0x1de   : > { %8593 = vmatpush1.bf16.msra.mxu1 %v10386_v43  ;;  %v818_v43 = vld [vmem:[%s15233_s1 + $0x13e8] sm:$0xff] }
 0x1df   : > { %8594 = vmatprep.subr.bf16.mxu1 %v10379_v47  ;;  %v942_v44 = vld [vmem:[%s15233_s1 + $0x17c8] sm:$0xff]  ;;  %v10218_v47 = vcombine.low %v694_v30, %v698_v31  ;;  %v10339_v23 = vcombine.high %v814_v19, %v818_v43 }
 0x1e0   : > { %8554 = vmatpush1.bf16.msra.mxu0 %v10250_v52  ;;  %v946_v46 = vld [vmem:[%s15233_s1 + $0x17e8] sm:$0xff] }
 0x1e1   : > { %8555 = vmatprep.subr.bf16.mxu0 %v10243_v57  ;;  %v10467_v50 = vcombine.high %v942_v44, %v946_v46  ;;  %v806_v51 = vld [vmem:[%s15233_s1 + $0x1388] sm:$0xff]  ;;  %v10466_v63 = vcombine.low %v942_v44, %v946_v46 }
 0x1e2   : > { %8595 = vmatpush1.bf16.msra.mxu1 %v10378_v34  ;;  %v810_v52 = vld [vmem:[%s15233_s1 + $0x13a8] sm:$0xff] }
 0x1e3   : > { %8596 = vmatprep.subr.bf16.mxu1 %v10371_v61  ;;  %v934_v34 = vld [vmem:[%s15233_s1 + $0x1788] sm:$0xff]  ;;  %v10338_v61 = vcombine.low %v814_v19, %v818_v43  ;;  %v10331_v7 = vcombine.high %v806_v51, %v810_v52 }
 0x1e4   : > { %8556 = vmatpush1.bf16.msra.mxu0 %v10242_v3  ;;  %v938_v57 = vld [vmem:[%s15233_s1 + $0x17a8] sm:$0xff] }
 0x1e5   : > { %8557 = vmatprep.subr.bf16.mxu0 %v10235_v9  ;;  %v10459_v1 = vcombine.high %v934_v34, %v938_v57  ;;  %v798_v2 = vld [vmem:[%s15233_s1 + $0x1348] sm:$0xff]  ;;  %v10458_v45 = vcombine.low %v934_v34, %v938_v57 }
 0x1e6   : > { %8597 = vmatpush1.bf16.msra.mxu1 %v10370_v6  ;;  %v802_v3 = vld [vmem:[%s15233_s1 + $0x1368] sm:$0xff] }
 0x1e7   : > { %8598 = vmatprep.subr.bf16.mxu1 %v10363_v39  ;;  %v926_v6 = vld [vmem:[%s15233_s1 + $0x1748] sm:$0xff]  ;;  %v10330_v39 = vcombine.low %v806_v51, %v810_v52  ;;  %v10323_v11 = vcombine.high %v798_v2, %v802_v3 }
 0x1e8   : > { %8558 = vmatpush1.bf16.msra.mxu0 %v10234_v17  ;;  %v930_v9 = vld [vmem:[%s15233_s1 + $0x1768] sm:$0xff] }
 0x1e9   : > { %8559 = vmatprep.subr.bf16.mxu0 %v10227_v27  ;;  %v10451_v13 = vcombine.high %v926_v6, %v930_v9  ;;  %v790_v56 = vld [vmem:[%s15233_s1 + $0x1308] sm:$0xff]  ;;  %v10450_v30 = vcombine.low %v926_v6, %v930_v9 }
 0x1ea   : > { %8599 = vmatpush1.bf16.msra.mxu1 %v10362_v24  ;;  %v794_v17 = vld [vmem:[%s15233_s1 + $0x1328] sm:$0xff] }
 0x1eb   : > { %8600 = vmatprep.subr.bf16.mxu1 %v10355_v28  ;;  %v918_v24 = vld [vmem:[%s15233_s1 + $0x1708] sm:$0xff]  ;;  %v10322_v28 = vcombine.low %v798_v2, %v802_v3  ;;  %v10315_v31 = vcombine.high %v790_v56, %v794_v17 }
 0x1ec   : > { %8560 = vmatpush1.bf16.msra.mxu0 %v10226_v35  ;;  %v922_v27 = vld [vmem:[%s15233_s1 + $0x1728] sm:$0xff] }
 0x1ed   : > { %8561 = vmatprep.subr.bf16.mxu0 %v10219_v38  ;;  %v10443_v33 = vcombine.high %v918_v24, %v922_v27  ;;  %v782_v0 = vld [vmem:[%s15233_s1 + $0x12c8] sm:$0xff]  ;;  %v10442_v19 = vcombine.low %v918_v24, %v922_v27 }
 0x1ee   : > { %8601 = vmatpush1.bf16.msra.mxu1 %v10354_v37  ;;  %v786_v35 = vld [vmem:[%s15233_s1 + $0x12e8] sm:$0xff] }
 0x1ef   : > { %8602 = vmatprep.subr.bf16.mxu1 %v10347_v41  ;;  %v910_v37 = vld [vmem:[%s15233_s1 + $0x16c8] sm:$0xff]  ;;  %v10314_v41 = vcombine.low %v790_v56, %v794_v17  ;;  %v10307_v43 = vcombine.high %v782_v0, %v786_v35 }
 0x1f0   : > { %8562 = vmatpush1.bf16.msra.mxu0 %v10218_v47  ;;  %v914_v38 = vld [vmem:[%s15233_s1 + $0x16e8] sm:$0xff] }
 0x1f1   : > { %8563 = vmatprep.subr.bf16.mxu0 %v10339_v23  ;;  %v10435_v44 = vcombine.high %v910_v37, %v914_v38  ;;  %v774_v46 = vld [vmem:[%s15233_s1 + $0x1288] sm:$0xff]  ;;  %v10434_v51 = vcombine.low %v910_v37, %v914_v38  ;;  %v8254_v37 = vadd.f32 %v12600_v14, %v12407_v5  ;;  %v8256_v5 = vadd.f32 %v12612_v26, %v12424_v15 }
 0x1f2   : > { %8603 = vmatpush1.bf16.msra.mxu1 %v10346_v48  ;;  %v778_v47 = vld [vmem:[%s15233_s1 + $0x12a8] sm:$0xff] }
 0x1f3   : > { %8604 = vmatprep.subr.bf16.mxu1 %v10467_v50  ;;  %v902_v48 = vld [vmem:[%s15233_s1 + $0x1688] sm:$0xff]  ;;  %v10306_v50 = vcombine.low %v782_v0, %v786_v35  ;;  %v10299_v52 = vcombine.high %v774_v46, %v778_v47 }
 0x1f4   : > { %8564 = vmatpush2.bf16.msra.mxu0 %v10338_v61  ;;  %v906_v23 = vld [vmem:[%s15233_s1 + $0x16a8] sm:$0xff] }
 0x1f5   : > { %8565 = vmatprep.subr.bf16.mxu0 %v10331_v7  ;;  %v10427_v34 = vcombine.high %v902_v48, %v906_v23  ;;  %v766_v57 = vld [vmem:[%s15233_s1 + $0x1248] sm:$0xff]  ;;  %v10426_v2 = vcombine.low %v902_v48, %v906_v23  ;;  %v8295_v48 = vadd.f32 %v12609_v53, %v8254_v37 }
 0x1f6   : > { %8605 = vmatpush2.bf16.msra.mxu1 %v10466_v63  ;;  %v770_v61 = vld [vmem:[%s15233_s1 + $0x1268] sm:$0xff] }
 0x1f7   : > { %8606 = vmatprep.subr.bf16.mxu1 %v10459_v1  ;;  %v894_v63 = vld [vmem:[%s15233_s1 + $0x1648] sm:$0xff]  ;;  %v10298_v1 = vcombine.low %v774_v46, %v778_v47  ;;  %v10291_v3 = vcombine.high %v766_v57, %v770_v61 }
 0x1f8   : > { %8566 = vmatpush2.bf16.msra.mxu0 %v10330_v39  ;;  %v898_v7 = vld [vmem:[%s15233_s1 + $0x1668] sm:$0xff] }
 0x1f9   : > { %8567 = vmatprep.subr.bf16.mxu0 %v10323_v11  ;;  %v10419_v6 = vcombine.high %v894_v63, %v898_v7  ;;  %v758_v9 = vld [vmem:[%s15233_s1 + $0x1208] sm:$0xff]  ;;  %v10418_v56 = vcombine.low %v894_v63, %v898_v7 }
 0x1fa   : > { %8607 = vmatpush2.bf16.msra.mxu1 %v10458_v45  ;;  %v762_v39 = vld [vmem:[%s15233_s1 + $0x1228] sm:$0xff] }
 0x1fb   : > { %8608 = vmatprep.subr.bf16.mxu1 %v10451_v13  ;;  %v886_v45 = vld [vmem:[%s15233_s1 + $0x1608] sm:$0xff]  ;;  %v10290_v13 = vcombine.low %v766_v57, %v770_v61  ;;  %v10283_v17 = vcombine.high %v758_v9, %v762_v39 }
 0x1fc   : > { %8568 = vmatpush2.bf16.msra.mxu0 %v10322_v28  ;;  %v890_v11 = vld [vmem:[%s15233_s1 + $0x1628] sm:$0xff] }
 0x1fd   : > { %8569 = vmatprep.subr.bf16.mxu0 %v10315_v31  ;;  %v10411_v24 = vcombine.high %v886_v45, %v890_v11  ;;  %v1006_v27 = vld [vmem:[%s15233_s1 + $0x19c8] sm:$0xff]  ;;  %v10410_v0 = vcombine.low %v886_v45, %v890_v11 }
 0x1fe   : > { %8609 = vmatpush2.bf16.msra.mxu1 %v10450_v30  ;;  %v1010_v28 = vld [vmem:[%s15233_s1 + $0x19e8] sm:$0xff] }
 0x1ff   : > { %8610 = vmatprep.subr.bf16.mxu1 %v10443_v33  ;;  %v1134_v30 = vld [vmem:[%s15233_s1 + $0x1dc8] sm:$0xff]  ;;  %v10282_v33 = vcombine.low %v758_v9, %v762_v39  ;;  %v10531_v35 = vcombine.high %v1006_v27, %v1010_v28  ;;  %v10530_v14 = vcombine.low %v1006_v27, %v1010_v28 }
 0x200   : > { %8570 = vmatpush2.bf16.msra.mxu0 %v10314_v41  ;;  %v1138_v31 = vld [vmem:[%s15233_s1 + $0x1de8] sm:$0xff] }
 0x201   : > { %8571 = vmatprep.subr.bf16.mxu0 %v10307_v43  ;;  %v10659_v38 = vcombine.high %v1134_v30, %v1138_v31  ;;  %v998_v41 = vld [vmem:[%s15233_s1 + $0x1988] sm:$0xff]  ;;  %v10658_v46 = vcombine.low %v1134_v30, %v1138_v31 }
 0x202   : > { %8611 = vmatpush2.bf16.msra.mxu1 %v10442_v19  ;;  %v1002_v19 = vld [vmem:[%s15233_s1 + $0x19a8] sm:$0xff] }
 0x203   : > { %8612 = vmatprep.subr.bf16.mxu1 %v10435_v44  ;;  %v1126_v43 = vld [vmem:[%s15233_s1 + $0x1d88] sm:$0xff]  ;;  %v10523_v47 = vcombine.high %v998_v41, %v1002_v19  ;;  %v10522_v61 = vcombine.low %v998_v41, %v1002_v19 }
 0x204   : > { %8572 = vmatpush2.bf16.msra.mxu0 %v10306_v50  ;;  %v1130_v44 = vld [vmem:[%s15233_s1 + $0x1da8] sm:$0xff] }
 0x205   : > { %8573 = vmatprep.subr.bf16.mxu0 %v10299_v52  ;;  %v10651_v23 = vcombine.high %v1126_v43, %v1130_v44  ;;  %v990_v50 = vld [vmem:[%s15233_s1 + $0x1948] sm:$0xff]  ;;  %v8297_v52 = vadd.f32 %v12614_v60, %v8256_v5  ;;  %v10650_v7 = vcombine.low %v1126_v43, %v1130_v44 }
 0x206   : > { %8613 = vmatpush2.bf16.msra.mxu1 %v10434_v51  ;;  %v994_v51 = vld [vmem:[%s15233_s1 + $0x1968] sm:$0xff] }
 0x207   : > { %8614 = vmatprep.subr.bf16.mxu1 %v10427_v34  ;;  %v1118_v26 = vld [vmem:[%s15233_s1 + $0x1d48] sm:$0xff] }
 0x208   : > { %8574 = vmatpush2.bf16.msra.mxu0 %v10298_v1  ;;  %v1122_v53 = vld [vmem:[%s15233_s1 + $0x1d68] sm:$0xff]  ;;  %v10515_v1 = vcombine.high %v990_v50, %v994_v51 }
 0x209   : > { %8575 = vmatprep.subr.bf16.mxu0 %v10291_v3  ;;  %v982_v9 = vld [vmem:[%s15233_s1 + $0x1908] sm:$0xff]  ;;  %v10642_v28 = vcombine.low %v1118_v26, %v1122_v53 }
 0x20a   : > { %8615 = vmatpush2.bf16.msra.mxu1 %v10426_v2  ;;  %v986_v39 = vld [vmem:[%s15233_s1 + $0x1928] sm:$0xff] }
 0x20b   : > { %8616 = vmatprep.subr.bf16.mxu1 %v10419_v6  ;;  %v10643_v6 = vcombine.high %v1118_v26, %v1122_v53  ;;  %v1110_v11 = vld [vmem:[%s15233_s1 + $0x1d08] sm:$0xff]  ;;  %v10507_v30 = vcombine.high %v982_v9, %v986_v39  ;;  %v10506_v41 = vcombine.low %v982_v9, %v986_v39 }
 0x20c   : > { %8576 = vmatpush2.bf16.msra.mxu0 %v10290_v13  ;;  %v1114_v13 = vld [vmem:[%s15233_s1 + $0x1d28] sm:$0xff] }
 0x20d   : > { %8577 = vmatprep.subr.bf16.mxu0 %v10283_v17  ;;  %v1102_v37 = vld [vmem:[%s15233_s1 + $0x1cc8] sm:$0xff]  ;;  %v10634_v19 = vcombine.low %v1110_v11, %v1114_v13 }
 0x20e   : > { %8617 = vmatpush2.bf16.msra.mxu1 %v10418_v56  ;;  %v966_v5 = vld [vmem:[%s15233_s1 + $0x1888] sm:$0xff] }
 0x20f   : > { %8618 = vmatprep.subr.bf16.mxu1 %v10411_v24  ;;  %v10514_v24 = vcombine.low %v990_v50, %v994_v51  ;;  %v962_v26 = vld [vmem:[%s15233_s1 + $0x1868] sm:$0xff] }
 0x210   : > { %8578 = vmatpush2.bf16.msra.mxu0 %v10282_v33  ;;  %v10635_v33 = vcombine.high %v1110_v11, %v1114_v13  ;;  %v1086_v53 = vld [vmem:[%s15233_s1 + $0x1c48] sm:$0xff] }
 0x211   : > { %8629 = vmatprep.subr.bf16.mxu0 %v10531_v35  ;;  %v978_v35 = vld [vmem:[%s15233_s1 + $0x18e8] sm:$0xff] }
 0x212   : > { %8619 = vmatpush2.bf16.msra.mxu1 %v10410_v0  ;;  %v974_v0 = vld [vmem:[%s15233_s1 + $0x18c8] sm:$0xff] }
 0x213   : > { %8670 = vmatprep.subr.bf16.mxu1 %v10659_v38  ;;  %v8335_v15 = vpop.f32.mrf.mxu0  ;;  %8580 = vmatmul.mubr.bf16.vlgmr.msra.gmra.mxu0 %v11731_v4  ;;  %v1106_v38 = vld [vmem:[%s15233_s1 + $0x1ce8] sm:$0xff]  ;;  %v10499_v43 = vcombine.high %v974_v0, %v978_v35 }
 0x214   : > { %v8336_v34 = vadd.f32 %v8335_v15, %v8295_v48  ;;  %8630 = vmatpush1.bf16.msra.mxu0 %v10530_v14  ;;  %8661 = vmatprep.mubr.bf16.mxu0 %v11757_v42  ;;  %v10627_v44 = vcombine.high %v1102_v37, %v1106_v38  ;;  %v970_v14 = vld [vmem:[%s15233_s1 + $0x18a8] sm:$0xff]  ;;  %v10498_v48 = vcombine.low %v974_v0, %v978_v35 }
 0x215   : > { %v8376_v57 = vpop.f32.mrf.mxu1  ;;  %8621 = vmatmul.mubr.bf16.vlgmr.msra.gmra.mxu1 %v11744_v8  ;;  %v8337_v63 = vpop.f32.mrf.mxu0  ;;  %8631 = vmatprep.subr.bf16.mxu0 %v10523_v47  ;;  %v1098_v47 = vld [vmem:[%s15233_s1 + $0x1ca8] sm:$0xff]  ;;  %v10491_v50 = vcombine.high %v966_v5, %v970_v14 }
 0x216   : > { %8671 = vmatpush1.bf16.msra.mxu1 %v10658_v46  ;;  %v8377_v2 = vadd.f32 %v8376_v57, %v8336_v34  ;;  %v8338_v3 = vadd.f32 %v8337_v63, %v8297_v52  ;;  %8702 = vmatprep.mubr.bf16.mxu1 %v11768_v18  ;;  %v1094_v46 = vld [vmem:[%s15233_s1 + $0x1c88] sm:$0xff]  ;;  %v10490_v34 = vcombine.low %v966_v5, %v970_v14 }
 0x217   : > { %v8378_v60 = vpop.f32.mrf.mxu1  ;;  %8672 = vmatprep.subr.bf16.mxu1 %v10651_v23  ;;  %v8339_v45 = vpop.f32.mrf.mxu0  ;;  %v10626_v23 = vcombine.low %v1102_v37, %v1106_v38  ;;  %v10619_v51 = vcombine.high %v1094_v46, %v1098_v47  ;;  %v958_v15 = vld [vmem:[%s15233_s1 + $0x1848] sm:$0xff]  ;;  %v10618_v57 = vcombine.low %v1094_v46, %v1098_v47 }
 0x218   : > { %9613 = vst [vmem:[%s12822_s14] sm:$0xff] %v8377_v2  ;;  %v8379_v56 = vadd.f32 %v8378_v60, %v8338_v3  ;;  %8632 = vmatpush1.bf16.msra.mxu0 %v10522_v61  ;;  %v1090_v52 = vld [vmem:[%s15233_s1 + $0x1c68] sm:$0xff]  ;;  %v10483_v61 = vcombine.high %v958_v15, %v962_v26  ;;  %v10482_v60 = vcombine.low %v958_v15, %v962_v26 }
 0x219   : > { %v8380_v17 = vpop.f32.mrf.mxu1  ;;  %v8340_v27 = vpop.f32.mrf.mxu0  ;;  %8633 = vmatprep.subr.bf16.mxu0 %v10515_v1  ;;  %v10611_v63 = vcombine.high %v1086_v53, %v1090_v52  ;;  %v954_v1 = vld [vmem:[%s15233_s1 + $0x1828] sm:$0xff] }
 0x21a   : > { %8673 = vmatpush1.bf16.msra.mxu1 %v10650_v7  ;;  %9614 = vst [vmem:[%s12822_s14 + $0x8] sm:$0xff] %v8379_v56  ;;  %v950_v7 = vld [vmem:[%s15233_s1 + $0x1808] sm:$0xff] }
 0x21b   : > { %v8381_v31 = vpop.f32.mrf.mxu1  ;;  %8674 = vmatprep.subr.bf16.mxu1 %v10643_v6  ;;  %v1078_v2 = vld [vmem:[%s15233_s1 + $0x1c08] sm:$0xff]  ;;  %v10610_v6 = vcombine.low %v1086_v53, %v1090_v52  ;;  %v10475_v9 = vcombine.high %v950_v7, %v954_v1  ;;  %v10474_v17 = vcombine.low %v950_v7, %v954_v1 }
 0x21c   : > { %8634 = vmatpush1.bf16.msra.mxu0 %v10514_v24  ;;  %v1082_v3 = vld [vmem:[%s15233_s1 + $0x1c28] sm:$0xff] }
 0x21d   : > { %8635 = vmatprep.subr.bf16.mxu0 %v10507_v30  ;;  %v10603_v39 = vcombine.high %v1078_v2, %v1082_v3  ;;  %v1070_v45 = vld [vmem:[%s15233_s1 + $0x1bc8] sm:$0xff]  ;;  %v10602_v24 = vcombine.low %v1078_v2, %v1082_v3 }
 0x21e   : > { %8675 = vmatpush1.bf16.msra.mxu1 %v10642_v28  ;;  %v1074_v11 = vld [vmem:[%s15233_s1 + $0x1be8] sm:$0xff] }
 0x21f   : > { %8676 = vmatprep.subr.bf16.mxu1 %v10635_v33  ;;  %v1198_v13 = vld [vmem:[%s15233_s1 + $0x1fc8] sm:$0xff]  ;;  %v10595_v27 = vcombine.high %v1070_v45, %v1074_v11  ;;  %v10594_v35 = vcombine.low %v1070_v45, %v1074_v11 }
 0x220   : > { %8636 = vmatpush1.bf16.msra.mxu0 %v10506_v41  ;;  %v1202_v56 = vld [vmem:[%s15233_s1 + $0x1fe8] sm:$0xff] }
 0x221   : > { %8637 = vmatprep.subr.bf16.mxu0 %v10499_v43  ;;  %v10723_v28 = vcombine.high %v1198_v13, %v1202_v56  ;;  %v1062_v30 = vld [vmem:[%s15233_s1 + $0x1b88] sm:$0xff]  ;;  %v10722_v37 = vcombine.low %v1198_v13, %v1202_v56 }
 0x222   : > { %8677 = vmatpush1.bf16.msra.mxu1 %v10634_v19  ;;  %v1066_v31 = vld [vmem:[%s15233_s1 + $0x1ba8] sm:$0xff] }
 0x223   : > { %8678 = vmatprep.subr.bf16.mxu1 %v10627_v44  ;;  %v1190_v33 = vld [vmem:[%s15233_s1 + $0x1f88] sm:$0xff]  ;;  %v10587_v38 = vcombine.high %v1062_v30, %v1066_v31  ;;  %v10586_v14 = vcombine.low %v1062_v30, %v1066_v31 }
 0x224   : > { %8638 = vmatpush1.bf16.msra.mxu0 %v10498_v48  ;;  %v1194_v0 = vld [vmem:[%s15233_s1 + $0x1fa8] sm:$0xff] }
 0x225   : > { %8639 = vmatprep.subr.bf16.mxu0 %v10491_v50  ;;  %v10715_v41 = vcombine.high %v1190_v33, %v1194_v0  ;;  %v1054_v19 = vld [vmem:[%s15233_s1 + $0x1b48] sm:$0xff]  ;;  %v10714_v46 = vcombine.low %v1190_v33, %v1194_v0 }
 0x226   : > { %8679 = vmatpush1.bf16.msra.mxu1 %v10626_v23  ;;  %v1058_v43 = vld [vmem:[%s15233_s1 + $0x1b68] sm:$0xff] }
 0x227   : > { %8680 = vmatprep.subr.bf16.mxu1 %v10619_v51  ;;  %v1182_v44 = vld [vmem:[%s15233_s1 + $0x1f48] sm:$0xff]  ;;  %v10579_v47 = vcombine.high %v1054_v19, %v1058_v43  ;;  %v10578_v26 = vcombine.low %v1054_v19, %v1058_v43 }
 0x228   : > { %8640 = vmatpush1.bf16.msra.mxu0 %v10490_v34  ;;  %v1186_v5 = vld [vmem:[%s15233_s1 + $0x1f68] sm:$0xff] }
 0x229   : > { %8641 = vmatprep.subr.bf16.mxu0 %v10483_v61  ;;  %v10707_v48 = vcombine.high %v1182_v44, %v1186_v5  ;;  %v1046_v23 = vld [vmem:[%s15233_s1 + $0x1b08] sm:$0xff]  ;;  %v10706_v53 = vcombine.low %v1182_v44, %v1186_v5 }
 0x22a   : > { %8681 = vmatpush1.bf16.msra.mxu1 %v10618_v57  ;;  %v1050_v50 = vld [vmem:[%s15233_s1 + $0x1b28] sm:$0xff] }
 0x22b   : > { %8682 = vmatprep.subr.bf16.mxu1 %v10611_v63  ;;  %v1174_v51 = vld [vmem:[%s15233_s1 + $0x1f08] sm:$0xff]  ;;  %v10571_v52 = vcombine.high %v1046_v23, %v1050_v50  ;;  %v10570_v1 = vcombine.low %v1046_v23, %v1050_v50 }
 0x22c   : > { %8642 = vmatpush1.bf16.msra.mxu0 %v10482_v60  ;;  %v1178_v15 = vld [vmem:[%s15233_s1 + $0x1f28] sm:$0xff] }
 0x22d   : > { %8643 = vmatprep.subr.bf16.mxu0 %v10475_v9  ;;  %v10699_v34 = vcombine.high %v1174_v51, %v1178_v15  ;;  %v1038_v57 = vld [vmem:[%s15233_s1 + $0x1ac8] sm:$0xff]  ;;  %v10698_v2 = vcombine.low %v1174_v51, %v1178_v15  ;;  %v1473_v51 = vsub.s32 2, %v11929_v32 }
 0x22e   : > { %8683 = vmatpush1.bf16.msra.mxu1 %v10610_v6  ;;  %v1042_v61 = vld [vmem:[%s15233_s1 + $0x1ae8] sm:$0xff] }
 0x22f   : > { %8684 = vmatprep.subr.bf16.mxu1 %v10603_v39  ;;  %v1166_v63 = vld [vmem:[%s15233_s1 + $0x1ec8] sm:$0xff]  ;;  %v10563_v3 = vcombine.high %v1038_v57, %v1042_v61  ;;  %v10562_v11 = vcombine.low %v1038_v57, %v1042_v61 }
 0x230   : > { %8644 = vmatpush1.bf16.msra.mxu0 %v10474_v17  ;;  %v1170_v7 = vld [vmem:[%s15233_s1 + $0x1ee8] sm:$0xff] }
 0x231   : > { %8645 = vmatprep.subr.bf16.mxu0 %v10595_v27  ;;  %v10691_v60 = vcombine.high %v1166_v63, %v1170_v7  ;;  %v1030_v6 = vld [vmem:[%s15233_s1 + $0x1a88] sm:$0xff]  ;;  %v10690_v13 = vcombine.low %v1166_v63, %v1170_v7  ;;  %v11016_v7 = vld [vmem:[%s15234_s2] sm:$0xff] }
 0x232   : > { %8685 = vmatpush1.bf16.msra.mxu1 %v10602_v24  ;;  %v1034_v9 = vld [vmem:[%s15233_s1 + $0x1aa8] sm:$0xff] }
 0x233   : > { %8686 = vmatprep.subr.bf16.mxu1 %v10723_v28  ;;  %v1158_v39 = vld [vmem:[%s15233_s1 + $0x1e88] sm:$0xff]  ;;  %v10555_v56 = vcombine.high %v1030_v6, %v1034_v9  ;;  %v10554_v31 = vcombine.low %v1030_v6, %v1034_v9 }
 0x234   : > { %8646 = vmatpush2.bf16.msra.mxu0 %v10594_v35  ;;  %v1162_v45 = vld [vmem:[%s15233_s1 + $0x1ea8] sm:$0xff] }
 0x235   : > { %8647 = vmatprep.subr.bf16.mxu0 %v10587_v38  ;;  %v10683_v17 = vcombine.high %v1158_v39, %v1162_v45  ;;  %v1022_v24 = vld [vmem:[%s15233_s1 + $0x1a48] sm:$0xff]  ;;  %v10682_v33 = vcombine.low %v1158_v39, %v1162_v45 }
 0x236   : > { %8687 = vmatpush2.bf16.msra.mxu1 %v10722_v37  ;;  %v1026_v27 = vld [vmem:[%s15233_s1 + $0x1a68] sm:$0xff] }
 0x237   : > { %8688 = vmatprep.subr.bf16.mxu1 %v10715_v41  ;;  %v1150_v28 = vld [vmem:[%s15233_s1 + $0x1e48] sm:$0xff]  ;;  %v10547_v0 = vcombine.high %v1022_v24, %v1026_v27  ;;  %v10546_v43 = vcombine.low %v1022_v24, %v1026_v27 }
 0x238   : > { %8648 = vmatpush2.bf16.msra.mxu0 %v10586_v14  ;;  %v1154_v30 = vld [vmem:[%s15233_s1 + $0x1e68] sm:$0xff] }
 0x239   : > { %8649 = vmatprep.subr.bf16.mxu0 %v10579_v47  ;;  %v10675_v35 = vcombine.high %v1150_v28, %v1154_v30  ;;  %v1014_v37 = vld [vmem:[%s15233_s1 + $0x1a08] sm:$0xff]  ;;  %v10674_v44 = vcombine.low %v1150_v28, %v1154_v30 }
 0x23a   : > { %8689 = vmatpush2.bf16.msra.mxu1 %v10714_v46  ;;  %v1018_v38 = vld [vmem:[%s15233_s1 + $0x1a28] sm:$0xff] }
 0x23b   : > { %8690 = vmatprep.subr.bf16.mxu1 %v10707_v48  ;;  %v1142_v41 = vld [vmem:[%s15233_s1 + $0x1e08] sm:$0xff]  ;;  %v10539_v5 = vcombine.high %v1014_v37, %v1018_v38  ;;  %v10538_v50 = vcombine.low %v1014_v37, %v1018_v38 }
 0x23c   : > { %8650 = vmatpush2.bf16.msra.mxu0 %v10578_v26  ;;  %v1146_v19 = vld [vmem:[%s15233_s1 + $0x1e28] sm:$0xff] }
 0x23d   : > { %8651 = vmatprep.subr.bf16.mxu0 %v10571_v52  ;;  %v10667_v14 = vcombine.high %v1142_v41, %v1146_v19  ;;  %v1262_v46 = vld [vmem:[%s15233_s1 + $0x21c8] sm:$0xff]  ;;  %v10666_v15 = vcombine.low %v1142_v41, %v1146_v19  ;;  %v1477_v52 = vsub.s32 3, %v11929_v32 }
 0x23e   : > { %8691 = vmatpush2.bf16.msra.mxu1 %v10706_v53  ;;  %v1266_v47 = vld [vmem:[%s15233_s1 + $0x21e8] sm:$0xff] }
 0x23f   : > { %8692 = vmatprep.subr.bf16.mxu1 %v10699_v34  ;;  %v1390_v48 = vld [vmem:[%s15233_s1 + $0x25c8] sm:$0xff]  ;;  %v10787_v26 = vcombine.high %v1262_v46, %v1266_v47  ;;  %v1478_v6 = vrot.slane %v11016_v7, %v1477_v52 }
 0x240   : > { %8652 = vmatpush2.bf16.msra.mxu0 %v10570_v1  ;;  %v1394_v23 = vld [vmem:[%s15233_s1 + $0x25e8] sm:$0xff]  ;;  %v1474_v1 = vrot.slane %v11016_v7, %v1473_v51 }
 0x241   : > { %8653 = vmatprep.subr.bf16.mxu0 %v10563_v3  ;;  %v10915_v53 = vcombine.high %v1390_v48, %v1394_v23  ;;  %v1254_v34 = vld [vmem:[%s15233_s1 + $0x2188] sm:$0xff]  ;;  %v10914_v3 = vcombine.low %v1390_v48, %v1394_v23 }
 0x242   : > { %8693 = vmatpush2.bf16.msra.mxu1 %v10698_v2  ;;  %v1258_v57 = vld [vmem:[%s15233_s1 + $0x21a8] sm:$0xff]  ;;  %v10786_v2 = vcombine.low %v1262_v46, %v1266_v47 }
 0x243   : > { %8694 = vmatprep.subr.bf16.mxu1 %v10691_v60  ;;  %v1382_v61 = vld [vmem:[%s15233_s1 + $0x2588] sm:$0xff]  ;;  %v10779_v60 = vcombine.high %v1254_v34, %v1258_v57  ;;  %v10778_v27 = vcombine.low %v1254_v34, %v1258_v57 }
 0x244   : > { %8654 = vmatpush2.bf16.msra.mxu0 %v10562_v11  ;;  %v1386_v63 = vld [vmem:[%s15233_s1 + $0x25a8] sm:$0xff] }
 0x245   : > { %8655 = vmatprep.subr.bf16.mxu0 %v10555_v56  ;;  %v10907_v9 = vcombine.high %v1382_v61, %v1386_v63  ;;  %v1246_v39 = vld [vmem:[%s15233_s1 + $0x2148] sm:$0xff]  ;;  %v10906_v30 = vcombine.low %v1382_v61, %v1386_v63 }
 0x246   : > { %8695 = vmatpush2.bf16.msra.mxu1 %v10690_v13  ;;  %v1250_v45 = vld [vmem:[%s15233_s1 + $0x2168] sm:$0xff] }
 0x247   : > { %8696 = vmatprep.subr.bf16.mxu1 %v10683_v17  ;;  %v1374_v13 = vld [vmem:[%s15233_s1 + $0x2548] sm:$0xff]  ;;  %v10770_v46 = vcombine.low %v1246_v39, %v1250_v45 }
 0x248   : > { %8656 = vmatpush2.bf16.msra.mxu0 %v10554_v31  ;;  %v1378_v56 = vld [vmem:[%s15233_s1 + $0x2568] sm:$0xff]  ;;  %v10771_v31 = vcombine.high %v1246_v39, %v1250_v45 }
 0x249   : > { %8657 = vmatprep.subr.bf16.mxu0 %v10547_v0  ;;  %v10899_v37 = vcombine.high %v1374_v13, %v1378_v56  ;;  %v1238_v38 = vld [vmem:[%s15233_s1 + $0x2108] sm:$0xff]  ;;  %v10898_v48 = vcombine.low %v1374_v13, %v1378_v56 }
 0x24a   : > { %8697 = vmatpush2.bf16.msra.mxu1 %v10682_v33  ;;  %v1242_v41 = vld [vmem:[%s15233_s1 + $0x2128] sm:$0xff] }
 0x24b   : > { %8698 = vmatprep.subr.bf16.mxu1 %v10675_v35  ;;  %v10763_v23 = vcombine.high %v1238_v38, %v1242_v41  ;;  %v1362_v52 = vld [vmem:[%s15233_s1 + $0x24e8] sm:$0xff]  ;;  %v10762_v34 = vcombine.low %v1238_v38, %v1242_v41 }
 0x24c   : > { %8658 = vmatpush2.bf16.msra.mxu0 %v10546_v43  ;;  %v1366_v43 = vld [vmem:[%s15233_s1 + $0x2508] sm:$0xff] }
 0x24d   : > { %8659 = vmatprep.subr.bf16.mxu0 %v10539_v5  ;;  %v1222_v7 = vld [vmem:[%s15233_s1 + $0x2088] sm:$0xff] }
 0x24e   : > { %8699 = vmatpush2.bf16.msra.mxu1 %v10674_v44  ;;  %v1370_v44 = vld [vmem:[%s15233_s1 + $0x2528] sm:$0xff] }
 0x24f   : > { %8700 = vmatprep.subr.bf16.mxu1 %v10667_v14  ;;  %v10891_v51 = vcombine.high %v1366_v43, %v1370_v44  ;;  %v10890_v57 = vcombine.low %v1366_v43, %v1370_v44  ;;  %v1214_v45 = vld [vmem:[%s15233_s1 + $0x2048] sm:$0xff] }
 0x250   : > { %8660 = vmatpush2.bf16.msra.mxu0 %v10538_v50  ;;  %v1342_v13 = vld [vmem:[%s15233_s1 + $0x2448] sm:$0xff] }
 0x251   : > { %8711 = vmatprep.subr.bf16.mxu0 %v10787_v26  ;;  %v1234_v26 = vld [vmem:[%s15233_s1 + $0x20e8] sm:$0xff] }
 0x252   : > { %8701 = vmatpush2.bf16.msra.mxu1 %v10666_v15  ;;  %v1230_v15 = vld [vmem:[%s15233_s1 + $0x20c8] sm:$0xff] }
 0x253   : > { %8752 = vmatprep.subr.bf16.mxu1 %v10915_v53  ;;  %v8417_v11 = vpop.f32.mrf.mxu0  ;;  %8662 = vmatmul.mubr.bf16.vlgmr.msra.gmra.mxu0 %v11956_v55  ;;  %v1358_v53 = vld [vmem:[%s15233_s1 + $0x24c8] sm:$0xff]  ;;  %v10755_v61 = vcombine.high %v1230_v15, %v1234_v26 }
 0x254   : > { %v8418_v17 = vadd.f32 %v8417_v11, %v1474_v1  ;;  %8712 = vmatpush1.bf16.msra.mxu0 %v10786_v2  ;;  %8743 = vmatprep.mubr.bf16.mxu0 %v11982_v10  ;;  %v10883_v63 = vcombine.high %v1358_v53, %v1362_v52  ;;  %v1226_v1 = vld [vmem:[%s15233_s1 + $0x20a8] sm:$0xff] }
 0x255   : > { %v8458_v24 = vpop.f32.mrf.mxu1  ;;  %8703 = vmatmul.mubr.bf16.vlgmr.msra.gmra.mxu1 %v11969_v62  ;;  %v8419_v28 = vpop.f32.mrf.mxu0  ;;  %8713 = vmatprep.subr.bf16.mxu0 %v10779_v60  ;;  %v1350_v2 = vld [vmem:[%s15233_s1 + $0x2488] sm:$0xff]  ;;  %v10754_v60 = vcombine.low %v1230_v15, %v1234_v26 }
 0x256   : > { %8753 = vmatpush1.bf16.msra.mxu1 %v10914_v3  ;;  %v13027_v33 = vadd.f32 %v8458_v24, %v8418_v17  ;;  %v8420_v0 = vadd.f32 %v8419_v28, %v1478_v6  ;;  %8784 = vmatprep.mubr.bf16.mxu1 %v11993_v12  ;;  %v1354_v3 = vld [vmem:[%s15233_s1 + $0x24a8] sm:$0xff]  ;;  %v10882_v6 = vcombine.low %v1358_v53, %v1362_v52 }
 0x257   : > { %v8460_v35 = vpop.f32.mrf.mxu1  ;;  %8754 = vmatprep.subr.bf16.mxu1 %v10907_v9  ;;  %v8421_v19 = vpop.f32.mrf.mxu0  ;;  %v10747_v9 = vcombine.high %v1222_v7, %v1226_v1  ;;  %v10875_v39 = vcombine.high %v1350_v2, %v1354_v3  ;;  %v1218_v11 = vld [vmem:[%s15233_s1 + $0x2068] sm:$0xff]  ;;  %v10746_v17 = vcombine.low %v1222_v7, %v1226_v1  ;;  %v10874_v24 = vcombine.low %v1350_v2, %v1354_v3 }
 0x258   : > { %v13043_v5 = vadd.f32 %v8460_v35, %v8420_v0  ;;  %8714 = vmatpush1.bf16.msra.mxu0 %v10778_v27  ;;  %v1346_v56 = vld [vmem:[%s15233_s1 + $0x2468] sm:$0xff]  ;;  %v10739_v27 = vcombine.high %v1214_v45, %v1218_v11 }
 0x259   : > { %v8462_v14 = vpop.f32.mrf.mxu1  ;;  %v8422_v47 = vpop.f32.mrf.mxu0  ;;  %8715 = vmatprep.subr.bf16.mxu0 %v10771_v31  ;;  %v10867_v28 = vcombine.high %v1342_v13, %v1346_v56  ;;  %v1210_v31 = vld [vmem:[%s15233_s1 + $0x2028] sm:$0xff]  ;;  %v10866_v38 = vcombine.low %v1342_v13, %v1346_v56 }
 0x25a   : > { %8755 = vmatpush1.bf16.msra.mxu1 %v10906_v30  ;;  %v1206_v30 = vld [vmem:[%s15233_s1 + $0x2008] sm:$0xff] }
 0x25b   : > { %v8463_v50 = vpop.f32.mrf.mxu1  ;;  %8756 = vmatprep.subr.bf16.mxu1 %v10899_v37  ;;  %v1334_v0 = vld [vmem:[%s15233_s1 + $0x2408] sm:$0xff]  ;;  %v10738_v37 = vcombine.low %v1214_v45, %v1218_v11  ;;  %v10731_v41 = vcombine.high %v1206_v30, %v1210_v31  ;;  %v10730_v47 = vcombine.low %v1206_v30, %v1210_v31 }
 0x25c   : > { %8716 = vmatpush1.bf16.msra.mxu0 %v10770_v46  ;;  %v1338_v35 = vld [vmem:[%s15233_s1 + $0x2428] sm:$0xff] }
 0x25d   : > { %8717 = vmatprep.subr.bf16.mxu0 %v10763_v23  ;;  %v10859_v19 = vcombine.high %v1334_v0, %v1338_v35  ;;  %v1326_v43 = vld [vmem:[%s15233_s1 + $0x23c8] sm:$0xff] }
 0x25e   : > { %8757 = vmatpush1.bf16.msra.mxu1 %v10898_v48  ;;  %v1330_v44 = vld [vmem:[%s15233_s1 + $0x23e8] sm:$0xff]  ;;  %v10858_v48 = vcombine.low %v1334_v0, %v1338_v35 }
 0x25f   : > { %8758 = vmatprep.subr.bf16.mxu1 %v10891_v51  ;;  %v1454_v14 = vld [vmem:[%s15233_s1 + $0x27c8] sm:$0xff]  ;;  %v10851_v23 = vcombine.high %v1326_v43, %v1330_v44  ;;  %v10850_v52 = vcombine.low %v1326_v43, %v1330_v44 }
 0x260   : > { %8718 = vmatpush1.bf16.msra.mxu0 %v10762_v34  ;;  %v1458_v46 = vld [vmem:[%s15233_s1 + $0x27e8] sm:$0xff] }
 0x261   : > { %8719 = vmatprep.subr.bf16.mxu0 %v10755_v61  ;;  %v10979_v50 = vcombine.high %v1454_v14, %v1458_v46  ;;  %v1318_v51 = vld [vmem:[%s15233_s1 + $0x2388] sm:$0xff]  ;;  %v10978_v34 = vcombine.low %v1454_v14, %v1458_v46 }
 0x262   : > { %8759 = vmatpush1.bf16.msra.mxu1 %v10890_v57  ;;  %v1322_v15 = vld [vmem:[%s15233_s1 + $0x23a8] sm:$0xff] }
 0x263   : > { %8760 = vmatprep.subr.bf16.mxu1 %v10883_v63  ;;  %v1446_v26 = vld [vmem:[%s15233_s1 + $0x2788] sm:$0xff]  ;;  %v10843_v57 = vcombine.high %v1318_v51, %v1322_v15  ;;  %v10842_v3 = vcombine.low %v1318_v51, %v1322_v15 }
 0x264   : > { %8720 = vmatpush1.bf16.msra.mxu0 %v10754_v60  ;;  %v1450_v53 = vld [vmem:[%s15233_s1 + $0x27a8] sm:$0xff] }
 0x265   : > { %8721 = vmatprep.subr.bf16.mxu0 %v10747_v9  ;;  %v10971_v61 = vcombine.high %v1446_v26, %v1450_v53  ;;  %v1310_v63 = vld [vmem:[%s15233_s1 + $0x2348] sm:$0xff]  ;;  %v10970_v60 = vcombine.low %v1446_v26, %v1450_v53 }
 0x266   : > { %8761 = vmatpush1.bf16.msra.mxu1 %v10882_v6  ;;  %v1314_v7 = vld [vmem:[%s15233_s1 + $0x2368] sm:$0xff] }
 0x267   : > { %8762 = vmatprep.subr.bf16.mxu1 %v10875_v39  ;;  %v1438_v1 = vld [vmem:[%s15233_s1 + $0x2748] sm:$0xff]  ;;  %v10835_v6 = vcombine.high %v1310_v63, %v1314_v7  ;;  %v10834_v56 = vcombine.low %v1310_v63, %v1314_v7 }
 0x268   : > { %8722 = vmatpush1.bf16.msra.mxu0 %v10746_v17  ;;  %v1442_v2 = vld [vmem:[%s15233_s1 + $0x2768] sm:$0xff] }
 0x269   : > { %8723 = vmatprep.subr.bf16.mxu0 %v10739_v27  ;;  %v10963_v9 = vcombine.high %v1438_v1, %v1442_v2  ;;  %v1302_v39 = vld [vmem:[%s15233_s1 + $0x2308] sm:$0xff]  ;;  %v10962_v17 = vcombine.low %v1438_v1, %v1442_v2 }
 0x26a   : > { %8763 = vmatpush1.bf16.msra.mxu1 %v10874_v24  ;;  %v1306_v45 = vld [vmem:[%s15233_s1 + $0x2328] sm:$0xff] }
 0x26b   : > { %8764 = vmatprep.subr.bf16.mxu1 %v10867_v28  ;;  %v1430_v11 = vld [vmem:[%s15233_s1 + $0x2708] sm:$0xff]  ;;  %v10827_v24 = vcombine.high %v1302_v39, %v1306_v45  ;;  %v10826_v35 = vcombine.low %v1302_v39, %v1306_v45  ;;  %v243_v39 = vld [vmem:[%s15233_s1 + $0x1f0] sm:$0xff] }
 0x26c   : > { %8724 = vmatpush1.bf16.msra.mxu0 %v10738_v37  ;;  %v1434_v13 = vld [vmem:[%s15233_s1 + $0x2728] sm:$0xff]  ;;  %v367_v45 = vld [vmem:[%s15233_s1 + $0x5d0] sm:$0xff] }
 0x26d   : > { %8725 = vmatprep.subr.bf16.mxu0 %v10731_v41  ;;  %v10955_v27 = vcombine.high %v1430_v11, %v1434_v13  ;;  %v1294_v28 = vld [vmem:[%s15233_s1 + $0x22c8] sm:$0xff]  ;;  %v10954_v37 = vcombine.low %v1430_v11, %v1434_v13  ;;  %v371_v11 = vld [vmem:[%s15233_s1 + $0x5f0] sm:$0xff] }
 0x26e   : > { %8765 = vmatpush1.bf16.msra.mxu1 %v10866_v38  ;;  %v1298_v30 = vld [vmem:[%s15233_s1 + $0x22e8] sm:$0xff] }
 0x26f   : > { %8766 = vmatprep.subr.bf16.mxu1 %v10859_v19  ;;  %v1422_v31 = vld [vmem:[%s15233_s1 + $0x26c8] sm:$0xff]  ;;  %v10819_v38 = vcombine.high %v1294_v28, %v1298_v30  ;;  %v10818_v46 = vcombine.low %v1294_v28, %v1298_v30  ;;  %v235_v28 = vld [vmem:[%s15233_s1 + $0x1b0] sm:$0xff] }
 0x270   : > { %8726 = vmatpush1.bf16.msra.mxu0 %v10730_v47  ;;  %v1426_v0 = vld [vmem:[%s15233_s1 + $0x26e8] sm:$0xff]  ;;  %v359_v30 = vld [vmem:[%s15233_s1 + $0x590] sm:$0xff] }
 0x271   : > { %8727 = vmatprep.subr.bf16.mxu0 %v10851_v23  ;;  %v10947_v41 = vcombine.high %v1422_v31, %v1426_v0  ;;  %v1286_v19 = vld [vmem:[%s15233_s1 + $0x2288] sm:$0xff]  ;;  %v10946_v47 = vcombine.low %v1422_v31, %v1426_v0  ;;  %v363_v31 = vld [vmem:[%s15233_s1 + $0x5b0] sm:$0xff] }
 0x272   : > { %8767 = vmatpush1.bf16.msra.mxu1 %v10858_v48  ;;  %v1290_v43 = vld [vmem:[%s15233_s1 + $0x22a8] sm:$0xff] }
 0x273   : > { %8768 = vmatprep.subr.bf16.mxu1 %v10979_v50  ;;  %v1414_v44 = vld [vmem:[%s15233_s1 + $0x2688] sm:$0xff]  ;;  %v10811_v48 = vcombine.high %v1286_v19, %v1290_v43  ;;  %v10810_v53 = vcombine.low %v1286_v19, %v1290_v43  ;;  %v227_v19 = vld [vmem:[%s15233_s1 + $0x170] sm:$0xff] }
 0x274   : > { %8728 = vmatpush2.bf16.msra.mxu0 %v10850_v52  ;;  %v1418_v14 = vld [vmem:[%s15233_s1 + $0x26a8] sm:$0xff] }
 0x275   : > { %8729 = vmatprep.subr.bf16.mxu0 %v10843_v57  ;;  %v10939_v23 = vcombine.high %v1414_v44, %v1418_v14  ;;  %v1278_v50 = vld [vmem:[%s15233_s1 + $0x2248] sm:$0xff]  ;;  %v10938_v52 = vcombine.low %v1414_v44, %v1418_v14  ;;  %v351_v44 = vld [vmem:[%s15233_s1 + $0x550] sm:$0xff] }
 0x276   : > { %8769 = vmatpush2.bf16.msra.mxu1 %v10978_v34  ;;  %v1282_v51 = vld [vmem:[%s15233_s1 + $0x2268] sm:$0xff]  ;;  %v355_v14 = vld [vmem:[%s15233_s1 + $0x570] sm:$0xff] }
 0x277   : > { %8770 = vmatprep.subr.bf16.mxu1 %v10971_v61  ;;  %v1406_v15 = vld [vmem:[%s15233_s1 + $0x2648] sm:$0xff]  ;;  %v10803_v34 = vcombine.high %v1278_v50, %v1282_v51  ;;  %v10802_v2 = vcombine.low %v1278_v50, %v1282_v51  ;;  %v9884_v50 = vcombine.low %v359_v30, %v363_v31 }
 0x278   : > { %8730 = vmatpush2.bf16.msra.mxu0 %v10842_v3  ;;  %v1410_v26 = vld [vmem:[%s15233_s1 + $0x2668] sm:$0xff] }
 0x279   : > { %8731 = vmatprep.subr.bf16.mxu0 %v10835_v6  ;;  %v10931_v57 = vcombine.high %v1406_v15, %v1410_v26  ;;  %v1270_v61 = vld [vmem:[%s15233_s1 + $0x2208] sm:$0xff]  ;;  %v10930_v3 = vcombine.low %v1406_v15, %v1410_v26 }
 0x27a   : > { %8771 = vmatpush2.bf16.msra.mxu1 %v10970_v60  ;;  %v1274_v63 = vld [vmem:[%s15233_s1 + $0x2228] sm:$0xff] }
 0x27b   : > { %8772 = vmatprep.subr.bf16.mxu1 %v10963_v9  ;;  %v1398_v7 = vld [vmem:[%s15233_s1 + $0x2608] sm:$0xff]  ;;  %v10795_v60 = vcombine.high %v1270_v61, %v1274_v63  ;;  %v239_v9 = vld [vmem:[%s15233_s1 + $0x1d0] sm:$0xff]  ;;  %v10794_v13 = vcombine.low %v1270_v61, %v1274_v63 }
 0x27c   : > { %8732 = vmatpush2.bf16.msra.mxu0 %v10834_v56  ;;  %v1402_v1 = vld [vmem:[%s15233_s1 + $0x2628] sm:$0xff]  ;;  %v9764_v0 = vcombine.low %v239_v9, %v243_v39  ;;  %v343_v61 = vld [vmem:[%s15233_s1 + $0x510] sm:$0xff] }
 0x27d   : > { %8733 = vmatprep.subr.bf16.mxu0 %v10827_v24  ;;  %v10923_v6 = vcombine.high %v1398_v7, %v1402_v1  ;;  %v10922_v56 = vcombine.low %v1398_v7, %v1402_v1  ;;  %v9893_v24 = vcombine.high %v367_v45, %v371_v11 }
 0x27e   : > { %8773 = vmatpush2.bf16.msra.mxu1 %v10962_v17  ;;  %v9765_v17 = vcombine.high %v239_v9, %v243_v39  ;;  %v207_v39 = vld [vmem:[%s15233_s1 + $0xd0] sm:$0xff] }
 0x27f   : > { %8774 = vmatprep.subr.bf16.mxu1 %v10955_v27  ;;  %v231_v27 = vld [vmem:[%s15233_s1 + $0x190] sm:$0xff] }
 0x280   : > { %8734 = vmatpush2.bf16.msra.mxu0 %v10826_v35  ;;  %v9892_v35 = vcombine.low %v367_v45, %v371_v11  ;;  %v211_v45 = vld [vmem:[%s15233_s1 + $0xf0] sm:$0xff] }
 0x281   : > { %8735 = vmatprep.subr.bf16.mxu0 %v10819_v38  ;;  %v9885_v38 = vcombine.high %v359_v30, %v363_v31  ;;  %v335_v11 = vld [vmem:[%s15233_s1 + $0x4d0] sm:$0xff] }
 0x282   : > { %8775 = vmatpush2.bf16.msra.mxu1 %v10954_v37  ;;  %v9757_v37 = vcombine.high %v231_v27, %v235_v28  ;;  %v203_v30 = vld [vmem:[%s15233_s1 + $0xb0] sm:$0xff] }
 0x283   : > { %8776 = vmatprep.subr.bf16.mxu1 %v10947_v41  ;;  %v223_v41 = vld [vmem:[%s15233_s1 + $0x150] sm:$0xff] }
 0x284   : > { %8736 = vmatpush2.bf16.msra.mxu0 %v10818_v46  ;;  %v9749_v51 = vcombine.high %v223_v41, %v227_v19  ;;  %v9748_v1 = vcombine.low %v223_v41, %v227_v19  ;;  %v327_v31 = vld [vmem:[%s15233_s1 + $0x490] sm:$0xff] }
 0x285   : > { %8737 = vmatprep.subr.bf16.mxu0 %v10811_v48  ;;  %v9756_v48 = vcombine.low %v231_v27, %v235_v28  ;;  %v199_v28 = vld [vmem:[%s15233_s1 + $0x90] sm:$0xff] }
 0x286   : > { %8777 = vmatpush2.bf16.msra.mxu1 %v10946_v47  ;;  %v191_v19 = vld [vmem:[%s15233_s1 + $0x50] sm:$0xff] }
 0x287   : > { %8778 = vmatprep.subr.bf16.mxu1 %v10939_v23 }
 0x288   : > { %8738 = vmatpush2.bf16.msra.mxu0 %v10810_v53 }
 0x289   : > { %8739 = vmatprep.subr.bf16.mxu0 %v10803_v34  ;;  %v219_v34 = vld [vmem:[%s15233_s1 + $0x130] sm:$0xff] }
 0x28a   : > { %8779 = vmatpush2.bf16.msra.mxu1 %v10938_v52  ;;  %v9877_v52 = vcombine.high %v351_v44, %v355_v14 }
 0x28b   : > { %8780 = vmatprep.subr.bf16.mxu1 %v10931_v57 }
 0x28c   : > { %8740 = vmatpush2.bf16.msra.mxu0 %v10802_v2 }
 0x28d   : > { %8741 = vmatprep.subr.bf16.mxu0 %v10795_v60 }
 0x28e   : > { %8781 = vmatpush2.bf16.msra.mxu1 %v10930_v3  ;;  %v9876_v3 = vcombine.low %v351_v44, %v355_v14  ;;  %v319_v44 = vld [vmem:[%s15233_s1 + $0x450] sm:$0xff] }
 0x28f   : > { %8782 = vmatprep.subr.bf16.mxu1 %v10923_v6  ;;  %v323_v14 = vld [vmem:[%s15233_s1 + $0x470] sm:$0xff] }
 0x290   : > { %8742 = vmatpush2.bf16.msra.mxu0 %v10794_v13  ;;  %v339_v13 = vld [vmem:[%s15233_s1 + $0x4f0] sm:$0xff] }
 0x291   : > { %8793 = vmatprep.subr.bf16.mxu0 %v9765_v17  ;;  %v9861_v27 = vcombine.high %v335_v11, %v339_v13 }
 0x292   : > { %8783 = vmatpush2.bf16.msra.mxu1 %v10922_v56 }
 0x293   : > { %8834 = vmatprep.subr.bf16.mxu1 %v9893_v24  ;;  %v8499_v43 = vpop.f32.mrf.mxu0  ;;  %8744 = vmatmul.mubr.bf16.vlgmr.msra.gmra.mxu0 %v12178_v21  ;;  %v9733_v24 = vcombine.high %v207_v39, %v211_v45 }
 0x294   : > { %v8500_v46 = vadd.f32 %v8499_v43, %v13027_v33  ;;  %8794 = vmatpush1.bf16.msra.mxu0 %v9764_v0  ;;  %v215_v33 = vld [vmem:[%s15233_s1 + $0x110] sm:$0xff]  ;;  %8825 = vmatprep.mubr.bf16.mxu0 %v11165_v58 }
 0x295   : > { %v8540_v47 = vpop.f32.mrf.mxu1  ;;  %8785 = vmatmul.mubr.bf16.vlgmr.msra.gmra.mxu1 %v12188_v25  ;;  %v8501_v23 = vpop.f32.mrf.mxu0  ;;  %8795 = vmatprep.subr.bf16.mxu0 %v9757_v37  ;;  %v9741_v60 = vcombine.high %v215_v33, %v219_v34  ;;  %v9740_v56 = vcombine.low %v215_v33, %v219_v34  ;;  %v331_v0 = vld [vmem:[%s15233_s1 + $0x4b0] sm:$0xff]  ;;  %v9860_v37 = vcombine.low %v335_v11, %v339_v13 }
 0x296   : > { %8835 = vmatpush1.bf16.msra.mxu1 %v9892_v35  ;;  %v13228_v15 = vadd.f32 %v8540_v47, %v8500_v46  ;;  %v8502_v26 = vadd.f32 %v8501_v23, %v13043_v5  ;;  %v347_v5 = vld [vmem:[%s15233_s1 + $0x530] sm:$0xff]  ;;  %8866 = vmatprep.mubr.bf16.mxu1 %v11169_v59  ;;  %v9732_v35 = vcombine.low %v207_v39, %v211_v45 }
 0x297   : > { %v8542_v53 = vpop.f32.mrf.mxu1  ;;  %8836 = vmatprep.subr.bf16.mxu1 %v9885_v38  ;;  %v8503_v57 = vpop.f32.mrf.mxu0  ;;  %v9869_v9 = vcombine.high %v343_v61, %v347_v5  ;;  %v9868_v17 = vcombine.low %v343_v61, %v347_v5  ;;  %v9725_v38 = vcombine.high %v199_v28, %v203_v30  ;;  %v9853_v41 = vcombine.high %v327_v31, %v331_v0  ;;  %v195_v43 = vld [vmem:[%s15233_s1 + $0x70] sm:$0xff] }
 0x298   : > { %v13245_v63 = vadd.f32 %v8542_v53, %v8502_v26  ;;  %8796 = vmatpush1.bf16.msra.mxu0 %v9756_v48  ;;  %v9724_v46 = vcombine.low %v199_v28, %v203_v30  ;;  %v9852_v47 = vcombine.low %v327_v31, %v331_v0  ;;  %v9717_v48 = vcombine.high %v191_v19, %v195_v43  ;;  %v311_v26 = vld [vmem:[%s15233_s1 + $0x410] sm:$0xff] }
 0x299   : > { %v8544_v7 = vpop.f32.mrf.mxu1  ;;  %v8504_v2 = vpop.f32.mrf.mxu0  ;;  %8797 = vmatprep.subr.bf16.mxu0 %v9749_v51  ;;  %v9845_v23 = vcombine.high %v319_v44, %v323_v14  ;;  %v187_v51 = vld [vmem:[%s15233_s1 + $0x30] sm:$0xff]  ;;  %v9844_v33 = vcombine.low %v319_v44, %v323_v14 }
 0x29a   : > { %8837 = vmatpush1.bf16.msra.mxu1 %v9884_v50  ;;  %v183_v50 = vld [vmem:[%s15233_s1 + $0x10] sm:$0xff] }
 0x29b   : > { %v8545_v6 = vpop.f32.mrf.mxu1  ;;  %8838 = vmatprep.subr.bf16.mxu1 %v9877_v52  ;;  %v315_v53 = vld [vmem:[%s15233_s1 + $0x430] sm:$0xff]  ;;  %v9716_v52 = vcombine.low %v191_v19, %v195_v43  ;;  %v9709_v34 = vcombine.high %v183_v50, %v187_v51  ;;  %v9708_v2 = vcombine.low %v183_v50, %v187_v51 }
 0x29c   : > { %8798 = vmatpush1.bf16.msra.mxu0 %v9748_v1  ;;  %v9837_v57 = vcombine.high %v311_v26, %v315_v53  ;;  %v303_v61 = vld [vmem:[%s15233_s1 + $0x3d0] sm:$0xff] }
 0x29d   : > { %8799 = vmatprep.subr.bf16.mxu0 %v9741_v60  ;;  %v307_v5 = vld [vmem:[%s15233_s1 + $0x3f0] sm:$0xff] }
 0x29e   : > { %8839 = vmatpush1.bf16.msra.mxu1 %v9876_v3  ;;  %v431_v7 = vld [vmem:[%s15233_s1 + $0x7d0] sm:$0xff]  ;;  %v9836_v3 = vcombine.low %v311_v26, %v315_v53  ;;  %v9829_v60 = vcombine.high %v303_v61, %v307_v5  ;;  %v9828_v13 = vcombine.low %v303_v61, %v307_v5 }
 0x29f   : > { %8840 = vmatprep.subr.bf16.mxu1 %v9869_v9  ;;  %v435_v1 = vld [vmem:[%s15233_s1 + $0x7f0] sm:$0xff] }
 0x2a0   : > { %8800 = vmatpush1.bf16.msra.mxu0 %v9740_v56  ;;  %v9957_v6 = vcombine.high %v431_v7, %v435_v1  ;;  %v295_v9 = vld [vmem:[%s15233_s1 + $0x390] sm:$0xff]  ;;  %v9956_v56 = vcombine.low %v431_v7, %v435_v1 }
 0x2a1   : > { %8801 = vmatprep.subr.bf16.mxu0 %v9733_v24  ;;  %v299_v39 = vld [vmem:[%s15233_s1 + $0x3b0] sm:$0xff] }
 0x2a2   : > { %8841 = vmatpush1.bf16.msra.mxu1 %v9868_v17  ;;  %v423_v45 = vld [vmem:[%s15233_s1 + $0x790] sm:$0xff]  ;;  %v9821_v17 = vcombine.high %v295_v9, %v299_v39  ;;  %v9820_v0 = vcombine.low %v295_v9, %v299_v39 }
 0x2a3   : > { %8842 = vmatprep.subr.bf16.mxu1 %v9861_v27  ;;  %v427_v11 = vld [vmem:[%s15233_s1 + $0x7b0] sm:$0xff] }
 0x2a4   : > { %8802 = vmatpush1.bf16.msra.mxu0 %v9732_v35  ;;  %v9949_v24 = vcombine.high %v423_v45, %v427_v11  ;;  %v287_v27 = vld [vmem:[%s15233_s1 + $0x350] sm:$0xff]  ;;  %v9948_v35 = vcombine.low %v423_v45, %v427_v11 }
 0x2a5   : > { %8803 = vmatprep.subr.bf16.mxu0 %v9725_v38  ;;  %v291_v28 = vld [vmem:[%s15233_s1 + $0x370] sm:$0xff] }
 0x2a6   : > { %8843 = vmatpush1.bf16.msra.mxu1 %v9860_v37  ;;  %v415_v30 = vld [vmem:[%s15233_s1 + $0x750] sm:$0xff]  ;;  %v9813_v37 = vcombine.high %v287_v27, %v291_v28  ;;  %v9812_v14 = vcombine.low %v287_v27, %v291_v28 }
 0x2a7   : > { %8844 = vmatprep.subr.bf16.mxu1 %v9853_v41  ;;  %v419_v31 = vld [vmem:[%s15233_s1 + $0x770] sm:$0xff] }
 0x2a8   : > { %8804 = vmatpush1.bf16.msra.mxu0 %v9724_v46  ;;  %v9941_v38 = vcombine.high %v415_v30, %v419_v31  ;;  %v279_v41 = vld [vmem:[%s15233_s1 + $0x310] sm:$0xff]  ;;  %v9940_v46 = vcombine.low %v415_v30, %v419_v31 }
 0x2a9   : > { %8805 = vmatprep.subr.bf16.mxu0 %v9717_v48  ;;  %v283_v19 = vld [vmem:[%s15233_s1 + $0x330] sm:$0xff] }
 0x2aa   : > { %8845 = vmatpush1.bf16.msra.mxu1 %v9852_v47  ;;  %v407_v43 = vld [vmem:[%s15233_s1 + $0x710] sm:$0xff]  ;;  %v9805_v47 = vcombine.high %v279_v41, %v283_v19  ;;  %v9804_v53 = vcombine.low %v279_v41, %v283_v19 }
 0x2ab   : > { %8846 = vmatprep.subr.bf16.mxu1 %v9845_v23  ;;  %v411_v44 = vld [vmem:[%s15233_s1 + $0x730] sm:$0xff] }
 0x2ac   : > { %8806 = vmatpush1.bf16.msra.mxu0 %v9716_v52  ;;  %v9933_v48 = vcombine.high %v407_v43, %v411_v44  ;;  %v271_v23 = vld [vmem:[%s15233_s1 + $0x2d0] sm:$0xff]  ;;  %v9932_v52 = vcombine.low %v407_v43, %v411_v44 }
 0x2ad   : > { %8807 = vmatprep.subr.bf16.mxu0 %v9709_v34  ;;  %v275_v50 = vld [vmem:[%s15233_s1 + $0x2f0] sm:$0xff] }
 0x2ae   : > { %8847 = vmatpush1.bf16.msra.mxu1 %v9844_v33  ;;  %v399_v51 = vld [vmem:[%s15233_s1 + $0x6d0] sm:$0xff]  ;;  %v9797_v33 = vcombine.high %v271_v23, %v275_v50  ;;  %v9796_v1 = vcombine.low %v271_v23, %v275_v50 }
 0x2af   : > { %8848 = vmatprep.subr.bf16.mxu1 %v9837_v57  ;;  %v403_v26 = vld [vmem:[%s15233_s1 + $0x6f0] sm:$0xff] }
 0x2b0   : > { %8808 = vmatpush1.bf16.msra.mxu0 %v9708_v2  ;;  %v9925_v34 = vcombine.high %v399_v51, %v403_v26  ;;  %v263_v57 = vld [vmem:[%s15233_s1 + $0x290] sm:$0xff]  ;;  %v9924_v2 = vcombine.low %v399_v51, %v403_v26 }
 0x2b1   : > { %8809 = vmatprep.subr.bf16.mxu0 %v9829_v60  ;;  %v267_v61 = vld [vmem:[%s15233_s1 + $0x2b0] sm:$0xff] }
 0x2b2   : > { %8849 = vmatpush1.bf16.msra.mxu1 %v9836_v3  ;;  %v391_v5 = vld [vmem:[%s15233_s1 + $0x690] sm:$0xff]  ;;  %v9789_v3 = vcombine.high %v263_v57, %v267_v61  ;;  %v9788_v11 = vcombine.low %v263_v57, %v267_v61 }
 0x2b3   : > { %8850 = vmatprep.subr.bf16.mxu1 %v9957_v6  ;;  %v395_v7 = vld [vmem:[%s15233_s1 + $0x6b0] sm:$0xff] }
 0x2b4   : > { %8810 = vmatpush2.bf16.msra.mxu0 %v9828_v13  ;;  %v9917_v60 = vcombine.high %v391_v5, %v395_v7  ;;  %v255_v6 = vld [vmem:[%s15233_s1 + $0x250] sm:$0xff]  ;;  %v9916_v13 = vcombine.low %v391_v5, %v395_v7 }
 0x2b5   : > { %8811 = vmatprep.subr.bf16.mxu0 %v9821_v17  ;;  %v259_v9 = vld [vmem:[%s15233_s1 + $0x270] sm:$0xff] }
 0x2b6   : > { %8851 = vmatpush2.bf16.msra.mxu1 %v9956_v56  ;;  %v383_v39 = vld [vmem:[%s15233_s1 + $0x650] sm:$0xff]  ;;  %v9781_v56 = vcombine.high %v255_v6, %v259_v9  ;;  %v9780_v31 = vcombine.low %v255_v6, %v259_v9 }
 0x2b7   : > { %8852 = vmatprep.subr.bf16.mxu1 %v9949_v24  ;;  %v387_v45 = vld [vmem:[%s15233_s1 + $0x670] sm:$0xff] }
 0x2b8   : > { %8812 = vmatpush2.bf16.msra.mxu0 %v9820_v0  ;;  %v9909_v17 = vcombine.high %v383_v39, %v387_v45  ;;  %v247_v24 = vld [vmem:[%s15233_s1 + $0x210] sm:$0xff]  ;;  %v9908_v0 = vcombine.low %v383_v39, %v387_v45 }
 0x2b9   : > { %8813 = vmatprep.subr.bf16.mxu0 %v9813_v37  ;;  %v251_v27 = vld [vmem:[%s15233_s1 + $0x230] sm:$0xff] }
 0x2ba   : > { %8853 = vmatpush2.bf16.msra.mxu1 %v9948_v35  ;;  %v375_v28 = vld [vmem:[%s15233_s1 + $0x610] sm:$0xff]  ;;  %v9773_v35 = vcombine.high %v247_v24, %v251_v27  ;;  %v9772_v44 = vcombine.low %v247_v24, %v251_v27 }
 0x2bb   : > { %8854 = vmatprep.subr.bf16.mxu1 %v9941_v38  ;;  %v379_v30 = vld [vmem:[%s15233_s1 + $0x630] sm:$0xff] }
 0x2bc   : > { %8814 = vmatpush2.bf16.msra.mxu0 %v9812_v14  ;;  %v9901_v37 = vcombine.high %v375_v28, %v379_v30  ;;  %v495_v38 = vld [vmem:[%s15233_s1 + $0x9d0] sm:$0xff]  ;;  %v9900_v14 = vcombine.low %v375_v28, %v379_v30 }
 0x2bd   : > { %8815 = vmatprep.subr.bf16.mxu0 %v9805_v47  ;;  %v499_v41 = vld [vmem:[%s15233_s1 + $0x9f0] sm:$0xff] }
 0x2be   : > { %8855 = vmatpush2.bf16.msra.mxu1 %v9940_v46  ;;  %v623_v19 = vld [vmem:[%s15233_s1 + $0xdd0] sm:$0xff]  ;;  %v10021_v46 = vcombine.high %v495_v38, %v499_v41  ;;  %v10020_v26 = vcombine.low %v495_v38, %v499_v41 }
 0x2bf   : > { %8856 = vmatprep.subr.bf16.mxu1 %v9933_v48  ;;  %v627_v43 = vld [vmem:[%s15233_s1 + $0xdf0] sm:$0xff] }
 0x2c0   : > { %8816 = vmatpush2.bf16.msra.mxu0 %v9804_v53  ;;  %v10149_v47 = vcombine.high %v623_v19, %v627_v43  ;;  %v487_v48 = vld [vmem:[%s15233_s1 + $0x990] sm:$0xff]  ;;  %v10148_v53 = vcombine.low %v623_v19, %v627_v43 }
 0x2c1   : > { %8817 = vmatprep.subr.bf16.mxu0 %v9797_v33  ;;  %v491_v23 = vld [vmem:[%s15233_s1 + $0x9b0] sm:$0xff] }
 0x2c2   : > { %8857 = vmatpush2.bf16.msra.mxu1 %v9932_v52  ;;  %v615_v50 = vld [vmem:[%s15233_s1 + $0xd90] sm:$0xff]  ;;  %v10013_v52 = vcombine.high %v487_v48, %v491_v23 }
 0x2c3   : > { %8858 = vmatprep.subr.bf16.mxu1 %v9925_v34  ;;  %v619_v51 = vld [vmem:[%s15233_s1 + $0xdb0] sm:$0xff] }
 0x2c4   : > { %8818 = vmatpush2.bf16.msra.mxu0 %v9796_v1  ;;  %v10141_v33 = vcombine.high %v615_v50, %v619_v51  ;;  %v479_v34 = vld [vmem:[%s15233_s1 + $0x950] sm:$0xff]  ;;  %v10140_v6 = vcombine.low %v615_v50, %v619_v51 }
 0x2c5   : > { %8819 = vmatprep.subr.bf16.mxu0 %v9789_v3  ;;  %v483_v57 = vld [vmem:[%s15233_s1 + $0x970] sm:$0xff]  ;;  %v10012_v3 = vcombine.low %v487_v48, %v491_v23 }
 0x2c6   : > { %8859 = vmatpush2.bf16.msra.mxu1 %v9924_v2  ;;  %v607_v5 = vld [vmem:[%s15233_s1 + $0xd50] sm:$0xff]  ;;  %v10005_v9 = vcombine.high %v479_v34, %v483_v57  ;;  %v10004_v30 = vcombine.low %v479_v34, %v483_v57 }
 0x2c7   : > { %8860 = vmatprep.subr.bf16.mxu1 %v9917_v60  ;;  %v611_v7 = vld [vmem:[%s15233_s1 + $0xd70] sm:$0xff] }
 0x2c8   : > { %8820 = vmatpush2.bf16.msra.mxu0 %v9788_v11  ;;  %v599_v24 = vld [vmem:[%s15233_s1 + $0xd10] sm:$0xff] }
 0x2c9   : > { %8821 = vmatprep.subr.bf16.mxu0 %v9781_v56  ;;  %v475_v56 = vld [vmem:[%s15233_s1 + $0x930] sm:$0xff] }
 0x2ca   : > { %8861 = vmatpush2.bf16.msra.mxu1 %v9916_v13  ;;  %v10133_v13 = vcombine.high %v607_v5, %v611_v7  ;;  %v463_v41 = vld [vmem:[%s15233_s1 + $0x8d0] sm:$0xff] }
 0x2cb   : > { %8862 = vmatprep.subr.bf16.mxu1 %v9909_v17  ;;  %v467_v19 = vld [vmem:[%s15233_s1 + $0x8f0] sm:$0xff] }
 0x2cc   : > { %8822 = vmatpush2.bf16.msra.mxu0 %v9780_v31  ;;  %v591_v43 = vld [vmem:[%s15233_s1 + $0xcd0] sm:$0xff] }
 0x2cd   : > { %8823 = vmatprep.subr.bf16.mxu0 %v9773_v35  ;;  %v455_v23 = vld [vmem:[%s15233_s1 + $0x890] sm:$0xff] }
 0x2ce   : > { %8863 = vmatpush2.bf16.msra.mxu1 %v9908_v0  ;;  %v10132_v0 = vcombine.low %v607_v5, %v611_v7  ;;  %v459_v50 = vld [vmem:[%s15233_s1 + $0x8b0] sm:$0xff] }
 0x2cf   : > { %8864 = vmatprep.subr.bf16.mxu1 %v9901_v37  ;;  %v583_v51 = vld [vmem:[%s15233_s1 + $0xc90] sm:$0xff] }
 0x2d0   : > { %8824 = vmatpush2.bf16.msra.mxu0 %v9772_v44  ;;  %v595_v44 = vld [vmem:[%s15233_s1 + $0xcf0] sm:$0xff] }
 0x2d1   : > { %8875 = vmatprep.subr.bf16.mxu0 %v10021_v46  ;;  %v10117_v48 = vcombine.high %v591_v43, %v595_v44  ;;  %v447_v57 = vld [vmem:[%s15233_s1 + $0x850] sm:$0xff] }
 0x2d2   : > { %8865 = vmatpush2.bf16.msra.mxu1 %v9900_v14  ;;  %v575_v5 = vld [vmem:[%s15233_s1 + $0xc50] sm:$0xff] }
 0x2d3   : > { %8916 = vmatprep.subr.bf16.mxu1 %v10149_v47  ;;  %v8581_v61 = vpop.f32.mrf.mxu0  ;;  %8826 = vmatmul.mubr.bf16.vlgmr.msra.gmra.mxu0 %v11295_v16  ;;  %v9989_v47 = vcombine.high %v463_v41, %v467_v19  ;;  %v579_v7 = vld [vmem:[%s15233_s1 + $0xc70] sm:$0xff] }
 0x2d4   : > { %v8582_v1 = vadd.f32 %v8581_v61, %v13228_v15  ;;  %8876 = vmatpush1.bf16.msra.mxu0 %v10020_v26  ;;  %v471_v15 = vld [vmem:[%s15233_s1 + $0x910] sm:$0xff]  ;;  %8907 = vmatprep.mubr.bf16.mxu0 %v11321_v54 }
 0x2d5   : > { %v8622_v2 = vpop.f32.mrf.mxu1  ;;  %8867 = vmatmul.mubr.bf16.vlgmr.msra.gmra.mxu1 %v11308_v20  ;;  %v8583_v60 = vpop.f32.mrf.mxu0  ;;  %8877 = vmatprep.subr.bf16.mxu0 %v10013_v52  ;;  %v9997_v35 = vcombine.high %v471_v15, %v475_v56  ;;  %v9996_v14 = vcombine.low %v471_v15, %v475_v56  ;;  %v587_v26 = vld [vmem:[%s15233_s1 + $0xcb0] sm:$0xff]  ;;  %v10116_v52 = vcombine.low %v591_v43, %v595_v44 }
 0x2d6   : > { %8917 = vmatpush1.bf16.msra.mxu1 %v10148_v53  ;;  %v13430_v39 = vadd.f32 %v8622_v2, %v8582_v1  ;;  %v8584_v45 = vadd.f32 %v8583_v60, %v13245_v63  ;;  %v603_v63 = vld [vmem:[%s15233_s1 + $0xd30] sm:$0xff]  ;;  %8948 = vmatprep.mubr.bf16.mxu1 %v11332_v29  ;;  %v9988_v53 = vcombine.low %v463_v41, %v467_v19 }
 0x2d7   : > { %v8624_v11 = vpop.f32.mrf.mxu1  ;;  %8918 = vmatprep.subr.bf16.mxu1 %v10141_v33  ;;  %v8585_v17 = vpop.f32.mrf.mxu0  ;;  %v10125_v38 = vcombine.high %v599_v24, %v603_v63  ;;  %v10124_v46 = vcombine.low %v599_v24, %v603_v63  ;;  %v9981_v33 = vcombine.high %v455_v23, %v459_v50  ;;  %v10109_v34 = vcombine.high %v583_v51, %v587_v26  ;;  %v451_v61 = vld [vmem:[%s15233_s1 + $0x870] sm:$0xff] }
 0x2d8   : > { %v13447_v27 = vadd.f32 %v8624_v11, %v8584_v45  ;;  %8878 = vmatpush1.bf16.msra.mxu0 %v10012_v3  ;;  %v9980_v1 = vcombine.low %v455_v23, %v459_v50  ;;  %v10108_v2 = vcombine.low %v583_v51, %v587_v26  ;;  %v9973_v3 = vcombine.high %v447_v57, %v451_v61  ;;  %v567_v45 = vld [vmem:[%s15233_s1 + $0xc10] sm:$0xff] }
 0x2d9   : > { %v8626_v28 = vpop.f32.mrf.mxu1  ;;  %v8586_v31 = vpop.f32.mrf.mxu0  ;;  %8879 = vmatprep.subr.bf16.mxu0 %v10005_v9  ;;  %v10101_v60 = vcombine.high %v575_v5, %v579_v7  ;;  %v443_v9 = vld [vmem:[%s15233_s1 + $0x830] sm:$0xff]  ;;  %v10100_v15 = vcombine.low %v575_v5, %v579_v7 }
 0x2da   : > { %8919 = vmatpush1.bf16.msra.mxu1 %v10140_v6  ;;  %v439_v6 = vld [vmem:[%s15233_s1 + $0x810] sm:$0xff] }
 0x2db   : > { %v8627_v37 = vpop.f32.mrf.mxu1  ;;  %8920 = vmatprep.subr.bf16.mxu1 %v10133_v13  ;;  %v571_v11 = vld [vmem:[%s15233_s1 + $0xc30] sm:$0xff]  ;;  %v9972_v13 = vcombine.low %v447_v57, %v451_v61  ;;  %v9965_v56 = vcombine.high %v439_v6, %v443_v9  ;;  %v9964_v31 = vcombine.low %v439_v6, %v443_v9 }
 0x2dc   : > { %8880 = vmatpush1.bf16.msra.mxu0 %v10004_v30  ;;  %v10093_v17 = vcombine.high %v567_v45, %v571_v11  ;;  %v559_v24 = vld [vmem:[%s15233_s1 + $0xbd0] sm:$0xff] }
 0x2dd   : > { %8881 = vmatprep.subr.bf16.mxu0 %v9997_v35  ;;  %v563_v63 = vld [vmem:[%s15233_s1 + $0xbf0] sm:$0xff] }
 0x2de   : > { %8921 = vmatpush1.bf16.msra.mxu1 %v10132_v0  ;;  %v687_v28 = vld [vmem:[%s15233_s1 + $0xfd0] sm:$0xff]  ;;  %v10092_v0 = vcombine.low %v567_v45, %v571_v11  ;;  %v10085_v35 = vcombine.high %v559_v24, %v563_v63  ;;  %v10084_v44 = vcombine.low %v559_v24, %v563_v63 }
 0x2df   : > { %8922 = vmatprep.subr.bf16.mxu1 %v10125_v38  ;;  %v691_v30 = vld [vmem:[%s15233_s1 + $0xff0] sm:$0xff] }
 0x2e0   : > { %8882 = vmatpush1.bf16.msra.mxu0 %v9996_v14  ;;  %v10213_v37 = vcombine.high %v687_v28, %v691_v30  ;;  %v551_v38 = vld [vmem:[%s15233_s1 + $0xb90] sm:$0xff]  ;;  %v10212_v14 = vcombine.low %v687_v28, %v691_v30 }
 0x2e1   : > { %8883 = vmatprep.subr.bf16.mxu0 %v9989_v47  ;;  %v555_v41 = vld [vmem:[%s15233_s1 + $0xbb0] sm:$0xff] }
 0x2e2   : > { %8923 = vmatpush1.bf16.msra.mxu1 %v10124_v46  ;;  %v679_v19 = vld [vmem:[%s15233_s1 + $0xf90] sm:$0xff]  ;;  %v10077_v46 = vcombine.high %v551_v38, %v555_v41  ;;  %v10076_v26 = vcombine.low %v551_v38, %v555_v41 }
 0x2e3   : > { %8924 = vmatprep.subr.bf16.mxu1 %v10117_v48  ;;  %v683_v43 = vld [vmem:[%s15233_s1 + $0xfb0] sm:$0xff] }
 0x2e4   : > { %8884 = vmatpush1.bf16.msra.mxu0 %v9988_v53  ;;  %v10205_v47 = vcombine.high %v679_v19, %v683_v43  ;;  %v543_v48 = vld [vmem:[%s15233_s1 + $0xb50] sm:$0xff]  ;;  %v10204_v53 = vcombine.low %v679_v19, %v683_v43 }
 0x2e5   : > { %8885 = vmatprep.subr.bf16.mxu0 %v9981_v33  ;;  %v547_v23 = vld [vmem:[%s15233_s1 + $0xb70] sm:$0xff] }
 0x2e6   : > { %8925 = vmatpush1.bf16.msra.mxu1 %v10116_v52  ;;  %v671_v50 = vld [vmem:[%s15233_s1 + $0xf50] sm:$0xff]  ;;  %v10069_v52 = vcombine.high %v543_v48, %v547_v23  ;;  %v10068_v7 = vcombine.low %v543_v48, %v547_v23 }
 0x2e7   : > { %8926 = vmatprep.subr.bf16.mxu1 %v10109_v34  ;;  %v675_v51 = vld [vmem:[%s15233_s1 + $0xf70] sm:$0xff] }
 0x2e8   : > { %8886 = vmatpush1.bf16.msra.mxu0 %v9980_v1  ;;  %v10197_v33 = vcombine.high %v671_v50, %v675_v51  ;;  %v535_v34 = vld [vmem:[%s15233_s1 + $0xb10] sm:$0xff]  ;;  %v10196_v1 = vcombine.low %v671_v50, %v675_v51 }
 0x2e9   : > { %8887 = vmatprep.subr.bf16.mxu0 %v9973_v3  ;;  %v539_v57 = vld [vmem:[%s15233_s1 + $0xb30] sm:$0xff] }
 0x2ea   : > { %8927 = vmatpush1.bf16.msra.mxu1 %v10108_v2  ;;  %v663_v61 = vld [vmem:[%s15233_s1 + $0xf10] sm:$0xff]  ;;  %v10061_v2 = vcombine.high %v535_v34, %v539_v57  ;;  %v10060_v11 = vcombine.low %v535_v34, %v539_v57 }
 0x2eb   : > { %8928 = vmatprep.subr.bf16.mxu1 %v10101_v60  ;;  %v667_v5 = vld [vmem:[%s15233_s1 + $0xf30] sm:$0xff] }
 0x2ec   : > { %8888 = vmatpush1.bf16.msra.mxu0 %v9972_v13  ;;  %v10189_v3 = vcombine.high %v663_v61, %v667_v5  ;;  %v527_v60 = vld [vmem:[%s15233_s1 + $0xad0] sm:$0xff]  ;;  %v10188_v13 = vcombine.low %v663_v61, %v667_v5 }
 0x2ed   : > { %8889 = vmatprep.subr.bf16.mxu0 %v9965_v56  ;;  %v531_v6 = vld [vmem:[%s15233_s1 + $0xaf0] sm:$0xff] }
 0x2ee   : > { %8929 = vmatpush1.bf16.msra.mxu1 %v10100_v15  ;;  %v655_v9 = vld [vmem:[%s15233_s1 + $0xed0] sm:$0xff]  ;;  %v10053_v15 = vcombine.high %v527_v60, %v531_v6  ;;  %v10052_v30 = vcombine.low %v527_v60, %v531_v6 }
 0x2ef   : > { %8930 = vmatprep.subr.bf16.mxu1 %v10093_v17  ;;  %v659_v45 = vld [vmem:[%s15233_s1 + $0xef0] sm:$0xff] }
 0x2f0   : > { %8890 = vmatpush1.bf16.msra.mxu0 %v9964_v31  ;;  %v10181_v56 = vcombine.high %v655_v9, %v659_v45  ;;  %v519_v17 = vld [vmem:[%s15233_s1 + $0xa90] sm:$0xff]  ;;  %v10180_v31 = vcombine.low %v655_v9, %v659_v45 }
 0x2f1   : > { %8891 = vmatprep.subr.bf16.mxu0 %v10085_v35  ;;  %v523_v24 = vld [vmem:[%s15233_s1 + $0xab0] sm:$0xff] }
 0x2f2   : > { %8931 = vmatpush1.bf16.msra.mxu1 %v10092_v0  ;;  %v647_v63 = vld [vmem:[%s15233_s1 + $0xe90] sm:$0xff]  ;;  %v10045_v0 = vcombine.high %v519_v17, %v523_v24  ;;  %v10044_v43 = vcombine.low %v519_v17, %v523_v24 }
 0x2f3   : > { %8932 = vmatprep.subr.bf16.mxu1 %v10213_v37  ;;  %v651_v28 = vld [vmem:[%s15233_s1 + $0xeb0] sm:$0xff] }
 0x2f4   : > { %8892 = vmatpush2.bf16.msra.mxu0 %v10084_v44  ;;  %v10173_v35 = vcombine.high %v647_v63, %v651_v28  ;;  %v511_v37 = vld [vmem:[%s15233_s1 + $0xa50] sm:$0xff]  ;;  %v10172_v44 = vcombine.low %v647_v63, %v651_v28 }
 0x2f5   : > { %8893 = vmatprep.subr.bf16.mxu0 %v10077_v46  ;;  %v515_v38 = vld [vmem:[%s15233_s1 + $0xa70] sm:$0xff] }
 0x2f6   : > { %8933 = vmatpush2.bf16.msra.mxu1 %v10212_v14  ;;  %v639_v41 = vld [vmem:[%s15233_s1 + $0xe50] sm:$0xff]  ;;  %v10037_v14 = vcombine.high %v511_v37, %v515_v38  ;;  %v10036_v51 = vcombine.low %v511_v37, %v515_v38 }
 0x2f7   : > { %8934 = vmatprep.subr.bf16.mxu1 %v10205_v47  ;;  %v643_v19 = vld [vmem:[%s15233_s1 + $0xe70] sm:$0xff] }
 0x2f8   : > { %8894 = vmatpush2.bf16.msra.mxu0 %v10076_v26  ;;  %v10165_v46 = vcombine.high %v639_v41, %v643_v19  ;;  %v503_v47 = vld [vmem:[%s15233_s1 + $0xa10] sm:$0xff]  ;;  %v10164_v26 = vcombine.low %v639_v41, %v643_v19 }
 0x2f9   : > { %8895 = vmatprep.subr.bf16.mxu0 %v10069_v52  ;;  %v507_v48 = vld [vmem:[%s15233_s1 + $0xa30] sm:$0xff] }
 0x2fa   : > { %8935 = vmatpush2.bf16.msra.mxu1 %v10204_v53  ;;  %v631_v23 = vld [vmem:[%s15233_s1 + $0xe10] sm:$0xff]  ;;  %v10029_v53 = vcombine.high %v503_v47, %v507_v48  ;;  %v10028_v5 = vcombine.low %v503_v47, %v507_v48 }
 0x2fb   : > { %8936 = vmatprep.subr.bf16.mxu1 %v10197_v33  ;;  %v635_v50 = vld [vmem:[%s15233_s1 + $0xe30] sm:$0xff] }
 0x2fc   : > { %8896 = vmatpush2.bf16.msra.mxu0 %v10068_v7  ;;  %v10157_v52 = vcombine.high %v631_v23, %v635_v50  ;;  %v751_v33 = vld [vmem:[%s15233_s1 + $0x11d0] sm:$0xff]  ;;  %v10156_v7 = vcombine.low %v631_v23, %v635_v50 }
 0x2fd   : > { %8897 = vmatprep.subr.bf16.mxu0 %v10061_v2  ;;  %v755_v34 = vld [vmem:[%s15233_s1 + $0x11f0] sm:$0xff] }
 0x2fe   : > { %8937 = vmatpush2.bf16.msra.mxu1 %v10196_v1  ;;  %v879_v57 = vld [vmem:[%s15233_s1 + $0x15d0] sm:$0xff]  ;;  %v10277_v1 = vcombine.high %v751_v33, %v755_v34  ;;  %v10276_v45 = vcombine.low %v751_v33, %v755_v34 }
 0x2ff   : > { %8938 = vmatprep.subr.bf16.mxu1 %v10189_v3  ;;  %v883_v61 = vld [vmem:[%s15233_s1 + $0x15f0] sm:$0xff] }
 0x300   : > { %8898 = vmatpush2.bf16.msra.mxu0 %v10060_v11  ;;  %v10405_v2 = vcombine.high %v879_v57, %v883_v61  ;;  %v743_v3 = vld [vmem:[%s15233_s1 + $0x1190] sm:$0xff]  ;;  %v10404_v11 = vcombine.low %v879_v57, %v883_v61 }
 0x301   : > { %8899 = vmatprep.subr.bf16.mxu0 %v10053_v15  ;;  %v747_v60 = vld [vmem:[%s15233_s1 + $0x11b0] sm:$0xff] }
 0x302   : > { %8939 = vmatpush2.bf16.msra.mxu1 %v10188_v13  ;;  %v871_v6 = vld [vmem:[%s15233_s1 + $0x1590] sm:$0xff]  ;;  %v10269_v13 = vcombine.high %v743_v3, %v747_v60 }
 0x303   : > { %8940 = vmatprep.subr.bf16.mxu1 %v10181_v56  ;;  %v875_v9 = vld [vmem:[%s15233_s1 + $0x15b0] sm:$0xff] }
 0x304   : > { %8900 = vmatpush2.bf16.msra.mxu0 %v10052_v30  ;;  %v10397_v15 = vcombine.high %v871_v6, %v875_v9  ;;  %v735_v56 = vld [vmem:[%s15233_s1 + $0x1150] sm:$0xff] }
 0x305   : > { %8901 = vmatprep.subr.bf16.mxu0 %v10045_v0  ;;  %v739_v17 = vld [vmem:[%s15233_s1 + $0x1170] sm:$0xff] }
 0x306   : > { %8941 = vmatpush2.bf16.msra.mxu1 %v10180_v31  ;;  %v863_v63 = vld [vmem:[%s15233_s1 + $0x1550] sm:$0xff]  ;;  %v10268_v31 = vcombine.low %v743_v3, %v747_v60  ;;  %v10261_v37 = vcombine.high %v735_v56, %v739_v17  ;;  %v10260_v48 = vcombine.low %v735_v56, %v739_v17 }
 0x307   : > { %8942 = vmatprep.subr.bf16.mxu1 %v10173_v35  ;;  %v867_v28 = vld [vmem:[%s15233_s1 + $0x1570] sm:$0xff]  ;;  %v10396_v35 = vcombine.low %v871_v6, %v875_v9 }
 0x308   : > { %8902 = vmatpush2.bf16.msra.mxu0 %v10044_v43  ;;  %v10389_v41 = vcombine.high %v863_v63, %v867_v28  ;;  %v727_v19 = vld [vmem:[%s15233_s1 + $0x1110] sm:$0xff]  ;;  %v10388_v50 = vcombine.low %v863_v63, %v867_v28 }
 0x309   : > { %8903 = vmatprep.subr.bf16.mxu0 %v10037_v14  ;;  %v731_v43 = vld [vmem:[%s15233_s1 + $0x1130] sm:$0xff] }
 0x30a   : > { %8943 = vmatpush2.bf16.msra.mxu1 %v10172_v44  ;;  %v855_v14 = vld [vmem:[%s15233_s1 + $0x1510] sm:$0xff]  ;;  %v10252_v61 = vcombine.low %v727_v19, %v731_v43 }
 0x30b   : > { %8944 = vmatprep.subr.bf16.mxu1 %v10165_v46  ;;  %v859_v46 = vld [vmem:[%s15233_s1 + $0x1530] sm:$0xff] }
 0x30c   : > { %8904 = vmatpush2.bf16.msra.mxu0 %v10036_v51  ;;  %v10253_v51 = vcombine.high %v727_v19, %v731_v43  ;;  %v723_v33 = vld [vmem:[%s15233_s1 + $0x10f0] sm:$0xff] }
 0x30d   : > { %8905 = vmatprep.subr.bf16.mxu0 %v10029_v53  ;;  %v10381_v53 = vcombine.high %v855_v14, %v859_v46  ;;  %v847_v34 = vld [vmem:[%s15233_s1 + $0x14d0] sm:$0xff] }
 0x30e   : > { %8945 = vmatpush2.bf16.msra.mxu1 %v10164_v26  ;;  %v851_v57 = vld [vmem:[%s15233_s1 + $0x14f0] sm:$0xff] }
 0x30f   : > { %8946 = vmatprep.subr.bf16.mxu1 %v10157_v52  ;;  %v719_v52 = vld [vmem:[%s15233_s1 + $0x10d0] sm:$0xff] }
 0x310   : > { %8906 = vmatpush2.bf16.msra.mxu0 %v10028_v5  ;;  %v10380_v5 = vcombine.low %v855_v14, %v859_v46  ;;  %v715_v3 = vld [vmem:[%s15233_s1 + $0x10b0] sm:$0xff]  ;;  %v10244_v9 = vcombine.low %v719_v52, %v723_v33 }
 0x311   : > { %8957 = vmatprep.subr.bf16.mxu0 %v10277_v1  ;;  %v10373_v1 = vcombine.high %v847_v34, %v851_v57  ;;  %v839_v60 = vld [vmem:[%s15233_s1 + $0x1490] sm:$0xff] }
 0x312   : > { %8947 = vmatpush2.bf16.msra.mxu1 %v10156_v7  ;;  %v10245_v7 = vcombine.high %v719_v52, %v723_v33  ;;  %v843_v6 = vld [vmem:[%s15233_s1 + $0x14b0] sm:$0xff] }
 0x313   : > { %8998 = vmatprep.subr.bf16.mxu1 %v10405_v2  ;;  %v13623_v24 = vpop.f32.mrf.mxu0  ;;  %8908 = vmatmul.mubr.bf16.vlgmr.msra.gmra.mxu0 %v11513_v36  ;;  %v711_v2 = vld [vmem:[%s15233_s1 + $0x1090] sm:$0xff] }
 0x314   : > { %8958 = vmatpush1.bf16.msra.mxu0 %v10276_v45  ;;  %8989 = vmatprep.mubr.bf16.mxu0 %v11539_v22  ;;  %v10372_v45 = vcombine.low %v847_v34, %v851_v57  ;;  %v707_v56 = vld [vmem:[%s15233_s1 + $0x1070] sm:$0xff]  ;;  %v10236_v28 = vcombine.low %v711_v2, %v715_v3 }
 0x315   : > { %v13632_v30 = vpop.f32.mrf.mxu1  ;;  %8949 = vmatmul.mubr.bf16.vlgmr.msra.gmra.mxu1 %v11526_v40  ;;  %v13635_v0 = vpop.f32.mrf.mxu0  ;;  %8959 = vmatprep.subr.bf16.mxu0 %v10269_v13  ;;  %v10365_v13 = vcombine.high %v839_v60, %v843_v6  ;;  %v831_v17 = vld [vmem:[%s15233_s1 + $0x1450] sm:$0xff] }
 0x316   : > { %8999 = vmatpush1.bf16.msra.mxu1 %v10404_v11  ;;  %9030 = vmatprep.mubr.bf16.mxu1 %v11550_v49  ;;  %v10237_v11 = vcombine.high %v711_v2, %v715_v3  ;;  %v835_v63 = vld [vmem:[%s15233_s1 + $0x1470] sm:$0xff] }
 0x317   : > { %v13637_v38 = vpop.f32.mrf.mxu1  ;;  %9000 = vmatprep.subr.bf16.mxu1 %v10397_v15  ;;  %v8667_v44 = vpop.f32.mrf.mxu0  ;;  %v703_v15 = vld [vmem:[%s15233_s1 + $0x1050] sm:$0xff]  ;;  %v10356_v46 = vcombine.low %v831_v17, %v835_v63 }
 0x318   : > { %8960 = vmatpush1.bf16.msra.mxu0 %v10268_v31  ;;  %v10364_v31 = vcombine.low %v839_v60, %v843_v6  ;;  %v699_v19 = vld [vmem:[%s15233_s1 + $0x1030] sm:$0xff]  ;;  %v10228_v14 = vcombine.low %v703_v15, %v707_v56 }
 0x319   : > { %v8708_v47 = vpop.f32.mrf.mxu1  ;;  %v8668_v23 = vpop.f32.mrf.mxu0  ;;  %8961 = vmatprep.subr.bf16.mxu0 %v10261_v37  ;;  %v10357_v37 = vcombine.high %v831_v17, %v835_v63  ;;  %v823_v43 = vld [vmem:[%s15233_s1 + $0x1410] sm:$0xff] }
 0x31a   : > { %9001 = vmatpush1.bf16.msra.mxu1 %v10396_v35  ;;  %v10229_v35 = vcombine.high %v703_v15, %v707_v56  ;;  %v827_v44 = vld [vmem:[%s15233_s1 + $0x1430] sm:$0xff] }
 0x31b   : > { %v8709_v26 = vpop.f32.mrf.mxu1  ;;  %9002 = vmatprep.subr.bf16.mxu1 %v10389_v41  ;;  %v695_v41 = vld [vmem:[%s15233_s1 + $0x1010] sm:$0xff]  ;;  %v10348_v52 = vcombine.low %v823_v43, %v827_v44 }
 0x31c   : > { %8962 = vmatpush1.bf16.msra.mxu0 %v10260_v48  ;;  %v10221_v47 = vcombine.high %v695_v41, %v699_v19  ;;  %v10349_v48 = vcombine.high %v823_v43, %v827_v44  ;;  %v815_v23 = vld [vmem:[%s15233_s1 + $0x13d0] sm:$0xff] }
 0x31d   : > { %8963 = vmatprep.subr.bf16.mxu0 %v10253_v51  ;;  %v943_v51 = vld [vmem:[%s15233_s1 + $0x17d0] sm:$0xff] }
 0x31e   : > { %9003 = vmatpush1.bf16.msra.mxu1 %v10388_v50  ;;  %v819_v50 = vld [vmem:[%s15233_s1 + $0x13f0] sm:$0xff] }
 0x31f   : > { %9004 = vmatprep.subr.bf16.mxu1 %v10381_v53  ;;  %v947_v26 = vld [vmem:[%s15233_s1 + $0x17f0] sm:$0xff]  ;;  %v10220_v53 = vcombine.low %v695_v41, %v699_v19  ;;  %v10341_v33 = vcombine.high %v815_v23, %v819_v50 }
 0x320   : > { %8964 = vmatpush1.bf16.msra.mxu0 %v10252_v61  ;;  %v10469_v34 = vcombine.high %v943_v51, %v947_v26  ;;  %v807_v57 = vld [vmem:[%s15233_s1 + $0x1390] sm:$0xff]  ;;  %v10468_v2 = vcombine.low %v943_v51, %v947_v26 }
 0x321   : > { %8965 = vmatprep.subr.bf16.mxu0 %v10245_v7  ;;  %v811_v61 = vld [vmem:[%s15233_s1 + $0x13b0] sm:$0xff] }
 0x322   : > { %9005 = vmatpush1.bf16.msra.mxu1 %v10380_v5  ;;  %v935_v5 = vld [vmem:[%s15233_s1 + $0x1790] sm:$0xff]  ;;  %v10333_v3 = vcombine.high %v807_v57, %v811_v61 }
 0x323   : > { %9006 = vmatprep.subr.bf16.mxu1 %v10373_v1  ;;  %v939_v7 = vld [vmem:[%s15233_s1 + $0x17b0] sm:$0xff]  ;;  %v10340_v1 = vcombine.low %v815_v23, %v819_v50 }
 0x324   : > { %8966 = vmatpush1.bf16.msra.mxu0 %v10244_v9  ;;  %v10461_v60 = vcombine.high %v935_v5, %v939_v7  ;;  %v799_v6 = vld [vmem:[%s15233_s1 + $0x1350] sm:$0xff]  ;;  %v10460_v15 = vcombine.low %v935_v5, %v939_v7 }
 0x325   : > { %8967 = vmatprep.subr.bf16.mxu0 %v10237_v11  ;;  %v803_v9 = vld [vmem:[%s15233_s1 + $0x1370] sm:$0xff] }
 0x326   : > { %9007 = vmatpush1.bf16.msra.mxu1 %v10372_v45  ;;  %v927_v45 = vld [vmem:[%s15233_s1 + $0x1750] sm:$0xff]  ;;  %v10325_v56 = vcombine.high %v799_v6, %v803_v9 }
 0x327   : > { %9008 = vmatprep.subr.bf16.mxu1 %v10365_v13  ;;  %v931_v11 = vld [vmem:[%s15233_s1 + $0x1770] sm:$0xff]  ;;  %v10332_v13 = vcombine.low %v807_v57, %v811_v61 }
 0x328   : > { %8968 = vmatpush1.bf16.msra.mxu0 %v10236_v28  ;;  %v10453_v17 = vcombine.high %v927_v45, %v931_v11  ;;  %v791_v63 = vld [vmem:[%s15233_s1 + $0x1310] sm:$0xff]  ;;  %v10452_v41 = vcombine.low %v927_v45, %v931_v11 }
 0x329   : > { %8969 = vmatprep.subr.bf16.mxu0 %v10229_v35  ;;  %v795_v28 = vld [vmem:[%s15233_s1 + $0x1330] sm:$0xff] }
 0x32a   : > { %9009 = vmatpush1.bf16.msra.mxu1 %v10364_v31  ;;  %v919_v31 = vld [vmem:[%s15233_s1 + $0x1710] sm:$0xff]  ;;  %v10317_v19 = vcombine.high %v791_v63, %v795_v28 }
 0x32b   : > { %9010 = vmatprep.subr.bf16.mxu1 %v10357_v37  ;;  %v923_v35 = vld [vmem:[%s15233_s1 + $0x1730] sm:$0xff]  ;;  %v10324_v37 = vcombine.low %v799_v6, %v803_v9 }
 0x32c   : > { %8970 = vmatpush1.bf16.msra.mxu0 %v10228_v14  ;;  %v10445_v43 = vcombine.high %v919_v31, %v923_v35  ;;  %v783_v44 = vld [vmem:[%s15233_s1 + $0x12d0] sm:$0xff]  ;;  %v10444_v23 = vcombine.low %v919_v31, %v923_v35 }
 0x32d   : > { %8971 = vmatprep.subr.bf16.mxu0 %v10221_v47  ;;  %v787_v14 = vld [vmem:[%s15233_s1 + $0x12f0] sm:$0xff] }
 0x32e   : > { %9011 = vmatpush1.bf16.msra.mxu1 %v10356_v46  ;;  %v911_v46 = vld [vmem:[%s15233_s1 + $0x16d0] sm:$0xff]  ;;  %v10309_v50 = vcombine.high %v783_v44, %v787_v14 }
 0x32f   : > { %9012 = vmatprep.subr.bf16.mxu1 %v10349_v48  ;;  %v915_v47 = vld [vmem:[%s15233_s1 + $0x16f0] sm:$0xff]  ;;  %v10316_v48 = vcombine.low %v791_v63, %v795_v28 }
 0x330   : > { %8972 = vmatpush1.bf16.msra.mxu0 %v10220_v53  ;;  %v10437_v51 = vcombine.high %v911_v46, %v915_v47  ;;  %v775_v26 = vld [vmem:[%s15233_s1 + $0x1290] sm:$0xff]  ;;  %v10436_v57 = vcombine.low %v911_v46, %v915_v47  ;;  %v8664_v46 = vadd.f32 %v13623_v24, %v13430_v39  ;;  %v8666_v39 = vadd.f32 %v13635_v0, %v13447_v27 }
 0x331   : > { %8973 = vmatprep.subr.bf16.mxu0 %v10341_v33  ;;  %v779_v53 = vld [vmem:[%s15233_s1 + $0x12b0] sm:$0xff] }
 0x332   : > { %9013 = vmatpush1.bf16.msra.mxu1 %v10348_v52  ;;  %v903_v52 = vld [vmem:[%s15233_s1 + $0x1690] sm:$0xff]  ;;  %v10301_v61 = vcombine.high %v775_v26, %v779_v53  ;;  %v8707_v0 = vadd.f32 %v13637_v38, %v8666_v39 }
 0x333   : > { %9014 = vmatprep.subr.bf16.mxu1 %v10469_v34  ;;  %v907_v33 = vld [vmem:[%s15233_s1 + $0x16b0] sm:$0xff]  ;;  %v10308_v34 = vcombine.low %v783_v44, %v787_v14 }
 0x334   : > { %8974 = vmatpush2.bf16.msra.mxu0 %v10340_v1  ;;  %v10429_v5 = vcombine.high %v903_v52, %v907_v33  ;;  %v767_v7 = vld [vmem:[%s15233_s1 + $0x1250] sm:$0xff]  ;;  %v10428_v6 = vcombine.low %v903_v52, %v907_v33  ;;  %v8705_v52 = vadd.f32 %v13632_v30, %v8664_v46 }
 0x335   : > { %8975 = vmatprep.subr.bf16.mxu0 %v10333_v3  ;;  %v771_v1 = vld [vmem:[%s15233_s1 + $0x1270] sm:$0xff] }
 0x336   : > { %9015 = vmatpush2.bf16.msra.mxu1 %v10468_v2  ;;  %v895_v2 = vld [vmem:[%s15233_s1 + $0x1650] sm:$0xff]  ;;  %v10293_v9 = vcombine.high %v767_v7, %v771_v1 }
 0x337   : > { %9016 = vmatprep.subr.bf16.mxu1 %v10461_v60  ;;  %v899_v3 = vld [vmem:[%s15233_s1 + $0x1670] sm:$0xff]  ;;  %v10300_v60 = vcombine.low %v775_v26, %v779_v53 }
 0x338   : > { %8976 = vmatpush2.bf16.msra.mxu0 %v10332_v13  ;;  %v10421_v45 = vcombine.high %v895_v2, %v899_v3  ;;  %v759_v11 = vld [vmem:[%s15233_s1 + $0x1210] sm:$0xff]  ;;  %v10420_v63 = vcombine.low %v895_v2, %v899_v3 }
 0x339   : > { %8977 = vmatprep.subr.bf16.mxu0 %v10325_v56  ;;  %v763_v13 = vld [vmem:[%s15233_s1 + $0x1230] sm:$0xff] }
 0x33a   : > { %9017 = vmatpush2.bf16.msra.mxu1 %v10460_v15  ;;  %v887_v15 = vld [vmem:[%s15233_s1 + $0x1610] sm:$0xff]  ;;  %v10285_v28 = vcombine.high %v759_v11, %v763_v13 }
 0x33b   : > { %9018 = vmatprep.subr.bf16.mxu1 %v10453_v17  ;;  %v891_v56 = vld [vmem:[%s15233_s1 + $0x1630] sm:$0xff]  ;;  %v10292_v17 = vcombine.low %v767_v7, %v771_v1 }
 0x33c   : > { %8978 = vmatpush2.bf16.msra.mxu0 %v10324_v37  ;;  %v10413_v31 = vcombine.high %v887_v15, %v891_v56  ;;  %v1007_v35 = vld [vmem:[%s15233_s1 + $0x19d0] sm:$0xff]  ;;  %v10412_v44 = vcombine.low %v887_v15, %v891_v56 }
 0x33d   : > { %8979 = vmatprep.subr.bf16.mxu0 %v10317_v19  ;;  %v1011_v37 = vld [vmem:[%s15233_s1 + $0x19f0] sm:$0xff] }
 0x33e   : > { %9019 = vmatpush2.bf16.msra.mxu1 %v10452_v41  ;;  %v1135_v41 = vld [vmem:[%s15233_s1 + $0x1dd0] sm:$0xff]  ;;  %v10533_v14 = vcombine.high %v1007_v35, %v1011_v37  ;;  %v10532_v24 = vcombine.low %v1007_v35, %v1011_v37 }
 0x33f   : > { %9020 = vmatprep.subr.bf16.mxu1 %v10445_v43  ;;  %v1139_v19 = vld [vmem:[%s15233_s1 + $0x1df0] sm:$0xff]  ;;  %v10284_v43 = vcombine.low %v759_v11, %v763_v13 }
 0x340   : > { %8980 = vmatpush2.bf16.msra.mxu0 %v10316_v48  ;;  %v10661_v47 = vcombine.high %v1135_v41, %v1139_v19  ;;  %v999_v48 = vld [vmem:[%s15233_s1 + $0x1990] sm:$0xff]  ;;  %v10660_v26 = vcombine.low %v1135_v41, %v1139_v19 }
 0x341   : > { %8981 = vmatprep.subr.bf16.mxu0 %v10309_v50  ;;  %v1127_v50 = vld [vmem:[%s15233_s1 + $0x1d90] sm:$0xff] }
 0x342   : > { %9021 = vmatpush2.bf16.msra.mxu1 %v10444_v23  ;;  %v1003_v23 = vld [vmem:[%s15233_s1 + $0x19b0] sm:$0xff] }
 0x343   : > { %9022 = vmatprep.subr.bf16.mxu1 %v10437_v51  ;;  %v1131_v51 = vld [vmem:[%s15233_s1 + $0x1db0] sm:$0xff]  ;;  %v10525_v53 = vcombine.high %v999_v48, %v1003_v23  ;;  %v10524_v1 = vcombine.low %v999_v48, %v1003_v23 }
 0x344   : > { %8982 = vmatpush2.bf16.msra.mxu0 %v10308_v34  ;;  %v10653_v33 = vcombine.high %v1127_v50, %v1131_v51  ;;  %v991_v34 = vld [vmem:[%s15233_s1 + $0x1950] sm:$0xff]  ;;  %v10652_v3 = vcombine.low %v1127_v50, %v1131_v51 }
 0x345   : > { %8983 = vmatprep.subr.bf16.mxu0 %v10301_v61  ;;  %v1119_v27 = vld [vmem:[%s15233_s1 + $0x1d50] sm:$0xff] }
 0x346   : > { %9023 = vmatpush2.bf16.msra.mxu1 %v10436_v57  ;;  %v995_v57 = vld [vmem:[%s15233_s1 + $0x1970] sm:$0xff] }
 0x347   : > { %9024 = vmatprep.subr.bf16.mxu1 %v10429_v5  ;;  %v1123_v30 = vld [vmem:[%s15233_s1 + $0x1d70] sm:$0xff] }
 0x348   : > { %8984 = vmatpush2.bf16.msra.mxu0 %v10300_v60  ;;  %v10517_v60 = vcombine.high %v991_v34, %v995_v57  ;;  %v10645_v11 = vcombine.high %v1119_v27, %v1123_v30  ;;  %v983_v38 = vld [vmem:[%s15233_s1 + $0x1910] sm:$0xff]  ;;  %v10644_v37 = vcombine.low %v1119_v27, %v1123_v30 }
 0x349   : > { %8985 = vmatprep.subr.bf16.mxu0 %v10293_v9  ;;  %v987_v13 = vld [vmem:[%s15233_s1 + $0x1930] sm:$0xff] }
 0x34a   : > { %9025 = vmatpush2.bf16.msra.mxu1 %v10428_v6  ;;  %v1111_v56 = vld [vmem:[%s15233_s1 + $0x1d10] sm:$0xff]  ;;  %v10509_v41 = vcombine.high %v983_v38, %v987_v13  ;;  %v10508_v48 = vcombine.low %v983_v38, %v987_v13 }
 0x34b   : > { %9026 = vmatprep.subr.bf16.mxu1 %v10421_v45  ;;  %v1103_v46 = vld [vmem:[%s15233_s1 + $0x1cd0] sm:$0xff] }
 0x34c   : > { %8986 = vmatpush2.bf16.msra.mxu0 %v10292_v17  ;;  %v1115_v17 = vld [vmem:[%s15233_s1 + $0x1d30] sm:$0xff] }
 0x34d   : > { %8987 = vmatprep.subr.bf16.mxu0 %v10285_v28  ;;  %v10636_v23 = vcombine.low %v1111_v56, %v1115_v17  ;;  %v967_v39 = vld [vmem:[%s15233_s1 + $0x1890] sm:$0xff] }
 0x34e   : > { %9027 = vmatpush2.bf16.msra.mxu1 %v10420_v63  ;;  %v963_v27 = vld [vmem:[%s15233_s1 + $0x1870] sm:$0xff] }
 0x34f   : > { %9028 = vmatprep.subr.bf16.mxu1 %v10413_v31  ;;  %v10516_v31 = vcombine.low %v991_v34, %v995_v57  ;;  %v1087_v30 = vld [vmem:[%s15233_s1 + $0x1c50] sm:$0xff] }
 0x350   : > { %8988 = vmatpush2.bf16.msra.mxu0 %v10284_v43  ;;  %v10637_v43 = vcombine.high %v1111_v56, %v1115_v17  ;;  %v1075_v56 = vld [vmem:[%s15233_s1 + $0x1bf0] sm:$0xff] }
 0x351   : > { %9039 = vmatprep.subr.bf16.mxu0 %v10533_v14  ;;  %v979_v14 = vld [vmem:[%s15233_s1 + $0x18f0] sm:$0xff] }
 0x352   : > { %9029 = vmatpush2.bf16.msra.mxu1 %v10412_v44  ;;  %v975_v44 = vld [vmem:[%s15233_s1 + $0x18d0] sm:$0xff] }
 0x353   : > { %9080 = vmatprep.subr.bf16.mxu1 %v10661_v47  ;;  %v8745_v61 = vpop.f32.mrf.mxu0  ;;  %8990 = vmatmul.mubr.bf16.vlgmr.msra.gmra.mxu0 %v11731_v4  ;;  %v1107_v47 = vld [vmem:[%s15233_s1 + $0x1cf0] sm:$0xff]  ;;  %v10501_v50 = vcombine.high %v975_v44, %v979_v14 }
 0x354   : > { %v8746_v5 = vadd.f32 %v8745_v61, %v8705_v52  ;;  %9040 = vmatpush1.bf16.msra.mxu0 %v10532_v24  ;;  %9071 = vmatprep.mubr.bf16.mxu0 %v11757_v42  ;;  %v10629_v51 = vcombine.high %v1103_v46, %v1107_v47  ;;  %v971_v24 = vld [vmem:[%s15233_s1 + $0x18b0] sm:$0xff]  ;;  %v10500_v52 = vcombine.low %v975_v44, %v979_v14 }
 0x355   : > { %v8786_v7 = vpop.f32.mrf.mxu1  ;;  %9031 = vmatmul.mubr.bf16.vlgmr.msra.gmra.mxu1 %v11744_v8  ;;  %v8747_v2 = vpop.f32.mrf.mxu0  ;;  %9041 = vmatprep.subr.bf16.mxu0 %v10525_v53  ;;  %v1099_v53 = vld [vmem:[%s15233_s1 + $0x1cb0] sm:$0xff]  ;;  %v10493_v34 = vcombine.high %v967_v39, %v971_v24 }
 0x356   : > { %9081 = vmatpush1.bf16.msra.mxu1 %v10660_v26  ;;  %v8787_v6 = vadd.f32 %v8786_v7, %v8746_v5  ;;  %v8748_v9 = vadd.f32 %v8747_v2, %v8707_v0  ;;  %9112 = vmatprep.mubr.bf16.mxu1 %v11768_v18  ;;  %v1095_v26 = vld [vmem:[%s15233_s1 + $0x1c90] sm:$0xff]  ;;  %v10492_v5 = vcombine.low %v967_v39, %v971_v24 }
 0x357   : > { %v8788_v45 = vpop.f32.mrf.mxu1  ;;  %9082 = vmatprep.subr.bf16.mxu1 %v10653_v33  ;;  %v8749_v15 = vpop.f32.mrf.mxu0  ;;  %v10628_v33 = vcombine.low %v1103_v46, %v1107_v47  ;;  %v10621_v57 = vcombine.high %v1095_v26, %v1099_v53  ;;  %v959_v61 = vld [vmem:[%s15233_s1 + $0x1850] sm:$0xff]  ;;  %v10620_v7 = vcombine.low %v1095_v26, %v1099_v53 }
 0x358   : > { %9615 = vst [vmem:[%s12822_s14 + $0x10] sm:$0xff] %v8787_v6  ;;  %v8789_v63 = vadd.f32 %v8788_v45, %v8748_v9  ;;  %9042 = vmatpush1.bf16.msra.mxu0 %v10524_v1  ;;  %v1091_v0 = vld [vmem:[%s15233_s1 + $0x1c70] sm:$0xff]  ;;  %v10485_v1 = vcombine.high %v959_v61, %v963_v27  ;;  %v10484_v45 = vcombine.low %v959_v61, %v963_v27 }
 0x359   : > { %v8790_v28 = vpop.f32.mrf.mxu1  ;;  %v8750_v35 = vpop.f32.mrf.mxu0  ;;  %9043 = vmatprep.subr.bf16.mxu0 %v10517_v60  ;;  %v10613_v2 = vcombine.high %v1087_v30, %v1091_v0  ;;  %v955_v60 = vld [vmem:[%s15233_s1 + $0x1830] sm:$0xff] }
 0x35a   : > { %9083 = vmatpush1.bf16.msra.mxu1 %v10652_v3  ;;  %9616 = vst [vmem:[%s12822_s14 + $0x18] sm:$0xff] %v8789_v63  ;;  %v951_v3 = vld [vmem:[%s15233_s1 + $0x1810] sm:$0xff] }
 0x35b   : > { %v8791_v19 = vpop.f32.mrf.mxu1  ;;  %9084 = vmatprep.subr.bf16.mxu1 %v10645_v11  ;;  %v1079_v6 = vld [vmem:[%s15233_s1 + $0x1c10] sm:$0xff]  ;;  %v10612_v11 = vcombine.low %v1087_v30, %v1091_v0  ;;  %v10477_v38 = vcombine.high %v951_v3, %v955_v60  ;;  %v10476_v28 = vcombine.low %v951_v3, %v955_v60 }
 0x35c   : > { %9044 = vmatpush1.bf16.msra.mxu0 %v10516_v31  ;;  %v1083_v9 = vld [vmem:[%s15233_s1 + $0x1c30] sm:$0xff] }
 0x35d   : > { %9045 = vmatprep.subr.bf16.mxu0 %v10509_v41  ;;  %v10605_v13 = vcombine.high %v1079_v6, %v1083_v9  ;;  %v1071_v15 = vld [vmem:[%s15233_s1 + $0x1bd0] sm:$0xff]  ;;  %v10604_v31 = vcombine.low %v1079_v6, %v1083_v9 }
 0x35e   : > { %9085 = vmatpush1.bf16.msra.mxu1 %v10644_v37  ;;  %v1199_v17 = vld [vmem:[%s15233_s1 + $0x1fd0] sm:$0xff]  ;;  %v10597_v35 = vcombine.high %v1071_v15, %v1075_v56  ;;  %v10596_v14 = vcombine.low %v1071_v15, %v1075_v56 }
 0x35f   : > { %9086 = vmatprep.subr.bf16.mxu1 %v10637_v43  ;;  %v1203_v63 = vld [vmem:[%s15233_s1 + $0x1ff0] sm:$0xff] }
 0x360   : > { %9046 = vmatpush1.bf16.msra.mxu0 %v10508_v48  ;;  %v10725_v37 = vcombine.high %v1199_v17, %v1203_v63  ;;  %v1063_v41 = vld [vmem:[%s15233_s1 + $0x1b90] sm:$0xff]  ;;  %v10724_v46 = vcombine.low %v1199_v17, %v1203_v63 }
 0x361   : > { %9047 = vmatprep.subr.bf16.mxu0 %v10501_v50  ;;  %v1067_v19 = vld [vmem:[%s15233_s1 + $0x1bb0] sm:$0xff] }
 0x362   : > { %9087 = vmatpush1.bf16.msra.mxu1 %v10636_v23  ;;  %v1191_v43 = vld [vmem:[%s15233_s1 + $0x1f90] sm:$0xff]  ;;  %v10589_v47 = vcombine.high %v1063_v41, %v1067_v19  ;;  %v10588_v24 = vcombine.low %v1063_v41, %v1067_v19 }
 0x363   : > { %9088 = vmatprep.subr.bf16.mxu1 %v10629_v51  ;;  %v1195_v44 = vld [vmem:[%s15233_s1 + $0x1fb0] sm:$0xff] }
 0x364   : > { %9048 = vmatpush1.bf16.msra.mxu0 %v10500_v52  ;;  %v10717_v48 = vcombine.high %v1191_v43, %v1195_v44  ;;  %v1055_v23 = vld [vmem:[%s15233_s1 + $0x1b50] sm:$0xff]  ;;  %v10716_v26 = vcombine.low %v1191_v43, %v1195_v44 }
 0x365   : > { %9049 = vmatprep.subr.bf16.mxu0 %v10493_v34  ;;  %v1059_v50 = vld [vmem:[%s15233_s1 + $0x1b70] sm:$0xff] }
 0x366   : > { %9089 = vmatpush1.bf16.msra.mxu1 %v10628_v33  ;;  %v1183_v51 = vld [vmem:[%s15233_s1 + $0x1f50] sm:$0xff]  ;;  %v10581_v53 = vcombine.high %v1055_v23, %v1059_v50  ;;  %v10580_v27 = vcombine.low %v1055_v23, %v1059_v50 }
 0x367   : > { %9090 = vmatprep.subr.bf16.mxu1 %v10621_v57  ;;  %v1187_v39 = vld [vmem:[%s15233_s1 + $0x1f70] sm:$0xff] }
 0x368   : > { %9050 = vmatpush1.bf16.msra.mxu0 %v10492_v5  ;;  %v10709_v52 = vcombine.high %v1183_v51, %v1187_v39  ;;  %v1047_v33 = vld [vmem:[%s15233_s1 + $0x1b10] sm:$0xff]  ;;  %v10708_v30 = vcombine.low %v1183_v51, %v1187_v39 }
 0x369   : > { %9051 = vmatprep.subr.bf16.mxu0 %v10485_v1  ;;  %v1051_v34 = vld [vmem:[%s15233_s1 + $0x1b30] sm:$0xff] }
 0x36a   : > { %9091 = vmatpush1.bf16.msra.mxu1 %v10620_v7  ;;  %v1175_v57 = vld [vmem:[%s15233_s1 + $0x1f10] sm:$0xff]  ;;  %v10573_v0 = vcombine.high %v1047_v33, %v1051_v34  ;;  %v10572_v60 = vcombine.low %v1047_v33, %v1051_v34 }
 0x36b   : > { %9092 = vmatprep.subr.bf16.mxu1 %v10613_v2  ;;  %v1179_v61 = vld [vmem:[%s15233_s1 + $0x1f30] sm:$0xff] }
 0x36c   : > { %9052 = vmatpush1.bf16.msra.mxu0 %v10484_v45  ;;  %v10701_v5 = vcombine.high %v1175_v57, %v1179_v61  ;;  %v1039_v7 = vld [vmem:[%s15233_s1 + $0x1ad0] sm:$0xff]  ;;  %v10700_v6 = vcombine.low %v1175_v57, %v1179_v61  ;;  %v1481_v57 = vsub.s32 4, %v11929_v32 }
 0x36d   : > { %9053 = vmatprep.subr.bf16.mxu0 %v10477_v38  ;;  %v1043_v1 = vld [vmem:[%s15233_s1 + $0x1af0] sm:$0xff] }
 0x36e   : > { %9093 = vmatpush1.bf16.msra.mxu1 %v10612_v11  ;;  %v1167_v2 = vld [vmem:[%s15233_s1 + $0x1ed0] sm:$0xff]  ;;  %v10565_v9 = vcombine.high %v1039_v7, %v1043_v1  ;;  %v10564_v56 = vcombine.low %v1039_v7, %v1043_v1 }
 0x36f   : > { %9094 = vmatprep.subr.bf16.mxu1 %v10605_v13  ;;  %v1171_v3 = vld [vmem:[%s15233_s1 + $0x1ef0] sm:$0xff] }
 0x370   : > { %9054 = vmatpush1.bf16.msra.mxu0 %v10476_v28  ;;  %v10693_v45 = vcombine.high %v1167_v2, %v1171_v3  ;;  %v1031_v11 = vld [vmem:[%s15233_s1 + $0x1a90] sm:$0xff]  ;;  %v10692_v17 = vcombine.low %v1167_v2, %v1171_v3  ;;  %v11017_v3 = vld [vmem:[%s15234_s2] sm:$0xff] }
 0x371   : > { %9055 = vmatprep.subr.bf16.mxu0 %v10597_v35  ;;  %v1035_v38 = vld [vmem:[%s15233_s1 + $0x1ab0] sm:$0xff] }
 0x372   : > { %9095 = vmatpush1.bf16.msra.mxu1 %v10604_v31  ;;  %v1159_v13 = vld [vmem:[%s15233_s1 + $0x1e90] sm:$0xff]  ;;  %v10557_v63 = vcombine.high %v1031_v11, %v1035_v38  ;;  %v10556_v19 = vcombine.low %v1031_v11, %v1035_v38 }
 0x373   : > { %9096 = vmatprep.subr.bf16.mxu1 %v10725_v37  ;;  %v1163_v15 = vld [vmem:[%s15233_s1 + $0x1eb0] sm:$0xff] }
 0x374   : > { %9056 = vmatpush2.bf16.msra.mxu0 %v10596_v14  ;;  %v10685_v28 = vcombine.high %v1159_v13, %v1163_v15  ;;  %v1023_v31 = vld [vmem:[%s15233_s1 + $0x1a50] sm:$0xff]  ;;  %v10684_v43 = vcombine.low %v1159_v13, %v1163_v15 }
 0x375   : > { %9057 = vmatprep.subr.bf16.mxu0 %v10589_v47  ;;  %v1027_v35 = vld [vmem:[%s15233_s1 + $0x1a70] sm:$0xff] }
 0x376   : > { %9097 = vmatpush2.bf16.msra.mxu1 %v10724_v46  ;;  %v1151_v37 = vld [vmem:[%s15233_s1 + $0x1e50] sm:$0xff]  ;;  %v10549_v44 = vcombine.high %v1023_v31, %v1027_v35  ;;  %v10548_v50 = vcombine.low %v1023_v31, %v1027_v35 }
 0x377   : > { %9098 = vmatprep.subr.bf16.mxu1 %v10717_v48  ;;  %v1155_v41 = vld [vmem:[%s15233_s1 + $0x1e70] sm:$0xff] }
 0x378   : > { %9058 = vmatpush2.bf16.msra.mxu0 %v10588_v24  ;;  %v10677_v14 = vcombine.high %v1151_v37, %v1155_v41  ;;  %v1015_v46 = vld [vmem:[%s15233_s1 + $0x1a10] sm:$0xff]  ;;  %v10676_v51 = vcombine.low %v1151_v37, %v1155_v41 }
 0x379   : > { %9059 = vmatprep.subr.bf16.mxu0 %v10581_v53  ;;  %v1019_v47 = vld [vmem:[%s15233_s1 + $0x1a30] sm:$0xff] }
 0x37a   : > { %9099 = vmatpush2.bf16.msra.mxu1 %v10716_v26  ;;  %v1143_v48 = vld [vmem:[%s15233_s1 + $0x1e10] sm:$0xff]  ;;  %v10541_v39 = vcombine.high %v1015_v46, %v1019_v47  ;;  %v10540_v34 = vcombine.low %v1015_v46, %v1019_v47 }
 0x37b   : > { %9100 = vmatprep.subr.bf16.mxu1 %v10709_v52  ;;  %v1147_v23 = vld [vmem:[%s15233_s1 + $0x1e30] sm:$0xff] }
 0x37c   : > { %9060 = vmatpush2.bf16.msra.mxu0 %v10580_v27  ;;  %v10669_v24 = vcombine.high %v1143_v48, %v1147_v23  ;;  %v1263_v26 = vld [vmem:[%s15233_s1 + $0x21d0] sm:$0xff]  ;;  %v10668_v61 = vcombine.low %v1143_v48, %v1147_v23 }
 0x37d   : > { %9061 = vmatprep.subr.bf16.mxu0 %v10573_v0  ;;  %v1267_v53 = vld [vmem:[%s15233_s1 + $0x21f0] sm:$0xff]  ;;  %v1485_v0 = vsub.s32 5, %v11929_v32 }
 0x37e   : > { %9101 = vmatpush2.bf16.msra.mxu1 %v10708_v30  ;;  %v1391_v52 = vld [vmem:[%s15233_s1 + $0x25d0] sm:$0xff]  ;;  %v10789_v27 = vcombine.high %v1263_v26, %v1267_v53 }
 0x37f   : > { %9102 = vmatprep.subr.bf16.mxu1 %v10701_v5  ;;  %v1395_v33 = vld [vmem:[%s15233_s1 + $0x25f0] sm:$0xff]  ;;  %v1486_v11 = vrot.slane %v11017_v3, %v1485_v0 }
 0x380   : > { %9062 = vmatpush2.bf16.msra.mxu0 %v10572_v60  ;;  %v10917_v30 = vcombine.high %v1391_v52, %v1395_v33  ;;  %v1255_v5 = vld [vmem:[%s15233_s1 + $0x2190] sm:$0xff]  ;;  %v1482_v60 = vrot.slane %v11017_v3, %v1481_v57 }
 0x381   : > { %9063 = vmatprep.subr.bf16.mxu0 %v10565_v9  ;;  %v1259_v7 = vld [vmem:[%s15233_s1 + $0x21b0] sm:$0xff]  ;;  %v10916_v9 = vcombine.low %v1391_v52, %v1395_v33 }
 0x382   : > { %9103 = vmatpush2.bf16.msra.mxu1 %v10700_v6  ;;  %v1383_v1 = vld [vmem:[%s15233_s1 + $0x2590] sm:$0xff]  ;;  %v10788_v6 = vcombine.low %v1263_v26, %v1267_v53  ;;  %v10780_v35 = vcombine.low %v1255_v5, %v1259_v7 }
 0x383   : > { %9104 = vmatprep.subr.bf16.mxu1 %v10693_v45  ;;  %v1387_v2 = vld [vmem:[%s15233_s1 + $0x25b0] sm:$0xff]  ;;  %v10781_v45 = vcombine.high %v1255_v5, %v1259_v7 }
 0x384   : > { %9064 = vmatpush2.bf16.msra.mxu0 %v10564_v56  ;;  %v10909_v38 = vcombine.high %v1383_v1, %v1387_v2  ;;  %v1247_v13 = vld [vmem:[%s15233_s1 + $0x2150] sm:$0xff]  ;;  %v10908_v41 = vcombine.low %v1383_v1, %v1387_v2 }
 0x385   : > { %9065 = vmatprep.subr.bf16.mxu0 %v10557_v63  ;;  %v1251_v15 = vld [vmem:[%s15233_s1 + $0x2170] sm:$0xff] }
 0x386   : > { %9105 = vmatpush2.bf16.msra.mxu1 %v10692_v17  ;;  %v1375_v17 = vld [vmem:[%s15233_s1 + $0x2550] sm:$0xff]  ;;  %v10772_v26 = vcombine.low %v1247_v13, %v1251_v15 }
 0x387   : > { %9106 = vmatprep.subr.bf16.mxu1 %v10685_v28  ;;  %v1379_v63 = vld [vmem:[%s15233_s1 + $0x2570] sm:$0xff] }
 0x388   : > { %9066 = vmatpush2.bf16.msra.mxu0 %v10556_v19  ;;  %v10773_v19 = vcombine.high %v1247_v13, %v1251_v15  ;;  %v10901_v46 = vcombine.high %v1375_v17, %v1379_v63  ;;  %v1239_v47 = vld [vmem:[%s15233_s1 + $0x2110] sm:$0xff]  ;;  %v10900_v52 = vcombine.low %v1375_v17, %v1379_v63 }
 0x389   : > { %9067 = vmatprep.subr.bf16.mxu0 %v10549_v44  ;;  %v1243_v48 = vld [vmem:[%s15233_s1 + $0x2130] sm:$0xff] }
 0x38a   : > { %9107 = vmatpush2.bf16.msra.mxu1 %v10684_v43  ;;  %v10765_v33 = vcombine.high %v1239_v47, %v1243_v48  ;;  %v1363_v0 = vld [vmem:[%s15233_s1 + $0x24f0] sm:$0xff]  ;;  %v10764_v5 = vcombine.low %v1239_v47, %v1243_v48 }
 0x38b   : > { %9108 = vmatprep.subr.bf16.mxu1 %v10677_v14  ;;  %v1223_v3 = vld [vmem:[%s15233_s1 + $0x2090] sm:$0xff] }
 0x38c   : > { %9068 = vmatpush2.bf16.msra.mxu0 %v10548_v50  ;;  %v1367_v50 = vld [vmem:[%s15233_s1 + $0x2510] sm:$0xff] }
 0x38d   : > { %9069 = vmatprep.subr.bf16.mxu0 %v10541_v39  ;;  %v1215_v15 = vld [vmem:[%s15233_s1 + $0x2050] sm:$0xff] }
 0x38e   : > { %9109 = vmatpush2.bf16.msra.mxu1 %v10676_v51  ;;  %v1371_v51 = vld [vmem:[%s15233_s1 + $0x2530] sm:$0xff] }
 0x38f   : > { %9110 = vmatprep.subr.bf16.mxu1 %v10669_v24  ;;  %v10893_v57 = vcombine.high %v1367_v50, %v1371_v51  ;;  %v10892_v7 = vcombine.low %v1367_v50, %v1371_v51  ;;  %v1343_v17 = vld [vmem:[%s15233_s1 + $0x2450] sm:$0xff] }
 0x390   : > { %9070 = vmatpush2.bf16.msra.mxu0 %v10540_v34  ;;  %v1347_v63 = vld [vmem:[%s15233_s1 + $0x2470] sm:$0xff] }
 0x391   : > { %9121 = vmatprep.subr.bf16.mxu0 %v10789_v27  ;;  %v1235_v27 = vld [vmem:[%s15233_s1 + $0x20f0] sm:$0xff]  ;;  %v10868_v47 = vcombine.low %v1343_v17, %v1347_v63 }
 0x392   : > { %9111 = vmatpush2.bf16.msra.mxu1 %v10668_v61  ;;  %v1231_v61 = vld [vmem:[%s15233_s1 + $0x20d0] sm:$0xff] }
 0x393   : > { %9162 = vmatprep.subr.bf16.mxu1 %v10917_v30  ;;  %v8827_v56 = vpop.f32.mrf.mxu0  ;;  %9072 = vmatmul.mubr.bf16.vlgmr.msra.gmra.mxu0 %v11956_v55  ;;  %v1359_v30 = vld [vmem:[%s15233_s1 + $0x24d0] sm:$0xff]  ;;  %v10757_v1 = vcombine.high %v1231_v61, %v1235_v27 }
 0x394   : > { %v8828_v28 = vadd.f32 %v8827_v56, %v1482_v60  ;;  %9122 = vmatpush1.bf16.msra.mxu0 %v10788_v6  ;;  %9153 = vmatprep.mubr.bf16.mxu0 %v11982_v10  ;;  %v10885_v2 = vcombine.high %v1359_v30, %v1363_v0  ;;  %v1227_v60 = vld [vmem:[%s15233_s1 + $0x20b0] sm:$0xff] }
 0x395   : > { %v8868_v31 = vpop.f32.mrf.mxu1  ;;  %9113 = vmatmul.mubr.bf16.vlgmr.msra.gmra.mxu1 %v11969_v62  ;;  %v8829_v37 = vpop.f32.mrf.mxu0  ;;  %9123 = vmatprep.subr.bf16.mxu0 %v10781_v45  ;;  %v1351_v6 = vld [vmem:[%s15233_s1 + $0x2490] sm:$0xff]  ;;  %v10756_v45 = vcombine.low %v1231_v61, %v1235_v27 }
 0x396   : > { %9163 = vmatpush1.bf16.msra.mxu1 %v10916_v9  ;;  %v14044_v43 = vadd.f32 %v8868_v31, %v8828_v28  ;;  %v8830_v44 = vadd.f32 %v8829_v37, %v1486_v11  ;;  %9194 = vmatprep.mubr.bf16.mxu1 %v11993_v12  ;;  %v1355_v9 = vld [vmem:[%s15233_s1 + $0x24b0] sm:$0xff]  ;;  %v10884_v11 = vcombine.low %v1359_v30, %v1363_v0 }
 0x397   : > { %v8870_v14 = vpop.f32.mrf.mxu1  ;;  %9164 = vmatprep.subr.bf16.mxu1 %v10909_v38  ;;  %v8831_v23 = vpop.f32.mrf.mxu0  ;;  %v10749_v38 = vcombine.high %v1223_v3, %v1227_v60  ;;  %v10877_v13 = vcombine.high %v1351_v6, %v1355_v9  ;;  %v1219_v56 = vld [vmem:[%s15233_s1 + $0x2070] sm:$0xff]  ;;  %v10748_v28 = vcombine.low %v1223_v3, %v1227_v60  ;;  %v10876_v31 = vcombine.low %v1351_v6, %v1355_v9 }
 0x398   : > { %v14060_v39 = vadd.f32 %v8870_v14, %v8830_v44  ;;  %9124 = vmatpush1.bf16.msra.mxu0 %v10780_v35  ;;  %v10741_v35 = vcombine.high %v1215_v15, %v1219_v56  ;;  %v10869_v37 = vcombine.high %v1343_v17, %v1347_v63  ;;  %v1335_v44 = vld [vmem:[%s15233_s1 + $0x2410] sm:$0xff] }
 0x399   : > { %v8872_v24 = vpop.f32.mrf.mxu1  ;;  %v8832_v53 = vpop.f32.mrf.mxu0  ;;  %9125 = vmatprep.subr.bf16.mxu0 %v10773_v19  ;;  %v1211_v19 = vld [vmem:[%s15233_s1 + $0x2030] sm:$0xff] }
 0x39a   : > { %9165 = vmatpush1.bf16.msra.mxu1 %v10908_v41  ;;  %v1207_v41 = vld [vmem:[%s15233_s1 + $0x2010] sm:$0xff] }
 0x39b   : > { %v8873_v34 = vpop.f32.mrf.mxu1  ;;  %9166 = vmatprep.subr.bf16.mxu1 %v10901_v46  ;;  %v1339_v14 = vld [vmem:[%s15233_s1 + $0x2430] sm:$0xff]  ;;  %v10740_v46 = vcombine.low %v1215_v15, %v1219_v56  ;;  %v10733_v48 = vcombine.high %v1207_v41, %v1211_v19  ;;  %v10732_v53 = vcombine.low %v1207_v41, %v1211_v19 }
 0x39c   : > { %9126 = vmatpush1.bf16.msra.mxu0 %v10772_v26  ;;  %v10861_v23 = vcombine.high %v1335_v44, %v1339_v14  ;;  %v1327_v50 = vld [vmem:[%s15233_s1 + $0x23d0] sm:$0xff] }
 0x39d   : > { %9127 = vmatprep.subr.bf16.mxu0 %v10765_v33  ;;  %v1331_v51 = vld [vmem:[%s15233_s1 + $0x23f0] sm:$0xff] }
 0x39e   : > { %9167 = vmatpush1.bf16.msra.mxu1 %v10900_v52  ;;  %v1455_v24 = vld [vmem:[%s15233_s1 + $0x27d0] sm:$0xff]  ;;  %v10860_v52 = vcombine.low %v1335_v44, %v1339_v14  ;;  %v10853_v33 = vcombine.high %v1327_v50, %v1331_v51  ;;  %v10852_v0 = vcombine.low %v1327_v50, %v1331_v51 }
 0x39f   : > { %9168 = vmatprep.subr.bf16.mxu1 %v10893_v57  ;;  %v1459_v26 = vld [vmem:[%s15233_s1 + $0x27f0] sm:$0xff] }
 0x3a0   : > { %9128 = vmatpush1.bf16.msra.mxu0 %v10764_v5  ;;  %v10981_v34 = vcombine.high %v1455_v24, %v1459_v26  ;;  %v1319_v57 = vld [vmem:[%s15233_s1 + $0x2390] sm:$0xff]  ;;  %v10980_v5 = vcombine.low %v1455_v24, %v1459_v26 }
 0x3a1   : > { %9129 = vmatprep.subr.bf16.mxu0 %v10757_v1  ;;  %v1323_v61 = vld [vmem:[%s15233_s1 + $0x23b0] sm:$0xff] }
 0x3a2   : > { %9169 = vmatpush1.bf16.msra.mxu1 %v10892_v7  ;;  %v1447_v27 = vld [vmem:[%s15233_s1 + $0x2790] sm:$0xff]  ;;  %v10845_v7 = vcombine.high %v1319_v57, %v1323_v61  ;;  %v10844_v9 = vcombine.low %v1319_v57, %v1323_v61 }
 0x3a3   : > { %9170 = vmatprep.subr.bf16.mxu1 %v10885_v2  ;;  %v1451_v30 = vld [vmem:[%s15233_s1 + $0x27b0] sm:$0xff] }
 0x3a4   : > { %9130 = vmatpush1.bf16.msra.mxu0 %v10756_v45  ;;  %v10973_v1 = vcombine.high %v1447_v27, %v1451_v30  ;;  %v1311_v2 = vld [vmem:[%s15233_s1 + $0x2350] sm:$0xff]  ;;  %v10972_v45 = vcombine.low %v1447_v27, %v1451_v30 }
 0x3a5   : > { %9131 = vmatprep.subr.bf16.mxu0 %v10749_v38  ;;  %v1315_v3 = vld [vmem:[%s15233_s1 + $0x2370] sm:$0xff] }
 0x3a6   : > { %9171 = vmatpush1.bf16.msra.mxu1 %v10884_v11  ;;  %v1439_v60 = vld [vmem:[%s15233_s1 + $0x2750] sm:$0xff]  ;;  %v10837_v11 = vcombine.high %v1311_v2, %v1315_v3  ;;  %v10836_v63 = vcombine.low %v1311_v2, %v1315_v3 }
 0x3a7   : > { %9172 = vmatprep.subr.bf16.mxu1 %v10877_v13  ;;  %v1443_v6 = vld [vmem:[%s15233_s1 + $0x2770] sm:$0xff] }
 0x3a8   : > { %9132 = vmatpush1.bf16.msra.mxu0 %v10748_v28  ;;  %v10965_v38 = vcombine.high %v1439_v60, %v1443_v6  ;;  %v1303_v13 = vld [vmem:[%s15233_s1 + $0x2310] sm:$0xff]  ;;  %v10964_v28 = vcombine.low %v1439_v60, %v1443_v6 }
 0x3a9   : > { %9133 = vmatprep.subr.bf16.mxu0 %v10741_v35  ;;  %v1307_v15 = vld [vmem:[%s15233_s1 + $0x2330] sm:$0xff] }
 0x3aa   : > { %9173 = vmatpush1.bf16.msra.mxu1 %v10876_v31  ;;  %v1431_v56 = vld [vmem:[%s15233_s1 + $0x2710] sm:$0xff]  ;;  %v10829_v31 = vcombine.high %v1303_v13, %v1307_v15  ;;  %v10828_v14 = vcombine.low %v1303_v13, %v1307_v15  ;;  %v244_v13 = vld [vmem:[%s15233_s1 + $0x1f8] sm:$0xff] }
 0x3ab   : > { %9174 = vmatprep.subr.bf16.mxu1 %v10869_v37  ;;  %v1435_v17 = vld [vmem:[%s15233_s1 + $0x2730] sm:$0xff]  ;;  %v368_v15 = vld [vmem:[%s15233_s1 + $0x5d8] sm:$0xff] }
 0x3ac   : > { %9134 = vmatpush1.bf16.msra.mxu0 %v10740_v46  ;;  %v10957_v35 = vcombine.high %v1431_v56, %v1435_v17  ;;  %v1295_v37 = vld [vmem:[%s15233_s1 + $0x22d0] sm:$0xff]  ;;  %v10956_v46 = vcombine.low %v1431_v56, %v1435_v17  ;;  %v372_v56 = vld [vmem:[%s15233_s1 + $0x5f8] sm:$0xff] }
 0x3ad   : > { %9135 = vmatprep.subr.bf16.mxu0 %v10733_v48  ;;  %v1299_v41 = vld [vmem:[%s15233_s1 + $0x22f0] sm:$0xff] }
 0x3ae   : > { %9175 = vmatpush1.bf16.msra.mxu1 %v10868_v47  ;;  %v1423_v19 = vld [vmem:[%s15233_s1 + $0x26d0] sm:$0xff]  ;;  %v10821_v47 = vcombine.high %v1295_v37, %v1299_v41  ;;  %v10820_v26 = vcombine.low %v1295_v37, %v1299_v41  ;;  %v236_v37 = vld [vmem:[%s15233_s1 + $0x1b8] sm:$0xff] }
 0x3af   : > { %9176 = vmatprep.subr.bf16.mxu1 %v10861_v23  ;;  %v1427_v44 = vld [vmem:[%s15233_s1 + $0x26f0] sm:$0xff]  ;;  %v360_v41 = vld [vmem:[%s15233_s1 + $0x598] sm:$0xff] }
 0x3b0   : > { %9136 = vmatpush1.bf16.msra.mxu0 %v10732_v53  ;;  %v10949_v48 = vcombine.high %v1423_v19, %v1427_v44  ;;  %v1287_v23 = vld [vmem:[%s15233_s1 + $0x2290] sm:$0xff]  ;;  %v10948_v53 = vcombine.low %v1423_v19, %v1427_v44  ;;  %v364_v19 = vld [vmem:[%s15233_s1 + $0x5b8] sm:$0xff] }
 0x3b1   : > { %9137 = vmatprep.subr.bf16.mxu0 %v10853_v33  ;;  %v1291_v50 = vld [vmem:[%s15233_s1 + $0x22b0] sm:$0xff] }
 0x3b2   : > { %9177 = vmatpush1.bf16.msra.mxu1 %v10860_v52  ;;  %v1415_v51 = vld [vmem:[%s15233_s1 + $0x2690] sm:$0xff]  ;;  %v10813_v52 = vcombine.high %v1287_v23, %v1291_v50  ;;  %v10812_v30 = vcombine.low %v1287_v23, %v1291_v50  ;;  %v228_v23 = vld [vmem:[%s15233_s1 + $0x178] sm:$0xff] }
 0x3b3   : > { %9178 = vmatprep.subr.bf16.mxu1 %v10981_v34  ;;  %v1419_v24 = vld [vmem:[%s15233_s1 + $0x26b0] sm:$0xff] }
 0x3b4   : > { %9138 = vmatpush2.bf16.msra.mxu0 %v10852_v0  ;;  %v10941_v33 = vcombine.high %v1415_v51, %v1419_v24  ;;  %v1279_v34 = vld [vmem:[%s15233_s1 + $0x2250] sm:$0xff]  ;;  %v10940_v0 = vcombine.low %v1415_v51, %v1419_v24  ;;  %v352_v51 = vld [vmem:[%s15233_s1 + $0x558] sm:$0xff] }
 0x3b5   : > { %9139 = vmatprep.subr.bf16.mxu0 %v10845_v7  ;;  %v1283_v57 = vld [vmem:[%s15233_s1 + $0x2270] sm:$0xff]  ;;  %v356_v24 = vld [vmem:[%s15233_s1 + $0x578] sm:$0xff] }
 0x3b6   : > { %9179 = vmatpush2.bf16.msra.mxu1 %v10980_v5  ;;  %v1407_v61 = vld [vmem:[%s15233_s1 + $0x2650] sm:$0xff]  ;;  %v10805_v5 = vcombine.high %v1279_v34, %v1283_v57  ;;  %v10804_v6 = vcombine.low %v1279_v34, %v1283_v57  ;;  %v9886_v34 = vcombine.low %v360_v41, %v364_v19 }
 0x3b7   : > { %9180 = vmatprep.subr.bf16.mxu1 %v10973_v1  ;;  %v1411_v27 = vld [vmem:[%s15233_s1 + $0x2670] sm:$0xff] }
 0x3b8   : > { %9140 = vmatpush2.bf16.msra.mxu0 %v10844_v9  ;;  %v10933_v7 = vcombine.high %v1407_v61, %v1411_v27  ;;  %v1271_v1 = vld [vmem:[%s15233_s1 + $0x2210] sm:$0xff]  ;;  %v10932_v9 = vcombine.low %v1407_v61, %v1411_v27 }
 0x3b9   : > { %9141 = vmatprep.subr.bf16.mxu0 %v10837_v11  ;;  %v1275_v2 = vld [vmem:[%s15233_s1 + $0x2230] sm:$0xff] }
 0x3ba   : > { %9181 = vmatpush2.bf16.msra.mxu1 %v10972_v45  ;;  %v1399_v3 = vld [vmem:[%s15233_s1 + $0x2610] sm:$0xff]  ;;  %v10797_v45 = vcombine.high %v1271_v1, %v1275_v2  ;;  %v10796_v17 = vcombine.low %v1271_v1, %v1275_v2  ;;  %v344_v1 = vld [vmem:[%s15233_s1 + $0x518] sm:$0xff] }
 0x3bb   : > { %9182 = vmatprep.subr.bf16.mxu1 %v10965_v38  ;;  %v1403_v60 = vld [vmem:[%s15233_s1 + $0x2630] sm:$0xff]  ;;  %v240_v38 = vld [vmem:[%s15233_s1 + $0x1d8] sm:$0xff] }
 0x3bc   : > { %9142 = vmatpush2.bf16.msra.mxu0 %v10836_v63  ;;  %v10925_v11 = vcombine.high %v1399_v3, %v1403_v60  ;;  %v10924_v63 = vcombine.low %v1399_v3, %v1403_v60  ;;  %v9766_v44 = vcombine.low %v240_v38, %v244_v13 }
 0x3bd   : > { %9143 = vmatprep.subr.bf16.mxu0 %v10829_v31  ;;  %v9895_v31 = vcombine.high %v368_v15, %v372_v56 }
 0x3be   : > { %9183 = vmatpush2.bf16.msra.mxu1 %v10964_v28  ;;  %v9767_v28 = vcombine.high %v240_v38, %v244_v13  ;;  %v208_v38 = vld [vmem:[%s15233_s1 + $0xd8] sm:$0xff] }
 0x3bf   : > { %9184 = vmatprep.subr.bf16.mxu1 %v10957_v35  ;;  %v232_v35 = vld [vmem:[%s15233_s1 + $0x198] sm:$0xff] }
 0x3c0   : > { %9144 = vmatpush2.bf16.msra.mxu0 %v10828_v14  ;;  %v9894_v14 = vcombine.low %v368_v15, %v372_v56  ;;  %v336_v13 = vld [vmem:[%s15233_s1 + $0x4d8] sm:$0xff] }
 0x3c1   : > { %9145 = vmatprep.subr.bf16.mxu0 %v10821_v47  ;;  %v9887_v47 = vcombine.high %v360_v41, %v364_v19  ;;  %v340_v15 = vld [vmem:[%s15233_s1 + $0x4f8] sm:$0xff] }
 0x3c2   : > { %9185 = vmatpush2.bf16.msra.mxu1 %v10956_v46  ;;  %v9759_v46 = vcombine.high %v232_v35, %v236_v37  ;;  %v332_v41 = vld [vmem:[%s15233_s1 + $0x4b8] sm:$0xff] }
 0x3c3   : > { %9186 = vmatprep.subr.bf16.mxu1 %v10949_v48  ;;  %v224_v48 = vld [vmem:[%s15233_s1 + $0x158] sm:$0xff] }
 0x3c4   : > { %9146 = vmatpush2.bf16.msra.mxu0 %v10820_v26  ;;  %v9751_v57 = vcombine.high %v224_v48, %v228_v23  ;;  %v9750_v60 = vcombine.low %v224_v48, %v228_v23  ;;  %v196_v48 = vld [vmem:[%s15233_s1 + $0x78] sm:$0xff] }
 0x3c5   : > { %9147 = vmatprep.subr.bf16.mxu0 %v10813_v52  ;;  %v9758_v52 = vcombine.low %v232_v35, %v236_v37  ;;  %v204_v35 = vld [vmem:[%s15233_s1 + $0xb8] sm:$0xff] }
 0x3c6   : > { %9187 = vmatpush2.bf16.msra.mxu1 %v10948_v53  ;;  %v328_v37 = vld [vmem:[%s15233_s1 + $0x498] sm:$0xff] }
 0x3c7   : > { %9188 = vmatprep.subr.bf16.mxu1 %v10941_v33  ;;  %v320_v23 = vld [vmem:[%s15233_s1 + $0x458] sm:$0xff] }
 0x3c8   : > { %9148 = vmatpush2.bf16.msra.mxu0 %v10812_v30 }
 0x3c9   : > { %9149 = vmatprep.subr.bf16.mxu0 %v10805_v5  ;;  %v220_v5 = vld [vmem:[%s15233_s1 + $0x138] sm:$0xff] }
 0x3ca   : > { %9189 = vmatpush2.bf16.msra.mxu1 %v10940_v0  ;;  %v9879_v0 = vcombine.high %v352_v51, %v356_v24 }
 0x3cb   : > { %9190 = vmatprep.subr.bf16.mxu1 %v10933_v7 }
 0x3cc   : > { %9150 = vmatpush2.bf16.msra.mxu0 %v10804_v6 }
 0x3cd   : > { %9151 = vmatprep.subr.bf16.mxu0 %v10797_v45 }
 0x3ce   : > { %9191 = vmatpush2.bf16.msra.mxu1 %v10932_v9 }
 0x3cf   : > { %9192 = vmatprep.subr.bf16.mxu1 %v10925_v11 }
 0x3d0   : > { %9152 = vmatpush2.bf16.msra.mxu0 %v10796_v17 }
 0x3d1   : > { %9203 = vmatprep.subr.bf16.mxu0 %v9767_v28  ;;  %v9863_v28 = vcombine.high %v336_v13, %v340_v15 }
 0x3d2   : > { %9193 = vmatpush2.bf16.msra.mxu1 %v10924_v63 }
 0x3d3   : > { %9244 = vmatprep.subr.bf16.mxu1 %v9895_v31  ;;  %v8909_v50 = vpop.f32.mrf.mxu0  ;;  %9154 = vmatmul.mubr.bf16.vlgmr.msra.gmra.mxu0 %v12178_v21  ;;  %v200_v31 = vld [vmem:[%s15233_s1 + $0x98] sm:$0xff] }
 0x3d4   : > { %v8910_v26 = vadd.f32 %v8909_v50, %v14044_v43  ;;  %9204 = vmatpush1.bf16.msra.mxu0 %v9766_v44  ;;  %v216_v43 = vld [vmem:[%s15233_s1 + $0x118] sm:$0xff]  ;;  %9235 = vmatprep.mubr.bf16.mxu0 %v11165_v58  ;;  %v9878_v58 = vcombine.low %v352_v51, %v356_v24  ;;  %v9862_v44 = vcombine.low %v336_v13, %v340_v15 }
 0x3d5   : > { %v8950_v53 = vpop.f32.mrf.mxu1  ;;  %9195 = vmatmul.mubr.bf16.vlgmr.msra.gmra.mxu1 %v12188_v25  ;;  %v8911_v33 = vpop.f32.mrf.mxu0  ;;  %9205 = vmatprep.subr.bf16.mxu0 %v9759_v46  ;;  %v9743_v9 = vcombine.high %v216_v43, %v220_v5  ;;  %v9742_v56 = vcombine.low %v216_v43, %v220_v5  ;;  %v9855_v46 = vcombine.high %v328_v37, %v332_v41  ;;  %v324_v50 = vld [vmem:[%s15233_s1 + $0x478] sm:$0xff] }
 0x3d6   : > { %9245 = vmatpush1.bf16.msra.mxu1 %v9894_v14  ;;  %v14245_v61 = vadd.f32 %v8950_v53, %v8910_v26  ;;  %v8912_v27 = vadd.f32 %v8911_v33, %v14060_v39  ;;  %v348_v39 = vld [vmem:[%s15233_s1 + $0x538] sm:$0xff]  ;;  %9276 = vmatprep.mubr.bf16.mxu1 %v11169_v59  ;;  %v9727_v14 = vcombine.high %v200_v31, %v204_v35 }
 0x3d7   : > { %v8952_v30 = vpop.f32.mrf.mxu1  ;;  %9246 = vmatprep.subr.bf16.mxu1 %v9887_v47  ;;  %v8913_v7 = vpop.f32.mrf.mxu0  ;;  %v9871_v11 = vcombine.high %v344_v1, %v348_v39  ;;  %v212_v59 = vld [vmem:[%s15233_s1 + $0xf8] sm:$0xff]  ;;  %v9870_v17 = vcombine.low %v344_v1, %v348_v39  ;;  %v9726_v51 = vcombine.low %v200_v31, %v204_v35  ;;  %v9854_v24 = vcombine.low %v328_v37, %v332_v41 }
 0x3d8   : > { %v14262_v2 = vadd.f32 %v8952_v30, %v8912_v27  ;;  %9206 = vmatpush1.bf16.msra.mxu0 %v9758_v52  ;;  %v9735_v63 = vcombine.high %v208_v38, %v212_v59  ;;  %v9734_v19 = vcombine.low %v208_v38, %v212_v59  ;;  %v192_v47 = vld [vmem:[%s15233_s1 + $0x58] sm:$0xff]  ;;  %v9847_v53 = vcombine.high %v320_v23, %v324_v50 }
 0x3d9   : > { %v8954_v3 = vpop.f32.mrf.mxu1  ;;  %v8914_v6 = vpop.f32.mrf.mxu0  ;;  %9207 = vmatprep.subr.bf16.mxu0 %v9751_v57  ;;  %v9719_v26 = vcombine.high %v192_v47, %v196_v48  ;;  %v184_v52 = vld [vmem:[%s15233_s1 + $0x18] sm:$0xff]  ;;  %v9718_v27 = vcombine.low %v192_v47, %v196_v48  ;;  %v9846_v30 = vcombine.low %v320_v23, %v324_v50 }
 0x3da   : > { %9247 = vmatpush1.bf16.msra.mxu1 %v9886_v34  ;;  %v188_v33 = vld [vmem:[%s15233_s1 + $0x38] sm:$0xff] }
 0x3db   : > { %v8955_v45 = vpop.f32.mrf.mxu1  ;;  %9248 = vmatprep.subr.bf16.mxu1 %v9879_v0  ;;  %v312_v34 = vld [vmem:[%s15233_s1 + $0x418] sm:$0xff]  ;;  %v9711_v0 = vcombine.high %v184_v52, %v188_v33  ;;  %v9710_v3 = vcombine.low %v184_v52, %v188_v33 }
 0x3dc   : > { %9208 = vmatpush1.bf16.msra.mxu0 %v9750_v60  ;;  %v316_v57 = vld [vmem:[%s15233_s1 + $0x438] sm:$0xff] }
 0x3dd   : > { %9209 = vmatprep.subr.bf16.mxu0 %v9743_v9  ;;  %v9839_v43 = vcombine.high %v312_v34, %v316_v57  ;;  %v304_v5 = vld [vmem:[%s15233_s1 + $0x3d8] sm:$0xff]  ;;  %v9838_v60 = vcombine.low %v312_v34, %v316_v57 }
 0x3de   : > { %9249 = vmatpush1.bf16.msra.mxu1 %v9878_v58  ;;  %v308_v7 = vld [vmem:[%s15233_s1 + $0x3f8] sm:$0xff] }
 0x3df   : > { %9250 = vmatprep.subr.bf16.mxu1 %v9871_v11  ;;  %v432_v1 = vld [vmem:[%s15233_s1 + $0x7d8] sm:$0xff]  ;;  %v9831_v6 = vcombine.high %v304_v5, %v308_v7  ;;  %v9830_v59 = vcombine.low %v304_v5, %v308_v7 }
 0x3e0   : > { %9210 = vmatpush1.bf16.msra.mxu0 %v9742_v56  ;;  %v436_v39 = vld [vmem:[%s15233_s1 + $0x7f8] sm:$0xff] }
 0x3e1   : > { %9211 = vmatprep.subr.bf16.mxu0 %v9735_v63  ;;  %v9959_v58 = vcombine.high %v432_v1, %v436_v39  ;;  %v296_v9 = vld [vmem:[%s15233_s1 + $0x398] sm:$0xff]  ;;  %v9958_v13 = vcombine.low %v432_v1, %v436_v39 }
 0x3e2   : > { %9251 = vmatpush1.bf16.msra.mxu1 %v9870_v17  ;;  %v300_v45 = vld [vmem:[%s15233_s1 + $0x3b8] sm:$0xff] }
 0x3e3   : > { %9252 = vmatprep.subr.bf16.mxu1 %v9863_v28  ;;  %v424_v11 = vld [vmem:[%s15233_s1 + $0x798] sm:$0xff]  ;;  %v9823_v15 = vcombine.high %v296_v9, %v300_v45  ;;  %v9822_v35 = vcombine.low %v296_v9, %v300_v45 }
 0x3e4   : > { %9212 = vmatpush1.bf16.msra.mxu0 %v9734_v19  ;;  %v428_v38 = vld [vmem:[%s15233_s1 + $0x7b8] sm:$0xff] }
 0x3e5   : > { %9213 = vmatprep.subr.bf16.mxu0 %v9727_v14  ;;  %v9951_v56 = vcombine.high %v424_v11, %v428_v38  ;;  %v288_v17 = vld [vmem:[%s15233_s1 + $0x358] sm:$0xff]  ;;  %v9950_v37 = vcombine.low %v424_v11, %v428_v38 }
 0x3e6   : > { %9253 = vmatpush1.bf16.msra.mxu1 %v9862_v44  ;;  %v292_v63 = vld [vmem:[%s15233_s1 + $0x378] sm:$0xff] }
 0x3e7   : > { %9254 = vmatprep.subr.bf16.mxu1 %v9855_v46  ;;  %v416_v28 = vld [vmem:[%s15233_s1 + $0x758] sm:$0xff]  ;;  %v9815_v41 = vcombine.high %v288_v17, %v292_v63  ;;  %v9814_v48 = vcombine.low %v288_v17, %v292_v63 }
 0x3e8   : > { %9214 = vmatpush1.bf16.msra.mxu0 %v9726_v51  ;;  %v420_v31 = vld [vmem:[%s15233_s1 + $0x778] sm:$0xff] }
 0x3e9   : > { %9215 = vmatprep.subr.bf16.mxu0 %v9719_v26  ;;  %v9943_v19 = vcombine.high %v416_v28, %v420_v31  ;;  %v280_v44 = vld [vmem:[%s15233_s1 + $0x318] sm:$0xff]  ;;  %v9942_v23 = vcombine.low %v416_v28, %v420_v31 }
 0x3ea   : > { %9255 = vmatpush1.bf16.msra.mxu1 %v9854_v24  ;;  %v284_v14 = vld [vmem:[%s15233_s1 + $0x338] sm:$0xff] }
 0x3eb   : > { %9256 = vmatprep.subr.bf16.mxu1 %v9847_v53  ;;  %v408_v46 = vld [vmem:[%s15233_s1 + $0x718] sm:$0xff]  ;;  %v9807_v50 = vcombine.high %v280_v44, %v284_v14  ;;  %v9806_v33 = vcombine.low %v280_v44, %v284_v14 }
 0x3ec   : > { %9216 = vmatpush1.bf16.msra.mxu0 %v9718_v27  ;;  %v412_v47 = vld [vmem:[%s15233_s1 + $0x738] sm:$0xff] }
 0x3ed   : > { %9217 = vmatprep.subr.bf16.mxu0 %v9711_v0  ;;  %v9935_v51 = vcombine.high %v408_v46, %v412_v47  ;;  %v272_v24 = vld [vmem:[%s15233_s1 + $0x2d8] sm:$0xff]  ;;  %v9934_v34 = vcombine.low %v408_v46, %v412_v47 }
 0x3ee   : > { %9257 = vmatpush1.bf16.msra.mxu1 %v9846_v30  ;;  %v276_v26 = vld [vmem:[%s15233_s1 + $0x2f8] sm:$0xff] }
 0x3ef   : > { %9258 = vmatprep.subr.bf16.mxu1 %v9839_v43  ;;  %v400_v53 = vld [vmem:[%s15233_s1 + $0x6d8] sm:$0xff]  ;;  %v9799_v57 = vcombine.high %v272_v24, %v276_v26  ;;  %v9798_v7 = vcombine.low %v272_v24, %v276_v26 }
 0x3f0   : > { %9218 = vmatpush1.bf16.msra.mxu0 %v9710_v3  ;;  %v404_v52 = vld [vmem:[%s15233_s1 + $0x6f8] sm:$0xff] }
 0x3f1   : > { %9219 = vmatprep.subr.bf16.mxu0 %v9831_v6  ;;  %v9927_v27 = vcombine.high %v400_v53, %v404_v52  ;;  %v264_v30 = vld [vmem:[%s15233_s1 + $0x298] sm:$0xff]  ;;  %v9926_v1 = vcombine.low %v400_v53, %v404_v52 }
 0x3f2   : > { %9259 = vmatpush1.bf16.msra.mxu1 %v9838_v60  ;;  %v268_v0 = vld [vmem:[%s15233_s1 + $0x2b8] sm:$0xff] }
 0x3f3   : > { %9260 = vmatprep.subr.bf16.mxu1 %v9959_v58  ;;  %v392_v43 = vld [vmem:[%s15233_s1 + $0x698] sm:$0xff]  ;;  %v9791_v39 = vcombine.high %v264_v30, %v268_v0  ;;  %v9790_v45 = vcombine.low %v264_v30, %v268_v0 }
 0x3f4   : > { %9220 = vmatpush2.bf16.msra.mxu0 %v9830_v59  ;;  %v396_v5 = vld [vmem:[%s15233_s1 + $0x6b8] sm:$0xff] }
 0x3f5   : > { %9221 = vmatprep.subr.bf16.mxu0 %v9823_v15  ;;  %v9919_v3 = vcombine.high %v392_v43, %v396_v5  ;;  %v256_v60 = vld [vmem:[%s15233_s1 + $0x258] sm:$0xff]  ;;  %v9918_v11 = vcombine.low %v392_v43, %v396_v5 }
 0x3f6   : > { %9261 = vmatpush2.bf16.msra.mxu1 %v9958_v13  ;;  %v260_v6 = vld [vmem:[%s15233_s1 + $0x278] sm:$0xff] }
 0x3f7   : > { %9262 = vmatprep.subr.bf16.mxu1 %v9951_v56  ;;  %v384_v58 = vld [vmem:[%s15233_s1 + $0x658] sm:$0xff]  ;;  %v9783_v38 = vcombine.high %v256_v60, %v260_v6  ;;  %v9782_v63 = vcombine.low %v256_v60, %v260_v6 }
 0x3f8   : > { %9222 = vmatpush2.bf16.msra.mxu0 %v9822_v35  ;;  %v388_v9 = vld [vmem:[%s15233_s1 + $0x678] sm:$0xff] }
 0x3f9   : > { %9223 = vmatprep.subr.bf16.mxu0 %v9815_v41  ;;  %v9911_v59 = vcombine.high %v384_v58, %v388_v9  ;;  %v248_v13 = vld [vmem:[%s15233_s1 + $0x218] sm:$0xff]  ;;  %v9910_v28 = vcombine.low %v384_v58, %v388_v9 }
 0x3fa   : > { %9263 = vmatpush2.bf16.msra.mxu1 %v9950_v37  ;;  %v252_v15 = vld [vmem:[%s15233_s1 + $0x238] sm:$0xff] }
 0x3fb   : > { %9264 = vmatprep.subr.bf16.mxu1 %v9943_v19  ;;  %v376_v56 = vld [vmem:[%s15233_s1 + $0x618] sm:$0xff]  ;;  %v9775_v31 = vcombine.high %v248_v13, %v252_v15  ;;  %v9774_v14 = vcombine.low %v248_v13, %v252_v15 }
 0x3fc   : > { %9224 = vmatpush2.bf16.msra.mxu0 %v9814_v48  ;;  %v380_v17 = vld [vmem:[%s15233_s1 + $0x638] sm:$0xff] }
 0x3fd   : > { %9225 = vmatprep.subr.bf16.mxu0 %v9807_v50  ;;  %v9903_v35 = vcombine.high %v376_v56, %v380_v17  ;;  %v496_v37 = vld [vmem:[%s15233_s1 + $0x9d8] sm:$0xff]  ;;  %v9902_v46 = vcombine.low %v376_v56, %v380_v17 }
 0x3fe   : > { %9265 = vmatpush2.bf16.msra.mxu1 %v9942_v23  ;;  %v500_v41 = vld [vmem:[%s15233_s1 + $0x9f8] sm:$0xff] }
 0x3ff   : > { %9266 = vmatprep.subr.bf16.mxu1 %v9935_v51  ;;  %v624_v19 = vld [vmem:[%s15233_s1 + $0xdd8] sm:$0xff]  ;;  %v10023_v47 = vcombine.high %v496_v37, %v500_v41  ;;  %v10022_v26 = vcombine.low %v496_v37, %v500_v41 }
 0x400   : > { %9226 = vmatpush2.bf16.msra.mxu0 %v9806_v33  ;;  %v628_v44 = vld [vmem:[%s15233_s1 + $0xdf8] sm:$0xff] }
 0x401   : > { %9227 = vmatprep.subr.bf16.mxu0 %v9799_v57  ;;  %v10151_v48 = vcombine.high %v624_v19, %v628_v44  ;;  %v488_v23 = vld [vmem:[%s15233_s1 + $0x998] sm:$0xff]  ;;  %v10150_v53 = vcombine.low %v624_v19, %v628_v44 }
 0x402   : > { %9267 = vmatpush2.bf16.msra.mxu1 %v9934_v34  ;;  %v492_v50 = vld [vmem:[%s15233_s1 + $0x9b8] sm:$0xff] }
 0x403   : > { %9268 = vmatprep.subr.bf16.mxu1 %v9927_v27  ;;  %v616_v51 = vld [vmem:[%s15233_s1 + $0xd98] sm:$0xff]  ;;  %v10015_v52 = vcombine.high %v488_v23, %v492_v50 }
 0x404   : > { %9228 = vmatpush2.bf16.msra.mxu0 %v9798_v7  ;;  %v620_v24 = vld [vmem:[%s15233_s1 + $0xdb8] sm:$0xff]  ;;  %v10014_v7 = vcombine.low %v488_v23, %v492_v50 }
 0x405   : > { %9229 = vmatprep.subr.bf16.mxu0 %v9791_v39  ;;  %v10143_v33 = vcombine.high %v616_v51, %v620_v24  ;;  %v480_v34 = vld [vmem:[%s15233_s1 + $0x958] sm:$0xff]  ;;  %v10142_v39 = vcombine.low %v616_v51, %v620_v24 }
 0x406   : > { %9269 = vmatpush2.bf16.msra.mxu1 %v9926_v1  ;;  %v484_v57 = vld [vmem:[%s15233_s1 + $0x978] sm:$0xff] }
 0x407   : > { %9270 = vmatprep.subr.bf16.mxu1 %v9919_v3  ;;  %v608_v30 = vld [vmem:[%s15233_s1 + $0xd58] sm:$0xff] }
 0x408   : > { %9230 = vmatpush2.bf16.msra.mxu0 %v9790_v45  ;;  %v612_v0 = vld [vmem:[%s15233_s1 + $0xd78] sm:$0xff] }
 0x409   : > { %9231 = vmatprep.subr.bf16.mxu0 %v9783_v38  ;;  %v10135_v58 = vcombine.high %v608_v30, %v612_v0  ;;  %v600_v45 = vld [vmem:[%s15233_s1 + $0xd18] sm:$0xff] }
 0x40a   : > { %9271 = vmatpush2.bf16.msra.mxu1 %v9918_v11  ;;  %v456_v44 = vld [vmem:[%s15233_s1 + $0x898] sm:$0xff] }
 0x40b   : > { %9272 = vmatprep.subr.bf16.mxu1 %v9911_v59  ;;  %v10006_v59 = vcombine.low %v480_v34, %v484_v57  ;;  %v448_v24 = vld [vmem:[%s15233_s1 + $0x858] sm:$0xff] }
 0x40c   : > { %9232 = vmatpush2.bf16.msra.mxu0 %v9782_v63  ;;  %v464_v63 = vld [vmem:[%s15233_s1 + $0x8d8] sm:$0xff] }
 0x40d   : > { %9233 = vmatprep.subr.bf16.mxu0 %v9775_v31  ;;  %v596_v31 = vld [vmem:[%s15233_s1 + $0xcf8] sm:$0xff] }
 0x40e   : > { %9273 = vmatpush2.bf16.msra.mxu1 %v9910_v28  ;;  %v592_v28 = vld [vmem:[%s15233_s1 + $0xcd8] sm:$0xff] }
 0x40f   : > { %9274 = vmatprep.subr.bf16.mxu1 %v9903_v35  ;;  %v10119_v19 = vcombine.high %v592_v28, %v596_v31  ;;  %v10118_v23 = vcombine.low %v592_v28, %v596_v31  ;;  %v548_v28 = vld [vmem:[%s15233_s1 + $0xb78] sm:$0xff] }
 0x410   : > { %9234 = vmatpush2.bf16.msra.mxu0 %v9774_v14  ;;  %v460_v14 = vld [vmem:[%s15233_s1 + $0x8b8] sm:$0xff] }
 0x411   : > { %9285 = vmatprep.subr.bf16.mxu0 %v10023_v47  ;;  %v588_v47 = vld [vmem:[%s15233_s1 + $0xcb8] sm:$0xff]  ;;  %v9983_v50 = vcombine.high %v456_v44, %v460_v14 }
 0x412   : > { %9275 = vmatpush2.bf16.msra.mxu1 %v9902_v46  ;;  %v584_v46 = vld [vmem:[%s15233_s1 + $0xc98] sm:$0xff] }
 0x413   : > { %9326 = vmatprep.subr.bf16.mxu1 %v10151_v48  ;;  %v8991_v27 = vpop.f32.mrf.mxu0  ;;  %9236 = vmatmul.mubr.bf16.vlgmr.msra.gmra.mxu0 %v11295_v16  ;;  %v10007_v16 = vcombine.high %v480_v34, %v484_v57  ;;  %v10111_v51 = vcombine.high %v584_v46, %v588_v47  ;;  %v10110_v34 = vcombine.low %v584_v46, %v588_v47  ;;  %v672_v31 = vld [vmem:[%s15233_s1 + $0xf58] sm:$0xff] }
 0x414   : > { %v8992_v43 = vadd.f32 %v8991_v27, %v14245_v61  ;;  %9286 = vmatpush1.bf16.msra.mxu0 %v10022_v26  ;;  %v472_v61 = vld [vmem:[%s15233_s1 + $0x918] sm:$0xff]  ;;  %9317 = vmatprep.mubr.bf16.mxu0 %v11321_v54  ;;  %v10134_v54 = vcombine.low %v608_v30, %v612_v0 }
 0x415   : > { %v9032_v5 = vpop.f32.mrf.mxu1  ;;  %9277 = vmatmul.mubr.bf16.vlgmr.msra.gmra.mxu1 %v11308_v20  ;;  %v8993_v1 = vpop.f32.mrf.mxu0  ;;  %9287 = vmatprep.subr.bf16.mxu0 %v10015_v52  ;;  %v476_v20 = vld [vmem:[%s15233_s1 + $0x938] sm:$0xff] }
 0x416   : > { %9327 = vmatpush1.bf16.msra.mxu1 %v10150_v53  ;;  %v14447_v3 = vadd.f32 %v9032_v5, %v8992_v43  ;;  %v8994_v60 = vadd.f32 %v8993_v1, %v14262_v2  ;;  %v604_v2 = vld [vmem:[%s15233_s1 + $0xd38] sm:$0xff]  ;;  %9358 = vmatprep.mubr.bf16.mxu1 %v11332_v29  ;;  %v9999_v15 = vcombine.high %v472_v61, %v476_v20 }
 0x417   : > { %v9034_v6 = vpop.f32.mrf.mxu1  ;;  %9328 = vmatprep.subr.bf16.mxu1 %v10143_v33  ;;  %v8995_v9 = vpop.f32.mrf.mxu0  ;;  %v10127_v17 = vcombine.high %v600_v45, %v604_v2  ;;  %v468_v29 = vld [vmem:[%s15233_s1 + $0x8f8] sm:$0xff]  ;;  %v9998_v35 = vcombine.low %v472_v61, %v476_v20  ;;  %v10126_v37 = vcombine.low %v600_v45, %v604_v2  ;;  %v9982_v33 = vcombine.low %v456_v44, %v460_v14 }
 0x418   : > { %v14464_v11 = vadd.f32 %v9034_v6, %v8994_v60  ;;  %9288 = vmatpush1.bf16.msra.mxu0 %v10014_v7  ;;  %v9991_v41 = vcombine.high %v464_v63, %v468_v29  ;;  %v9990_v48 = vcombine.low %v464_v63, %v468_v29  ;;  %v452_v26 = vld [vmem:[%s15233_s1 + $0x878] sm:$0xff] }
 0x419   : > { %v9036_v38 = vpop.f32.mrf.mxu1  ;;  %v8996_v13 = vpop.f32.mrf.mxu0  ;;  %9289 = vmatprep.subr.bf16.mxu0 %v10007_v16  ;;  %v576_v53 = vld [vmem:[%s15233_s1 + $0xc58] sm:$0xff]  ;;  %v9975_v57 = vcombine.high %v448_v24, %v452_v26  ;;  %v9974_v7 = vcombine.low %v448_v24, %v452_v26 }
 0x41a   : > { %9329 = vmatpush1.bf16.msra.mxu1 %v10142_v39  ;;  %v580_v52 = vld [vmem:[%s15233_s1 + $0xc78] sm:$0xff] }
 0x41b   : > { %v9037_v56 = vpop.f32.mrf.mxu1  ;;  %9330 = vmatprep.subr.bf16.mxu1 %v10135_v58  ;;  %v10103_v27 = vcombine.high %v576_v53, %v580_v52  ;;  %v440_v30 = vld [vmem:[%s15233_s1 + $0x818] sm:$0xff]  ;;  %v10102_v1 = vcombine.low %v576_v53, %v580_v52 }
 0x41c   : > { %9290 = vmatpush1.bf16.msra.mxu0 %v10006_v59  ;;  %v444_v0 = vld [vmem:[%s15233_s1 + $0x838] sm:$0xff] }
 0x41d   : > { %9291 = vmatprep.subr.bf16.mxu0 %v9999_v15  ;;  %v568_v43 = vld [vmem:[%s15233_s1 + $0xc18] sm:$0xff]  ;;  %v9967_v39 = vcombine.high %v440_v30, %v444_v0  ;;  %v9966_v20 = vcombine.low %v440_v30, %v444_v0 }
 0x41e   : > { %9331 = vmatpush1.bf16.msra.mxu1 %v10134_v54  ;;  %v572_v5 = vld [vmem:[%s15233_s1 + $0xc38] sm:$0xff] }
 0x41f   : > { %9332 = vmatprep.subr.bf16.mxu1 %v10127_v17  ;;  %v10095_v16 = vcombine.high %v568_v43, %v572_v5  ;;  %v560_v60 = vld [vmem:[%s15233_s1 + $0xbd8] sm:$0xff]  ;;  %v10094_v9 = vcombine.low %v568_v43, %v572_v5 }
 0x420   : > { %9292 = vmatpush1.bf16.msra.mxu0 %v9998_v35  ;;  %v564_v6 = vld [vmem:[%s15233_s1 + $0xbf8] sm:$0xff] }
 0x421   : > { %9293 = vmatprep.subr.bf16.mxu0 %v9991_v41  ;;  %v688_v58 = vld [vmem:[%s15233_s1 + $0xfd8] sm:$0xff]  ;;  %v10087_v45 = vcombine.high %v560_v60, %v564_v6  ;;  %v10086_v15 = vcombine.low %v560_v60, %v564_v6 }
 0x422   : > { %9333 = vmatpush1.bf16.msra.mxu1 %v10126_v37  ;;  %v692_v61 = vld [vmem:[%s15233_s1 + $0xff8] sm:$0xff] }
 0x423   : > { %9334 = vmatprep.subr.bf16.mxu1 %v10119_v19  ;;  %v10215_v2 = vcombine.high %v688_v58, %v692_v61  ;;  %v552_v38 = vld [vmem:[%s15233_s1 + $0xb98] sm:$0xff]  ;;  %v10214_v56 = vcombine.low %v688_v58, %v692_v61 }
 0x424   : > { %9294 = vmatpush1.bf16.msra.mxu0 %v9990_v48  ;;  %v556_v59 = vld [vmem:[%s15233_s1 + $0xbb8] sm:$0xff] }
 0x425   : > { %9295 = vmatprep.subr.bf16.mxu0 %v9983_v50  ;;  %v680_v13 = vld [vmem:[%s15233_s1 + $0xf98] sm:$0xff]  ;;  %v10079_v17 = vcombine.high %v552_v38, %v556_v59  ;;  %v10078_v37 = vcombine.low %v552_v38, %v556_v59 }
 0x426   : > { %9335 = vmatpush1.bf16.msra.mxu1 %v10118_v23  ;;  %v684_v54 = vld [vmem:[%s15233_s1 + $0xfb8] sm:$0xff] }
 0x427   : > { %9336 = vmatprep.subr.bf16.mxu1 %v10111_v51  ;;  %v10207_v63 = vcombine.high %v680_v13, %v684_v54  ;;  %v544_v29 = vld [vmem:[%s15233_s1 + $0xb58] sm:$0xff]  ;;  %v10206_v41 = vcombine.low %v680_v13, %v684_v54 }
 0x428   : > { %9296 = vmatpush1.bf16.msra.mxu0 %v9982_v33  ;;  %v676_v35 = vld [vmem:[%s15233_s1 + $0xf78] sm:$0xff]  ;;  %v10071_v19 = vcombine.high %v544_v29, %v548_v28  ;;  %v10070_v23 = vcombine.low %v544_v29, %v548_v28 }
 0x429   : > { %9297 = vmatprep.subr.bf16.mxu0 %v9975_v57  ;;  %v10199_v44 = vcombine.high %v672_v31, %v676_v35  ;;  %v536_v14 = vld [vmem:[%s15233_s1 + $0xb18] sm:$0xff]  ;;  %v10198_v50 = vcombine.low %v672_v31, %v676_v35 }
 0x42a   : > { %9337 = vmatpush1.bf16.msra.mxu1 %v10110_v34  ;;  %v540_v46 = vld [vmem:[%s15233_s1 + $0xb38] sm:$0xff] }
 0x42b   : > { %9338 = vmatprep.subr.bf16.mxu1 %v10103_v27  ;;  %v664_v47 = vld [vmem:[%s15233_s1 + $0xf18] sm:$0xff]  ;;  %v10063_v51 = vcombine.high %v536_v14, %v540_v46  ;;  %v10062_v34 = vcombine.low %v536_v14, %v540_v46 }
 0x42c   : > { %9298 = vmatpush1.bf16.msra.mxu0 %v9974_v7  ;;  %v668_v48 = vld [vmem:[%s15233_s1 + $0xf38] sm:$0xff] }
 0x42d   : > { %9299 = vmatprep.subr.bf16.mxu0 %v9967_v39  ;;  %v10191_v24 = vcombine.high %v664_v47, %v668_v48  ;;  %v528_v26 = vld [vmem:[%s15233_s1 + $0xad8] sm:$0xff]  ;;  %v10190_v57 = vcombine.low %v664_v47, %v668_v48 }
 0x42e   : > { %9339 = vmatpush1.bf16.msra.mxu1 %v10102_v1  ;;  %v532_v53 = vld [vmem:[%s15233_s1 + $0xaf8] sm:$0xff] }
 0x42f   : > { %9340 = vmatprep.subr.bf16.mxu1 %v10095_v16  ;;  %v656_v52 = vld [vmem:[%s15233_s1 + $0xed8] sm:$0xff]  ;;  %v10055_v27 = vcombine.high %v528_v26, %v532_v53  ;;  %v10054_v1 = vcombine.low %v528_v26, %v532_v53 }
 0x430   : > { %9300 = vmatpush1.bf16.msra.mxu0 %v9966_v20  ;;  %v660_v33 = vld [vmem:[%s15233_s1 + $0xef8] sm:$0xff] }
 0x431   : > { %9301 = vmatprep.subr.bf16.mxu0 %v10087_v45  ;;  %v10183_v30 = vcombine.high %v656_v52, %v660_v33  ;;  %v520_v0 = vld [vmem:[%s15233_s1 + $0xa98] sm:$0xff]  ;;  %v10182_v39 = vcombine.low %v656_v52, %v660_v33 }
 0x432   : > { %9341 = vmatpush1.bf16.msra.mxu1 %v10094_v9  ;;  %v524_v43 = vld [vmem:[%s15233_s1 + $0xab8] sm:$0xff] }
 0x433   : > { %9342 = vmatprep.subr.bf16.mxu1 %v10215_v2  ;;  %v648_v5 = vld [vmem:[%s15233_s1 + $0xe98] sm:$0xff]  ;;  %v10047_v16 = vcombine.high %v520_v0, %v524_v43  ;;  %v10046_v9 = vcombine.low %v520_v0, %v524_v43 }
 0x434   : > { %9302 = vmatpush2.bf16.msra.mxu0 %v10086_v15  ;;  %v652_v7 = vld [vmem:[%s15233_s1 + $0xeb8] sm:$0xff] }
 0x435   : > { %9303 = vmatprep.subr.bf16.mxu0 %v10079_v17  ;;  %v10175_v60 = vcombine.high %v648_v5, %v652_v7  ;;  %v512_v6 = vld [vmem:[%s15233_s1 + $0xa58] sm:$0xff]  ;;  %v10174_v45 = vcombine.low %v648_v5, %v652_v7 }
 0x436   : > { %9343 = vmatpush2.bf16.msra.mxu1 %v10214_v56  ;;  %v516_v58 = vld [vmem:[%s15233_s1 + $0xa78] sm:$0xff] }
 0x437   : > { %9344 = vmatprep.subr.bf16.mxu1 %v10207_v63  ;;  %v640_v61 = vld [vmem:[%s15233_s1 + $0xe58] sm:$0xff]  ;;  %v10039_v2 = vcombine.high %v512_v6, %v516_v58  ;;  %v10038_v56 = vcombine.low %v512_v6, %v516_v58 }
 0x438   : > { %9304 = vmatpush2.bf16.msra.mxu0 %v10078_v37  ;;  %v644_v20 = vld [vmem:[%s15233_s1 + $0xe78] sm:$0xff] }
 0x439   : > { %9305 = vmatprep.subr.bf16.mxu0 %v10071_v19  ;;  %v10167_v38 = vcombine.high %v640_v61, %v644_v20  ;;  %v504_v59 = vld [vmem:[%s15233_s1 + $0xa18] sm:$0xff]  ;;  %v10166_v17 = vcombine.low %v640_v61, %v644_v20 }
 0x43a   : > { %9345 = vmatpush2.bf16.msra.mxu1 %v10206_v41  ;;  %v508_v13 = vld [vmem:[%s15233_s1 + $0xa38] sm:$0xff] }
 0x43b   : > { %9346 = vmatprep.subr.bf16.mxu1 %v10199_v44  ;;  %v632_v54 = vld [vmem:[%s15233_s1 + $0xe18] sm:$0xff]  ;;  %v10031_v63 = vcombine.high %v504_v59, %v508_v13  ;;  %v10030_v41 = vcombine.low %v504_v59, %v508_v13 }
 0x43c   : > { %9306 = vmatpush2.bf16.msra.mxu0 %v10070_v23  ;;  %v636_v15 = vld [vmem:[%s15233_s1 + $0xe38] sm:$0xff] }
 0x43d   : > { %9307 = vmatprep.subr.bf16.mxu0 %v10063_v51  ;;  %v10159_v29 = vcombine.high %v632_v54, %v636_v15  ;;  %v752_v28 = vld [vmem:[%s15233_s1 + $0x11d8] sm:$0xff]  ;;  %v10158_v19 = vcombine.low %v632_v54, %v636_v15 }
 0x43e   : > { %9347 = vmatpush2.bf16.msra.mxu1 %v10198_v50  ;;  %v756_v31 = vld [vmem:[%s15233_s1 + $0x11f8] sm:$0xff] }
 0x43f   : > { %9348 = vmatprep.subr.bf16.mxu1 %v10191_v24  ;;  %v880_v35 = vld [vmem:[%s15233_s1 + $0x15d8] sm:$0xff]  ;;  %v10279_v44 = vcombine.high %v752_v28, %v756_v31  ;;  %v10278_v50 = vcombine.low %v752_v28, %v756_v31 }
 0x440   : > { %9308 = vmatpush2.bf16.msra.mxu0 %v10062_v34  ;;  %v884_v37 = vld [vmem:[%s15233_s1 + $0x15f8] sm:$0xff] }
 0x441   : > { %9309 = vmatprep.subr.bf16.mxu0 %v10055_v27  ;;  %v10407_v14 = vcombine.high %v880_v35, %v884_v37  ;;  %v744_v46 = vld [vmem:[%s15233_s1 + $0x1198] sm:$0xff]  ;;  %v10406_v51 = vcombine.low %v880_v35, %v884_v37 }
 0x442   : > { %9349 = vmatpush2.bf16.msra.mxu1 %v10190_v57  ;;  %v748_v47 = vld [vmem:[%s15233_s1 + $0x11b8] sm:$0xff] }
 0x443   : > { %9350 = vmatprep.subr.bf16.mxu1 %v10183_v30  ;;  %v872_v48 = vld [vmem:[%s15233_s1 + $0x1598] sm:$0xff]  ;;  %v10271_v24 = vcombine.high %v744_v46, %v748_v47  ;;  %v10270_v30 = vcombine.low %v744_v46, %v748_v47 }
 0x444   : > { %9310 = vmatpush2.bf16.msra.mxu0 %v10054_v1  ;;  %v876_v23 = vld [vmem:[%s15233_s1 + $0x15b8] sm:$0xff] }
 0x445   : > { %9311 = vmatprep.subr.bf16.mxu0 %v10047_v16  ;;  %v10399_v26 = vcombine.high %v872_v48, %v876_v23  ;;  %v736_v53 = vld [vmem:[%s15233_s1 + $0x1158] sm:$0xff]  ;;  %v10398_v43 = vcombine.low %v872_v48, %v876_v23 }
 0x446   : > { %9351 = vmatpush2.bf16.msra.mxu1 %v10182_v39  ;;  %v740_v52 = vld [vmem:[%s15233_s1 + $0x1178] sm:$0xff] }
 0x447   : > { %9352 = vmatprep.subr.bf16.mxu1 %v10175_v60  ;;  %v864_v34 = vld [vmem:[%s15233_s1 + $0x1558] sm:$0xff]  ;;  %v10262_v58 = vcombine.low %v736_v53, %v740_v52 }
 0x448   : > { %9312 = vmatpush2.bf16.msra.mxu0 %v10046_v9  ;;  %v868_v57 = vld [vmem:[%s15233_s1 + $0x1578] sm:$0xff] }
 0x449   : > { %9313 = vmatprep.subr.bf16.mxu0 %v10039_v2  ;;  %v10391_v7 = vcombine.high %v864_v34, %v868_v57  ;;  %v728_v1 = vld [vmem:[%s15233_s1 + $0x1118] sm:$0xff]  ;;  %v10390_v20 = vcombine.low %v864_v34, %v868_v57 }
 0x44a   : > { %9353 = vmatpush2.bf16.msra.mxu1 %v10174_v45  ;;  %v856_v16 = vld [vmem:[%s15233_s1 + $0x1518] sm:$0xff] }
 0x44b   : > { %9354 = vmatprep.subr.bf16.mxu1 %v10167_v38  ;;  %v860_v60 = vld [vmem:[%s15233_s1 + $0x1538] sm:$0xff] }
 0x44c   : > { %9314 = vmatpush2.bf16.msra.mxu0 %v10038_v56  ;;  %v10383_v45 = vcombine.high %v856_v16, %v860_v60  ;;  %v720_v2 = vld [vmem:[%s15233_s1 + $0x10d8] sm:$0xff]  ;;  %v10382_v54 = vcombine.low %v856_v16, %v860_v60 }
 0x44d   : > { %9315 = vmatprep.subr.bf16.mxu0 %v10031_v63  ;;  %v724_v38 = vld [vmem:[%s15233_s1 + $0x10f8] sm:$0xff] }
 0x44e   : > { %9355 = vmatpush2.bf16.msra.mxu1 %v10166_v17  ;;  %v852_v59 = vld [vmem:[%s15233_s1 + $0x14f8] sm:$0xff]  ;;  %v10247_v15 = vcombine.high %v720_v2, %v724_v38  ;;  %v10246_v31 = vcombine.low %v720_v2, %v724_v38 }
 0x44f   : > { %9356 = vmatprep.subr.bf16.mxu1 %v10159_v29  ;;  %v712_v17 = vld [vmem:[%s15233_s1 + $0x1098] sm:$0xff] }
 0x450   : > { %9316 = vmatpush2.bf16.msra.mxu0 %v10030_v41  ;;  %v716_v63 = vld [vmem:[%s15233_s1 + $0x10b8] sm:$0xff] }
 0x451   : > { %9367 = vmatprep.subr.bf16.mxu0 %v10279_v44  ;;  %v840_v29 = vld [vmem:[%s15233_s1 + $0x1498] sm:$0xff]  ;;  %v10239_v37 = vcombine.high %v712_v17, %v716_v63  ;;  %v10238_v47 = vcombine.low %v712_v17, %v716_v63 }
 0x452   : > { %9357 = vmatpush2.bf16.msra.mxu1 %v10158_v19  ;;  %v844_v28 = vld [vmem:[%s15233_s1 + $0x14b8] sm:$0xff] }
 0x453   : > { %9408 = vmatprep.subr.bf16.mxu1 %v10407_v14  ;;  %v14640_v33 = vpop.f32.mrf.mxu0  ;;  %9318 = vmatmul.mubr.bf16.vlgmr.msra.gmra.mxu0 %v11513_v36  ;;  %v10263_v36 = vcombine.high %v736_v53, %v740_v52  ;;  %v10367_v41 = vcombine.high %v840_v29, %v844_v28  ;;  %v704_v19 = vld [vmem:[%s15233_s1 + $0x1058] sm:$0xff]  ;;  %v10366_v48 = vcombine.low %v840_v29, %v844_v28 }
 0x454   : > { %9368 = vmatpush1.bf16.msra.mxu0 %v10278_v50  ;;  %9399 = vmatprep.mubr.bf16.mxu0 %v11539_v22  ;;  %v708_v44 = vld [vmem:[%s15233_s1 + $0x1078] sm:$0xff] }
 0x455   : > { %v14649_v27 = vpop.f32.mrf.mxu1  ;;  %9359 = vmatmul.mubr.bf16.vlgmr.msra.gmra.mxu1 %v11526_v40  ;;  %v14652_v0 = vpop.f32.mrf.mxu0  ;;  %9369 = vmatprep.subr.bf16.mxu0 %v10271_v24  ;;  %v732_v40 = vld [vmem:[%s15233_s1 + $0x1138] sm:$0xff]  ;;  %v10231_v23 = vcombine.high %v704_v19, %v708_v44  ;;  %v10230_v52 = vcombine.low %v704_v19, %v708_v44 }
 0x456   : > { %9409 = vmatpush1.bf16.msra.mxu1 %v10406_v51  ;;  %9440 = vmatprep.mubr.bf16.mxu1 %v11550_v49  ;;  %v10255_v9 = vcombine.high %v728_v1, %v732_v40  ;;  %v848_v49 = vld [vmem:[%s15233_s1 + $0x14d8] sm:$0xff]  ;;  %v10254_v13 = vcombine.low %v728_v1, %v732_v40 }
 0x457   : > { %v14654_v5 = vpop.f32.mrf.mxu1  ;;  %9410 = vmatprep.subr.bf16.mxu1 %v10399_v26  ;;  %v9077_v39 = vpop.f32.mrf.mxu0  ;;  %v10375_v56 = vcombine.high %v848_v49, %v852_v59  ;;  %v10374_v35 = vcombine.low %v848_v49, %v852_v59  ;;  %v832_v14 = vld [vmem:[%s15233_s1 + $0x1458] sm:$0xff] }
 0x458   : > { %9370 = vmatpush1.bf16.msra.mxu0 %v10270_v30  ;;  %v836_v46 = vld [vmem:[%s15233_s1 + $0x1478] sm:$0xff] }
 0x459   : > { %v9118_v6 = vpop.f32.mrf.mxu1  ;;  %v9078_v61 = vpop.f32.mrf.mxu0  ;;  %9371 = vmatprep.subr.bf16.mxu0 %v10263_v36  ;;  %v10359_v50 = vcombine.high %v832_v14, %v836_v46  ;;  %v696_v51 = vld [vmem:[%s15233_s1 + $0x1018] sm:$0xff]  ;;  %v10358_v34 = vcombine.low %v832_v14, %v836_v46 }
 0x45a   : > { %9411 = vmatpush1.bf16.msra.mxu1 %v10398_v43  ;;  %v700_v24 = vld [vmem:[%s15233_s1 + $0x1038] sm:$0xff] }
 0x45b   : > { %v9119_v22 = vpop.f32.mrf.mxu1  ;;  %9412 = vmatprep.subr.bf16.mxu1 %v10391_v7  ;;  %v824_v26 = vld [vmem:[%s15233_s1 + $0x1418] sm:$0xff]  ;;  %v10223_v57 = vcombine.high %v696_v51, %v700_v24  ;;  %v10222_v40 = vcombine.low %v696_v51, %v700_v24 }
 0x45c   : > { %9372 = vmatpush1.bf16.msra.mxu0 %v10262_v58  ;;  %v828_v53 = vld [vmem:[%s15233_s1 + $0x1438] sm:$0xff] }
 0x45d   : > { %9373 = vmatprep.subr.bf16.mxu0 %v10255_v9  ;;  %v10351_v30 = vcombine.high %v824_v26, %v828_v53  ;;  %v816_v43 = vld [vmem:[%s15233_s1 + $0x13d8] sm:$0xff]  ;;  %v10350_v39 = vcombine.low %v824_v26, %v828_v53 }
 0x45e   : > { %9413 = vmatpush1.bf16.msra.mxu1 %v10390_v20  ;;  %v820_v36 = vld [vmem:[%s15233_s1 + $0x13f8] sm:$0xff] }
 0x45f   : > { %9414 = vmatprep.subr.bf16.mxu1 %v10383_v45  ;;  %v944_v7 = vld [vmem:[%s15233_s1 + $0x17d8] sm:$0xff]  ;;  %v10343_v16 = vcombine.high %v816_v43, %v820_v36  ;;  %v10342_v9 = vcombine.low %v816_v43, %v820_v36 }
 0x460   : > { %9374 = vmatpush1.bf16.msra.mxu0 %v10254_v13  ;;  %v948_v1 = vld [vmem:[%s15233_s1 + $0x17f8] sm:$0xff] }
 0x461   : > { %9375 = vmatprep.subr.bf16.mxu0 %v10247_v15  ;;  %v10471_v60 = vcombine.high %v944_v7, %v948_v1  ;;  %v808_v6 = vld [vmem:[%s15233_s1 + $0x1398] sm:$0xff]  ;;  %v10470_v22 = vcombine.low %v944_v7, %v948_v1 }
 0x462   : > { %9415 = vmatpush1.bf16.msra.mxu1 %v10382_v54  ;;  %v812_v58 = vld [vmem:[%s15233_s1 + $0x13b8] sm:$0xff] }
 0x463   : > { %9416 = vmatprep.subr.bf16.mxu1 %v10375_v56  ;;  %v936_v61 = vld [vmem:[%s15233_s1 + $0x1798] sm:$0xff]  ;;  %v10335_v45 = vcombine.high %v808_v6, %v812_v58  ;;  %v10334_v54 = vcombine.low %v808_v6, %v812_v58 }
 0x464   : > { %9376 = vmatpush1.bf16.msra.mxu0 %v10246_v31  ;;  %v940_v20 = vld [vmem:[%s15233_s1 + $0x17b8] sm:$0xff] }
 0x465   : > { %9377 = vmatprep.subr.bf16.mxu0 %v10239_v37  ;;  %v10463_v2 = vcombine.high %v936_v61, %v940_v20  ;;  %v800_v38 = vld [vmem:[%s15233_s1 + $0x1358] sm:$0xff]  ;;  %v10462_v15 = vcombine.low %v936_v61, %v940_v20 }
 0x466   : > { %9417 = vmatpush1.bf16.msra.mxu1 %v10374_v35  ;;  %v804_v49 = vld [vmem:[%s15233_s1 + $0x1378] sm:$0xff] }
 0x467   : > { %9418 = vmatprep.subr.bf16.mxu1 %v10367_v41  ;;  %v928_v59 = vld [vmem:[%s15233_s1 + $0x1758] sm:$0xff]  ;;  %v10327_v56 = vcombine.high %v800_v38, %v804_v49  ;;  %v10326_v35 = vcombine.low %v800_v38, %v804_v49 }
 0x468   : > { %9378 = vmatpush1.bf16.msra.mxu0 %v10238_v47  ;;  %v932_v13 = vld [vmem:[%s15233_s1 + $0x1778] sm:$0xff] }
 0x469   : > { %9379 = vmatprep.subr.bf16.mxu0 %v10231_v23  ;;  %v10455_v17 = vcombine.high %v928_v59, %v932_v13  ;;  %v792_v63 = vld [vmem:[%s15233_s1 + $0x1318] sm:$0xff]  ;;  %v10454_v37 = vcombine.low %v928_v59, %v932_v13 }
 0x46a   : > { %9419 = vmatpush1.bf16.msra.mxu1 %v10366_v48  ;;  %v796_v29 = vld [vmem:[%s15233_s1 + $0x1338] sm:$0xff] }
 0x46b   : > { %9420 = vmatprep.subr.bf16.mxu1 %v10359_v50  ;;  %v920_v28 = vld [vmem:[%s15233_s1 + $0x1718] sm:$0xff]  ;;  %v10319_v41 = vcombine.high %v792_v63, %v796_v29  ;;  %v10318_v48 = vcombine.low %v792_v63, %v796_v29  ;;  %v9074_v63 = vadd.f32 %v14640_v33, %v14447_v3  ;;  %v9076_v3 = vadd.f32 %v14652_v0, %v14464_v11 }
 0x46c   : > { %9380 = vmatpush1.bf16.msra.mxu0 %v10230_v52  ;;  %v924_v31 = vld [vmem:[%s15233_s1 + $0x1738] sm:$0xff] }
 0x46d   : > { %9381 = vmatprep.subr.bf16.mxu0 %v10223_v57  ;;  %v10447_v19 = vcombine.high %v920_v28, %v924_v31  ;;  %v784_v44 = vld [vmem:[%s15233_s1 + $0x12d8] sm:$0xff]  ;;  %v10446_v23 = vcombine.low %v920_v28, %v924_v31  ;;  %v9117_v0 = vadd.f32 %v14654_v5, %v9076_v3 }
 0x46e   : > { %9421 = vmatpush1.bf16.msra.mxu1 %v10358_v34  ;;  %v788_v14 = vld [vmem:[%s15233_s1 + $0x12f8] sm:$0xff] }
 0x46f   : > { %9422 = vmatprep.subr.bf16.mxu1 %v10351_v30  ;;  %v912_v46 = vld [vmem:[%s15233_s1 + $0x16d8] sm:$0xff]  ;;  %v10311_v50 = vcombine.high %v784_v44, %v788_v14  ;;  %v10310_v34 = vcombine.low %v784_v44, %v788_v14  ;;  %v9115_v44 = vadd.f32 %v14649_v27, %v9074_v63 }
 0x470   : > { %9382 = vmatpush1.bf16.msra.mxu0 %v10222_v40  ;;  %v916_v47 = vld [vmem:[%s15233_s1 + $0x16f8] sm:$0xff] }
 0x471   : > { %9383 = vmatprep.subr.bf16.mxu0 %v10343_v16  ;;  %v10439_v51 = vcombine.high %v912_v46, %v916_v47  ;;  %v776_v24 = vld [vmem:[%s15233_s1 + $0x1298] sm:$0xff]  ;;  %v10438_v57 = vcombine.low %v912_v46, %v916_v47 }
 0x472   : > { %9423 = vmatpush1.bf16.msra.mxu1 %v10350_v39  ;;  %v780_v26 = vld [vmem:[%s15233_s1 + $0x12b8] sm:$0xff] }
 0x473   : > { %9424 = vmatprep.subr.bf16.mxu1 %v10471_v60  ;;  %v904_v53 = vld [vmem:[%s15233_s1 + $0x1698] sm:$0xff]  ;;  %v10303_v30 = vcombine.high %v776_v24, %v780_v26  ;;  %v10302_v39 = vcombine.low %v776_v24, %v780_v26 }
 0x474   : > { %9384 = vmatpush2.bf16.msra.mxu0 %v10342_v9  ;;  %v908_v52 = vld [vmem:[%s15233_s1 + $0x16b8] sm:$0xff] }
 0x475   : > { %9385 = vmatprep.subr.bf16.mxu0 %v10335_v45  ;;  %v10431_v43 = vcombine.high %v904_v53, %v908_v52  ;;  %v768_v36 = vld [vmem:[%s15233_s1 + $0x1258] sm:$0xff]  ;;  %v10430_v16 = vcombine.low %v904_v53, %v908_v52 }
 0x476   : > { %9425 = vmatpush2.bf16.msra.mxu1 %v10470_v22  ;;  %v772_v7 = vld [vmem:[%s15233_s1 + $0x1278] sm:$0xff] }
 0x477   : > { %9426 = vmatprep.subr.bf16.mxu1 %v10463_v2  ;;  %v896_v1 = vld [vmem:[%s15233_s1 + $0x1658] sm:$0xff]  ;;  %v10295_v60 = vcombine.high %v768_v36, %v772_v7  ;;  %v10294_v22 = vcombine.low %v768_v36, %v772_v7 }
 0x478   : > { %9386 = vmatpush2.bf16.msra.mxu0 %v10334_v54  ;;  %v900_v40 = vld [vmem:[%s15233_s1 + $0x1678] sm:$0xff] }
 0x479   : > { %9387 = vmatprep.subr.bf16.mxu0 %v10327_v56  ;;  %v10423_v6 = vcombine.high %v896_v1, %v900_v40  ;;  %v760_v58 = vld [vmem:[%s15233_s1 + $0x1218] sm:$0xff]  ;;  %v10422_v45 = vcombine.low %v896_v1, %v900_v40 }
 0x47a   : > { %9427 = vmatpush2.bf16.msra.mxu1 %v10462_v15  ;;  %v764_v61 = vld [vmem:[%s15233_s1 + $0x1238] sm:$0xff] }
 0x47b   : > { %9428 = vmatprep.subr.bf16.mxu1 %v10455_v17  ;;  %v888_v20 = vld [vmem:[%s15233_s1 + $0x1618] sm:$0xff]  ;;  %v10287_v2 = vcombine.high %v760_v58, %v764_v61  ;;  %v10286_v15 = vcombine.low %v760_v58, %v764_v61 }
 0x47c   : > { %9388 = vmatpush2.bf16.msra.mxu0 %v10326_v35  ;;  %v892_v9 = vld [vmem:[%s15233_s1 + $0x1638] sm:$0xff] }
 0x47d   : > { %9389 = vmatprep.subr.bf16.mxu0 %v10319_v41  ;;  %v10415_v38 = vcombine.high %v888_v20, %v892_v9  ;;  %v1008_v49 = vld [vmem:[%s15233_s1 + $0x19d8] sm:$0xff]  ;;  %v10414_v56 = vcombine.low %v888_v20, %v892_v9 }
 0x47e   : > { %9429 = vmatpush2.bf16.msra.mxu1 %v10454_v37  ;;  %v1012_v59 = vld [vmem:[%s15233_s1 + $0x19f8] sm:$0xff] }
 0x47f   : > { %9430 = vmatprep.subr.bf16.mxu1 %v10447_v19  ;;  %v1136_v13 = vld [vmem:[%s15233_s1 + $0x1dd8] sm:$0xff]  ;;  %v10535_v17 = vcombine.high %v1008_v49, %v1012_v59  ;;  %v10534_v33 = vcombine.low %v1008_v49, %v1012_v59 }
 0x480   : > { %9390 = vmatpush2.bf16.msra.mxu0 %v10318_v48  ;;  %v1140_v54 = vld [vmem:[%s15233_s1 + $0x1df8] sm:$0xff] }
 0x481   : > { %9391 = vmatprep.subr.bf16.mxu0 %v10311_v50  ;;  %v10663_v29 = vcombine.high %v1136_v13, %v1140_v54  ;;  %v1000_v28 = vld [vmem:[%s15233_s1 + $0x1998] sm:$0xff]  ;;  %v10662_v41 = vcombine.low %v1136_v13, %v1140_v54 }
 0x482   : > { %9431 = vmatpush2.bf16.msra.mxu1 %v10446_v23  ;;  %v1004_v31 = vld [vmem:[%s15233_s1 + $0x19b8] sm:$0xff] }
 0x483   : > { %9432 = vmatprep.subr.bf16.mxu1 %v10439_v51  ;;  %v1128_v35 = vld [vmem:[%s15233_s1 + $0x1d98] sm:$0xff]  ;;  %v10527_v19 = vcombine.high %v1000_v28, %v1004_v31  ;;  %v10526_v51 = vcombine.low %v1000_v28, %v1004_v31 }
 0x484   : > { %9392 = vmatpush2.bf16.msra.mxu0 %v10310_v34  ;;  %v1132_v37 = vld [vmem:[%s15233_s1 + $0x1db8] sm:$0xff] }
 0x485   : > { %9393 = vmatprep.subr.bf16.mxu0 %v10303_v30  ;;  %v10655_v14 = vcombine.high %v1128_v35, %v1132_v37  ;;  %v992_v46 = vld [vmem:[%s15233_s1 + $0x1958] sm:$0xff] }
 0x486   : > { %9433 = vmatpush2.bf16.msra.mxu1 %v10438_v57  ;;  %v996_v47 = vld [vmem:[%s15233_s1 + $0x1978] sm:$0xff] }
 0x487   : > { %9434 = vmatprep.subr.bf16.mxu1 %v10431_v43  ;;  %v1120_v11 = vld [vmem:[%s15233_s1 + $0x1d58] sm:$0xff]  ;;  %v10519_v26 = vcombine.high %v992_v46, %v996_v47  ;;  %v10518_v40 = vcombine.low %v992_v46, %v996_v47 }
 0x488   : > { %9394 = vmatpush2.bf16.msra.mxu0 %v10302_v39  ;;  %v1124_v27 = vld [vmem:[%s15233_s1 + $0x1d78] sm:$0xff] }
 0x489   : > { %9395 = vmatprep.subr.bf16.mxu0 %v10295_v60  ;;  %v10647_v57 = vcombine.high %v1120_v11, %v1124_v27  ;;  %v984_v5 = vld [vmem:[%s15233_s1 + $0x1918] sm:$0xff] }
 0x48a   : > { %9435 = vmatpush2.bf16.msra.mxu1 %v10430_v16  ;;  %v1112_v43 = vld [vmem:[%s15233_s1 + $0x1d18] sm:$0xff] }
 0x48b   : > { %9436 = vmatprep.subr.bf16.mxu1 %v10423_v6  ;;  %v1116_v36 = vld [vmem:[%s15233_s1 + $0x1d38] sm:$0xff] }
 0x48c   : > { %9396 = vmatpush2.bf16.msra.mxu0 %v10294_v22  ;;  %v10639_v6 = vcombine.high %v1112_v43, %v1116_v36  ;;  %v976_v58 = vld [vmem:[%s15233_s1 + $0x18d8] sm:$0xff]  ;;  %v10638_v22 = vcombine.low %v1112_v43, %v1116_v36 }
 0x48d   : > { %9397 = vmatprep.subr.bf16.mxu0 %v10287_v2  ;;  %v1104_v61 = vld [vmem:[%s15233_s1 + $0x1cd8] sm:$0xff] }
 0x48e   : > { %9437 = vmatpush2.bf16.msra.mxu1 %v10422_v45  ;;  %v1108_v20 = vld [vmem:[%s15233_s1 + $0x1cf8] sm:$0xff] }
 0x48f   : > { %9438 = vmatprep.subr.bf16.mxu1 %v10415_v38  ;;  %v10631_v2 = vcombine.high %v1104_v61, %v1108_v20  ;;  %v968_v38 = vld [vmem:[%s15233_s1 + $0x1898] sm:$0xff] }
 0x490   : > { %9398 = vmatpush2.bf16.msra.mxu0 %v10286_v15  ;;  %v972_v49 = vld [vmem:[%s15233_s1 + $0x18b8] sm:$0xff]  ;;  %v10630_v15 = vcombine.low %v1104_v61, %v1108_v20 }
 0x491   : > { %9449 = vmatprep.subr.bf16.mxu0 %v10535_v17  ;;  %v1096_v59 = vld [vmem:[%s15233_s1 + $0x1c98] sm:$0xff] }
 0x492   : > { %9439 = vmatpush2.bf16.msra.mxu1 %v10414_v56  ;;  %v1100_v13 = vld [vmem:[%s15233_s1 + $0x1cb8] sm:$0xff]  ;;  %v10495_v56 = vcombine.high %v968_v38, %v972_v49 }
 0x493   : > { %9490 = vmatprep.subr.bf16.mxu1 %v10663_v29  ;;  %v9155_v48 = vpop.f32.mrf.mxu0  ;;  %9400 = vmatmul.mubr.bf16.vlgmr.msra.gmra.mxu0 %v11731_v4  ;;  %v10654_v4 = vcombine.low %v1128_v35, %v1132_v37  ;;  %v10623_v17 = vcombine.high %v1096_v59, %v1100_v13  ;;  %v960_v63 = vld [vmem:[%s15233_s1 + $0x1858] sm:$0xff]  ;;  %v10494_v35 = vcombine.low %v968_v38, %v972_v49 }
 0x494   : > { %v9156_v23 = vadd.f32 %v9155_v48, %v9115_v44  ;;  %9450 = vmatpush1.bf16.msra.mxu0 %v10534_v33  ;;  %9481 = vmatprep.mubr.bf16.mxu0 %v11757_v42  ;;  %v10646_v42 = vcombine.low %v1120_v11, %v1124_v27  ;;  %v964_v29 = vld [vmem:[%s15233_s1 + $0x1878] sm:$0xff]  ;;  %v10622_v37 = vcombine.low %v1096_v59, %v1100_v13 }
 0x495   : > { %v9196_v50 = vpop.f32.mrf.mxu1  ;;  %9441 = vmatmul.mubr.bf16.vlgmr.msra.gmra.mxu1 %v11744_v8  ;;  %v9157_v24 = vpop.f32.mrf.mxu0  ;;  %9451 = vmatprep.subr.bf16.mxu0 %v10527_v19  ;;  %v988_v8 = vld [vmem:[%s15233_s1 + $0x1938] sm:$0xff]  ;;  %v10487_v3 = vcombine.high %v960_v63, %v964_v29  ;;  %v10486_v46 = vcombine.low %v960_v63, %v964_v29 }
 0x496   : > { %9491 = vmatpush1.bf16.msra.mxu1 %v10662_v41  ;;  %v9197_v53 = vadd.f32 %v9196_v50, %v9156_v23  ;;  %v9158_v52 = vadd.f32 %v9157_v24, %v9117_v0  ;;  %9522 = vmatprep.mubr.bf16.mxu1 %v11768_v18  ;;  %v10511_v16 = vcombine.high %v984_v5, %v988_v8  ;;  %v980_v18 = vld [vmem:[%s15233_s1 + $0x18f8] sm:$0xff] }
 0x497   : > { %v9198_v34 = vpop.f32.mrf.mxu1  ;;  %9492 = vmatprep.subr.bf16.mxu1 %v10655_v14  ;;  %v9159_v30 = vpop.f32.mrf.mxu0  ;;  %v10510_v9 = vcombine.low %v984_v5, %v988_v8  ;;  %v10503_v45 = vcombine.high %v976_v58, %v980_v18  ;;  %v10502_v54 = vcombine.low %v976_v58, %v980_v18  ;;  %v1088_v28 = vld [vmem:[%s15233_s1 + $0x1c58] sm:$0xff] }
 0x498   : > { %9617 = vst [vmem:[%s12822_s14 + $0x20] sm:$0xff] %v9197_v53  ;;  %v9199_v7 = vadd.f32 %v9198_v34, %v9158_v52  ;;  %9452 = vmatpush1.bf16.msra.mxu0 %v10526_v51  ;;  %v1092_v31 = vld [vmem:[%s15233_s1 + $0x1c78] sm:$0xff] }
 0x499   : > { %v9200_v1 = vpop.f32.mrf.mxu1  ;;  %v9160_v39 = vpop.f32.mrf.mxu0  ;;  %9453 = vmatprep.subr.bf16.mxu0 %v10519_v26  ;;  %v10615_v33 = vcombine.high %v1088_v28, %v1092_v31  ;;  %v952_v41 = vld [vmem:[%s15233_s1 + $0x1818] sm:$0xff]  ;;  %v10614_v47 = vcombine.low %v1088_v28, %v1092_v31 }
 0x49a   : > { %9493 = vmatpush1.bf16.msra.mxu1 %v10654_v4  ;;  %9618 = vst [vmem:[%s12822_s14 + $0x28] sm:$0xff] %v9199_v7  ;;  %v956_v19 = vld [vmem:[%s15233_s1 + $0x1838] sm:$0xff] }
 0x49b   : > { %v9201_v60 = vpop.f32.mrf.mxu1  ;;  %9494 = vmatprep.subr.bf16.mxu1 %v10647_v57  ;;  %v1080_v44 = vld [vmem:[%s15233_s1 + $0x1c18] sm:$0xff]  ;;  %v10479_v48 = vcombine.high %v952_v41, %v956_v19  ;;  %v10478_v51 = vcombine.low %v952_v41, %v956_v19 }
 0x49c   : > { %9454 = vmatpush1.bf16.msra.mxu0 %v10518_v40  ;;  %v1084_v14 = vld [vmem:[%s15233_s1 + $0x1c38] sm:$0xff] }
 0x49d   : > { %9455 = vmatprep.subr.bf16.mxu0 %v10511_v16  ;;  %v10607_v11 = vcombine.high %v1080_v44, %v1084_v14  ;;  %v1072_v27 = vld [vmem:[%s15233_s1 + $0x1bd8] sm:$0xff]  ;;  %v10606_v24 = vcombine.low %v1080_v44, %v1084_v14 }
 0x49e   : > { %9495 = vmatpush1.bf16.msra.mxu1 %v10646_v42  ;;  %v1076_v0 = vld [vmem:[%s15233_s1 + $0x1bf8] sm:$0xff] }
 0x49f   : > { %9496 = vmatprep.subr.bf16.mxu1 %v10639_v6  ;;  %v1200_v23 = vld [vmem:[%s15233_s1 + $0x1fd8] sm:$0xff]  ;;  %v10599_v4 = vcombine.high %v1072_v27, %v1076_v0  ;;  %v10598_v5 = vcombine.low %v1072_v27, %v1076_v0 }
 0x4a0   : > { %9456 = vmatpush1.bf16.msra.mxu0 %v10510_v9  ;;  %v1204_v50 = vld [vmem:[%s15233_s1 + $0x1ff8] sm:$0xff] }
 0x4a1   : > { %9457 = vmatprep.subr.bf16.mxu0 %v10503_v45  ;;  %v10727_v26 = vcombine.high %v1200_v23, %v1204_v50  ;;  %v1064_v53 = vld [vmem:[%s15233_s1 + $0x1b98] sm:$0xff]  ;;  %v10726_v8 = vcombine.low %v1200_v23, %v1204_v50 }
 0x4a2   : > { %9497 = vmatpush1.bf16.msra.mxu1 %v10638_v22  ;;  %v1068_v52 = vld [vmem:[%s15233_s1 + $0x1bb8] sm:$0xff] }
 0x4a3   : > { %9498 = vmatprep.subr.bf16.mxu1 %v10631_v2  ;;  %v1192_v34 = vld [vmem:[%s15233_s1 + $0x1f98] sm:$0xff]  ;;  %v10591_v30 = vcombine.high %v1064_v53, %v1068_v52  ;;  %v10590_v39 = vcombine.low %v1064_v53, %v1068_v52 }
 0x4a4   : > { %9458 = vmatpush1.bf16.msra.mxu0 %v10502_v54  ;;  %v1196_v57 = vld [vmem:[%s15233_s1 + $0x1fb8] sm:$0xff] }
 0x4a5   : > { %9459 = vmatprep.subr.bf16.mxu0 %v10495_v56  ;;  %v10719_v43 = vcombine.high %v1192_v34, %v1196_v57  ;;  %v1056_v36 = vld [vmem:[%s15233_s1 + $0x1b58] sm:$0xff]  ;;  %v10718_v42 = vcombine.low %v1192_v34, %v1196_v57 }
 0x4a6   : > { %9499 = vmatpush1.bf16.msra.mxu1 %v10630_v15  ;;  %v1060_v7 = vld [vmem:[%s15233_s1 + $0x1b78] sm:$0xff] }
 0x4a7   : > { %9500 = vmatprep.subr.bf16.mxu1 %v10623_v17  ;;  %v1184_v1 = vld [vmem:[%s15233_s1 + $0x1f58] sm:$0xff]  ;;  %v10583_v16 = vcombine.high %v1056_v36, %v1060_v7  ;;  %v10582_v20 = vcombine.low %v1056_v36, %v1060_v7  ;;  %v1493_v36 = vsub.s32 7, %v11929_v32 }
 0x4a8   : > { %9460 = vmatpush1.bf16.msra.mxu0 %v10494_v35  ;;  %v1188_v40 = vld [vmem:[%s15233_s1 + $0x1f78] sm:$0xff] }
 0x4a9   : > { %9461 = vmatprep.subr.bf16.mxu0 %v10487_v3  ;;  %v10711_v60 = vcombine.high %v1184_v1, %v1188_v40  ;;  %v1048_v6 = vld [vmem:[%s15233_s1 + $0x1b18] sm:$0xff]  ;;  %v10710_v9 = vcombine.low %v1184_v1, %v1188_v40 }
 0x4aa   : > { %9501 = vmatpush1.bf16.msra.mxu1 %v10622_v37  ;;  %v1052_v58 = vld [vmem:[%s15233_s1 + $0x1b38] sm:$0xff] }
 0x4ab   : > { %9502 = vmatprep.subr.bf16.mxu1 %v10615_v33  ;;  %v1176_v18 = vld [vmem:[%s15233_s1 + $0x1f18] sm:$0xff]  ;;  %v10575_v22 = vcombine.high %v1048_v6, %v1052_v58  ;;  %v10574_v13 = vcombine.low %v1048_v6, %v1052_v58 }
 0x4ac   : > { %9462 = vmatpush1.bf16.msra.mxu0 %v10486_v46  ;;  %v1180_v61 = vld [vmem:[%s15233_s1 + $0x1f38] sm:$0xff] }
 0x4ad   : > { %9463 = vmatprep.subr.bf16.mxu0 %v10479_v48  ;;  %v10703_v45 = vcombine.high %v1176_v18, %v1180_v61  ;;  %v1040_v2 = vld [vmem:[%s15233_s1 + $0x1ad8] sm:$0xff]  ;;  %v10702_v54 = vcombine.low %v1176_v18, %v1180_v61 }
 0x4ae   : > { %9503 = vmatpush1.bf16.msra.mxu1 %v10614_v47  ;;  %v1044_v38 = vld [vmem:[%s15233_s1 + $0x1af8] sm:$0xff] }
 0x4af   : > { %9504 = vmatprep.subr.bf16.mxu1 %v10607_v11  ;;  %v1168_v49 = vld [vmem:[%s15233_s1 + $0x1ed8] sm:$0xff]  ;;  %v10567_v15 = vcombine.high %v1040_v2, %v1044_v38  ;;  %v10566_v31 = vcombine.low %v1040_v2, %v1044_v38 }
 0x4b0   : > { %9464 = vmatpush1.bf16.msra.mxu0 %v10478_v51  ;;  %v1172_v59 = vld [vmem:[%s15233_s1 + $0x1ef8] sm:$0xff] }
 0x4b1   : > { %9465 = vmatprep.subr.bf16.mxu0 %v10599_v4  ;;  %v10695_v56 = vcombine.high %v1168_v49, %v1172_v59  ;;  %v1032_v17 = vld [vmem:[%s15233_s1 + $0x1a98] sm:$0xff]  ;;  %v10694_v35 = vcombine.low %v1168_v49, %v1172_v59 }
 0x4b2   : > { %9505 = vmatpush1.bf16.msra.mxu1 %v10606_v24  ;;  %v1036_v63 = vld [vmem:[%s15233_s1 + $0x1ab8] sm:$0xff] }
 0x4b3   : > { %9506 = vmatprep.subr.bf16.mxu1 %v10727_v26  ;;  %v1160_v29 = vld [vmem:[%s15233_s1 + $0x1e98] sm:$0xff]  ;;  %v10559_v37 = vcombine.high %v1032_v17, %v1036_v63  ;;  %v10558_v14 = vcombine.low %v1032_v17, %v1036_v63 }
 0x4b4   : > { %9466 = vmatpush2.bf16.msra.mxu0 %v10598_v5  ;;  %v1164_v28 = vld [vmem:[%s15233_s1 + $0x1eb8] sm:$0xff]  ;;  %v1489_v5 = vsub.s32 6, %v11929_v32  ;;  %v11018_v32 = vld [vmem:[%s15234_s2] sm:$0xff] }
 0x4b5   : > { %9467 = vmatprep.subr.bf16.mxu0 %v10591_v30  ;;  %v10687_v3 = vcombine.high %v1160_v29, %v1164_v28  ;;  %v1024_v33 = vld [vmem:[%s15233_s1 + $0x1a58] sm:$0xff]  ;;  %v10686_v46 = vcombine.low %v1160_v29, %v1164_v28  ;;  %v1494_v58 = vrot.slane %v11018_v32, %v1493_v36 }
 0x4b6   : > { %9507 = vmatpush2.bf16.msra.mxu1 %v10726_v8  ;;  %v1028_v41 = vld [vmem:[%s15233_s1 + $0x1a78] sm:$0xff] }
 0x4b7   : > { %9508 = vmatprep.subr.bf16.mxu1 %v10719_v43  ;;  %v1152_v19 = vld [vmem:[%s15233_s1 + $0x1e58] sm:$0xff]  ;;  %v10551_v47 = vcombine.high %v1024_v33, %v1028_v41  ;;  %v10550_v50 = vcombine.low %v1024_v33, %v1028_v41 }
 0x4b8   : > { %9468 = vmatpush2.bf16.msra.mxu0 %v10590_v39  ;;  %v1156_v44 = vld [vmem:[%s15233_s1 + $0x1e78] sm:$0xff] }
 0x4b9   : > { %9469 = vmatprep.subr.bf16.mxu0 %v10583_v16  ;;  %v10679_v48 = vcombine.high %v1152_v19, %v1156_v44  ;;  %v1016_v11 = vld [vmem:[%s15233_s1 + $0x1a18] sm:$0xff]  ;;  %v10678_v51 = vcombine.low %v1152_v19, %v1156_v44 }
 0x4ba   : > { %9509 = vmatpush2.bf16.msra.mxu1 %v10718_v42  ;;  %v1020_v27 = vld [vmem:[%s15233_s1 + $0x1a38] sm:$0xff]  ;;  %v1490_v42 = vrot.slane %v11018_v32, %v1489_v5 }
 0x4bb   : > { %9510 = vmatprep.subr.bf16.mxu1 %v10711_v60  ;;  %v1144_v0 = vld [vmem:[%s15233_s1 + $0x1e18] sm:$0xff]  ;;  %v10543_v24 = vcombine.high %v1016_v11, %v1020_v27  ;;  %v10542_v57 = vcombine.low %v1016_v11, %v1020_v27 }
 0x4bc   : > { %9470 = vmatpush2.bf16.msra.mxu0 %v10582_v20  ;;  %v1148_v23 = vld [vmem:[%s15233_s1 + $0x1e38] sm:$0xff] }
 0x4bd   : > { %9471 = vmatprep.subr.bf16.mxu0 %v10575_v22  ;;  %v10671_v4 = vcombine.high %v1144_v0, %v1148_v23  ;;  %v1264_v26 = vld [vmem:[%s15233_s1 + $0x21d8] sm:$0xff]  ;;  %v10670_v8 = vcombine.low %v1144_v0, %v1148_v23 }
 0x4be   : > { %9511 = vmatpush2.bf16.msra.mxu1 %v10710_v9  ;;  %v1268_v53 = vld [vmem:[%s15233_s1 + $0x21f8] sm:$0xff] }
 0x4bf   : > { %9512 = vmatprep.subr.bf16.mxu1 %v10703_v45  ;;  %v1392_v52 = vld [vmem:[%s15233_s1 + $0x25d8] sm:$0xff]  ;;  %v10791_v30 = vcombine.high %v1264_v26, %v1268_v53  ;;  %v10790_v16 = vcombine.low %v1264_v26, %v1268_v53 }
 0x4c0   : > { %9472 = vmatpush2.bf16.msra.mxu0 %v10574_v13  ;;  %v1396_v34 = vld [vmem:[%s15233_s1 + $0x25f8] sm:$0xff] }
 0x4c1   : > { %9473 = vmatprep.subr.bf16.mxu0 %v10567_v15  ;;  %v10919_v43 = vcombine.high %v1392_v52, %v1396_v34  ;;  %v1256_v7 = vld [vmem:[%s15233_s1 + $0x2198] sm:$0xff]  ;;  %v10918_v60 = vcombine.low %v1392_v52, %v1396_v34 }
 0x4c2   : > { %9513 = vmatpush2.bf16.msra.mxu1 %v10702_v54  ;;  %v1260_v1 = vld [vmem:[%s15233_s1 + $0x21b8] sm:$0xff] }
 0x4c3   : > { %9514 = vmatprep.subr.bf16.mxu1 %v10695_v56  ;;  %v1384_v40 = vld [vmem:[%s15233_s1 + $0x2598] sm:$0xff]  ;;  %v10783_v6 = vcombine.high %v1256_v7, %v1260_v1  ;;  %v10782_v49 = vcombine.low %v1256_v7, %v1260_v1 }
 0x4c4   : > { %9474 = vmatpush2.bf16.msra.mxu0 %v10566_v31  ;;  %v1388_v39 = vld [vmem:[%s15233_s1 + $0x25b8] sm:$0xff] }
 0x4c5   : > { %9475 = vmatprep.subr.bf16.mxu0 %v10559_v37  ;;  %v10911_v18 = vcombine.high %v1384_v40, %v1388_v39  ;;  %v1248_v61 = vld [vmem:[%s15233_s1 + $0x2158] sm:$0xff]  ;;  %v10910_v13 = vcombine.low %v1384_v40, %v1388_v39 }
 0x4c6   : > { %9515 = vmatpush2.bf16.msra.mxu1 %v10694_v35  ;;  %v1252_v20 = vld [vmem:[%s15233_s1 + $0x2178] sm:$0xff] }
 0x4c7   : > { %9516 = vmatprep.subr.bf16.mxu1 %v10687_v3  ;;  %v1376_v22 = vld [vmem:[%s15233_s1 + $0x2558] sm:$0xff]  ;;  %v10775_v54 = vcombine.high %v1248_v61, %v1252_v20  ;;  %v10774_v3 = vcombine.low %v1248_v61, %v1252_v20 }
 0x4c8   : > { %9476 = vmatpush2.bf16.msra.mxu0 %v10558_v14  ;;  %v1380_v45 = vld [vmem:[%s15233_s1 + $0x2578] sm:$0xff] }
 0x4c9   : > { %9477 = vmatprep.subr.bf16.mxu0 %v10551_v47  ;;  %v10903_v17 = vcombine.high %v1376_v22, %v1380_v45  ;;  %v1240_v63 = vld [vmem:[%s15233_s1 + $0x2118] sm:$0xff] }
 0x4ca   : > { %9517 = vmatpush2.bf16.msra.mxu1 %v10686_v46  ;;  %v1368_v28 = vld [vmem:[%s15233_s1 + $0x2518] sm:$0xff] }
 0x4cb   : > { %9518 = vmatprep.subr.bf16.mxu1 %v10679_v48  ;;  %v1372_v31 = vld [vmem:[%s15233_s1 + $0x2538] sm:$0xff] }
 0x4cc   : > { %9478 = vmatpush2.bf16.msra.mxu0 %v10550_v50  ;;  %v10895_v44 = vcombine.high %v1368_v28, %v1372_v31  ;;  %v1232_v14 = vld [vmem:[%s15233_s1 + $0x20d8] sm:$0xff]  ;;  %v10894_v11 = vcombine.low %v1368_v28, %v1372_v31 }
 0x4cd   : > { %9479 = vmatprep.subr.bf16.mxu0 %v10543_v24  ;;  %v1360_v46 = vld [vmem:[%s15233_s1 + $0x24d8] sm:$0xff] }
 0x4ce   : > { %9519 = vmatpush2.bf16.msra.mxu1 %v10678_v51  ;;  %v1364_v47 = vld [vmem:[%s15233_s1 + $0x24f8] sm:$0xff] }
 0x4cf   : > { %9520 = vmatprep.subr.bf16.mxu1 %v10671_v4  ;;  %v10887_v0 = vcombine.high %v1360_v46, %v1364_v47  ;;  %v1224_v23 = vld [vmem:[%s15233_s1 + $0x2098] sm:$0xff]  ;;  %v10886_v26 = vcombine.low %v1360_v46, %v1364_v47 }
 0x4d0   : > { %9480 = vmatpush2.bf16.msra.mxu0 %v10542_v57  ;;  %v1228_v50 = vld [vmem:[%s15233_s1 + $0x20b8] sm:$0xff] }
 0x4d1   : > { %9531 = vmatprep.subr.bf16.mxu0 %v10791_v30  ;;  %v1352_v51 = vld [vmem:[%s15233_s1 + $0x2498] sm:$0xff]  ;;  %v10751_v53 = vcombine.high %v1224_v23, %v1228_v50  ;;  %v10750_v30 = vcombine.low %v1224_v23, %v1228_v50 }
 0x4d2   : > { %9521 = vmatpush2.bf16.msra.mxu1 %v10670_v8  ;;  %v1356_v24 = vld [vmem:[%s15233_s1 + $0x24b8] sm:$0xff] }
 0x4d3   : > { %9572 = vmatprep.subr.bf16.mxu1 %v10919_v43  ;;  %v9237_v9 = vpop.f32.mrf.mxu0  ;;  %9482 = vmatmul.mubr.bf16.vlgmr.msra.gmra.mxu0 %v11956_v55  ;;  %v10879_v52 = vcombine.high %v1352_v51, %v1356_v24  ;;  %v1216_v34 = vld [vmem:[%s15233_s1 + $0x2058] sm:$0xff]  ;;  %v10878_v43 = vcombine.low %v1352_v51, %v1356_v24 }
 0x4d4   : > { %v9238_v2 = vadd.f32 %v9237_v9, %v1490_v42  ;;  %9532 = vmatpush1.bf16.msra.mxu0 %v10790_v16  ;;  %9563 = vmatprep.mubr.bf16.mxu0 %v11982_v10  ;;  %v10902_v10 = vcombine.low %v1376_v22, %v1380_v45  ;;  %v1220_v57 = vld [vmem:[%s15233_s1 + $0x2078] sm:$0xff] }
 0x4d5   : > { %v9278_v38 = vpop.f32.mrf.mxu1  ;;  %9523 = vmatmul.mubr.bf16.vlgmr.msra.gmra.mxu1 %v11969_v62  ;;  %v9239_v59 = vpop.f32.mrf.mxu0  ;;  %9533 = vmatprep.subr.bf16.mxu0 %v10783_v6  ;;  %v1244_v62 = vld [vmem:[%s15233_s1 + $0x2138] sm:$0xff]  ;;  %v10743_v36 = vcombine.high %v1216_v34, %v1220_v57  ;;  %v10742_v42 = vcombine.low %v1216_v34, %v1220_v57 }
 0x4d6   : > { %9573 = vmatpush1.bf16.msra.mxu1 %v10918_v60  ;;  %v15061_v55 = vadd.f32 %v9278_v38, %v9238_v2  ;;  %v9240_v15 = vadd.f32 %v9239_v59, %v1494_v58  ;;  %9604 = vmatprep.mubr.bf16.mxu1 %v11993_v12  ;;  %v10767_v41 = vcombine.high %v1240_v63, %v1244_v62  ;;  %v1236_v12 = vld [vmem:[%s15233_s1 + $0x20f8] sm:$0xff] }
 0x4d7   : > { %v9280_v56 = vpop.f32.mrf.mxu1  ;;  %9574 = vmatprep.subr.bf16.mxu1 %v10911_v18  ;;  %v9241_v29 = vpop.f32.mrf.mxu0  ;;  %v10766_v48 = vcombine.low %v1240_v63, %v1244_v62  ;;  %v10759_v27 = vcombine.high %v1232_v14, %v1236_v12  ;;  %v10758_v4 = vcombine.low %v1232_v14, %v1236_v12  ;;  %v1344_v5 = vld [vmem:[%s15233_s1 + $0x2458] sm:$0xff] }
 0x4d8   : > { %v15077_v35 = vadd.f32 %v9280_v56, %v9240_v15  ;;  %9534 = vmatpush1.bf16.msra.mxu0 %v10782_v49  ;;  %v1348_v8 = vld [vmem:[%s15233_s1 + $0x2478] sm:$0xff] }
 0x4d9   : > { %v9282_v37 = vpop.f32.mrf.mxu1  ;;  %v9242_v33 = vpop.f32.mrf.mxu0  ;;  %9535 = vmatprep.subr.bf16.mxu0 %v10775_v54  ;;  %v10871_v7 = vcombine.high %v1344_v5, %v1348_v8  ;;  %v1208_v1 = vld [vmem:[%s15233_s1 + $0x2018] sm:$0xff]  ;;  %v10870_v16 = vcombine.low %v1344_v5, %v1348_v8 }
 0x4da   : > { %9575 = vmatpush1.bf16.msra.mxu1 %v10910_v13  ;;  %v1212_v40 = vld [vmem:[%s15233_s1 + $0x2038] sm:$0xff] }
 0x4db   : > { %v9283_v19 = vpop.f32.mrf.mxu1  ;;  %9576 = vmatprep.subr.bf16.mxu1 %v10903_v17  ;;  %v1336_v39 = vld [vmem:[%s15233_s1 + $0x2418] sm:$0xff]  ;;  %v10735_v60 = vcombine.high %v1208_v1, %v1212_v40  ;;  %v10734_v9 = vcombine.low %v1208_v1, %v1212_v40 }
 0x4dc   : > { %9536 = vmatpush1.bf16.msra.mxu0 %v10774_v3  ;;  %v1340_v32 = vld [vmem:[%s15233_s1 + $0x2438] sm:$0xff] }
 0x4dd   : > { %9537 = vmatprep.subr.bf16.mxu0 %v10767_v41  ;;  %v10863_v6 = vcombine.high %v1336_v39, %v1340_v32  ;;  %v1328_v58 = vld [vmem:[%s15233_s1 + $0x23d8] sm:$0xff]  ;;  %v10862_v22 = vcombine.low %v1336_v39, %v1340_v32 }
 0x4de   : > { %9577 = vmatpush1.bf16.msra.mxu1 %v10902_v10  ;;  %v1332_v18 = vld [vmem:[%s15233_s1 + $0x23f8] sm:$0xff] }
 0x4df   : > { %9578 = vmatprep.subr.bf16.mxu1 %v10895_v44  ;;  %v1456_v61 = vld [vmem:[%s15233_s1 + $0x27d8] sm:$0xff]  ;;  %v10855_v45 = vcombine.high %v1328_v58, %v1332_v18  ;;  %v10854_v54 = vcombine.low %v1328_v58, %v1332_v18 }
 0x4e0   : > { %9538 = vmatpush1.bf16.msra.mxu0 %v10766_v48  ;;  %v1460_v20 = vld [vmem:[%s15233_s1 + $0x27f8] sm:$0xff] }
 0x4e1   : > { %9539 = vmatprep.subr.bf16.mxu0 %v10759_v27  ;;  %v10983_v2 = vcombine.high %v1456_v61, %v1460_v20  ;;  %v1320_v38 = vld [vmem:[%s15233_s1 + $0x2398] sm:$0xff]  ;;  %v10982_v15 = vcombine.low %v1456_v61, %v1460_v20 }
 0x4e2   : > { %9579 = vmatpush1.bf16.msra.mxu1 %v10894_v11  ;;  %v1324_v49 = vld [vmem:[%s15233_s1 + $0x23b8] sm:$0xff] }
 0x4e3   : > { %9580 = vmatprep.subr.bf16.mxu1 %v10887_v0  ;;  %v1448_v59 = vld [vmem:[%s15233_s1 + $0x2798] sm:$0xff]  ;;  %v10847_v56 = vcombine.high %v1320_v38, %v1324_v49  ;;  %v10846_v31 = vcombine.low %v1320_v38, %v1324_v49 }
 0x4e4   : > { %9540 = vmatpush1.bf16.msra.mxu0 %v10758_v4  ;;  %v1452_v13 = vld [vmem:[%s15233_s1 + $0x27b8] sm:$0xff] }
 0x4e5   : > { %9541 = vmatprep.subr.bf16.mxu0 %v10751_v53  ;;  %v10975_v17 = vcombine.high %v1448_v59, %v1452_v13  ;;  %v1312_v63 = vld [vmem:[%s15233_s1 + $0x2358] sm:$0xff]  ;;  %v10974_v37 = vcombine.low %v1448_v59, %v1452_v13 }
 0x4e6   : > { %9581 = vmatpush1.bf16.msra.mxu1 %v10886_v26  ;;  %v1316_v62 = vld [vmem:[%s15233_s1 + $0x2378] sm:$0xff] }
 0x4e7   : > { %9582 = vmatprep.subr.bf16.mxu1 %v10879_v52  ;;  %v1440_v29 = vld [vmem:[%s15233_s1 + $0x2758] sm:$0xff]  ;;  %v10839_v3 = vcombine.high %v1312_v63, %v1316_v62  ;;  %v10838_v14 = vcombine.low %v1312_v63, %v1316_v62 }
 0x4e8   : > { %9542 = vmatpush1.bf16.msra.mxu0 %v10750_v30  ;;  %v1444_v28 = vld [vmem:[%s15233_s1 + $0x2778] sm:$0xff] }
 0x4e9   : > { %9543 = vmatprep.subr.bf16.mxu0 %v10743_v36  ;;  %v10967_v33 = vcombine.high %v1440_v29, %v1444_v28  ;;  %v1304_v10 = vld [vmem:[%s15233_s1 + $0x2318] sm:$0xff]  ;;  %v10966_v12 = vcombine.low %v1440_v29, %v1444_v28 }
 0x4ea   : > { %9583 = vmatpush1.bf16.msra.mxu1 %v10878_v43  ;;  %v1308_v41 = vld [vmem:[%s15233_s1 + $0x2338] sm:$0xff] }
 0x4eb   : > { %9584 = vmatprep.subr.bf16.mxu1 %v10871_v7  ;;  %v1432_v19 = vld [vmem:[%s15233_s1 + $0x2718] sm:$0xff]  ;;  %v10831_v46 = vcombine.high %v1304_v10, %v1308_v41  ;;  %v10830_v23 = vcombine.low %v1304_v10, %v1308_v41 }
 0x4ec   : > { %9544 = vmatpush1.bf16.msra.mxu0 %v10742_v42  ;;  %v1436_v44 = vld [vmem:[%s15233_s1 + $0x2738] sm:$0xff] }
 0x4ed   : > { %9545 = vmatprep.subr.bf16.mxu0 %v10735_v60  ;;  %v10959_v47 = vcombine.high %v1432_v19, %v1436_v44  ;;  %v1296_v48 = vld [vmem:[%s15233_s1 + $0x22d8] sm:$0xff]  ;;  %v10958_v50 = vcombine.low %v1432_v19, %v1436_v44 }
 0x4ee   : > { %9585 = vmatpush1.bf16.msra.mxu1 %v10870_v16  ;;  %v1300_v11 = vld [vmem:[%s15233_s1 + $0x22f8] sm:$0xff] }
 0x4ef   : > { %9586 = vmatprep.subr.bf16.mxu1 %v10863_v6  ;;  %v1424_v27 = vld [vmem:[%s15233_s1 + $0x26d8] sm:$0xff]  ;;  %v10823_v51 = vcombine.high %v1296_v48, %v1300_v11  ;;  %v10822_v34 = vcombine.low %v1296_v48, %v1300_v11 }
 0x4f0   : > { %9546 = vmatpush1.bf16.msra.mxu0 %v10734_v9  ;;  %v1428_v0 = vld [vmem:[%s15233_s1 + $0x26f8] sm:$0xff] }
 0x4f1   : > { %9547 = vmatprep.subr.bf16.mxu0 %v10855_v45  ;;  %v10951_v24 = vcombine.high %v1424_v27, %v1428_v0  ;;  %v1288_v4 = vld [vmem:[%s15233_s1 + $0x2298] sm:$0xff]  ;;  %v10950_v57 = vcombine.low %v1424_v27, %v1428_v0 }
 0x4f2   : > { %9587 = vmatpush1.bf16.msra.mxu1 %v10862_v22  ;;  %v1292_v26 = vld [vmem:[%s15233_s1 + $0x22b8] sm:$0xff] }
 0x4f3   : > { %9588 = vmatprep.subr.bf16.mxu1 %v10983_v2  ;;  %v1416_v53 = vld [vmem:[%s15233_s1 + $0x2698] sm:$0xff]  ;;  %v10815_v5 = vcombine.high %v1288_v4, %v1292_v26  ;;  %v10814_v1 = vcombine.low %v1288_v4, %v1292_v26 }
 0x4f4   : > { %9548 = vmatpush2.bf16.msra.mxu0 %v10854_v54  ;;  %v1420_v52 = vld [vmem:[%s15233_s1 + $0x26b8] sm:$0xff] }
 0x4f5   : > { %9549 = vmatprep.subr.bf16.mxu0 %v10847_v56  ;;  %v10943_v8 = vcombine.high %v1416_v53, %v1420_v52  ;;  %v1280_v30 = vld [vmem:[%s15233_s1 + $0x2258] sm:$0xff]  ;;  %v10942_v40 = vcombine.low %v1416_v53, %v1420_v52 }
 0x4f6   : > { %9589 = vmatpush2.bf16.msra.mxu1 %v10982_v15  ;;  %v1284_v43 = vld [vmem:[%s15233_s1 + $0x2278] sm:$0xff] }
 0x4f7   : > { %9590 = vmatprep.subr.bf16.mxu1 %v10975_v17  ;;  %v1408_v36 = vld [vmem:[%s15233_s1 + $0x2658] sm:$0xff]  ;;  %v10807_v39 = vcombine.high %v1280_v30, %v1284_v43  ;;  %v10806_v58 = vcombine.low %v1280_v30, %v1284_v43 }
 0x4f8   : > { %9550 = vmatpush2.bf16.msra.mxu0 %v10846_v31  ;;  %v1412_v7 = vld [vmem:[%s15233_s1 + $0x2678] sm:$0xff] }
 0x4f9   : > { %9551 = vmatprep.subr.bf16.mxu0 %v10839_v3  ;;  %v10935_v32 = vcombine.high %v1408_v36, %v1412_v7  ;;  %v1272_v42 = vld [vmem:[%s15233_s1 + $0x2218] sm:$0xff]  ;;  %v10934_v18 = vcombine.low %v1408_v36, %v1412_v7 }
 0x4fa   : > { %9591 = vmatpush2.bf16.msra.mxu1 %v10974_v37  ;;  %v1276_v16 = vld [vmem:[%s15233_s1 + $0x2238] sm:$0xff] }
 0x4fb   : > { %9592 = vmatprep.subr.bf16.mxu1 %v10967_v33  ;;  %v1400_v60 = vld [vmem:[%s15233_s1 + $0x2618] sm:$0xff]  ;;  %v10799_v61 = vcombine.high %v1272_v42, %v1276_v16  ;;  %v10798_v9 = vcombine.low %v1272_v42, %v1276_v16 }
 0x4fc   : > { %9552 = vmatpush2.bf16.msra.mxu0 %v10838_v14  ;;  %v1404_v6 = vld [vmem:[%s15233_s1 + $0x2638] sm:$0xff] }
 0x4fd   : > { %9553 = vmatprep.subr.bf16.mxu0 %v10831_v46  ;;  %v10927_v20 = vcombine.high %v1400_v60, %v1404_v6  ;;  %v10926_v22 = vcombine.low %v1400_v60, %v1404_v6 }
 0x4fe   : > { %9593 = vmatpush2.bf16.msra.mxu1 %v10966_v12 }
 0x4ff   : > { %9594 = vmatprep.subr.bf16.mxu1 %v10959_v47 }
 0x500   : > { %9554 = vmatpush2.bf16.msra.mxu0 %v10830_v23 }
 0x501   : > { %9555 = vmatprep.subr.bf16.mxu0 %v10823_v51 }
 0x502   : > { %9595 = vmatpush2.bf16.msra.mxu1 %v10958_v50 }
 0x503   : > { %9596 = vmatprep.subr.bf16.mxu1 %v10951_v24 }
 0x504   : > { %9556 = vmatpush2.bf16.msra.mxu0 %v10822_v34 }
 0x505   : > { %9557 = vmatprep.subr.bf16.mxu0 %v10815_v5 }
 0x506   : > { %9597 = vmatpush2.bf16.msra.mxu1 %v10950_v57 }
 0x507   : > { %9598 = vmatprep.subr.bf16.mxu1 %v10943_v8 }
 0x508   : > { %9558 = vmatpush2.bf16.msra.mxu0 %v10814_v1 }
 0x509   : > { %9559 = vmatprep.subr.bf16.mxu0 %v10807_v39 }
 0x50a   : > { %9599 = vmatpush2.bf16.msra.mxu1 %v10942_v40 }
 0x50b   : > { %9600 = vmatprep.subr.bf16.mxu1 %v10935_v32 }
 0x50c   : > { %9560 = vmatpush2.bf16.msra.mxu0 %v10806_v58 }
 0x50d   : > { %9561 = vmatprep.subr.bf16.mxu0 %v10799_v61 }
 0x50e   : > { %9601 = vmatpush2.bf16.msra.mxu1 %v10934_v18 }
 0x50f   : > { %9602 = vmatprep.subr.bf16.mxu1 %v10927_v20 }
 0x510   : > { %9562 = vmatpush2.bf16.msra.mxu0 %v10798_v9 }
 0x512   : > { %9603 = vmatpush2.bf16.msra.mxu1 %v10926_v22 }
 0x513   : > { %v9319_v45 = vpop.f32.mrf.mxu0  ;;  %9564 = vmatmul.mubr.bf16.vlgmr.msra.gmra.mxu0 %v12178_v21 }
 0x514   : > { %v9320_v2 = vadd.f32 %v9319_v45, %v15061_v55 }
 0x515   : > { %v9360_v38 = vpop.f32.mrf.mxu1  ;;  %9605 = vmatmul.mubr.bf16.vlgmr.msra.gmra.mxu1 %v12188_v25  ;;  %v9321_v49 = vpop.f32.mrf.mxu0 }
 0x516   : > { %v9361_v59 = vadd.f32 %v9360_v38, %v9320_v2  ;;  %v9322_v13 = vadd.f32 %v9321_v49, %v15077_v35 }
 0x517   : > { %v9362_v54 = vpop.f32.mrf.mxu1  ;;  %v9323_v15 = vpop.f32.mrf.mxu0 }
 0x518   : > { %v9363_v56 = vadd.f32 %v9362_v54, %v9322_v13 }
 0x519   : > { %v9364_v17 = vpop.f32.mrf.mxu1  ;;  %v9324_v63 = vpop.f32.mrf.mxu0 }
 0x51b   : > { %v9365_v62 = vpop.f32.mrf.mxu1 }
 0x553   : > { %v9401_v29 = vpop.f32.mrf.mxu0 }
 0x554   : > { %v9402_v28 = vadd.f32 %v9401_v29, %v9361_v59 }
 0x555   : > { %v9442_v31 = vpop.f32.mrf.mxu1  ;;  %v9403_v37 = vpop.f32.mrf.mxu0 }
 0x556   : > { %v9443_v21 = vadd.f32 %v9442_v31, %v9402_v28  ;;  %v9404_v3 = vadd.f32 %v9403_v37, %v9363_v56 }
 0x557   : > { %v9444_v55 = vpop.f32.mrf.mxu1  ;;  %v9405_v33 = vpop.f32.mrf.mxu0 }
 0x558   : > { %v9445_v10 = vadd.f32 %v9444_v55, %v9404_v3 }
 0x559   : > { %v9446_v25 = vpop.f32.mrf.mxu1  ;;  %v9406_v41 = vpop.f32.mrf.mxu0 }
 0x55b   : > { %v9447_v19 = vpop.f32.mrf.mxu1 }
 0x593   : > { %v9483_v44 = vpop.f32.mrf.mxu0 }
 0x594   : > { %v9484_v27 = vadd.f32 %v9483_v44, %v9443_v21 }
 0x595   : > { %v9524_v35 = vpop.f32.mrf.mxu1  ;;  %v9485_v14 = vpop.f32.mrf.mxu0 }
 0x596   : > { %v9486_v0 = vadd.f32 %v9485_v14, %v9445_v10  ;;  %v9525_v23 = vadd.f32 %v9524_v35, %v9484_v27 }
 0x597   : > { %v9526_v12 = vpop.f32.mrf.mxu1  ;;  %v9487_v46 = vpop.f32.mrf.mxu0 }
 0x598   : > { %v9527_v51 = vadd.f32 %v9526_v12, %v9486_v0 }
 0x599   : > { %v9528_v47 = vpop.f32.mrf.mxu1  ;;  %v9488_v48 = vpop.f32.mrf.mxu0 }
 0x59b   : > { %v9529_v11 = vpop.f32.mrf.mxu1 }
 0x5d3   : > { %v9565_v50 = vpop.f32.mrf.mxu0 }
 0x5d4   : > { %v9566_v24 = vadd.f32 %v9565_v50, %v9525_v23 }
 0x5d5   : > { %v9606_v4 = vpop.f32.mrf.mxu1  ;;  %v9567_v26 = vpop.f32.mrf.mxu0 }
 0x5d6   : > { %v9607_v53 = vadd.f32 %v9606_v4, %v9566_v24  ;;  %v9568_v52 = vadd.f32 %v9567_v26, %v9527_v51 }
 0x5d7   : > { %v9608_v34 = vpop.f32.mrf.mxu1  ;;  %v9569_v57 = vpop.f32.mrf.mxu0 }
 0x5d8   : > { %9619 = vst [vmem:[%s12822_s14 + $0x30] sm:$0xff] %v9607_v53  ;;  %v9609_v5 = vadd.f32 %v9608_v34, %v9568_v52 }
 0x5d9   : > { %v9610_v8 = vpop.f32.mrf.mxu1  ;;  %v9570_v30 = vpop.f32.mrf.mxu0 }
 0x5da   : > { %9620 = vst [vmem:[%s12822_s14 + $0x38] sm:$0xff] %v9609_v5 }
 0x5db   : > { %v9611_v43 = vpop.f32.mrf.mxu1 }
 0x5dc PF: > { %s13_s12 = sadd.s32 1, %s11025_s12  }
 0x5dd   : > { %p10_p4 = scmp.ge.s32.totalorder %s13_s12, 4  }
 0x5df   :  { %12 = sbr.rel (!%p10_p4) target bundleno = 1 (0x1), region = 62 }

</bundles_post_ra>
